<compile_context>
chip_gen: v7x
topology: tpu7x:2x2x1
jax: 0.10.0
libtpu: 0.0.40
codegen_flags: <defaults>
</compile_context>

<pallas_src>
import jax
import jax.numpy as jnp
from jax.experimental import pallas as pl
from jax.experimental.pallas import tpu as pltpu


def _round_up(n, m):
    return ((n + m - 1) // m) * m


# ----------------------------------------------------------------------------
# Fused kernel
# ----------------------------------------------------------------------------
def _make_fused_kernel(B, W, S1, S2, C2):
    """B: batch, W: window, S1/S2: per-batch stripe lengths (multiples of 8)
    of the stage-1 / stage-2 halo scratches, C2: padded conv3/4 channels."""
    Wp = W // 2

    def kernel(x_ref,
               w1_ref, p1_ref, w2_ref, p2_ref, w3_ref, p3_ref, w4_ref, p4_ref,
               fw1_ref, q1_ref, fw2_ref, q2_ref, fw3_ref, fb3_ref,
               o_ref,
               xh_ref, h1_ref, h2_ref, h3_ref, feat_ref):
        f32 = jnp.float32
        bf16 = jnp.bfloat16
        R1 = B * S1
        R2 = B * S2

        def conv_relu_bn(src_ref, R, w_ref, p_ref):
            # src_ref: [R, Cin] f32 slab of per-batch stripes; data rows live at
            # stripe offset 8, all other rows are zero (the conv halo).  The conv
            # (kernel_size=3, padding=1) is 3 shifted whole-slab matmuls; rows
            # that straddle stripe boundaries are garbage and never read back.
            v = src_ref[...]
            acc = jnp.dot(v[0:R - 2, :].astype(bf16), w_ref[0],
                          preferred_element_type=f32)
            acc = acc + jnp.dot(v[1:R - 1, :].astype(bf16), w_ref[1],
                                preferred_element_type=f32)
            acc = acc + jnp.dot(v[2:R, :].astype(bf16), w_ref[2],
                                preferred_element_type=f32)
            acc = jnp.maximum(acc + p_ref[0:1, :], 0.0)        # conv bias + ReLU
            return acc * p_ref[1:2, :] + p_ref[2:3, :]         # folded BN (eval)

        # ---- build the conv1 input halo in VMEM (replaces jnp.pad) ----------
        xh_ref[...] = jnp.zeros_like(xh_ref)
        h1_ref[...] = jnp.zeros_like(h1_ref)
        h2_ref[...] = jnp.zeros_like(h2_ref)
        h3_ref[...] = jnp.zeros_like(h3_ref)
        for b in range(B):
            xh_ref[b * S1 + 8:b * S1 + 8 + W, :] = x_ref[b]

        # ---- conv1 + ReLU + BN ----------------------------------------------
        y = conv_relu_bn(xh_ref, R1, w1_ref, p1_ref)           # [R1-2, C1]
        for b in range(B):
            h1_ref[b * S1 + 8:b * S1 + 8 + W, :] = y[b * S1 + 7:b * S1 + 7 + W, :]

        # ---- conv2 + ReLU + BN + fused MaxPool1d(2, 2) ------------------------
        y = conv_relu_bn(h1_ref, R1, w2_ref, p2_ref)           # [R1-2, C1]
        for b in range(B):
            for j in range(Wp):
                r = b * S1 + 7 + 2 * j
                pooled = jnp.maximum(y[r:r + 1, :], y[r + 1:r + 2, :])
                h2_ref[b * S2 + 8 + j:b * S2 + 9 + j, :] = pooled

        # ---- conv3 + ReLU + BN ----------------------------------------------
        y = conv_relu_bn(h2_ref, R2, w3_ref, p3_ref)           # [R2-2, C2]
        for b in range(B):
            h3_ref[b * S2 + 8:b * S2 + 8 + Wp, :] = y[b * S2 + 7:b * S2 + 7 + Wp, :]

        # ---- conv4 + ReLU + BN ----------------------------------------------
        y = conv_relu_bn(h3_ref, R2, w4_ref, p4_ref)           # [R2-2, C2]

        # ---- flatten (PyTorch NCL .view(B,-1); transpose folded into fc1_w) --
        for b in range(B):
            for l in range(Wp):
                r = b * S2 + 7 + l
                feat_ref[b:b + 1, l * C2:(l + 1) * C2] = y[r:r + 1, :]

        # ---- FC stack (bf16 matmuls, fp32 accumulation / elementwise) --------
        h = jnp.dot(feat_ref[...].astype(bf16), fw1_ref[...],
                    preferred_element_type=f32)
        h = jnp.maximum(h + q1_ref[0:1, :], 0.0) * q1_ref[1:2, :] + q1_ref[2:3, :]
        h = jnp.dot(h.astype(bf16), fw2_ref[...], preferred_element_type=f32)
        h = jnp.maximum(h + q2_ref[0:1, :], 0.0) * q2_ref[1:2, :] + q2_ref[2:3, :]
        out = jnp.dot(h.astype(bf16), fw3_ref[...],
                      preferred_element_type=f32) + fb3_ref[...]
        o_ref[...] = out.astype(o_ref.dtype)

    return kernel


def _full_spec(arr):
    nd = arr.ndim
    return pl.BlockSpec(arr.shape, lambda i, _nd=nd: (0,) * _nd)


def cnn_fused(x, kp):
    """x: [B, W, E] f32 embedded input -> padded logits [B, Vp] f32."""
    B, W, E = x.shape
    C1 = kp["w1"].shape[-1]
    C2 = kp["w4"].shape[-1]
    Vp = kp["fw3"].shape[-1]
    Wp = W // 2
    # Per-batch stripe: 8 zero halo rows + W data rows + >=2 trailing zero rows,
    # rounded so the data region starts at a sublane-aligned (multiple-of-8) row.
    S1 = 8 + _round_up(W + 2, 8)
    S2 = 8 + _round_up(Wp + 2, 8)

    args = (x,
            kp["w1"], kp["p1"], kp["w2"], kp["p2"],
            kp["w3"], kp["p3"], kp["w4"], kp["p4"],
            kp["fw1"], kp["q1"], kp["fw2"], kp["q2"],
            kp["fw3"], kp["fb3"])
    in_specs = [_full_spec(a) for a in args]

    # VMEM budget: double-buffered inputs + scratch, clamped to [32, 48] MiB so
    # it stays well under v7x's 64 MiB physical VMEM (review item).
    in_bytes = sum(a.size * a.dtype.itemsize for a in args)
    vmem_bytes = int(min(48 * 2**20, max(32 * 2**20, 2 * in_bytes + 4 * 2**20)))

    kernel = _make_fused_kernel(B, W, S1, S2, C2)
    return pl.pallas_call(
        kernel,
        out_shape=jax.ShapeDtypeStruct((B, Vp), jnp.float32),
        grid=(1,),
        in_specs=in_specs,
        out_specs=pl.BlockSpec((B, Vp), lambda i: (0, 0)),
        scratch_shapes=[
            pltpu.VMEM((B * S1, E), jnp.float32),     # conv1 input + halo
            pltpu.VMEM((B * S1, C1), jnp.float32),    # conv1 output + halo
            pltpu.VMEM((B * S2, C1), jnp.float32),    # pooled output + halo
            pltpu.VMEM((B * S2, C2), jnp.float32),    # conv3 output + halo
            pltpu.VMEM((B, Wp * C2), jnp.float32),    # flattened FC input
        ],
        compiler_params=pltpu.CompilerParams(
            dimension_semantics=("arbitrary",),
            vmem_limit_bytes=vmem_bytes),
    )(*args)


# ----------------------------------------------------------------------------
# Parameter initialization (deterministic, synthetic) + packing
# ----------------------------------------------------------------------------
def _fold_bn(gamma, beta, mean, var, eps=1e-5):
    scale = gamma / jnp.sqrt(var + eps)
    shift = beta - mean * scale
    return scale, shift


def init_params(key, vocab_size, emb_size, window_size):
    oc = 100                     # output_channels in the PyTorch module
    hid = 1024                   # hid_size in the PyTorch module
    ks = iter(jax.random.split(key, 64))

    def nrm(shape, s):
        return jax.random.normal(next(ks), shape, jnp.float32) * s

    def bn(n):
        gamma = 1.0 + 0.1 * jax.random.normal(next(ks), (n,), jnp.float32)
        beta = 0.1 * jax.random.normal(next(ks), (n,), jnp.float32)
        mean = 0.1 * jax.random.normal(next(ks), (n,), jnp.float32)
        var = jax.random.uniform(next(ks), (n,), jnp.float32, 0.5, 1.5)
        return _fold_bn(gamma, beta, mean, var)

    p = {}
    p["emb"] = nrm((vocab_size, emb_size), 1.0)
    # conv weights stored as [K, Cin, Cout] (PyTorch: [Cout, Cin, K])
    p["c1_w"] = nrm((3, emb_size, oc), (3 * emb_size) ** -0.5)
    p["c1_b"] = nrm((oc,), 0.05)
    p["bn1"] = bn(oc)
    p["c2_w"] = nrm((3, oc, oc), (3 * oc) ** -0.5)
    p["c2_b"] = nrm((oc,), 0.05)
    p["bn2"] = bn(oc)
    p["c3_w"] = nrm((3, oc, 2 * oc), (3 * oc) ** -0.5)
    p["c3_b"] = nrm((2 * oc,), 0.05)
    p["bn3"] = bn(2 * oc)
    p["c4_w"] = nrm((3, 2 * oc, 2 * oc), (3 * 2 * oc) ** -0.5)
    p["c4_b"] = nrm((2 * oc,), 0.05)
    p["bn4"] = bn(2 * oc)

    fin = 2 * oc * (window_size // 2)
    # linear weights stored as [in, out] (PyTorch: [out, in]); in-index = c*L' + l
    p["fc1_w"] = nrm((fin, hid), fin ** -0.5)
    p["fc1_b"] = nrm((hid,), 0.05)
    p["bnf1"] = bn(hid)
    p["fc2_w"] = nrm((hid, hid), hid ** -0.5)
    p["fc2_b"] = nrm((hid,), 0.05)
    p["bnf2"] = bn(hid)
    p["fc3_w"] = nrm((hid, vocab_size), hid ** -0.5)
    p["fc3_b"] = nrm((vocab_size,), 0.05)
    return p


def pack_params(p, window_size):
    """Convert logical (PyTorch-layout) params into padded bf16 kernel arrays.
    Padded channels get zero weight/bias/scale/shift so they stay exactly zero
    through the whole network (the fc1 rows for padded channels are zero too)."""
    oc = p["c1_b"].shape[0]                  # 100
    E = p["c1_w"].shape[1]
    C1 = _round_up(oc, 128)                  # 128
    C2 = _round_up(2 * oc, 128)              # 256
    H = p["fc1_b"].shape[0]                  # 1024
    V = p["fc3_b"].shape[0]
    Vp = _round_up(V, 128)
    Wp = window_size // 2
    bf16 = jnp.bfloat16

    def pad_to(a, shape):
        return jnp.pad(a, [(0, s - d) for d, s in zip(a.shape, shape)])

    def conv_pack(w, b, bn, cin_p, cout_p):
        scale, shift = bn
        wq = pad_to(w, (3, cin_p, cout_p)).astype(bf16)
        pq = jnp.stack([pad_to(b, (cout_p,)),
                        pad_to(scale, (cout_p,)),
                        pad_to(shift, (cout_p,))], axis=0).astype(jnp.float32)
        return wq, pq

    kp = {"emb": p["emb"]}
    kp["w1"], kp["p1"] = conv_pack(p["c1_w"], p["c1_b"], p["bn1"], E, C1)
    kp["w2"], kp["p2"] = conv_pack(p["c2_w"], p["c2_b"], p["bn2"], C1, C1)
    kp["w3"], kp["p3"] = conv_pack(p["c3_w"], p["c3_b"], p["bn3"], C1, C2)
    kp["w4"], kp["p4"] = conv_pack(p["c4_w"], p["c4_b"], p["bn4"], C2, C2)

    # fc1: PyTorch flattens [B, C, L'] channel-major; the kernel flattens the
    # channels-last activation [B, L', C2(padded)] instead, so permute + pad the
    # fc1 weight rows once here (folds the runtime transpose into the weights).
    fw1 = p["fc1_w"].reshape(2 * oc, Wp, H).transpose(1, 0, 2)   # [Wp, 2*oc, H]
    kp["fw1"] = pad_to(fw1, (Wp, C2, H)).reshape(Wp * C2, H).astype(bf16)
    s1, t1 = p["bnf1"]
    kp["q1"] = jnp.stack([p["fc1_b"], s1, t1], axis=0)
    kp["fw2"] = p["fc2_w"].astype(bf16)
    s2, t2 = p["bnf2"]
    kp["q2"] = jnp.stack([p["fc2_b"], s2, t2], axis=0)
    kp["fw3"] = pad_to(p["fc3_w"], (H, Vp)).astype(bf16)
    kp["fb3"] = pad_to(p["fc3_b"], (Vp,)).reshape(1, Vp)
    return kp


# ----------------------------------------------------------------------------
# Forward pass (mirrors CNN.forward with default_build=True)
# ----------------------------------------------------------------------------
def cnn_forward(kp, idx):
    """idx: [B, window] int32 token ids -> logits [B, vocab] f32."""
    # TODO(synk): embedding gather kept in plain JAX (tiny, not the hot path).
    x = jnp.take(kp["emb"], idx, axis=0)            # [B, W, E] channels-last
    vocab = kp["emb"].shape[0]
    out = cnn_fused(x, kp)                          # [B, Vp] (padded vocab)
    return out[:, :vocab]


# ----------------------------------------------------------------------------
if __name__ == "__main__":
    B = 2
    VOCAB = 16
    EMB = 8
    WINDOW = 16   # window_size argument of CNN.__init__

    key = jax.random.PRNGKey(0)
    k_param, k_idx = jax.random.split(key)
    params = init_params(k_param, VOCAB, EMB, WINDOW)
    kparams = pack_params(params, WINDOW)
    idx = jax.random.randint(k_idx, (B, WINDOW), 0, VOCAB, dtype=jnp.int32)

    out = cnn_forward(kparams, idx)
    out = jax.block_until_ready(out)
    assert out.shape == (B, VOCAB) and out.dtype == jnp.float32
    print("KERNEL_OK")
</pallas_src>

<mosaic_0001>
module attributes {stable_mosaic.version = 11 : i64} {
  func.func @kernel(%arg0: i32, %arg1: memref<2x16x8xf32, #tpu.memory_space<vmem>>, %arg2: memref<3x8x128xbf16, #tpu.memory_space<vmem>>, %arg3: memref<3x128xf32, #tpu.memory_space<vmem>>, %arg4: memref<3x128x128xbf16, #tpu.memory_space<vmem>>, %arg5: memref<3x128xf32, #tpu.memory_space<vmem>>, %arg6: memref<3x128x256xbf16, #tpu.memory_space<vmem>>, %arg7: memref<3x256xf32, #tpu.memory_space<vmem>>, %arg8: memref<3x256x256xbf16, #tpu.memory_space<vmem>>, %arg9: memref<3x256xf32, #tpu.memory_space<vmem>>, %arg10: memref<2048x1024xbf16, #tpu.memory_space<vmem>>, %arg11: memref<3x1024xf32, #tpu.memory_space<vmem>>, %arg12: memref<1024x1024xbf16, #tpu.memory_space<vmem>>, %arg13: memref<3x1024xf32, #tpu.memory_space<vmem>>, %arg14: memref<1024x128xbf16, #tpu.memory_space<vmem>>, %arg15: memref<1x128xf32, #tpu.memory_space<vmem>>, %arg16: memref<2x128xf32, #tpu.memory_space<vmem>>, %arg17: memref<64x8xf32, #tpu.memory_space<vmem>>, %arg18: memref<64x128xf32, #tpu.memory_space<vmem>>, %arg19: memref<48x128xf32, #tpu.memory_space<vmem>>, %arg20: memref<48x256xf32, #tpu.memory_space<vmem>>, %arg21: memref<2x2048xf32, #tpu.memory_space<vmem>>) attributes {dimension_semantics = [#tpu.dimension_semantics<arbitrary>], iteration_bounds = array<i64: 1>, scalar_prefetch = 0 : i64, scratch_operands = 5 : i64, tpu.core_type = #tpu.core_type<tc>, window_params = [{pipeline_mode = #tpu.pipeline_mode<synchronous>, transform_indices = @transform_0, window_bounds = array<i64: 2, 16, 8>}, {pipeline_mode = #tpu.pipeline_mode<synchronous>, transform_indices = @transform_1, window_bounds = array<i64: 3, 8, 128>}, {pipeline_mode = #tpu.pipeline_mode<synchronous>, transform_indices = @transform_2, window_bounds = array<i64: 3, 128>}, {pipeline_mode = #tpu.pipeline_mode<synchronous>, transform_indices = @transform_3, window_bounds = array<i64: 3, 128, 128>}, {pipeline_mode = #tpu.pipeline_mode<synchronous>, transform_indices = @transform_4, window_bounds = array<i64: 3, 128>}, {pipeline_mode = #tpu.pipeline_mode<synchronous>, transform_indices = @transform_5, window_bounds = array<i64: 3, 128, 256>}, {pipeline_mode = #tpu.pipeline_mode<synchronous>, transform_indices = @transform_6, window_bounds = array<i64: 3, 256>}, {pipeline_mode = #tpu.pipeline_mode<synchronous>, transform_indices = @transform_7, window_bounds = array<i64: 3, 256, 256>}, {pipeline_mode = #tpu.pipeline_mode<synchronous>, transform_indices = @transform_8, window_bounds = array<i64: 3, 256>}, {pipeline_mode = #tpu.pipeline_mode<synchronous>, transform_indices = @transform_9, window_bounds = array<i64: 2048, 1024>}, {pipeline_mode = #tpu.pipeline_mode<synchronous>, transform_indices = @transform_10, window_bounds = array<i64: 3, 1024>}, {pipeline_mode = #tpu.pipeline_mode<synchronous>, transform_indices = @transform_11, window_bounds = array<i64: 1024, 1024>}, {pipeline_mode = #tpu.pipeline_mode<synchronous>, transform_indices = @transform_12, window_bounds = array<i64: 3, 1024>}, {pipeline_mode = #tpu.pipeline_mode<synchronous>, transform_indices = @transform_13, window_bounds = array<i64: 1024, 128>}, {pipeline_mode = #tpu.pipeline_mode<synchronous>, transform_indices = @transform_14, window_bounds = array<i64: 1, 128>}, {pipeline_mode = #tpu.pipeline_mode<synchronous>, transform_indices = @transform_15, window_bounds = array<i64: 2, 128>}]} {
    %cst = arith.constant 0.000000e+00 : f32
    %0 = vector.broadcast %cst : f32 to vector<64x8xf32>
    %c0 = arith.constant 0 : index
    %c0_0 = arith.constant 0 : index
    %1 = vector.load %arg17[%c0, %c0_0] : memref<64x8xf32, #tpu.memory_space<vmem>>, vector<64x8xf32>
    tpu.vector_store %arg17[%c0, %c0_0], %0 {strides = array<i32>} : memref<64x8xf32, #tpu.memory_space<vmem>>, vector<64x8xf32>,
    %cst_1 = arith.constant 0.000000e+00 : f32
    %2 = vector.broadcast %cst_1 : f32 to vector<64x128xf32>
    %c0_2 = arith.constant 0 : index
    %c0_3 = arith.constant 0 : index
    %3 = vector.load %arg18[%c0_2, %c0_3] : memref<64x128xf32, #tpu.memory_space<vmem>>, vector<64x128xf32>
    tpu.vector_store %arg18[%c0_2, %c0_3], %2 {strides = array<i32>} : memref<64x128xf32, #tpu.memory_space<vmem>>, vector<64x128xf32>,
    %cst_4 = arith.constant 0.000000e+00 : f32
    %4 = vector.broadcast %cst_4 : f32 to vector<48x128xf32>
    %c0_5 = arith.constant 0 : index
    %c0_6 = arith.constant 0 : index
    %5 = vector.load %arg19[%c0_5, %c0_6] : memref<48x128xf32, #tpu.memory_space<vmem>>, vector<48x128xf32>
    tpu.vector_store %arg19[%c0_5, %c0_6], %4 {strides = array<i32>} : memref<48x128xf32, #tpu.memory_space<vmem>>, vector<48x128xf32>,
    %cst_7 = arith.constant 0.000000e+00 : f32
    %6 = vector.broadcast %cst_7 : f32 to vector<48x256xf32>
    %c0_8 = arith.constant 0 : index
    %c0_9 = arith.constant 0 : index
    %7 = vector.load %arg20[%c0_8, %c0_9] : memref<48x256xf32, #tpu.memory_space<vmem>>, vector<48x256xf32>
    tpu.vector_store %arg20[%c0_8, %c0_9], %6 {strides = array<i32>} : memref<48x256xf32, #tpu.memory_space<vmem>>, vector<48x256xf32>,
    %c0_10 = arith.constant 0 : index
    %c0_11 = arith.constant 0 : index
    %c0_12 = arith.constant 0 : index
    %8 = vector.load %arg1[%c0_10, %c0_11, %c0_12] : memref<2x16x8xf32, #tpu.memory_space<vmem>>, vector<1x16x8xf32>
    %9 = vector.shape_cast %8 : vector<1x16x8xf32> to vector<16x8xf32>
    %c8 = arith.constant 8 : index
    %c0_13 = arith.constant 0 : index
    %10 = vector.load %arg17[%c8, %c0_13] : memref<64x8xf32, #tpu.memory_space<vmem>>, vector<16x8xf32>
    tpu.vector_store %arg17[%c8, %c0_13], %9 {strides = array<i32>} : memref<64x8xf32, #tpu.memory_space<vmem>>, vector<16x8xf32>,
    %c1 = arith.constant 1 : index
    %c0_14 = arith.constant 0 : index
    %c0_15 = arith.constant 0 : index
    %11 = vector.load %arg1[%c1, %c0_14, %c0_15] : memref<2x16x8xf32, #tpu.memory_space<vmem>>, vector<1x16x8xf32>
    %12 = vector.shape_cast %11 : vector<1x16x8xf32> to vector<16x8xf32>
    %c40 = arith.constant 40 : index
    %c0_16 = arith.constant 0 : index
    %13 = vector.load %arg17[%c40, %c0_16] : memref<64x8xf32, #tpu.memory_space<vmem>>, vector<16x8xf32>
    tpu.vector_store %arg17[%c40, %c0_16], %12 {strides = array<i32>} : memref<64x8xf32, #tpu.memory_space<vmem>>, vector<16x8xf32>,
    %c0_17 = arith.constant 0 : index
    %c0_18 = arith.constant 0 : index
    %14 = vector.load %arg17[%c0_17, %c0_18] : memref<64x8xf32, #tpu.memory_space<vmem>>, vector<64x8xf32>
    %15 = vector.extract_strided_slice %14 {offsets = [0, 0], sizes = [62, 8], strides = [1, 1]} : vector<64x8xf32> to vector<62x8xf32>
    %16 = arith.truncf %15 : vector<62x8xf32> to vector<62x8xbf16>
    %c0_19 = arith.constant 0 : index
    %c0_20 = arith.constant 0 : index
    %c0_21 = arith.constant 0 : index
    %17 = vector.load %arg2[%c0_19, %c0_20, %c0_21] : memref<3x8x128xbf16, #tpu.memory_space<vmem>>, vector<1x8x128xbf16>
    %18 = vector.shape_cast %17 : vector<1x8x128xbf16> to vector<8x128xbf16>
    %cst_22 = arith.constant dense<0.000000e+00> : vector<62x128xf32>
    %19 = tpu.matmul %16, %18, %cst_22 {dimension_numbers = #tpu.dot_dimension_numbers<[1], [0], [0], [1], [0, 0, 1, 1], [], []>} : vector<62x8xbf16>, vector<8x128xbf16>, vector<62x128xf32> -> vector<62x128xf32>
    %20 = vector.extract_strided_slice %14 {offsets = [1, 0], sizes = [62, 8], strides = [1, 1]} : vector<64x8xf32> to vector<62x8xf32>
    %21 = arith.truncf %20 : vector<62x8xf32> to vector<62x8xbf16>
    %c1_23 = arith.constant 1 : index
    %c0_24 = arith.constant 0 : index
    %c0_25 = arith.constant 0 : index
    %22 = vector.load %arg2[%c1_23, %c0_24, %c0_25] : memref<3x8x128xbf16, #tpu.memory_space<vmem>>, vector<1x8x128xbf16>
    %23 = vector.shape_cast %22 : vector<1x8x128xbf16> to vector<8x128xbf16>
    %cst_26 = arith.constant dense<0.000000e+00> : vector<62x128xf32>
    %24 = tpu.matmul %21, %23, %cst_26 {dimension_numbers = #tpu.dot_dimension_numbers<[1], [0], [0], [1], [0, 0, 1, 1], [], []>} : vector<62x8xbf16>, vector<8x128xbf16>, vector<62x128xf32> -> vector<62x128xf32>
    %25 = arith.addf %19, %24 : vector<62x128xf32>
    %26 = vector.extract_strided_slice %14 {offsets = [2, 0], sizes = [62, 8], strides = [1, 1]} : vector<64x8xf32> to vector<62x8xf32>
    %27 = arith.truncf %26 : vector<62x8xf32> to vector<62x8xbf16>
    %c2 = arith.constant 2 : index
    %c0_27 = arith.constant 0 : index
    %c0_28 = arith.constant 0 : index
    %28 = vector.load %arg2[%c2, %c0_27, %c0_28] : memref<3x8x128xbf16, #tpu.memory_space<vmem>>, vector<1x8x128xbf16>
    %29 = vector.shape_cast %28 : vector<1x8x128xbf16> to vector<8x128xbf16>
    %cst_29 = arith.constant dense<0.000000e+00> : vector<62x128xf32>
    %30 = tpu.matmul %27, %29, %cst_29 {dimension_numbers = #tpu.dot_dimension_numbers<[1], [0], [0], [1], [0, 0, 1, 1], [], []>} : vector<62x8xbf16>, vector<8x128xbf16>, vector<62x128xf32> -> vector<62x128xf32>
    %31 = arith.addf %25, %30 : vector<62x128xf32>
    %c0_30 = arith.constant 0 : index
    %c0_31 = arith.constant 0 : index
    %32 = vector.load %arg3[%c0_30, %c0_31] : memref<3x128xf32, #tpu.memory_space<vmem>>, vector<1x128xf32>
    %33 = vector.broadcast %32 : vector<1x128xf32> to vector<62x128xf32>
    %34 = arith.addf %31, %33 : vector<62x128xf32>
    %cst_32 = arith.constant 0.000000e+00 : f32
    %35 = vector.broadcast %cst_32 : f32 to vector<62x128xf32>
    %36 = arith.maximumf %34, %35 : vector<62x128xf32>
    %c1_33 = arith.constant 1 : index
    %c0_34 = arith.constant 0 : index
    %37 = vector.load %arg3[%c1_33, %c0_34] : memref<3x128xf32, #tpu.memory_space<vmem>>, vector<1x128xf32>
    %38 = vector.broadcast %37 : vector<1x128xf32> to vector<62x128xf32>
    %39 = arith.mulf %36, %38 : vector<62x128xf32>
    %c2_35 = arith.constant 2 : index
    %c0_36 = arith.constant 0 : index
    %40 = vector.load %arg3[%c2_35, %c0_36] : memref<3x128xf32, #tpu.memory_space<vmem>>, vector<1x128xf32>
    %41 = vector.broadcast %40 : vector<1x128xf32> to vector<62x128xf32>
    %42 = arith.addf %39, %41 : vector<62x128xf32>
    %43 = vector.extract_strided_slice %42 {offsets = [7, 0], sizes = [16, 128], strides = [1, 1]} : vector<62x128xf32> to vector<16x128xf32>
    %c8_37 = arith.constant 8 : index
    %c0_38 = arith.constant 0 : index
    %44 = vector.load %arg18[%c8_37, %c0_38] : memref<64x128xf32, #tpu.memory_space<vmem>>, vector<16x128xf32>
    tpu.vector_store %arg18[%c8_37, %c0_38], %43 {strides = array<i32>} : memref<64x128xf32, #tpu.memory_space<vmem>>, vector<16x128xf32>,
    %45 = vector.extract_strided_slice %42 {offsets = [39, 0], sizes = [16, 128], strides = [1, 1]} : vector<62x128xf32> to vector<16x128xf32>
    %c40_39 = arith.constant 40 : index
    %c0_40 = arith.constant 0 : index
    %46 = vector.load %arg18[%c40_39, %c0_40] : memref<64x128xf32, #tpu.memory_space<vmem>>, vector<16x128xf32>
    tpu.vector_store %arg18[%c40_39, %c0_40], %45 {strides = array<i32>} : memref<64x128xf32, #tpu.memory_space<vmem>>, vector<16x128xf32>,
    %c0_41 = arith.constant 0 : index
    %c0_42 = arith.constant 0 : index
    %47 = vector.load %arg18[%c0_41, %c0_42] : memref<64x128xf32, #tpu.memory_space<vmem>>, vector<64x128xf32>
    %48 = vector.extract_strided_slice %47 {offsets = [0, 0], sizes = [62, 128], strides = [1, 1]} : vector<64x128xf32> to vector<62x128xf32>
    %49 = arith.truncf %48 : vector<62x128xf32> to vector<62x128xbf16>
    %c0_43 = arith.constant 0 : index
    %c0_44 = arith.constant 0 : index
    %c0_45 = arith.constant 0 : index
    %50 = vector.load %arg4[%c0_43, %c0_44, %c0_45] : memref<3x128x128xbf16, #tpu.memory_space<vmem>>, vector<1x128x128xbf16>
    %51 = vector.shape_cast %50 : vector<1x128x128xbf16> to vector<128x128xbf16>
    %cst_46 = arith.constant dense<0.000000e+00> : vector<62x128xf32>
    %52 = tpu.matmul %49, %51, %cst_46 {dimension_numbers = #tpu.dot_dimension_numbers<[1], [0], [0], [1], [0, 0, 1, 1], [], []>} : vector<62x128xbf16>, vector<128x128xbf16>, vector<62x128xf32> -> vector<62x128xf32>
    %53 = vector.extract_strided_slice %47 {offsets = [1, 0], sizes = [62, 128], strides = [1, 1]} : vector<64x128xf32> to vector<62x128xf32>
    %54 = arith.truncf %53 : vector<62x128xf32> to vector<62x128xbf16>
    %c1_47 = arith.constant 1 : index
    %c0_48 = arith.constant 0 : index
    %c0_49 = arith.constant 0 : index
    %55 = vector.load %arg4[%c1_47, %c0_48, %c0_49] : memref<3x128x128xbf16, #tpu.memory_space<vmem>>, vector<1x128x128xbf16>
    %56 = vector.shape_cast %55 : vector<1x128x128xbf16> to vector<128x128xbf16>
    %cst_50 = arith.constant dense<0.000000e+00> : vector<62x128xf32>
    %57 = tpu.matmul %54, %56, %cst_50 {dimension_numbers = #tpu.dot_dimension_numbers<[1], [0], [0], [1], [0, 0, 1, 1], [], []>} : vector<62x128xbf16>, vector<128x128xbf16>, vector<62x128xf32> -> vector<62x128xf32>
    %58 = arith.addf %52, %57 : vector<62x128xf32>
    %59 = vector.extract_strided_slice %47 {offsets = [2, 0], sizes = [62, 128], strides = [1, 1]} : vector<64x128xf32> to vector<62x128xf32>
    %60 = arith.truncf %59 : vector<62x128xf32> to vector<62x128xbf16>
    %c2_51 = arith.constant 2 : index
    %c0_52 = arith.constant 0 : index
    %c0_53 = arith.constant 0 : index
    %61 = vector.load %arg4[%c2_51, %c0_52, %c0_53] : memref<3x128x128xbf16, #tpu.memory_space<vmem>>, vector<1x128x128xbf16>
    %62 = vector.shape_cast %61 : vector<1x128x128xbf16> to vector<128x128xbf16>
    %cst_54 = arith.constant dense<0.000000e+00> : vector<62x128xf32>
    %63 = tpu.matmul %60, %62, %cst_54 {dimension_numbers = #tpu.dot_dimension_numbers<[1], [0], [0], [1], [0, 0, 1, 1], [], []>} : vector<62x128xbf16>, vector<128x128xbf16>, vector<62x128xf32> -> vector<62x128xf32>
    %64 = arith.addf %58, %63 : vector<62x128xf32>
    %c0_55 = arith.constant 0 : index
    %c0_56 = arith.constant 0 : index
    %65 = vector.load %arg5[%c0_55, %c0_56] : memref<3x128xf32, #tpu.memory_space<vmem>>, vector<1x128xf32>
    %66 = vector.broadcast %65 : vector<1x128xf32> to vector<62x128xf32>
    %67 = arith.addf %64, %66 : vector<62x128xf32>
    %cst_57 = arith.constant 0.000000e+00 : f32
    %68 = vector.broadcast %cst_57 : f32 to vector<62x128xf32>
    %69 = arith.maximumf %67, %68 : vector<62x128xf32>
    %c1_58 = arith.constant 1 : index
    %c0_59 = arith.constant 0 : index
    %70 = vector.load %arg5[%c1_58, %c0_59] : memref<3x128xf32, #tpu.memory_space<vmem>>, vector<1x128xf32>
    %71 = vector.broadcast %70 : vector<1x128xf32> to vector<62x128xf32>
    %72 = arith.mulf %69, %71 : vector<62x128xf32>
    %c2_60 = arith.constant 2 : index
    %c0_61 = arith.constant 0 : index
    %73 = vector.load %arg5[%c2_60, %c0_61] : memref<3x128xf32, #tpu.memory_space<vmem>>, vector<1x128xf32>
    %74 = vector.broadcast %73 : vector<1x128xf32> to vector<62x128xf32>
    %75 = arith.addf %72, %74 : vector<62x128xf32>
    %76 = vector.extract_strided_slice %75 {offsets = [7, 0], sizes = [1, 128], strides = [1, 1]} : vector<62x128xf32> to vector<1x128xf32>
    %77 = vector.extract_strided_slice %75 {offsets = [8, 0], sizes = [1, 128], strides = [1, 1]} : vector<62x128xf32> to vector<1x128xf32>
    %78 = arith.maximumf %76, %77 : vector<1x128xf32>
    %c8_62 = arith.constant 8 : index
    %c0_63 = arith.constant 0 : index
    %79 = vector.load %arg19[%c8_62, %c0_63] : memref<48x128xf32, #tpu.memory_space<vmem>>, vector<1x128xf32>
    tpu.vector_store %arg19[%c8_62, %c0_63], %78 {strides = array<i32>} : memref<48x128xf32, #tpu.memory_space<vmem>>, vector<1x128xf32>,
    %80 = vector.extract_strided_slice %75 {offsets = [9, 0], sizes = [1, 128], strides = [1, 1]} : vector<62x128xf32> to vector<1x128xf32>
    %81 = vector.extract_strided_slice %75 {offsets = [10, 0], sizes = [1, 128], strides = [1, 1]} : vector<62x128xf32> to vector<1x128xf32>
    %82 = arith.maximumf %80, %81 : vector<1x128xf32>
    %c9 = arith.constant 9 : index
    %c0_64 = arith.constant 0 : index
    %83 = vector.load %arg19[%c9, %c0_64] : memref<48x128xf32, #tpu.memory_space<vmem>>, vector<1x128xf32>
    tpu.vector_store %arg19[%c9, %c0_64], %82 {strides = array<i32>} : memref<48x128xf32, #tpu.memory_space<vmem>>, vector<1x128xf32>,
    %84 = vector.extract_strided_slice %75 {offsets = [11, 0], sizes = [1, 128], strides = [1, 1]} : vector<62x128xf32> to vector<1x128xf32>
    %85 = vector.extract_strided_slice %75 {offsets = [12, 0], sizes = [1, 128], strides = [1, 1]} : vector<62x128xf32> to vector<1x128xf32>
    %86 = arith.maximumf %84, %85 : vector<1x128xf32>
    %c10 = arith.constant 10 : index
    %c0_65 = arith.constant 0 : index
    %87 = vector.load %arg19[%c10, %c0_65] : memref<48x128xf32, #tpu.memory_space<vmem>>, vector<1x128xf32>
    tpu.vector_store %arg19[%c10, %c0_65], %86 {strides = array<i32>} : memref<48x128xf32, #tpu.memory_space<vmem>>, vector<1x128xf32>,
    %88 = vector.extract_strided_slice %75 {offsets = [13, 0], sizes = [1, 128], strides = [1, 1]} : vector<62x128xf32> to vector<1x128xf32>
    %89 = vector.extract_strided_slice %75 {offsets = [14, 0], sizes = [1, 128], strides = [1, 1]} : vector<62x128xf32> to vector<1x128xf32>
    %90 = arith.maximumf %88, %89 : vector<1x128xf32>
    %c11 = arith.constant 11 : index
    %c0_66 = arith.constant 0 : index
    %91 = vector.load %arg19[%c11, %c0_66] : memref<48x128xf32, #tpu.memory_space<vmem>>, vector<1x128xf32>
    tpu.vector_store %arg19[%c11, %c0_66], %90 {strides = array<i32>} : memref<48x128xf32, #tpu.memory_space<vmem>>, vector<1x128xf32>,
    %92 = vector.extract_strided_slice %75 {offsets = [15, 0], sizes = [1, 128], strides = [1, 1]} : vector<62x128xf32> to vector<1x128xf32>
    %93 = vector.extract_strided_slice %75 {offsets = [16, 0], sizes = [1, 128], strides = [1, 1]} : vector<62x128xf32> to vector<1x128xf32>
    %94 = arith.maximumf %92, %93 : vector<1x128xf32>
    %c12 = arith.constant 12 : index
    %c0_67 = arith.constant 0 : index
    %95 = vector.load %arg19[%c12, %c0_67] : memref<48x128xf32, #tpu.memory_space<vmem>>, vector<1x128xf32>
    tpu.vector_store %arg19[%c12, %c0_67], %94 {strides = array<i32>} : memref<48x128xf32, #tpu.memory_space<vmem>>, vector<1x128xf32>,
    %96 = vector.extract_strided_slice %75 {offsets = [17, 0], sizes = [1, 128], strides = [1, 1]} : vector<62x128xf32> to vector<1x128xf32>
    %97 = vector.extract_strided_slice %75 {offsets = [18, 0], sizes = [1, 128], strides = [1, 1]} : vector<62x128xf32> to vector<1x128xf32>
    %98 = arith.maximumf %96, %97 : vector<1x128xf32>
    %c13 = arith.constant 13 : index
    %c0_68 = arith.constant 0 : index
    %99 = vector.load %arg19[%c13, %c0_68] : memref<48x128xf32, #tpu.memory_space<vmem>>, vector<1x128xf32>
    tpu.vector_store %arg19[%c13, %c0_68], %98 {strides = array<i32>} : memref<48x128xf32, #tpu.memory_space<vmem>>, vector<1x128xf32>,
    %100 = vector.extract_strided_slice %75 {offsets = [19, 0], sizes = [1, 128], strides = [1, 1]} : vector<62x128xf32> to vector<1x128xf32>
    %101 = vector.extract_strided_slice %75 {offsets = [20, 0], sizes = [1, 128], strides = [1, 1]} : vector<62x128xf32> to vector<1x128xf32>
    %102 = arith.maximumf %100, %101 : vector<1x128xf32>
    %c14 = arith.constant 14 : index
    %c0_69 = arith.constant 0 : index
    %103 = vector.load %arg19[%c14, %c0_69] : memref<48x128xf32, #tpu.memory_space<vmem>>, vector<1x128xf32>
    tpu.vector_store %arg19[%c14, %c0_69], %102 {strides = array<i32>} : memref<48x128xf32, #tpu.memory_space<vmem>>, vector<1x128xf32>,
    %104 = vector.extract_strided_slice %75 {offsets = [21, 0], sizes = [1, 128], strides = [1, 1]} : vector<62x128xf32> to vector<1x128xf32>
    %105 = vector.extract_strided_slice %75 {offsets = [22, 0], sizes = [1, 128], strides = [1, 1]} : vector<62x128xf32> to vector<1x128xf32>
    %106 = arith.maximumf %104, %105 : vector<1x128xf32>
    %c15 = arith.constant 15 : index
    %c0_70 = arith.constant 0 : index
    %107 = vector.load %arg19[%c15, %c0_70] : memref<48x128xf32, #tpu.memory_space<vmem>>, vector<1x128xf32>
    tpu.vector_store %arg19[%c15, %c0_70], %106 {strides = array<i32>} : memref<48x128xf32, #tpu.memory_space<vmem>>, vector<1x128xf32>,
    %108 = vector.extract_strided_slice %75 {offsets = [39, 0], sizes = [1, 128], strides = [1, 1]} : vector<62x128xf32> to vector<1x128xf32>
    %109 = vector.extract_strided_slice %75 {offsets = [40, 0], sizes = [1, 128], strides = [1, 1]} : vector<62x128xf32> to vector<1x128xf32>
    %110 = arith.maximumf %108, %109 : vector<1x128xf32>
    %c32 = arith.constant 32 : index
    %c0_71 = arith.constant 0 : index
    %111 = vector.load %arg19[%c32, %c0_71] : memref<48x128xf32, #tpu.memory_space<vmem>>, vector<1x128xf32>
    tpu.vector_store %arg19[%c32, %c0_71], %110 {strides = array<i32>} : memref<48x128xf32, #tpu.memory_space<vmem>>, vector<1x128xf32>,
    %112 = vector.extract_strided_slice %75 {offsets = [41, 0], sizes = [1, 128], strides = [1, 1]} : vector<62x128xf32> to vector<1x128xf32>
    %113 = vector.extract_strided_slice %75 {offsets = [42, 0], sizes = [1, 128], strides = [1, 1]} : vector<62x128xf32> to vector<1x128xf32>
    %114 = arith.maximumf %112, %113 : vector<1x128xf32>
    %c33 = arith.constant 33 : index
    %c0_72 = arith.constant 0 : index
    %115 = vector.load %arg19[%c33, %c0_72] : memref<48x128xf32, #tpu.memory_space<vmem>>, vector<1x128xf32>
    tpu.vector_store %arg19[%c33, %c0_72], %114 {strides = array<i32>} : memref<48x128xf32, #tpu.memory_space<vmem>>, vector<1x128xf32>,
    %116 = vector.extract_strided_slice %75 {offsets = [43, 0], sizes = [1, 128], strides = [1, 1]} : vector<62x128xf32> to vector<1x128xf32>
    %117 = vector.extract_strided_slice %75 {offsets = [44, 0], sizes = [1, 128], strides = [1, 1]} : vector<62x128xf32> to vector<1x128xf32>
    %118 = arith.maximumf %116, %117 : vector<1x128xf32>
    %c34 = arith.constant 34 : index
    %c0_73 = arith.constant 0 : index
    %119 = vector.load %arg19[%c34, %c0_73] : memref<48x128xf32, #tpu.memory_space<vmem>>, vector<1x128xf32>
    tpu.vector_store %arg19[%c34, %c0_73], %118 {strides = array<i32>} : memref<48x128xf32, #tpu.memory_space<vmem>>, vector<1x128xf32>,
    %120 = vector.extract_strided_slice %75 {offsets = [45, 0], sizes = [1, 128], strides = [1, 1]} : vector<62x128xf32> to vector<1x128xf32>
    %121 = vector.extract_strided_slice %75 {offsets = [46, 0], sizes = [1, 128], strides = [1, 1]} : vector<62x128xf32> to vector<1x128xf32>
    %122 = arith.maximumf %120, %121 : vector<1x128xf32>
    %c35 = arith.constant 35 : index
    %c0_74 = arith.constant 0 : index
    %123 = vector.load %arg19[%c35, %c0_74] : memref<48x128xf32, #tpu.memory_space<vmem>>, vector<1x128xf32>
    tpu.vector_store %arg19[%c35, %c0_74], %122 {strides = array<i32>} : memref<48x128xf32, #tpu.memory_space<vmem>>, vector<1x128xf32>,
    %124 = vector.extract_strided_slice %75 {offsets = [47, 0], sizes = [1, 128], strides = [1, 1]} : vector<62x128xf32> to vector<1x128xf32>
    %125 = vector.extract_strided_slice %75 {offsets = [48, 0], sizes = [1, 128], strides = [1, 1]} : vector<62x128xf32> to vector<1x128xf32>
    %126 = arith.maximumf %124, %125 : vector<1x128xf32>
    %c36 = arith.constant 36 : index
    %c0_75 = arith.constant 0 : index
    %127 = vector.load %arg19[%c36, %c0_75] : memref<48x128xf32, #tpu.memory_space<vmem>>, vector<1x128xf32>
    tpu.vector_store %arg19[%c36, %c0_75], %126 {strides = array<i32>} : memref<48x128xf32, #tpu.memory_space<vmem>>, vector<1x128xf32>,
    %128 = vector.extract_strided_slice %75 {offsets = [49, 0], sizes = [1, 128], strides = [1, 1]} : vector<62x128xf32> to vector<1x128xf32>
    %129 = vector.extract_strided_slice %75 {offsets = [50, 0], sizes = [1, 128], strides = [1, 1]} : vector<62x128xf32> to vector<1x128xf32>
    %130 = arith.maximumf %128, %129 : vector<1x128xf32>
    %c37 = arith.constant 37 : index
    %c0_76 = arith.constant 0 : index
    %131 = vector.load %arg19[%c37, %c0_76] : memref<48x128xf32, #tpu.memory_space<vmem>>, vector<1x128xf32>
    tpu.vector_store %arg19[%c37, %c0_76], %130 {strides = array<i32>} : memref<48x128xf32, #tpu.memory_space<vmem>>, vector<1x128xf32>,
    %132 = vector.extract_strided_slice %75 {offsets = [51, 0], sizes = [1, 128], strides = [1, 1]} : vector<62x128xf32> to vector<1x128xf32>
    %133 = vector.extract_strided_slice %75 {offsets = [52, 0], sizes = [1, 128], strides = [1, 1]} : vector<62x128xf32> to vector<1x128xf32>
    %134 = arith.maximumf %132, %133 : vector<1x128xf32>
    %c38 = arith.constant 38 : index
    %c0_77 = arith.constant 0 : index
    %135 = vector.load %arg19[%c38, %c0_77] : memref<48x128xf32, #tpu.memory_space<vmem>>, vector<1x128xf32>
    tpu.vector_store %arg19[%c38, %c0_77], %134 {strides = array<i32>} : memref<48x128xf32, #tpu.memory_space<vmem>>, vector<1x128xf32>,
    %136 = vector.extract_strided_slice %75 {offsets = [53, 0], sizes = [1, 128], strides = [1, 1]} : vector<62x128xf32> to vector<1x128xf32>
    %137 = vector.extract_strided_slice %75 {offsets = [54, 0], sizes = [1, 128], strides = [1, 1]} : vector<62x128xf32> to vector<1x128xf32>
    %138 = arith.maximumf %136, %137 : vector<1x128xf32>
    %c39 = arith.constant 39 : index
    %c0_78 = arith.constant 0 : index
    %139 = vector.load %arg19[%c39, %c0_78] : memref<48x128xf32, #tpu.memory_space<vmem>>, vector<1x128xf32>
    tpu.vector_store %arg19[%c39, %c0_78], %138 {strides = array<i32>} : memref<48x128xf32, #tpu.memory_space<vmem>>, vector<1x128xf32>,
    %c0_79 = arith.constant 0 : index
    %c0_80 = arith.constant 0 : index
    %140 = vector.load %arg19[%c0_79, %c0_80] : memref<48x128xf32, #tpu.memory_space<vmem>>, vector<48x128xf32>
    %141 = vector.extract_strided_slice %140 {offsets = [0, 0], sizes = [46, 128], strides = [1, 1]} : vector<48x128xf32> to vector<46x128xf32>
    %142 = arith.truncf %141 : vector<46x128xf32> to vector<46x128xbf16>
    %c0_81 = arith.constant 0 : index
    %c0_82 = arith.constant 0 : index
    %c0_83 = arith.constant 0 : index
    %143 = vector.load %arg6[%c0_81, %c0_82, %c0_83] : memref<3x128x256xbf16, #tpu.memory_space<vmem>>, vector<1x128x256xbf16>
    %144 = vector.shape_cast %143 : vector<1x128x256xbf16> to vector<128x256xbf16>
    %cst_84 = arith.constant dense<0.000000e+00> : vector<46x256xf32>
    %145 = tpu.matmul %142, %144, %cst_84 {dimension_numbers = #tpu.dot_dimension_numbers<[1], [0], [0], [1], [0, 0, 1, 1], [], []>} : vector<46x128xbf16>, vector<128x256xbf16>, vector<46x256xf32> -> vector<46x256xf32>
    %146 = vector.extract_strided_slice %140 {offsets = [1, 0], sizes = [46, 128], strides = [1, 1]} : vector<48x128xf32> to vector<46x128xf32>
    %147 = arith.truncf %146 : vector<46x128xf32> to vector<46x128xbf16>
    %c1_85 = arith.constant 1 : index
    %c0_86 = arith.constant 0 : index
    %c0_87 = arith.constant 0 : index
    %148 = vector.load %arg6[%c1_85, %c0_86, %c0_87] : memref<3x128x256xbf16, #tpu.memory_space<vmem>>, vector<1x128x256xbf16>
    %149 = vector.shape_cast %148 : vector<1x128x256xbf16> to vector<128x256xbf16>
    %cst_88 = arith.constant dense<0.000000e+00> : vector<46x256xf32>
    %150 = tpu.matmul %147, %149, %cst_88 {dimension_numbers = #tpu.dot_dimension_numbers<[1], [0], [0], [1], [0, 0, 1, 1], [], []>} : vector<46x128xbf16>, vector<128x256xbf16>, vector<46x256xf32> -> vector<46x256xf32>
    %151 = arith.addf %145, %150 : vector<46x256xf32>
    %152 = vector.extract_strided_slice %140 {offsets = [2, 0], sizes = [46, 128], strides = [1, 1]} : vector<48x128xf32> to vector<46x128xf32>
    %153 = arith.truncf %152 : vector<46x128xf32> to vector<46x128xbf16>
    %c2_89 = arith.constant 2 : index
    %c0_90 = arith.constant 0 : index
    %c0_91 = arith.constant 0 : index
    %154 = vector.load %arg6[%c2_89, %c0_90, %c0_91] : memref<3x128x256xbf16, #tpu.memory_space<vmem>>, vector<1x128x256xbf16>
    %155 = vector.shape_cast %154 : vector<1x128x256xbf16> to vector<128x256xbf16>
    %cst_92 = arith.constant dense<0.000000e+00> : vector<46x256xf32>
    %156 = tpu.matmul %153, %155, %cst_92 {dimension_numbers = #tpu.dot_dimension_numbers<[1], [0], [0], [1], [0, 0, 1, 1], [], []>} : vector<46x128xbf16>, vector<128x256xbf16>, vector<46x256xf32> -> vector<46x256xf32>
    %157 = arith.addf %151, %156 : vector<46x256xf32>
    %c0_93 = arith.constant 0 : index
    %c0_94 = arith.constant 0 : index
    %158 = vector.load %arg7[%c0_93, %c0_94] : memref<3x256xf32, #tpu.memory_space<vmem>>, vector<1x256xf32>
    %159 = vector.broadcast %158 : vector<1x256xf32> to vector<46x256xf32>
    %160 = arith.addf %157, %159 : vector<46x256xf32>
    %cst_95 = arith.constant 0.000000e+00 : f32
    %161 = vector.broadcast %cst_95 : f32 to vector<46x256xf32>
    %162 = arith.maximumf %160, %161 : vector<46x256xf32>
    %c1_96 = arith.constant 1 : index
    %c0_97 = arith.constant 0 : index
    %163 = vector.load %arg7[%c1_96, %c0_97] : memref<3x256xf32, #tpu.memory_space<vmem>>, vector<1x256xf32>
    %164 = vector.broadcast %163 : vector<1x256xf32> to vector<46x256xf32>
    %165 = arith.mulf %162, %164 : vector<46x256xf32>
    %c2_98 = arith.constant 2 : index
    %c0_99 = arith.constant 0 : index
    %166 = vector.load %arg7[%c2_98, %c0_99] : memref<3x256xf32, #tpu.memory_space<vmem>>, vector<1x256xf32>
    %167 = vector.broadcast %166 : vector<1x256xf32> to vector<46x256xf32>
    %168 = arith.addf %165, %167 : vector<46x256xf32>
    %169 = vector.extract_strided_slice %168 {offsets = [7, 0], sizes = [8, 256], strides = [1, 1]} : vector<46x256xf32> to vector<8x256xf32>
    %c8_100 = arith.constant 8 : index
    %c0_101 = arith.constant 0 : index
    %170 = vector.load %arg20[%c8_100, %c0_101] : memref<48x256xf32, #tpu.memory_space<vmem>>, vector<8x256xf32>
    tpu.vector_store %arg20[%c8_100, %c0_101], %169 {strides = array<i32>} : memref<48x256xf32, #tpu.memory_space<vmem>>, vector<8x256xf32>,
    %171 = vector.extract_strided_slice %168 {offsets = [31, 0], sizes = [8, 256], strides = [1, 1]} : vector<46x256xf32> to vector<8x256xf32>
    %c32_102 = arith.constant 32 : index
    %c0_103 = arith.constant 0 : index
    %172 = vector.load %arg20[%c32_102, %c0_103] : memref<48x256xf32, #tpu.memory_space<vmem>>, vector<8x256xf32>
    tpu.vector_store %arg20[%c32_102, %c0_103], %171 {strides = array<i32>} : memref<48x256xf32, #tpu.memory_space<vmem>>, vector<8x256xf32>,
    %c0_104 = arith.constant 0 : index
    %c0_105 = arith.constant 0 : index
    %173 = vector.load %arg20[%c0_104, %c0_105] : memref<48x256xf32, #tpu.memory_space<vmem>>, vector<48x256xf32>
    %174 = vector.extract_strided_slice %173 {offsets = [0, 0], sizes = [46, 256], strides = [1, 1]} : vector<48x256xf32> to vector<46x256xf32>
    %175 = arith.truncf %174 : vector<46x256xf32> to vector<46x256xbf16>
    %c0_106 = arith.constant 0 : index
    %c0_107 = arith.constant 0 : index
    %c0_108 = arith.constant 0 : index
    %176 = vector.load %arg8[%c0_106, %c0_107, %c0_108] : memref<3x256x256xbf16, #tpu.memory_space<vmem>>, vector<1x256x256xbf16>
    %177 = vector.shape_cast %176 : vector<1x256x256xbf16> to vector<256x256xbf16>
    %cst_109 = arith.constant dense<0.000000e+00> : vector<46x256xf32>
    %178 = tpu.matmul %175, %177, %cst_109 {dimension_numbers = #tpu.dot_dimension_numbers<[1], [0], [0], [1], [0, 0, 1, 1], [], []>} : vector<46x256xbf16>, vector<256x256xbf16>, vector<46x256xf32> -> vector<46x256xf32>
    %179 = vector.extract_strided_slice %173 {offsets = [1, 0], sizes = [46, 256], strides = [1, 1]} : vector<48x256xf32> to vector<46x256xf32>
    %180 = arith.truncf %179 : vector<46x256xf32> to vector<46x256xbf16>
    %c1_110 = arith.constant 1 : index
    %c0_111 = arith.constant 0 : index
    %c0_112 = arith.constant 0 : index
    %181 = vector.load %arg8[%c1_110, %c0_111, %c0_112] : memref<3x256x256xbf16, #tpu.memory_space<vmem>>, vector<1x256x256xbf16>
    %182 = vector.shape_cast %181 : vector<1x256x256xbf16> to vector<256x256xbf16>
    %cst_113 = arith.constant dense<0.000000e+00> : vector<46x256xf32>
    %183 = tpu.matmul %180, %182, %cst_113 {dimension_numbers = #tpu.dot_dimension_numbers<[1], [0], [0], [1], [0, 0, 1, 1], [], []>} : vector<46x256xbf16>, vector<256x256xbf16>, vector<46x256xf32> -> vector<46x256xf32>
    %184 = arith.addf %178, %183 : vector<46x256xf32>
    %185 = vector.extract_strided_slice %173 {offsets = [2, 0], sizes = [46, 256], strides = [1, 1]} : vector<48x256xf32> to vector<46x256xf32>
    %186 = arith.truncf %185 : vector<46x256xf32> to vector<46x256xbf16>
    %c2_114 = arith.constant 2 : index
    %c0_115 = arith.constant 0 : index
    %c0_116 = arith.constant 0 : index
    %187 = vector.load %arg8[%c2_114, %c0_115, %c0_116] : memref<3x256x256xbf16, #tpu.memory_space<vmem>>, vector<1x256x256xbf16>
    %188 = vector.shape_cast %187 : vector<1x256x256xbf16> to vector<256x256xbf16>
    %cst_117 = arith.constant dense<0.000000e+00> : vector<46x256xf32>
    %189 = tpu.matmul %186, %188, %cst_117 {dimension_numbers = #tpu.dot_dimension_numbers<[1], [0], [0], [1], [0, 0, 1, 1], [], []>} : vector<46x256xbf16>, vector<256x256xbf16>, vector<46x256xf32> -> vector<46x256xf32>
    %190 = arith.addf %184, %189 : vector<46x256xf32>
    %c0_118 = arith.constant 0 : index
    %c0_119 = arith.constant 0 : index
    %191 = vector.load %arg9[%c0_118, %c0_119] : memref<3x256xf32, #tpu.memory_space<vmem>>, vector<1x256xf32>
    %192 = vector.broadcast %191 : vector<1x256xf32> to vector<46x256xf32>
    %193 = arith.addf %190, %192 : vector<46x256xf32>
    %cst_120 = arith.constant 0.000000e+00 : f32
    %194 = vector.broadcast %cst_120 : f32 to vector<46x256xf32>
    %195 = arith.maximumf %193, %194 : vector<46x256xf32>
    %c1_121 = arith.constant 1 : index
    %c0_122 = arith.constant 0 : index
    %196 = vector.load %arg9[%c1_121, %c0_122] : memref<3x256xf32, #tpu.memory_space<vmem>>, vector<1x256xf32>
    %197 = vector.broadcast %196 : vector<1x256xf32> to vector<46x256xf32>
    %198 = arith.mulf %195, %197 : vector<46x256xf32>
    %c2_123 = arith.constant 2 : index
    %c0_124 = arith.constant 0 : index
    %199 = vector.load %arg9[%c2_123, %c0_124] : memref<3x256xf32, #tpu.memory_space<vmem>>, vector<1x256xf32>
    %200 = vector.broadcast %199 : vector<1x256xf32> to vector<46x256xf32>
    %201 = arith.addf %198, %200 : vector<46x256xf32>
    %202 = vector.extract_strided_slice %201 {offsets = [7, 0], sizes = [1, 256], strides = [1, 1]} : vector<46x256xf32> to vector<1x256xf32>
    %c0_125 = arith.constant 0 : index
    %c0_126 = arith.constant 0 : index
    %203 = vector.load %arg21[%c0_125, %c0_126] : memref<2x2048xf32, #tpu.memory_space<vmem>>, vector<1x256xf32>
    tpu.vector_store %arg21[%c0_125, %c0_126], %202 {strides = array<i32>} : memref<2x2048xf32, #tpu.memory_space<vmem>>, vector<1x256xf32>,
    %204 = vector.extract_strided_slice %201 {offsets = [8, 0], sizes = [1, 256], strides = [1, 1]} : vector<46x256xf32> to vector<1x256xf32>
    %c0_127 = arith.constant 0 : index
    %c256 = arith.constant 256 : index
    %205 = vector.load %arg21[%c0_127, %c256] : memref<2x2048xf32, #tpu.memory_space<vmem>>, vector<1x256xf32>
    tpu.vector_store %arg21[%c0_127, %c256], %204 {strides = array<i32>} : memref<2x2048xf32, #tpu.memory_space<vmem>>, vector<1x256xf32>,
    %206 = vector.extract_strided_slice %201 {offsets = [9, 0], sizes = [1, 256], strides = [1, 1]} : vector<46x256xf32> to vector<1x256xf32>
    %c0_128 = arith.constant 0 : index
    %c512 = arith.constant 512 : index
    %207 = vector.load %arg21[%c0_128, %c512] : memref<2x2048xf32, #tpu.memory_space<vmem>>, vector<1x256xf32>
    tpu.vector_store %arg21[%c0_128, %c512], %206 {strides = array<i32>} : memref<2x2048xf32, #tpu.memory_space<vmem>>, vector<1x256xf32>,
    %208 = vector.extract_strided_slice %201 {offsets = [10, 0], sizes = [1, 256], strides = [1, 1]} : vector<46x256xf32> to vector<1x256xf32>
    %c0_129 = arith.constant 0 : index
    %c768 = arith.constant 768 : index
    %209 = vector.load %arg21[%c0_129, %c768] : memref<2x2048xf32, #tpu.memory_space<vmem>>, vector<1x256xf32>
    tpu.vector_store %arg21[%c0_129, %c768], %208 {strides = array<i32>} : memref<2x2048xf32, #tpu.memory_space<vmem>>, vector<1x256xf32>,
    %210 = vector.extract_strided_slice %201 {offsets = [11, 0], sizes = [1, 256], strides = [1, 1]} : vector<46x256xf32> to vector<1x256xf32>
    %c0_130 = arith.constant 0 : index
    %c1024 = arith.constant 1024 : index
    %211 = vector.load %arg21[%c0_130, %c1024] : memref<2x2048xf32, #tpu.memory_space<vmem>>, vector<1x256xf32>
    tpu.vector_store %arg21[%c0_130, %c1024], %210 {strides = array<i32>} : memref<2x2048xf32, #tpu.memory_space<vmem>>, vector<1x256xf32>,
    %212 = vector.extract_strided_slice %201 {offsets = [12, 0], sizes = [1, 256], strides = [1, 1]} : vector<46x256xf32> to vector<1x256xf32>
    %c0_131 = arith.constant 0 : index
    %c1280 = arith.constant 1280 : index
    %213 = vector.load %arg21[%c0_131, %c1280] : memref<2x2048xf32, #tpu.memory_space<vmem>>, vector<1x256xf32>
    tpu.vector_store %arg21[%c0_131, %c1280], %212 {strides = array<i32>} : memref<2x2048xf32, #tpu.memory_space<vmem>>, vector<1x256xf32>,
    %214 = vector.extract_strided_slice %201 {offsets = [13, 0], sizes = [1, 256], strides = [1, 1]} : vector<46x256xf32> to vector<1x256xf32>
    %c0_132 = arith.constant 0 : index
    %c1536 = arith.constant 1536 : index
    %215 = vector.load %arg21[%c0_132, %c1536] : memref<2x2048xf32, #tpu.memory_space<vmem>>, vector<1x256xf32>
    tpu.vector_store %arg21[%c0_132, %c1536], %214 {strides = array<i32>} : memref<2x2048xf32, #tpu.memory_space<vmem>>, vector<1x256xf32>,
    %216 = vector.extract_strided_slice %201 {offsets = [14, 0], sizes = [1, 256], strides = [1, 1]} : vector<46x256xf32> to vector<1x256xf32>
    %c0_133 = arith.constant 0 : index
    %c1792 = arith.constant 1792 : index
    %217 = vector.load %arg21[%c0_133, %c1792] : memref<2x2048xf32, #tpu.memory_space<vmem>>, vector<1x256xf32>
    tpu.vector_store %arg21[%c0_133, %c1792], %216 {strides = array<i32>} : memref<2x2048xf32, #tpu.memory_space<vmem>>, vector<1x256xf32>,
    %218 = vector.extract_strided_slice %201 {offsets = [31, 0], sizes = [1, 256], strides = [1, 1]} : vector<46x256xf32> to vector<1x256xf32>
    %c1_134 = arith.constant 1 : index
    %c0_135 = arith.constant 0 : index
    %219 = vector.load %arg21[%c1_134, %c0_135] : memref<2x2048xf32, #tpu.memory_space<vmem>>, vector<1x256xf32>
    tpu.vector_store %arg21[%c1_134, %c0_135], %218 {strides = array<i32>} : memref<2x2048xf32, #tpu.memory_space<vmem>>, vector<1x256xf32>,
    %220 = vector.extract_strided_slice %201 {offsets = [32, 0], sizes = [1, 256], strides = [1, 1]} : vector<46x256xf32> to vector<1x256xf32>
    %c1_136 = arith.constant 1 : index
    %c256_137 = arith.constant 256 : index
    %221 = vector.load %arg21[%c1_136, %c256_137] : memref<2x2048xf32, #tpu.memory_space<vmem>>, vector<1x256xf32>
    tpu.vector_store %arg21[%c1_136, %c256_137], %220 {strides = array<i32>} : memref<2x2048xf32, #tpu.memory_space<vmem>>, vector<1x256xf32>,
    %222 = vector.extract_strided_slice %201 {offsets = [33, 0], sizes = [1, 256], strides = [1, 1]} : vector<46x256xf32> to vector<1x256xf32>
    %c1_138 = arith.constant 1 : index
    %c512_139 = arith.constant 512 : index
    %223 = vector.load %arg21[%c1_138, %c512_139] : memref<2x2048xf32, #tpu.memory_space<vmem>>, vector<1x256xf32>
    tpu.vector_store %arg21[%c1_138, %c512_139], %222 {strides = array<i32>} : memref<2x2048xf32, #tpu.memory_space<vmem>>, vector<1x256xf32>,
    %224 = vector.extract_strided_slice %201 {offsets = [34, 0], sizes = [1, 256], strides = [1, 1]} : vector<46x256xf32> to vector<1x256xf32>
    %c1_140 = arith.constant 1 : index
    %c768_141 = arith.constant 768 : index
    %225 = vector.load %arg21[%c1_140, %c768_141] : memref<2x2048xf32, #tpu.memory_space<vmem>>, vector<1x256xf32>
    tpu.vector_store %arg21[%c1_140, %c768_141], %224 {strides = array<i32>} : memref<2x2048xf32, #tpu.memory_space<vmem>>, vector<1x256xf32>,
    %226 = vector.extract_strided_slice %201 {offsets = [35, 0], sizes = [1, 256], strides = [1, 1]} : vector<46x256xf32> to vector<1x256xf32>
    %c1_142 = arith.constant 1 : index
    %c1024_143 = arith.constant 1024 : index
    %227 = vector.load %arg21[%c1_142, %c1024_143] : memref<2x2048xf32, #tpu.memory_space<vmem>>, vector<1x256xf32>
    tpu.vector_store %arg21[%c1_142, %c1024_143], %226 {strides = array<i32>} : memref<2x2048xf32, #tpu.memory_space<vmem>>, vector<1x256xf32>,
    %228 = vector.extract_strided_slice %201 {offsets = [36, 0], sizes = [1, 256], strides = [1, 1]} : vector<46x256xf32> to vector<1x256xf32>
    %c1_144 = arith.constant 1 : index
    %c1280_145 = arith.constant 1280 : index
    %229 = vector.load %arg21[%c1_144, %c1280_145] : memref<2x2048xf32, #tpu.memory_space<vmem>>, vector<1x256xf32>
    tpu.vector_store %arg21[%c1_144, %c1280_145], %228 {strides = array<i32>} : memref<2x2048xf32, #tpu.memory_space<vmem>>, vector<1x256xf32>,
    %230 = vector.extract_strided_slice %201 {offsets = [37, 0], sizes = [1, 256], strides = [1, 1]} : vector<46x256xf32> to vector<1x256xf32>
    %c1_146 = arith.constant 1 : index
    %c1536_147 = arith.constant 1536 : index
    %231 = vector.load %arg21[%c1_146, %c1536_147] : memref<2x2048xf32, #tpu.memory_space<vmem>>, vector<1x256xf32>
    tpu.vector_store %arg21[%c1_146, %c1536_147], %230 {strides = array<i32>} : memref<2x2048xf32, #tpu.memory_space<vmem>>, vector<1x256xf32>,
    %232 = vector.extract_strided_slice %201 {offsets = [38, 0], sizes = [1, 256], strides = [1, 1]} : vector<46x256xf32> to vector<1x256xf32>
    %c1_148 = arith.constant 1 : index
    %c1792_149 = arith.constant 1792 : index
    %233 = vector.load %arg21[%c1_148, %c1792_149] : memref<2x2048xf32, #tpu.memory_space<vmem>>, vector<1x256xf32>
    tpu.vector_store %arg21[%c1_148, %c1792_149], %232 {strides = array<i32>} : memref<2x2048xf32, #tpu.memory_space<vmem>>, vector<1x256xf32>,
    %c0_150 = arith.constant 0 : index
    %c0_151 = arith.constant 0 : index
    %234 = vector.load %arg21[%c0_150, %c0_151] : memref<2x2048xf32, #tpu.memory_space<vmem>>, vector<2x2048xf32>
    %235 = arith.truncf %234 : vector<2x2048xf32> to vector<2x2048xbf16>
    %c0_152 = arith.constant 0 : index
    %c0_153 = arith.constant 0 : index
    %236 = vector.load %arg10[%c0_152, %c0_153] : memref<2048x1024xbf16, #tpu.memory_space<vmem>>, vector<2048x1024xbf16>
    %cst_154 = arith.constant dense<0.000000e+00> : vector<2x1024xf32>
    %237 = tpu.matmul %235, %236, %cst_154 {dimension_numbers = #tpu.dot_dimension_numbers<[1], [0], [0], [1], [0, 0, 1, 1], [], []>} : vector<2x2048xbf16>, vector<2048x1024xbf16>, vector<2x1024xf32> -> vector<2x1024xf32>
    %c0_155 = arith.constant 0 : index
    %c0_156 = arith.constant 0 : index
    %238 = vector.load %arg11[%c0_155, %c0_156] : memref<3x1024xf32, #tpu.memory_space<vmem>>, vector<1x1024xf32>
    %239 = vector.broadcast %238 : vector<1x1024xf32> to vector<2x1024xf32>
    %240 = arith.addf %237, %239 : vector<2x1024xf32>
    %cst_157 = arith.constant 0.000000e+00 : f32
    %241 = vector.broadcast %cst_157 : f32 to vector<2x1024xf32>
    %242 = arith.maximumf %240, %241 : vector<2x1024xf32>
    %c1_158 = arith.constant 1 : index
    %c0_159 = arith.constant 0 : index
    %243 = vector.load %arg11[%c1_158, %c0_159] : memref<3x1024xf32, #tpu.memory_space<vmem>>, vector<1x1024xf32>
    %244 = vector.broadcast %243 : vector<1x1024xf32> to vector<2x1024xf32>
    %245 = arith.mulf %242, %244 : vector<2x1024xf32>
    %c2_160 = arith.constant 2 : index
    %c0_161 = arith.constant 0 : index
    %246 = vector.load %arg11[%c2_160, %c0_161] : memref<3x1024xf32, #tpu.memory_space<vmem>>, vector<1x1024xf32>
    %247 = vector.broadcast %246 : vector<1x1024xf32> to vector<2x1024xf32>
    %248 = arith.addf %245, %247 : vector<2x1024xf32>
    %249 = arith.truncf %248 : vector<2x1024xf32> to vector<2x1024xbf16>
    %c0_162 = arith.constant 0 : index
    %c0_163 = arith.constant 0 : index
    %250 = vector.load %arg12[%c0_162, %c0_163] : memref<1024x1024xbf16, #tpu.memory_space<vmem>>, vector<1024x1024xbf16>
    %cst_164 = arith.constant dense<0.000000e+00> : vector<2x1024xf32>
    %251 = tpu.matmul %249, %250, %cst_164 {dimension_numbers = #tpu.dot_dimension_numbers<[1], [0], [0], [1], [0, 0, 1, 1], [], []>} : vector<2x1024xbf16>, vector<1024x1024xbf16>, vector<2x1024xf32> -> vector<2x1024xf32>
    %c0_165 = arith.constant 0 : index
    %c0_166 = arith.constant 0 : index
    %252 = vector.load %arg13[%c0_165, %c0_166] : memref<3x1024xf32, #tpu.memory_space<vmem>>, vector<1x1024xf32>
    %253 = vector.broadcast %252 : vector<1x1024xf32> to vector<2x1024xf32>
    %254 = arith.addf %251, %253 : vector<2x1024xf32>
    %cst_167 = arith.constant 0.000000e+00 : f32
    %255 = vector.broadcast %cst_167 : f32 to vector<2x1024xf32>
    %256 = arith.maximumf %254, %255 : vector<2x1024xf32>
    %c1_168 = arith.constant 1 : index
    %c0_169 = arith.constant 0 : index
    %257 = vector.load %arg13[%c1_168, %c0_169] : memref<3x1024xf32, #tpu.memory_space<vmem>>, vector<1x1024xf32>
    %258 = vector.broadcast %257 : vector<1x1024xf32> to vector<2x1024xf32>
    %259 = arith.mulf %256, %258 : vector<2x1024xf32>
    %c2_170 = arith.constant 2 : index
    %c0_171 = arith.constant 0 : index
    %260 = vector.load %arg13[%c2_170, %c0_171] : memref<3x1024xf32, #tpu.memory_space<vmem>>, vector<1x1024xf32>
    %261 = vector.broadcast %260 : vector<1x1024xf32> to vector<2x1024xf32>
    %262 = arith.addf %259, %261 : vector<2x1024xf32>
    %263 = arith.truncf %262 : vector<2x1024xf32> to vector<2x1024xbf16>
    %c0_172 = arith.constant 0 : index
    %c0_173 = arith.constant 0 : index
    %264 = vector.load %arg14[%c0_172, %c0_173] : memref<1024x128xbf16, #tpu.memory_space<vmem>>, vector<1024x128xbf16>
    %cst_174 = arith.constant dense<0.000000e+00> : vector<2x128xf32>
    %265 = tpu.matmul %263, %264, %cst_174 {dimension_numbers = #tpu.dot_dimension_numbers<[1], [0], [0], [1], [0, 0, 1, 1], [], []>} : vector<2x1024xbf16>, vector<1024x128xbf16>, vector<2x128xf32> -> vector<2x128xf32>
    %c0_175 = arith.constant 0 : index
    %c0_176 = arith.constant 0 : index
    %266 = vector.load %arg15[%c0_175, %c0_176] : memref<1x128xf32, #tpu.memory_space<vmem>>, vector<1x128xf32>
    %267 = vector.broadcast %266 : vector<1x128xf32> to vector<2x128xf32>
    %268 = arith.addf %265, %267 : vector<2x128xf32>
    %c0_177 = arith.constant 0 : index
    %c0_178 = arith.constant 0 : index
    %269 = vector.load %arg16[%c0_177, %c0_178] : memref<2x128xf32, #tpu.memory_space<vmem>>, vector<2x128xf32>
    tpu.vector_store %arg16[%c0_177, %c0_178], %268 {strides = array<i32>} : memref<2x128xf32, #tpu.memory_space<vmem>>, vector<2x128xf32>,
    return
  }
  func.func @transform_0(%arg0: i32) -> (i32, i32, i32) {
    %c0_i32 = arith.constant 0 : i32
    %c0_i32_0 = arith.constant 0 : i32
    %c0_i32_1 = arith.constant 0 : i32
    %c0_i32_2 = arith.constant 0 : i32
    return %c0_i32, %c0_i32_0, %c0_i32_1 : i32, i32, i32
  }
  func.func @transform_1(%arg0: i32) -> (i32, i32, i32) {
    %c0_i32 = arith.constant 0 : i32
    %c0_i32_0 = arith.constant 0 : i32
    %c0_i32_1 = arith.constant 0 : i32
    %c0_i32_2 = arith.constant 0 : i32
    return %c0_i32, %c0_i32_0, %c0_i32_1 : i32, i32, i32
  }
  func.func @transform_2(%arg0: i32) -> (i32, i32) {
    %c0_i32 = arith.constant 0 : i32
    %c0_i32_0 = arith.constant 0 : i32
    %c0_i32_1 = arith.constant 0 : i32
    return %c0_i32, %c0_i32_0 : i32, i32
  }
  func.func @transform_3(%arg0: i32) -> (i32, i32, i32) {
    %c0_i32 = arith.constant 0 : i32
    %c0_i32_0 = arith.constant 0 : i32
    %c0_i32_1 = arith.constant 0 : i32
    %c0_i32_2 = arith.constant 0 : i32
    return %c0_i32, %c0_i32_0, %c0_i32_1 : i32, i32, i32
  }
  func.func @transform_4(%arg0: i32) -> (i32, i32) {
    %c0_i32 = arith.constant 0 : i32
    %c0_i32_0 = arith.constant 0 : i32
    %c0_i32_1 = arith.constant 0 : i32
    return %c0_i32, %c0_i32_0 : i32, i32
  }
  func.func @transform_5(%arg0: i32) -> (i32, i32, i32) {
    %c0_i32 = arith.constant 0 : i32
    %c0_i32_0 = arith.constant 0 : i32
    %c0_i32_1 = arith.constant 0 : i32
    %c0_i32_2 = arith.constant 0 : i32
    return %c0_i32, %c0_i32_0, %c0_i32_1 : i32, i32, i32
  }
  func.func @transform_6(%arg0: i32) -> (i32, i32) {
    %c0_i32 = arith.constant 0 : i32
    %c0_i32_0 = arith.constant 0 : i32
    %c0_i32_1 = arith.constant 0 : i32
    return %c0_i32, %c0_i32_0 : i32, i32
  }
  func.func @transform_7(%arg0: i32) -> (i32, i32, i32) {
    %c0_i32 = arith.constant 0 : i32
    %c0_i32_0 = arith.constant 0 : i32
    %c0_i32_1 = arith.constant 0 : i32
    %c0_i32_2 = arith.constant 0 : i32
    return %c0_i32, %c0_i32_0, %c0_i32_1 : i32, i32, i32
  }
  func.func @transform_8(%arg0: i32) -> (i32, i32) {
    %c0_i32 = arith.constant 0 : i32
    %c0_i32_0 = arith.constant 0 : i32
    %c0_i32_1 = arith.constant 0 : i32
    return %c0_i32, %c0_i32_0 : i32, i32
  }
  func.func @transform_9(%arg0: i32) -> (i32, i32) {
    %c0_i32 = arith.constant 0 : i32
    %c0_i32_0 = arith.constant 0 : i32
    %c0_i32_1 = arith.constant 0 : i32
    return %c0_i32, %c0_i32_0 : i32, i32
  }
  func.func @transform_10(%arg0: i32) -> (i32, i32) {
    %c0_i32 = arith.constant 0 : i32
    %c0_i32_0 = arith.constant 0 : i32
    %c0_i32_1 = arith.constant 0 : i32
    return %c0_i32, %c0_i32_0 : i32, i32
  }
  func.func @transform_11(%arg0: i32) -> (i32, i32) {
    %c0_i32 = arith.constant 0 : i32
    %c0_i32_0 = arith.constant 0 : i32
    %c0_i32_1 = arith.constant 0 : i32
    return %c0_i32, %c0_i32_0 : i32, i32
  }
  func.func @transform_12(%arg0: i32) -> (i32, i32) {
    %c0_i32 = arith.constant 0 : i32
    %c0_i32_0 = arith.constant 0 : i32
    %c0_i32_1 = arith.constant 0 : i32
    return %c0_i32, %c0_i32_0 : i32, i32
  }
  func.func @transform_13(%arg0: i32) -> (i32, i32) {
    %c0_i32 = arith.constant 0 : i32
    %c0_i32_0 = arith.constant 0 : i32
    %c0_i32_1 = arith.constant 0 : i32
    return %c0_i32, %c0_i32_0 : i32, i32
  }
  func.func @transform_14(%arg0: i32) -> (i32, i32) {
    %c0_i32 = arith.constant 0 : i32
    %c0_i32_0 = arith.constant 0 : i32
    %c0_i32_1 = arith.constant 0 : i32
    return %c0_i32, %c0_i32_0 : i32, i32
  }
  func.func @transform_15(%arg0: i32) -> (i32, i32) {
    %c0_i32 = arith.constant 0 : i32
    %c0_i32_0 = arith.constant 0 : i32
    %c0_i32_1 = arith.constant 0 : i32
    return %c0_i32, %c0_i32_0 : i32, i32
  }
}

</mosaic_0001>

<bundles_post_ra>
// kernel: tpu_custom_call.1
= control target key start
LH: loop header
LB: loop body
LE: loop exit
PB: predicated region body
PF: predicated region fallthrough
CT: control target
= control target key end

     0   :  { %20 = vsyncpa [#allocation8], 0  ;;  %s19105_s0 = inlined_call_operand.vmem [shape: f32[2,16,8], index: 0, kind: input, shape index: {}]   ;;  %s19106_s1 = inlined_call_operand.hbm [shape: bf16[3,8,128], index: 1, kind: input, shape index: {}]   ;;  %s19107_s2 = inlined_call_operand.hbm [shape: f32[3,128], index: 2, kind: input, shape index: {}]   ;;  %s19108_s3 = inlined_call_operand.hbm [shape: bf16[3,128,128], index: 3, kind: input, shape index: {}]   ;;  %s19109_s4 = inlined_call_operand.hbm [shape: f32[3,128], index: 4, kind: input, shape index: {}]   ;;  %s19110_s5 = inlined_call_operand.hbm [shape: bf16[3,128,256], index: 5, kind: input, shape index: {}]   ;;  %s19111_s6 = inlined_call_operand.hbm [shape: f32[3,256], index: 6, kind: input, shape index: {}]   ;;  %s19112_s7 = inlined_call_operand.hbm [shape: bf16[3,256,256], index: 7, kind: input, shape index: {}]   ;;  %s19113_s8 = inlined_call_operand.hbm [shape: f32[3,256], index: 8, kind: input, shape index: {}]   ;;  %s19114_s9 = inlined_call_operand.hbm [shape: bf16[2048,1024], index: 9, kind: input, shape index: {}]   ;;  %s19115_s10 = inlined_call_operand.hbm [shape: f32[3,1024], index: 10, kind: input, shape index: {}]   ;;  %s19116_s11 = inlined_call_operand.hbm [shape: bf16[1024,1024], index: 11, kind: input, shape index: {}]   ;;  %s19117_s12 = inlined_call_operand.hbm [shape: f32[3,1024], index: 12, kind: input, shape index: {}]   ;;  %s19118_s13 = inlined_call_operand.hbm [shape: bf16[1024,128], index: 13, kind: input, shape index: {}]   ;;  %s19119_s14 = inlined_call_operand.hbm [shape: f32[1,128], index: 14, kind: input, shape index: {}]   ;;  %s19120_s15 = inlined_call_operand.hbm [shape: f32[2,128], index: 15, kind: output, shape index: {}]  }
   0x1   :  { %21 = vsyncpa [#allocation11], 0 }
   0x2   :  { %22 = vsyncpa [#allocation14], 0 }
   0x3   :  { %23 = vsyncpa [#allocation17], 0 }
   0x4   :  { %24 = vsyncpa [#allocation20], 0 }
   0x5   :  { %25 = vsyncpa [#allocation23], 0 }
   0x6   :  { %26 = vsyncpa [#allocation26], 0 }
   0x7   :  { %27 = vsyncpa [#allocation29], 0 }
   0x8   :  { %28 = vsyncpa [#allocation9], 0  ;;  %s18105_s18 = smov [#allocation10]   ;;  %s18106_s20 = smov [#allocation13]  }
   0x9   :  { %s49_s19 = sshll.u32 %s18105_s18, 4  ;;  %s71_s21 = sshll.u32 %s18106_s20, 4  ;;  %s50_s19 = int_to_ptr.vmem [resolvable:$true] %s49_s19  ;;  %s72_s21 = int_to_ptr.vmem [resolvable:$true] %s71_s21 }
   0xa   :  { %s17757_s24 = scalar_lea.hbm %s19107_s2, 64 }
   0xb   :  { %p17758_p0 = scmp.ne.s32.totalorder %s19107_s2, %s17757_s24  ;;  %p17761_p1 = scmp.lt.u32.totalorder %s17757_s24, %s19107_s2 }
   0xd   :  { %p17763_p2 = pnand %p17761_p1, %p17758_p0 }
   0xf   :  { %17766 = shalt.err (!%p17763_p2)
}
  0x10   :  { %s17767_s29 = scalar_lea.vmem %s50_s19, 64  ;;  %p17772_p4 = scmp.lt.s32.totalorder %s50_s19, %s50_s19 }
  0x11   :  { %p17768_p3 = scmp.ne.s32.totalorder %s50_s19, %s17767_s29  ;;  %p17773_p5 = scmp.lt.s32.totalorder %s17767_s29, %s17767_s29 }
  0x13   :  { %p17774_p6 = por %p17773_p5, %p17772_p4 }
  0x15   :  { %p17775_p7 = pnand %p17774_p6, %p17768_p3 }
  0x17   :  { %17778 = shalt.err (!%p17775_p7)
}
  0x18   :  { %52 = dma.hbm_to_vmem [thread:$0]  %s19107_s2, 64, %s50_s19, [#allocation11]  }
  0x19   :  { %s17779_s20 = scalar_lea.hbm %s19109_s4, 64 }
  0x1a   :  { %p17780_p8 = scmp.ne.s32.totalorder %s19109_s4, %s17779_s20  ;;  %p17783_p9 = scmp.lt.u32.totalorder %s17779_s20, %s19109_s4 }
  0x1c   :  { %p17785_p10 = pnand %p17783_p9, %p17780_p8 }
  0x1e   :  { %17788 = shalt.err (!%p17785_p10)
}
  0x1f   :  { %s17789_s26 = scalar_lea.vmem %s72_s21, 64  ;;  %p17794_p12 = scmp.lt.s32.totalorder %s72_s21, %s72_s21 }
  0x20   :  { %p17790_p11 = scmp.ne.s32.totalorder %s72_s21, %s17789_s26  ;;  %p17795_p13 = scmp.lt.s32.totalorder %s17789_s26, %s17789_s26 }
  0x22   :  { %p17796_p0 = por %p17795_p13, %p17794_p12 }
  0x24   :  { %p17797_p1 = pnand %p17796_p0, %p17790_p11 }
  0x26   :  { %17800 = shalt.err (!%p17797_p1)
}
  0x27   :  { %74 = dma.hbm_to_vmem [thread:$0]  %s19109_s4, 64, %s72_s21, [#allocation14]  }
  0x28   :  { %s18107_s27 = smov [#allocation16]   ;;  %s18108_s29 = smov [#allocation19]  }
  0x29   :  { %s93_s28 = sshll.u32 %s18107_s27, 4  ;;  %s115_s30 = sshll.u32 %s18108_s29, 4  ;;  %s94_s28 = int_to_ptr.vmem [resolvable:$true] %s93_s28  ;;  %s116_s30 = int_to_ptr.vmem [resolvable:$true] %s115_s30 }
  0x2a   :  { %s17801_s18 = scalar_lea.hbm %s19111_s6, 128 }
  0x2b   :  { %p17802_p2 = scmp.ne.s32.totalorder %s19111_s6, %s17801_s18  ;;  %p17805_p3 = scmp.lt.u32.totalorder %s17801_s18, %s19111_s6 }
  0x2d   :  { %p17807_p4 = pnand %p17805_p3, %p17802_p2 }
  0x2f   :  { %17810 = shalt.err (!%p17807_p4)
}
  0x30   :  { %s17811_s4 = scalar_lea.vmem %s94_s28, 128  ;;  %p17816_p6 = scmp.lt.s32.totalorder %s94_s28, %s94_s28 }
  0x31   :  { %p17812_p5 = scmp.ne.s32.totalorder %s94_s28, %s17811_s4  ;;  %p17817_p7 = scmp.lt.s32.totalorder %s17811_s4, %s17811_s4 }
  0x33   :  { %p17818_p8 = por %p17817_p7, %p17816_p6 }
  0x35   :  { %p17819_p9 = pnand %p17818_p8, %p17812_p5 }
  0x37   :  { %17822 = shalt.err (!%p17819_p9)
}
  0x38   :  { %96 = dma.hbm_to_vmem [thread:$0]  %s19111_s6, 128, %s94_s28, [#allocation17]  }
  0x39   :  { %s17823_s19 = scalar_lea.hbm %s19113_s8, 128 }
  0x3a   :  { %p17824_p10 = scmp.ne.s32.totalorder %s19113_s8, %s17823_s19  ;;  %p17827_p11 = scmp.lt.u32.totalorder %s17823_s19, %s19113_s8 }
  0x3c   :  { %p17829_p12 = pnand %p17827_p11, %p17824_p10 }
  0x3e   :  { %17832 = shalt.err (!%p17829_p12)
}
  0x3f   :  { %s17833_s18 = scalar_lea.vmem %s116_s30, 128  ;;  %p17838_p0 = scmp.lt.s32.totalorder %s116_s30, %s116_s30 }
  0x40   :  { %p17834_p13 = scmp.ne.s32.totalorder %s116_s30, %s17833_s18  ;;  %p17839_p1 = scmp.lt.s32.totalorder %s17833_s18, %s17833_s18 }
  0x42   :  { %p17840_p2 = por %p17839_p1, %p17838_p0 }
  0x44   :  { %p17841_p3 = pnand %p17840_p2, %p17834_p13 }
  0x46   :  { %17844 = shalt.err (!%p17841_p3)
}
  0x47   :  { %118 = dma.hbm_to_vmem [thread:$0]  %s19113_s8, 128, %s116_s30, [#allocation20]  }
  0x48   :  { %s18109_s20 = smov [#allocation22]   ;;  %s18110_s23 = smov [#allocation25]  }
  0x49   :  { %s137_s22 = sshll.u32 %s18109_s20, 4  ;;  %s159_s24 = sshll.u32 %s18110_s23, 4  ;;  %s138_s22 = int_to_ptr.vmem [resolvable:$true] %s137_s22  ;;  %s160_s24 = int_to_ptr.vmem [resolvable:$true] %s159_s24 }
  0x4a   :  { %s17845_s25 = scalar_lea.hbm %s19115_s10, 512 }
  0x4b   :  { %p17846_p4 = scmp.ne.s32.totalorder %s19115_s10, %s17845_s25  ;;  %p17849_p5 = scmp.lt.u32.totalorder %s17845_s25, %s19115_s10 }
  0x4d   :  { %p17851_p6 = pnand %p17849_p5, %p17846_p4 }
  0x4f   :  { %17854 = shalt.err (!%p17851_p6)
}
  0x50   :  { %s17855_s8 = scalar_lea.vmem %s138_s22, 512  ;;  %p17860_p8 = scmp.lt.s32.totalorder %s138_s22, %s138_s22 }
  0x51   :  { %p17856_p7 = scmp.ne.s32.totalorder %s138_s22, %s17855_s8  ;;  %p17861_p9 = scmp.lt.s32.totalorder %s17855_s8, %s17855_s8 }
  0x53   :  { %p17862_p10 = por %p17861_p9, %p17860_p8 }
  0x55   :  { %p17863_p11 = pnand %p17862_p10, %p17856_p7 }
  0x57   :  { %17866 = shalt.err (!%p17863_p11)
}
  0x58   :  { %140 = dma.hbm_to_vmem [thread:$0]  %s19115_s10, 512, %s138_s22, [#allocation23]  }
  0x59   :  { %s17867_s18 = scalar_lea.hbm %s19117_s12, 512 }
  0x5a   :  { %p17868_p12 = scmp.ne.s32.totalorder %s19117_s12, %s17867_s18  ;;  %p17871_p13 = scmp.lt.u32.totalorder %s17867_s18, %s19117_s12 }
  0x5c   :  { %p17873_p0 = pnand %p17871_p13, %p17868_p12 }
  0x5e   :  { %17876 = shalt.err (!%p17873_p0)
}
  0x5f   :  { %s17877_s4 = scalar_lea.vmem %s160_s24, 512  ;;  %p17882_p2 = scmp.lt.s32.totalorder %s160_s24, %s160_s24 }
  0x60   :  { %p17878_p1 = scmp.ne.s32.totalorder %s160_s24, %s17877_s4  ;;  %p17883_p3 = scmp.lt.s32.totalorder %s17877_s4, %s17877_s4 }
  0x62   :  { %p17884_p4 = por %p17883_p3, %p17882_p2 }
  0x64   :  { %p17885_p5 = pnand %p17884_p4, %p17878_p1 }
  0x66   :  { %17888 = shalt.err (!%p17885_p5)
}
  0x67   :  { %162 = dma.hbm_to_vmem [thread:$0]  %s19117_s12, 512, %s160_s24, [#allocation26]  }
  0x68   :  { %s18111_s21 = smov [#allocation7]   ;;  %s17889_s19 = scalar_lea.hbm %s19106_s1, 192 }
  0x69   :  { %s36_s25 = sshll.u32 %s18111_s21, 4  ;;  %p17890_p6 = scmp.ne.s32.totalorder %s19106_s1, %s17889_s19  ;;  %s37_s25 = int_to_ptr.vmem [resolvable:$true] %s36_s25 }
  0x6a   :  { %p17893_p7 = scmp.lt.u32.totalorder %s17889_s19, %s19106_s1 }
  0x6c   :  { %p17895_p8 = pnand %p17893_p7, %p17890_p6 }
  0x6e   :  { %17898 = shalt.err (!%p17895_p8)
}
  0x6f   :  { %s17899_s16 = scalar_lea.vmem %s37_s25, 192  ;;  %p17904_p10 = scmp.lt.s32.totalorder %s37_s25, %s37_s25 }
  0x70   :  { %p17900_p9 = scmp.ne.s32.totalorder %s37_s25, %s17899_s16  ;;  %p17905_p11 = scmp.lt.s32.totalorder %s17899_s16, %s17899_s16 }
  0x72   :  { %p17906_p12 = por %p17905_p11, %p17904_p10 }
  0x74   :  { %p17907_p13 = pnand %p17906_p12, %p17900_p9 }
  0x76   :  { %17910 = shalt.err (!%p17907_p13)
}
  0x77   :  { %s18112_s12 = smov 64   ;;  %s18113_s24 = smov 4  }
  0x78   :  { %42 = dma.hbm_to_vmem [thread:$0]  %s19106_s1, 192, %s37_s25, [#allocation8], %s18112_s12, %s18112_s12, %s18113_s24  }
  0x79   :  { %s18114_s6 = smov [#allocation12]   ;;  %s18115_s20 = smov [#allocation15]  }
  0x7a   :  { %s58_s28 = sshll.u32 %s18114_s6, 4  ;;  %s80_s23 = sshll.u32 %s18115_s20, 4  ;;  %s59_s28 = int_to_ptr.vmem [resolvable:$true] %s58_s28  ;;  %s81_s23 = int_to_ptr.vmem [resolvable:$true] %s80_s23 }
  0x7b   :  { %s17911_s22 = scalar_lea.hbm %s19108_s3, 3072 }
  0x7c   :  { %p17912_p0 = scmp.ne.s32.totalorder %s19108_s3, %s17911_s22  ;;  %p17915_p1 = scmp.lt.u32.totalorder %s17911_s22, %s19108_s3 }
  0x7e   :  { %p17917_p2 = pnand %p17915_p1, %p17912_p0 }
  0x80   :  { %17920 = shalt.err (!%p17917_p2)
}
  0x81   :  { %s17921_s1 = scalar_lea.vmem %s59_s28, 3072  ;;  %p17926_p4 = scmp.lt.s32.totalorder %s59_s28, %s59_s28 }
  0x82   :  { %p17922_p3 = scmp.ne.s32.totalorder %s59_s28, %s17921_s1  ;;  %p17927_p5 = scmp.lt.s32.totalorder %s17921_s1, %s17921_s1 }
  0x84   :  { %p17928_p6 = por %p17927_p5, %p17926_p4 }
  0x86   :  { %p17929_p7 = pnand %p17928_p6, %p17922_p3 }
  0x88   :  { %17932 = shalt.err (!%p17929_p7)
}
  0x89   :  { %64 = dma.hbm_to_vmem [thread:$0]  %s19108_s3, 3072, %s59_s28, [#allocation11], %s18112_s12, %s18112_s12, %s18113_s24  }
  0x8a   :  { %s17933_s29 = scalar_lea.hbm %s19110_s5, 6144 }
  0x8b   :  { %p17934_p8 = scmp.ne.s32.totalorder %s19110_s5, %s17933_s29  ;;  %p17937_p9 = scmp.lt.u32.totalorder %s17933_s29, %s19110_s5 }
  0x8d   :  { %p17939_p10 = pnand %p17937_p9, %p17934_p8 }
  0x8f   :  { %17942 = shalt.err (!%p17939_p10)
}
  0x90   :  { %s17943_s20 = scalar_lea.vmem %s81_s23, 6144  ;;  %p17948_p12 = scmp.lt.s32.totalorder %s81_s23, %s81_s23 }
  0x91   :  { %p17944_p11 = scmp.ne.s32.totalorder %s81_s23, %s17943_s20  ;;  %p17949_p13 = scmp.lt.s32.totalorder %s17943_s20, %s17943_s20 }
  0x93   :  { %p17950_p0 = por %p17949_p13, %p17948_p12 }
  0x95   :  { %p17951_p1 = pnand %p17950_p0, %p17944_p11 }
  0x97   :  { %17954 = shalt.err (!%p17951_p1)
}
  0x98   :  { %s18116_s3 = smov 128   ;;  %s18117_s28 = smov 8  }
  0x99   :  { %86 = dma.hbm_to_vmem [thread:$0]  %s19110_s5, 6144, %s81_s23, [#allocation14], %s18116_s3, %s18116_s3, %s18117_s28  }
  0x9a   :  { %s18118_s22 = smov [#allocation18]   ;;  %s18119_s26 = smov [#allocation21]  }
  0x9b   :  { %s102_s21 = sshll.u32 %s18118_s22, 4  ;;  %s124_s2 = sshll.u32 %s18119_s26, 4  ;;  %s103_s21 = int_to_ptr.vmem [resolvable:$true] %s102_s21  ;;  %s125_s2 = int_to_ptr.vmem [resolvable:$true] %s124_s2 }
  0x9c   :  { %s17955_s25 = scalar_lea.hbm %s19112_s7, 12288 }
  0x9d   :  { %p17956_p2 = scmp.ne.s32.totalorder %s19112_s7, %s17955_s25  ;;  %p17959_p3 = scmp.lt.u32.totalorder %s17955_s25, %s19112_s7 }
  0x9f   :  { %p17961_p4 = pnand %p17959_p3, %p17956_p2 }
  0xa1   :  { %17964 = shalt.err (!%p17961_p4)
}
  0xa2   :  { %s17965_s5 = scalar_lea.vmem %s103_s21, 12288  ;;  %p17970_p6 = scmp.lt.s32.totalorder %s103_s21, %s103_s21 }
  0xa3   :  { %p17966_p5 = scmp.ne.s32.totalorder %s103_s21, %s17965_s5  ;;  %p17971_p7 = scmp.lt.s32.totalorder %s17965_s5, %s17965_s5 }
  0xa5   :  { %p17972_p8 = por %p17971_p7, %p17970_p6 }
  0xa7   :  { %p17973_p9 = pnand %p17972_p8, %p17966_p5 }
  0xa9   :  { %17976 = shalt.err (!%p17973_p9)
}
  0xaa   :  { %108 = dma.hbm_to_vmem [thread:$0]  %s19112_s7, 12288, %s103_s21, [#allocation17], %s18116_s3, %s18116_s3, %s18117_s28  }
  0xab   :  { %s17977_s6 = scalar_lea.hbm %s19114_s9, 131072 }
  0xac   :  { %p17978_p10 = scmp.ne.s32.totalorder %s19114_s9, %s17977_s6  ;;  %p17981_p11 = scmp.lt.u32.totalorder %s17977_s6, %s19114_s9 }
  0xae   :  { %p17983_p12 = pnand %p17981_p11, %p17978_p10 }
  0xb0   :  { %17986 = shalt.err (!%p17983_p12)
}
  0xb1   :  { %s17987_s26 = scalar_lea.vmem %s125_s2, 131072  ;;  %p17992_p0 = scmp.lt.s32.totalorder %s125_s2, %s125_s2 }
  0xb2   :  { %p17988_p13 = scmp.ne.s32.totalorder %s125_s2, %s17987_s26  ;;  %p17993_p1 = scmp.lt.s32.totalorder %s17987_s26, %s17987_s26 }
  0xb4   :  { %p17994_p2 = por %p17993_p1, %p17992_p0 }
  0xb6   :  { %p17995_p3 = pnand %p17994_p2, %p17988_p13 }
  0xb8   :  { %17998 = shalt.err (!%p17995_p3)
}
  0xb9   :  { %s18120_s7 = smov 512   ;;  %s18121_s3 = smov 32  }
  0xba   :  { %130 = dma.hbm_to_vmem [thread:$0]  %s19114_s9, 131072, %s125_s2, [#allocation20], %s18120_s7, %s18120_s7, %s18121_s3  }
  0xbb   :  { %s18122_s19 = smov [#allocation24]   ;;  %s18123_s25 = smov [#allocation27]  }
  0xbc   :  { %s146_s1 = sshll.u32 %s18122_s19, 4  ;;  %s168_s27 = sshll.u32 %s18123_s25, 4  ;;  %s147_s1 = int_to_ptr.vmem [resolvable:$true] %s146_s1  ;;  %s169_s27 = int_to_ptr.vmem [resolvable:$true] %s168_s27 }
  0xbd   :  { %s17999_s29 = scalar_lea.hbm %s19116_s11, 65536 }
  0xbe   :  { %p18000_p4 = scmp.ne.s32.totalorder %s19116_s11, %s17999_s29  ;;  %p18003_p5 = scmp.lt.u32.totalorder %s17999_s29, %s19116_s11 }
  0xc0   :  { %p18005_p6 = pnand %p18003_p5, %p18000_p4 }
  0xc2   :  { %18008 = shalt.err (!%p18005_p6)
}
  0xc3   :  { %s18009_s9 = scalar_lea.vmem %s147_s1, 65536  ;;  %p18014_p8 = scmp.lt.s32.totalorder %s147_s1, %s147_s1 }
  0xc4   :  { %p18010_p7 = scmp.ne.s32.totalorder %s147_s1, %s18009_s9  ;;  %p18015_p9 = scmp.lt.s32.totalorder %s18009_s9, %s18009_s9 }
  0xc6   :  { %p18016_p10 = por %p18015_p9, %p18014_p8 }
  0xc8   :  { %p18017_p11 = pnand %p18016_p10, %p18010_p7 }
  0xca   :  { %18020 = shalt.err (!%p18017_p11)
}
  0xcb   :  { %152 = dma.hbm_to_vmem [thread:$0]  %s19116_s11, 65536, %s147_s1, [#allocation23], %s18120_s7, %s18120_s7, %s18121_s3  }
  0xcc   :  { %s18021_s4 = scalar_lea.hbm %s19118_s13, 8192 }
  0xcd   :  { %p18022_p12 = scmp.ne.s32.totalorder %s19118_s13, %s18021_s4  ;;  %p18025_p13 = scmp.lt.u32.totalorder %s18021_s4, %s19118_s13 }
  0xcf   :  { %p18027_p0 = pnand %p18025_p13, %p18022_p12 }
  0xd1   :  { %18030 = shalt.err (!%p18027_p0)
}
  0xd2   :  { %s18031_s21 = scalar_lea.vmem %s169_s27, 8192  ;;  %p18036_p2 = scmp.lt.s32.totalorder %s169_s27, %s169_s27 }
  0xd3   :  { %p18032_p1 = scmp.ne.s32.totalorder %s169_s27, %s18031_s21  ;;  %p18037_p3 = scmp.lt.s32.totalorder %s18031_s21, %s18031_s21 }
  0xd5   :  { %p18038_p4 = por %p18037_p3, %p18036_p2 }
  0xd7   :  { %p18039_p5 = pnand %p18038_p4, %p18032_p1 }
  0xd9   :  { %18042 = shalt.err (!%p18039_p5)
}
  0xda   :  { %174 = dma.hbm_to_vmem [thread:$0]  %s19118_s13, 8192, %s169_s27, [#allocation26], %s18112_s12, %s18112_s12, %s18113_s24  }
  0xdb   :  { %s18124_s3 = smov [#allocation28]   ;;  %s18043_s8 = scalar_lea.hbm %s19119_s14, 16 }
  0xdc   :  { %s181_s19 = sshll.u32 %s18124_s3, 4  ;;  %p18044_p6 = scmp.ne.s32.totalorder %s19119_s14, %s18043_s8  ;;  %s182_s19 = int_to_ptr.vmem [resolvable:$true] %s181_s19 }
  0xdd   :  { %p18047_p7 = scmp.lt.u32.totalorder %s18043_s8, %s19119_s14 }
  0xdf   :  { %p18049_p8 = pnand %p18047_p7, %p18044_p6 }
  0xe1   :  { %18052 = shalt.err (!%p18049_p8)
}
  0xe2   :  { %s18053_s16 = scalar_lea.vmem %s182_s19, 16  ;;  %s18057_s13 = scalar_lea.vmem %s182_s19, 32 }
  0xe3   :  { %p18054_p9 = scmp.ne.s32.totalorder %s182_s19, %s18053_s16  ;;  %p18058_p10 = scmp.lt.s32.totalorder %s182_s19, %s182_s19 }
  0xe4   :  { %p18059_p11 = scmp.lt.s32.totalorder %s18057_s13, %s18053_s16 }
  0xe6   :  { %p18060_p12 = por %p18059_p11, %p18058_p10 }
  0xe8   :  { %p18061_p13 = pnand %p18060_p12, %p18054_p9 }
  0xea   :  { %18064 = shalt.err (!%p18061_p13)
}
  0xeb   :  { %184 = dma.hbm_to_vmem [thread:$0]  %s19119_s14, 16, %s182_s19, [#allocation29]  }
  0xec   :  { %18087 = dma.done.wait [#allocation8], 192  }
  0xed   :  { %18088 = vsyncadd [#allocation8], 4294967104 }
  0xee   :  { %18089 = dma.done.wait [#allocation11], 3136  }
  0xef   :  { %18090 = vsyncadd [#allocation11], 4294964160 }
  0xf0   :  { %18091 = dma.done.wait [#allocation14], 6208  }
  0xf1   :  { %18092 = vsyncadd [#allocation14], 4294961088 }
  0xf2   :  { %18093 = dma.done.wait [#allocation17], 12416  }
  0xf3   :  { %18094 = vsyncadd [#allocation17], 4294954880 }
  0xf4   :  { %18095 = dma.done.wait [#allocation20], 131200  }
  0xf5   :  { %18096 = vsyncadd [#allocation20], 4294836096 }
  0xf6   :  { %18097 = dma.done.wait [#allocation23], 66048  }
  0xf7   :  { %18098 = vsyncadd [#allocation23], 4294901248 }
  0xf8   :  { %18099 = dma.done.wait [#allocation26], 8704  }
  0xf9   :  { %18100 = vsyncadd [#allocation26], 4294958592 }
  0xfa   :  { %18101 = dma.done.wait [#allocation29], 16  }
  0xfb   :  { %18102 = vsyncadd [#allocation29], 4294967280  ;;  %vm228_vm0 = vcmask 64512   ;;  %v18125_v0 = vmov 0.0   ;;  %vm331_vm1 = vcmask 1043456   ;;  %v263_v2 = vld [vmem:[%s19105_s0] sm:$0xff] }
  0xfc   :  { %229 = vst.msk [vmem:[#allocation2] sm:$0xff] %vm228_vm0, %v18125_v0  ;;  %230 = vst.msk [vmem:[#allocation2 + $0x8] sm:$0xff] %vm228_vm0, %v18125_v0  ;;  %v286_v1 = vld [vmem:[#allocation7 + $0x4] sm:$0xf]  ;;  %v264_v3 = vld [vmem:[%s19105_s0 + $0x8] sm:$0xff]  ;;  %vm478_vm3 = vcmask 1046528  }
  0xfd   :  { %231 = vst.msk [vmem:[#allocation2 + $0x10] sm:$0xff] %vm228_vm0, %v18125_v0  ;;  %232 = vst.msk [vmem:[#allocation2 + $0x18] sm:$0xff] %vm228_vm0, %v18125_v0  ;;  %17416 = vmatprep.subr.msk.bf16.mxu1 %vm331_vm1, %v286_v1  ;;  %17415 = vmatprep.subr.msk.bf16.mxu0 %vm331_vm1, %v286_v1  ;;  %v333_v4 = vsel %vm331_vm1, %v286_v1, 0  ;;  %v15191_v5 = vld [vmem:[%s19105_s0 + $0x10] sm:$0xff]  ;;  %v15192_v6 = vld [vmem:[%s19105_s0 + $0x18] sm:$0xff]  ;;  %vm1736_vm4 = vcmask 1040384  }
  0xfe   :  { %233 = vst.msk [vmem:[#allocation2 + $0x20] sm:$0xff] %vm228_vm0, %v18125_v0  ;;  %234 = vst.msk [vmem:[#allocation2 + $0x28] sm:$0xff] %vm228_vm0, %v18125_v0  ;;  %17222 = vmatpush3.bf16.msra.mxu1 %v333_v4  ;;  %17120 = vmatpush3.bf16.msra.mxu0 %v333_v4  ;;  %v284_v7 = vld [vmem:[#allocation7] sm:$0xf]  ;;  %v473_v8 = vld [vmem:[#allocation7 + $0x8] sm:$0xf] }
  0xff   :  { %235 = vst.msk [vmem:[#allocation2 + $0x30] sm:$0xff] %vm228_vm0, %v18125_v0  ;;  %236 = vst.msk [vmem:[#allocation2 + $0x38] sm:$0xff] %vm228_vm0, %v18125_v0  ;;  %17417 = vmatprep.subr.msk.bf16.mxu1 %vm331_vm1, %v284_v7  ;;  %17418 = vmatprep.subr.msk.bf16.mxu0 %vm331_vm1, %v473_v8  ;;  %vm287_vm2 = vsmask.f32 7424  ;;  %v407_v18 = vsel %vm331_vm1, %v284_v7, 0  ;;  %v499_v21 = vsel %vm331_vm1, %v473_v8, 0 }
 0x100   :  { %237 = vst [vmem:[#allocation3] sm:$0xff] %v18125_v0  ;;  %238 = vst [vmem:[#allocation3 + $0x8] sm:$0xff] %v18125_v0  ;;  %v17445_v49 = vld [vmem:[#allocation12] sm:$0xff]   ;;  %v17446_v50 = vld [vmem:[#allocation12 + $0x8] sm:$0xff]   ;;  %s18130_s0 = smov [#allocation30]  }
 0x101   :  { %239 = vst [vmem:[#allocation3 + $0x10] sm:$0xff] %v18125_v0  ;;  %242 = vst [vmem:[#allocation3 + $0x28] sm:$0xff] %v18125_v0  ;;  %v17447_v51 = vld [vmem:[#allocation12 + $0x10] sm:$0xff]   ;;  %v17448_v52 = vld [vmem:[#allocation12 + $0x40] sm:$0xff]   ;;  %s15175_s4 = sshll.u32 %s18130_s0, 4  ;;  %s15176_s4 = int_to_ptr.vmem [resolvable:$true] %s15175_s4 }
 0x102   :  { %243 = vst [vmem:[#allocation3 + $0x30] sm:$0xff] %v18125_v0  ;;  %246 = vst [vmem:[#allocation4 + $0x8] sm:$0xff] %v18125_v0  ;;  %v17449_v53 = vld [vmem:[#allocation12 + $0x18] sm:$0xff]   ;;  %v17450_v54 = vld [vmem:[#allocation12 + $0x48] sm:$0xff]   ;;  %s18065_s10 = scalar_lea.vmem %s15176_s4, 32  ;;  %p18070_p1 = scmp.lt.s32.totalorder %s15176_s4, %s15176_s4 }
 0x103   :  { %249 = vst [vmem:[#allocation4 + $0x20] sm:$0xff] %v18125_v0  ;;  %265 = vst.msk [vmem:[#allocation2 + $0x8] sm:$0xff] %vm228_vm0, %v263_v2  ;;  %v272_v9 = vld [vmem:[#allocation2] sm:$0xff]  ;;  %v17452_v56 = vld [vmem:[#allocation12 + $0x50] sm:$0xff]   ;;  %p18066_p0 = scmp.ne.s32.totalorder %s15176_s4, %s18065_s10  ;;  %p18071_p2 = scmp.lt.s32.totalorder %s18065_s10, %s18065_s10 }
 0x104   :  { %266 = vst.msk [vmem:[#allocation2 + $0x10] sm:$0xff] %vm228_vm0, %v264_v3  ;;  %270 = vst.msk [vmem:[#allocation2 + $0x28] sm:$0xff] %vm228_vm0, %v15191_v5  ;;  %v275_v10 = vld [vmem:[#allocation2 + $0x18] sm:$0xff]  ;;  %v17451_v55 = vld [vmem:[#allocation12 + $0x20] sm:$0xff]  }
 0x105   :  { %271 = vst.msk [vmem:[#allocation2 + $0x30] sm:$0xff] %vm228_vm0, %v15192_v6  ;;  %v276_v11 = vld [vmem:[#allocation2 + $0x20] sm:$0xff]  ;;  %v17453_v57 = vld [vmem:[#allocation12 + $0x28] sm:$0xff]   ;;  %v17454_v58 = vld [vmem:[#allocation12 + $0x58] sm:$0xff]   ;;  %p18072_p3 = por %p18071_p2, %p18070_p1 }
 0x106   :  { %v279_v12 = vld [vmem:[#allocation2 + $0x38] sm:$0xff]  ;;  %v17455_v59 = vld [vmem:[#allocation12 + $0x30] sm:$0xff]   ;;  %v17456_v60 = vld [vmem:[#allocation12 + $0x60] sm:$0xff]  }
 0x107   :  { %v17457_v61 = vld [vmem:[#allocation12 + $0x38] sm:$0xff]   ;;  %v17458_v62 = vld [vmem:[#allocation12 + $0x68] sm:$0xff]   ;;  %v17459_v63 = vld [vmem:[#allocation12 + $0x70] sm:$0xff]   ;;  %p18073_p4 = pnand %p18072_p3, %p18066_p0 }
 0x108   :  { %v17460_v0 = vld [vmem:[#allocation12 + $0x78] sm:$0xff]   ;;  %v18437_v1 = vld [vmem:[#allocation12 + $0x80] sm:$0xff]  }
 0x10a   :  { %v273_v13 = vld [vmem:[#allocation2 + $0x8] sm:$0xff] }
 0x10b   :  { %v274_v14 = vld [vmem:[#allocation2 + $0x10] sm:$0xff]  ;;  %v280_v15 = vpack.c.bf16 %v273_v13, %v272_v9  ;;  %v277_v17 = vld [vmem:[#allocation2 + $0x28] sm:$0xff] }
 0x10c   :  { %v281_v16 = vpack.c.bf16 %v275_v10, %v274_v14  ;;  %v278_v19 = vld [vmem:[#allocation2 + $0x30] sm:$0xff]  ;;  %v282_v20 = vpack.c.bf16 %v277_v17, %v276_v11 }
 0x10d   :  { %v289_v22 = vshrl.u32 %v280_v15, 16  ;;  %v291_v23 = vshll.u32 %v280_v15, 16  ;;  %v283_v26 = vpack.c.bf16 %v279_v12, %v278_v19  ;;  %v479_v29 = vrot.slane %v280_v15, 1 }
 0x10e   :  { %v296_v24 = vshll.u32 %v281_v16, 16  ;;  %v300_v25 = vshrl.u32 %v281_v16, 16  ;;  %v304_v27 = vshll.u32 %v282_v20, 16  ;;  %v308_v28 = vshrl.u32 %v282_v20, 16 }
 0x10f   :  { %v293_v30 = vrot.slane %v291_v23, 1  ;;  %v480_v32 = vrot.slane %v281_v16, 1  ;;  %v482_v33 = vrot.slane %v282_v20, 1  ;;  %v312_v35 = vshll.u32 %v283_v26, 16 }
 0x110   :  { %v298_v31 = vrot.slane %v296_v24, 1  ;;  %v306_v34 = vrot.slane %v304_v27, 1  ;;  %v316_v36 = vshrl.u32 %v283_v26, 16  ;;  %v484_v37 = vrot.slane %v283_v26, 1 }
 0x111   :  { %v294_v38 = vor.u32 %v293_v30, %v289_v22  ;;  %v314_v41 = vrot.slane %v312_v35, 1  ;;  %v481_v46 = vsel %vm478_vm3, %v479_v29, %v480_v32  ;;  %v483_v47 = vsel %vm478_vm3, %v480_v32, %v482_v33  ;;  %v15207_v30 = vld [vmem:[#allocation10 + $0x2] ss:$0 sm:$0xff] }
 0x112   :  { %v302_v39 = vor.u32 %v300_v25, %v298_v31  ;;  %v310_v40 = vor.u32 %v308_v28, %v306_v34  ;;  %v485_v48 = vsel %vm478_vm3, %v482_v33, %v484_v37  ;;  %v15206_v25 = vld [vmem:[#allocation10 + $0x1] ss:$0 sm:$0xff] }
 0x113   :  { %v299_v42 = vsel %vm287_vm2, %v294_v38, %v298_v31  ;;  %v318_v45 = vor.u32 %v316_v36, %v314_v41 }
 0x114   :  { %v307_v43 = vsel %vm287_vm2, %v302_v39, %v306_v34  ;;  %17121 = vmatprep.mubr.msk.bf16.mxu0 %vm228_vm0, %v299_v42  ;;  %v315_v44 = vsel %vm287_vm2, %v310_v40, %v314_v41 }
 0x115   :  { %17125 = vmatprep.mubr.msk.bf16.mxu1 %vm228_vm0, %v315_v44  ;;  %17122 = vmatmul.mubr.msk.bf16.vlgmr.msra.gmra.mrb[0].mxu0 %vm228_vm0, %v307_v43 }
 0x116   :  { %17126 = vmatmul.mubr.msk.bf16.vlgmr.msra.gmra.mrb[0].mxu1 %vm228_vm0, %v318_v45  ;;  %17140 = vmatpush3.bf16.msra.mxu0 %v499_v21 }
 0x117   :  { %17130 = vmatpush3.bf16.msra.mxu1 %v407_v18  ;;  %17131 = vmatprep.mubr.msk.bf16.mxu1 %vm228_vm0, %v280_v15 }
 0x118   :  { %17141 = vmatprep.mubr.msk.bf16.mxu0 %vm228_vm0, %v481_v46  ;;  %17173 = vmatprep.subr.bf16.mxu0 %v17445_v49 }
 0x119   :  { %17149 = vmatprep.subr.bf16.mxu1 %v17448_v52 }
 0x11d   :  { %17142 = vmatmul.mubr.msk.bf16.vlgmr.msra.gmra.mrb[4].mxu0 %vm228_vm0, %v483_v47 }
 0x11e   :  { %17132 = vmatmul.mubr.msk.bf16.vlgmr.msra.gmra.mrb[4].mxu1 %vm228_vm0, %v281_v16  ;;  %17145 = vmatprep.mubr.msk.bf16.mxu0 %vm228_vm0, %v485_v48  ;;  %v15205_v16 = vld [vmem:[#allocation10] ss:$0 sm:$0xff] }
 0x11f   :  { %17135 = vmatprep.mubr.msk.bf16.mxu1 %vm228_vm0, %v282_v20  ;;  %17174 = vmatpush3.bf16.msra.mxu0 %v17445_v49 }
 0x120   :  { %17175 = vmatprep.subr.bf16.mxu0 %v17446_v50  ;;  %17150 = vmatpush3.bf16.msra.mxu1 %v17448_v52 }
 0x121   :  { %17151 = vmatprep.subr.bf16.mxu1 %v17450_v54 }
 0x123   :  { %17176 = vmatpush3.bf16.msra.mxu0 %v17446_v50 }
 0x124   :  { %17177 = vmatprep.subr.bf16.mxu0 %v17447_v51  ;;  %17152 = vmatpush3.bf16.msra.mxu1 %v17450_v54 }
 0x125   :  { %17146 = vmatmul.mubr.msk.bf16.gmra.mrb[8].mxu0 %vm228_vm0, %v484_v37  ;;  %17153 = vmatprep.subr.bf16.mxu1 %v17452_v56 }
 0x126   :  { %17136 = vmatmul.mubr.msk.bf16.gmra.mrb[8].mxu1 %vm228_vm0, %v283_v26 }
 0x127   :  { %17178 = vmatpush3.bf16.msra.mxu0 %v17447_v51 }
 0x128   :  { %17179 = vmatprep.subr.bf16.mxu0 %v17449_v53  ;;  %17154 = vmatpush3.bf16.msra.mxu1 %v17452_v56 }
 0x129   :  { %17155 = vmatprep.subr.bf16.mxu1 %v17454_v58 }
 0x12b   :  { %17180 = vmatpush3.bf16.msra.mxu0 %v17449_v53 }
 0x12c   :  { %17181 = vmatprep.subr.bf16.mxu0 %v17451_v55  ;;  %17156 = vmatpush3.bf16.msra.mxu1 %v17454_v58 }
 0x12d   :  { %17157 = vmatprep.subr.bf16.mxu1 %v17456_v60 }
 0x12f   :  { %17182 = vmatpush3.bf16.msra.mxu0 %v17451_v55 }
 0x130   :  { %17183 = vmatprep.subr.bf16.mxu0 %v17453_v57  ;;  %17158 = vmatpush3.bf16.msra.mxu1 %v17456_v60 }
 0x131   :  { %17159 = vmatprep.subr.bf16.mxu1 %v17458_v62 }
 0x133   :  { %17184 = vmatpush3.bf16.msra.mxu0 %v17453_v57 }
 0x134   :  { %17185 = vmatprep.subr.bf16.mxu0 %v17455_v59  ;;  %17160 = vmatpush3.bf16.msra.mxu1 %v17458_v62 }
 0x135   :  { %17161 = vmatprep.subr.bf16.mxu1 %v17459_v63 }
 0x137   :  { %17186 = vmatpush3.bf16.msra.mxu0 %v17455_v59 }
 0x138   :  { %17187 = vmatprep.subr.bf16.mxu0 %v17457_v61  ;;  %17162 = vmatpush3.bf16.msra.mxu1 %v17459_v63 }
 0x139   :  { %17163 = vmatprep.subr.bf16.mxu1 %v17460_v0 }
 0x13b   :  { %17188 = vmatpush3.bf16.msra.mxu0 %v17457_v61 }
 0x13c   :  { %17164 = vmatpush3.bf16.msra.mxu1 %v17460_v0 }
 0x13d   :  { %17197 = vmatprep.subr.bf16.mxu1 %v18437_v1 }
 0x1e8   :  { %v17123_v2 = vpop.f32.mrb[0].mxu0 }
 0x1e9   :  { %v17127_v3 = vpop.f32.mrb[0].mxu1  ;;  %v369_v4 = vpop.f32.mrb[1].mxu0 }
 0x1ea   :  { %v384_v5 = vpop.f32.mrb[1].mxu1  ;;  %v17124_v6 = vpop.f32.mrb[2].mxu0 }
 0x1eb   :  { %v17128_v7 = vpop.f32.mrb[2].mxu1  ;;  %v372_v8 = vpop.f32.mrb[3].mxu0 }
 0x1ec   :  { %v387_v9 = vpop.f32.mrb[3].mxu1 }
 0x1f0   :  { %v17143_v10 = vpop.f32.mrb[4].mxu0 }
 0x1f1   :  { %v17133_v11 = vpop.f32.mrb[4].mxu1  ;;  %v535_v12 = vpop.f32.mrb[5].mxu0 }
 0x1f2   :  { %v452_v13 = vadd.f32 %v17133_v11, %v17123_v2  ;;  %v443_v14 = vpop.f32.mrb[5].mxu1  ;;  %v17144_v15 = vpop.f32.mrb[6].mxu0 }
 0x1f3   :  { %v444_v17 = vadd.f32 %v443_v14, %v369_v4  ;;  %v17134_v18 = vpop.f32.mrb[6].mxu1  ;;  %v538_v19 = vpop.f32.mrb[7].mxu0  ;;  %v18440_v4 = vld [vmem:[#allocation3] sm:$0xff] }
 0x1f4   :  { %v566_v20 = vadd.f32 %v17143_v10, %v452_v13  ;;  %v446_v21 = vpop.f32.mrb[7].mxu1 }
 0x1f5   :  { %v564_v22 = vadd.f32 %v535_v12, %v444_v17  ;;  %v447_v23 = vadd.f32 %v446_v21, %v372_v8 }
 0x1f6   :  { %v577_v24 = vadd.f32 %v15205_v16, %v566_v20 }
 0x1f7   :  { %v575_v26 = vadd.f32 %v15205_v16, %v564_v22  ;;  %v565_v27 = vadd.f32 %v538_v19, %v447_v23 }
 0x1f8   :  { %v583_v28 = vmax.f32 %v577_v24, 0.0  ;;  %v17147_v29 = vpop.f32.mrb[8].mxu0  ;;  %v17462_v24 = vld [vmem:[#allocation12 + $0x88] sm:$0xff]  }
 0x1f9   :  { %v581_v31 = vmax.f32 %v575_v26, 0.0  ;;  %v576_v32 = vadd.f32 %v15205_v16, %v565_v27  ;;  %v17137_v33 = vpop.f32.mrb[8].mxu1  ;;  %v550_v34 = vpop.f32.mrb[9].mxu0 }
 0x1fa   :  { %v594_v35 = vmul.f32 %v15206_v25, %v583_v28  ;;  %v467_v36 = vadd.f32 %v17137_v33, %v17127_v3  ;;  %v458_v37 = vpop.f32.mrb[9].mxu1  ;;  %v17148_v38 = vpop.f32.mrb[10].mxu0 }
 0x1fb   :  { %v592_v39 = vmul.f32 %v15206_v25, %v581_v31  ;;  %v582_v40 = vmax.f32 %v576_v32, 0.0  ;;  %v459_v41 = vadd.f32 %v458_v37, %v384_v5  ;;  %v17138_v42 = vpop.f32.mrb[10].mxu1  ;;  %v553_v43 = vpop.f32.mrb[11].mxu0  ;;  %v17467_v37 = vld [vmem:[#allocation12 + $0xb0] sm:$0xff]   ;;  %v17468_v38 = vld [vmem:[#allocation12 + $0xb8] sm:$0xff]  }
 0x1fc   :  { %v605_v44 = vadd.f32 %v15207_v30, %v594_v35  ;;  %v569_v45 = vadd.f32 %v17147_v29, %v467_v36  ;;  %v461_v46 = vpop.f32.mrb[11].mxu1  ;;  %v17463_v29 = vld [vmem:[#allocation12 + $0x90] sm:$0xff]   ;;  %v17465_v36 = vld [vmem:[#allocation12 + $0xa0] sm:$0xff]  }
 0x1fd   :  { %v603_v47 = vadd.f32 %v15207_v30, %v592_v39  ;;  %v593_v48 = vmul.f32 %v15206_v25, %v582_v40  ;;  %v567_v49 = vadd.f32 %v550_v34, %v459_v41  ;;  %v462_v50 = vadd.f32 %v461_v46, %v387_v9  ;;  %v17464_v34 = vld [vmem:[#allocation12 + $0x98] sm:$0xff]  }
 0x1fe   :  { %611 = vst [vmem:[#allocation3 + $0x11] sm:$0x7f] %v605_v44  ;;  %v580_v51 = vadd.f32 %v15205_v16, %v569_v45  ;;  %v17469_v44 = vld [vmem:[#allocation15 + $0x80] ss:$8 sps:$4 sm:$0xff]   ;;  %v17474_v45 = vld [vmem:[#allocation15 + $0x94] ss:$8 sps:$4 sm:$0xff]  }
 0x1ff   :  { %609 = vst [vmem:[#allocation3 + $0x1] sm:$0x80] %v603_v47  ;;  %v604_v52 = vadd.f32 %v15207_v30, %v593_v48  ;;  %v578_v53 = vadd.f32 %v15205_v16, %v567_v49  ;;  %v568_v54 = vadd.f32 %v553_v43, %v462_v50  ;;  %v17471_v43 = vld [vmem:[#allocation15 + $0x84] ss:$8 sps:$4 sm:$0xff]   ;;  %v17472_v46 = vld [vmem:[#allocation15 + $0x90] ss:$8 sps:$4 sm:$0xff]  }
 0x200   :  { %v586_v55 = vmax.f32 %v580_v51, 0.0  ;;  %1289 = vmatprep.subr.bf16.mxu0 %v17471_v43  ;;  %v17477_v47 = vld [vmem:[#allocation15 + $0xa4] ss:$8 sps:$4 sm:$0xff]   ;;  %v17475_v48 = vld [vmem:[#allocation15 + $0xa0] ss:$8 sps:$4 sm:$0xff]  }
 0x201   :  { %610 = vst [vmem:[#allocation3 + $0x9] sm:$0xff] %v604_v52  ;;  %v584_v56 = vmax.f32 %v578_v53, 0.0  ;;  %v579_v57 = vadd.f32 %v15205_v16, %v568_v54  ;;  %v17480_v49 = vld [vmem:[#allocation15 + $0xb4] ss:$8 sps:$4 sm:$0xff]   ;;  %v17478_v50 = vld [vmem:[#allocation15 + $0xb0] ss:$8 sps:$4 sm:$0xff]  }
 0x202   :  { %v597_v58 = vmul.f32 %v15206_v25, %v586_v55  ;;  %v17483_v51 = vld [vmem:[#allocation15 + $0xc4] ss:$8 sps:$4 sm:$0xff]   ;;  %v17481_v52 = vld [vmem:[#allocation15 + $0xc0] ss:$8 sps:$4 sm:$0xff]   ;;  %v17486_v53 = vld [vmem:[#allocation15 + $0xd4] ss:$8 sps:$4 sm:$0xff]  }
 0x203   :  { %v595_v59 = vmul.f32 %v15206_v25, %v584_v56  ;;  %v585_v60 = vmax.f32 %v579_v57, 0.0  ;;  %v17484_v54 = vld [vmem:[#allocation15 + $0xd0] ss:$8 sps:$4 sm:$0xff]   ;;  %v17489_v55 = vld [vmem:[#allocation15 + $0xe4] ss:$8 sps:$4 sm:$0xff]  }
 0x204   :  { %v608_v61 = vadd.f32 %v15207_v30, %v597_v58  ;;  %v17487_v56 = vld [vmem:[#allocation15 + $0xe0] ss:$8 sps:$4 sm:$0xff]   ;;  %v17492_v57 = vld [vmem:[#allocation15 + $0xf4] ss:$8 sps:$4 sm:$0xff]   ;;  %v17490_v58 = vld [vmem:[#allocation15 + $0xf0] ss:$8 sps:$4 sm:$0xff]  }
 0x205   :  { %v606_v62 = vadd.f32 %v15207_v30, %v595_v59  ;;  %v596_v63 = vmul.f32 %v15206_v25, %v585_v60  ;;  %v18126_v59 = vmov 0   ;;  %v17495_v60 = vld [vmem:[#allocation15 + $0x4] ss:$8 sps:$4 sm:$0xff]  }
 0x206   :  { %614 = vst [vmem:[#allocation3 + $0x31] sm:$0x7f] %v608_v61 }
 0x207   :  { %612 = vst [vmem:[#allocation3 + $0x21] sm:$0x80] %v606_v62  ;;  %v607_v0 = vadd.f32 %v15207_v30, %v596_v63 }
 0x208   :  { %v616_v2 = vld [vmem:[#allocation3 + $0x8] sm:$0xff]  ;;  %v617_v3 = vld [vmem:[#allocation3 + $0x10] sm:$0xff] }
 0x209   :  { %613 = vst [vmem:[#allocation3 + $0x29] sm:$0xff] %v607_v0  ;;  %v623_v5 = vpack.c.bf16 %v616_v2, %v18440_v4  ;;  %v624_v6 = vpack.c.bf16 %v18440_v4, %v617_v3 }
 0x20b   :  { %17189 = vmatprep.mubr.bf16.mxu0 %v623_v5  ;;  %v663_v7 = vshll.u32 %v623_v5, 16  ;;  %v668_v8 = vshll.u32 %v624_v6, 16  ;;  %v661_v9 = vshrl.u32 %v623_v5, 16  ;;  %v672_v18 = vshrl.u32 %v624_v6, 16 }
 0x20c   :  { %17190 = vmatmul.mubr.bf16.vlgmr.msra.gmra.mrb[12].mxu0 %v624_v6  ;;  %v938_v31 = vrot.slane %v623_v5, 1  ;;  %v939_v32 = vrot.slane %v624_v6, 1 }
 0x20d   :  { %v665_v10 = vrot.slane %v663_v7, 1  ;;  %v670_v12 = vrot.slane %v668_v8, 1  ;;  %1290 = vmatpush1.bf16.msra.mxu0 %v17469_v44 }
 0x20e   :  { %v940_v35 = vsel %vm478_vm3, %v938_v31, %v939_v32  ;;  %1291 = vmatprep.subr.bf16.mxu0 %v17474_v45 }
 0x20f   :  { %v666_v11 = vor.u32 %v665_v10, %v661_v9  ;;  %v674_v21 = vor.u32 %v672_v18, %v670_v12 }
 0x210   :  { %v620_v13 = vld [vmem:[#allocation3 + $0x28] sm:$0xff]  ;;  %v621_v14 = vld [vmem:[#allocation3 + $0x30] sm:$0xff] }
 0x211   :  { %v671_v15 = vsel %vm287_vm2, %v666_v11, %v670_v12  ;;  %v625_v16 = vpack.c.bf16 %v620_v13, %v18440_v4  ;;  %v626_v17 = vpack.c.bf16 %v18440_v4, %v621_v14  ;;  %1292 = vmatpush1.bf16.msra.mxu0 %v17472_v46 }
 0x212   :  { %17165 = vmatprep.mubr.bf16.mxu1 %v671_v15  ;;  %1293 = vmatprep.subr.bf16.mxu0 %v17477_v47 }
 0x213   :  { %17193 = vmatprep.mubr.bf16.mxu0 %v625_v16  ;;  %v676_v19 = vshll.u32 %v625_v16, 16  ;;  %v684_v20 = vshll.u32 %v626_v17, 16  ;;  %v680_v23 = vshrl.u32 %v625_v16, 16  ;;  %v688_v30 = vshrl.u32 %v626_v17, 16 }
 0x214   :  { %17194 = vmatmul.mubr.bf16.gmra.mrb[16].mxu0 %v626_v17  ;;  %v941_v39 = vrot.slane %v625_v16, 1  ;;  %v943_v40 = vrot.slane %v626_v17, 1 }
 0x215   :  { %v678_v22 = vrot.slane %v676_v19, 1  ;;  %v686_v27 = vrot.slane %v684_v20, 1  ;;  %1294 = vmatpush1.bf16.msra.mxu0 %v17475_v48  ;;  %1321 = vmatprep.mubr.bf16.mxu0 %v18126_v59 }
 0x216   :  { %v942_v41 = vsel %vm478_vm3, %v939_v32, %v941_v39  ;;  %v944_v42 = vsel %vm478_vm3, %v941_v39, %v943_v40  ;;  %1295 = vmatprep.subr.bf16.mxu0 %v17480_v49 }
 0x217   :  { %v679_v25 = vsel %vm287_vm2, %v674_v21, %v678_v22  ;;  %v682_v26 = vor.u32 %v680_v23, %v678_v22  ;;  %v690_v33 = vor.u32 %v688_v30, %v686_v27  ;;  %v15232_v22 = vld [vmem:[#allocation13] ss:$0 sm:$0xff] }
 0x218   :  { %17166 = vmatmul.mubr.bf16.vlgmr.msra.gmra.mrb[12].mxu1 %v679_v25 }
 0x219   :  { %17198 = vmatpush3.bf16.msra.mxu1 %v18437_v1  ;;  %v687_v28 = vsel %vm287_vm2, %v682_v26, %v686_v27  ;;  %v17466_v1 = vld [vmem:[#allocation12 + $0xa8] sm:$0xff]   ;;  %1296 = vmatpush1.bf16.msra.mxu0 %v17478_v50 }
 0x21a   :  { %17169 = vmatprep.mubr.bf16.mxu1 %v687_v28  ;;  %17199 = vmatprep.subr.bf16.mxu1 %v17462_v24 }
 0x21b   :  { %1297 = vmatprep.subr.bf16.mxu0 %v17483_v51 }
 0x21d   :  { %17200 = vmatpush3.bf16.msra.mxu1 %v17462_v24  ;;  %1298 = vmatpush1.bf16.msra.mxu0 %v17481_v52 }
 0x21e   :  { %17201 = vmatprep.subr.bf16.mxu1 %v17463_v29  ;;  %1299 = vmatprep.subr.bf16.mxu0 %v17486_v53 }
 0x220   :  { %17170 = vmatmul.mubr.bf16.gmra.mrb[16].mxu1 %v690_v33  ;;  %v15234_v33 = vld [vmem:[#allocation13 + $0x2] ss:$0 sm:$0xff] }
 0x221   :  { %17202 = vmatpush3.bf16.msra.mxu1 %v17463_v29  ;;  %17213 = vmatprep.mubr.bf16.mxu1 %v940_v35  ;;  %v15233_v29 = vld [vmem:[#allocation13 + $0x1] ss:$0 sm:$0xff] }
 0x222   :  { %17203 = vmatprep.subr.bf16.mxu1 %v17464_v34  ;;  %1300 = vmatpush1.bf16.msra.mxu0 %v17484_v54 }
 0x223   :  { %1301 = vmatprep.subr.bf16.mxu0 %v17489_v55 }
 0x225   :  { %17204 = vmatpush3.bf16.msra.mxu1 %v17464_v34 }
 0x226   :  { %17205 = vmatprep.subr.bf16.mxu1 %v17465_v36  ;;  %1302 = vmatpush1.bf16.msra.mxu0 %v17487_v56 }
 0x227   :  { %1303 = vmatprep.subr.bf16.mxu0 %v17492_v57 }
 0x229   :  { %17206 = vmatpush3.bf16.msra.mxu1 %v17465_v36 }
 0x22a   :  { %17207 = vmatprep.subr.bf16.mxu1 %v17466_v1  ;;  %1304 = vmatpush1.bf16.msra.mxu0 %v17490_v58 }
 0x22b   :  { %1428 = vmatprep.subr.bf16.mxu0 %v17495_v60 }
 0x22d   :  { %17208 = vmatpush3.bf16.msra.mxu1 %v17466_v1 }
 0x22e   :  { %17209 = vmatprep.subr.bf16.mxu1 %v17467_v37 }
 0x231   :  { %17210 = vmatpush3.bf16.msra.mxu1 %v17467_v37 }
 0x232   :  { %17211 = vmatprep.subr.bf16.mxu1 %v17468_v38 }
 0x235   :  { %17212 = vmatpush3.bf16.msra.mxu1 %v17468_v38 }
 0x238   :  { %17214 = vmatmul.mubr.bf16.vlgmr.msra.gmra.mrb[20].mxu1 %v942_v41 }
 0x239   :  { %17217 = vmatprep.mubr.bf16.mxu1 %v944_v42 }
 0x240   :  { %17218 = vmatmul.mubr.bf16.gmra.mrb[24].mxu1 %v943_v40 }
 0x2df   :  { %v17191_v61 = vpop.f32.mrb[12].mxu0 }
 0x2e0   :  { %v888_v62 = vpop.f32.mrb[13].mxu0 }
 0x2e1   :  { %v17192_v63 = vpop.f32.mrb[14].mxu0 }
 0x2e2   :  { %v891_v0 = vpop.f32.mrb[15].mxu0 }
 0x2e7   :  { %v17195_v2 = vpop.f32.mrb[16].mxu0 }
 0x2e8   :  { %v903_v3 = vpop.f32.mrb[17].mxu0 }
 0x2e9   :  { %v17196_v5 = vpop.f32.mrb[18].mxu0 }
 0x2ea   :  { %v906_v6 = vpop.f32.mrb[19].mxu0 }
 0x2eb   :  { %v17167_v7 = vpop.f32.mrb[12].mxu1 }
 0x2ec   :  { %v897_v8 = vadd.f32 %v17191_v61, %v17167_v7  ;;  %v777_v9 = vpop.f32.mrb[13].mxu1 }
 0x2ed   :  { %v889_v10 = vadd.f32 %v888_v62, %v777_v9  ;;  %v17168_v11 = vpop.f32.mrb[14].mxu1 }
 0x2ee   :  { %v780_v12 = vpop.f32.mrb[15].mxu1 }
 0x2ef   :  { %v892_v13 = vadd.f32 %v891_v0, %v780_v12  ;;  %v18456_v12 = vpack.c.bf16 %v18440_v4, %v18440_v4 }
 0x2f3   :  { %v17171_v14 = vpop.f32.mrb[16].mxu1 }
 0x2f4   :  { %v912_v15 = vadd.f32 %v17195_v2, %v17171_v14  ;;  %v792_v16 = vpop.f32.mrb[17].mxu1 }
 0x2f5   :  { %v904_v17 = vadd.f32 %v903_v3, %v792_v16  ;;  %v17172_v18 = vpop.f32.mrb[18].mxu1 }
 0x2f6   :  { %v795_v19 = vpop.f32.mrb[19].mxu1 }
 0x2f7   :  { %v907_v20 = vadd.f32 %v906_v6, %v795_v19 }
 0x30b   :  { %v17215_v21 = vpop.f32.mrb[20].mxu1 }
 0x30c   :  { %v1062_v23 = vadd.f32 %v17215_v21, %v897_v8  ;;  %v1031_v24 = vpop.f32.mrb[21].mxu1 }
 0x30d   :  { %v1060_v25 = vadd.f32 %v1031_v24, %v889_v10  ;;  %v17216_v26 = vpop.f32.mrb[22].mxu1 }
 0x30e   :  { %v1073_v27 = vadd.f32 %v15232_v22, %v1062_v23  ;;  %v1034_v28 = vpop.f32.mrb[23].mxu1  ;;  %v1195_v26 = vshrl.u32 %v18456_v12, 16 }
 0x30f   :  { %v1071_v30 = vadd.f32 %v15232_v22, %v1060_v25  ;;  %v1061_v31 = vadd.f32 %v1034_v28, %v892_v13 }
 0x310   :  { %v1079_v32 = vmax.f32 %v1073_v27, 0.0  ;;  %v17496_v27 = vld [vmem:[#allocation15 + $0x10] ss:$8 sps:$4 sm:$0xff]  }
 0x311   :  { %v1077_v34 = vmax.f32 %v1071_v30, 0.0  ;;  %v1072_v35 = vadd.f32 %v15232_v22, %v1061_v31 }
 0x312   :  { %v1090_v36 = vmul.f32 %v15233_v29, %v1079_v32  ;;  %v17499_v32 = vld [vmem:[#allocation15 + $0x20] ss:$8 sps:$4 sm:$0xff]  }
 0x313   :  { %v1078_v1 = vmax.f32 %v1072_v35, 0.0  ;;  %v17219_v37 = vpop.f32.mrb[24].mxu1  ;;  %v1088_v39 = vmul.f32 %v15233_v29, %v1077_v34  ;;  %v17502_v35 = vld [vmem:[#allocation15 + $0x30] ss:$8 sps:$4 sm:$0xff]  }
 0x314   :  { %v1101_v38 = vadd.f32 %v15234_v33, %v1090_v36  ;;  %v1065_v40 = vadd.f32 %v17219_v37, %v912_v15  ;;  %v1046_v41 = vpop.f32.mrb[25].mxu1  ;;  %v1191_v15 = vshll.u32 %v18456_v12, 16  ;;  %v17507_v36 = vld [vmem:[#allocation15 + $0x44] ss:$8 sps:$4 sm:$0xff]   ;;  %v17505_v37 = vld [vmem:[#allocation15 + $0x40] ss:$8 sps:$4 sm:$0xff]  }
 0x315   :  { %v1089_v42 = vmul.f32 %v15233_v29, %v1078_v1  ;;  %v1063_v43 = vadd.f32 %v1046_v41, %v904_v17  ;;  %v17220_v44 = vpop.f32.mrb[26].mxu1  ;;  %v1099_v52 = vadd.f32 %v15234_v33, %v1088_v39  ;;  %v17510_v39 = vld [vmem:[#allocation15 + $0x54] ss:$8 sps:$4 sm:$0xff]   ;;  %v17513_v41 = vld [vmem:[#allocation15 + $0x64] ss:$8 sps:$4 sm:$0xff]  }
 0x316   :  { %v1115_v45 = vrot.slane %v1101_v38, 1  ;;  %v1076_v46 = vadd.f32 %v15232_v22, %v1065_v40  ;;  %v1049_v47 = vpop.f32.mrb[27].mxu1  ;;  %v1193_v19 = vrot.slane %v1191_v15, 1  ;;  %v17508_v40 = vld [vmem:[#allocation15 + $0x50] ss:$8 sps:$4 sm:$0xff]  }
 0x317   :  { %v1100_v48 = vadd.f32 %v15234_v33, %v1089_v42  ;;  %v1074_v49 = vadd.f32 %v15232_v22, %v1063_v43  ;;  %v1064_v50 = vadd.f32 %v1049_v47, %v907_v20  ;;  %v17493_v20 = vld [vmem:[#allocation15] ss:$8 sps:$4 sm:$0xff]   ;;  %v17516_v43 = vld [vmem:[#allocation15 + $0x74] ss:$8 sps:$4 sm:$0xff]   ;;  %v17514_v44 = vld [vmem:[#allocation15 + $0x70] ss:$8 sps:$4 sm:$0xff]  }
 0x318   :  { %v1119_v51 = vmax.f32 %v1101_v38, %v1115_v45  ;;  %v1082_v53 = vmax.f32 %v1076_v46, 0.0  ;;  %v1197_v30 = vor.u32 %v1195_v26, %v1193_v19  ;;  %v17511_v42 = vld [vmem:[#allocation15 + $0x60] ss:$8 sps:$4 sm:$0xff]   ;;  %v17522_v47 = vld [vmem:[#allocation15 + $0x114] ss:$8 sps:$4 sm:$0xff]  }
 0x319   :  { %v1106_v54 = vrot.slane %v1100_v48, 1  ;;  %v1117_v55 = vmax.f32 %v1100_v48, %v1115_v45  ;;  %v1080_v56 = vmax.f32 %v1074_v49, 0.0  ;;  %v1075_v57 = vadd.f32 %v15232_v22, %v1064_v50  ;;  %v17498_v22 = vld [vmem:[#allocation15 + $0x14] ss:$8 sps:$4 sm:$0xff]   ;;  %v17519_v45 = vld [vmem:[#allocation15 + $0x104] ss:$8 sps:$4 sm:$0xff]  }
 0x31a   :  { %1120 = vst [vmem:[#allocation4 + $0xc] sm:$0x2] %v1119_v51  ;;  %1121 = vst [vmem:[#allocation4 + $0xb] sm:$0x8] %v1119_v51  ;;  %v1093_v58 = vmul.f32 %v15233_v29, %v1082_v53  ;;  %v17517_v46 = vld [vmem:[#allocation15 + $0x100] ss:$8 sps:$4 sm:$0xff]  }
 0x31b   :  { %1122 = vst [vmem:[#allocation4 + $0xa] sm:$0x20] %v1119_v51  ;;  %v1108_v60 = vmax.f32 %v1099_v52, %v1106_v54  ;;  %v1110_v61 = vmax.f32 %v1100_v48, %v1106_v54  ;;  %1118 = vst [vmem:[#allocation4 + $0x5] sm:$0x80] %v1117_v55  ;;  %v1081_v62 = vmax.f32 %v1075_v57, 0.0  ;;  %v1091_v0 = vmul.f32 %v15233_v29, %v1080_v56 }
 0x31c   :  { %v1104_v63 = vadd.f32 %v15234_v33, %v1093_v58  ;;  %v17520_v48 = vld [vmem:[#allocation15 + $0x110] ss:$8 sps:$4 sm:$0xff]   ;;  %v17525_v49 = vld [vmem:[#allocation15 + $0x124] ss:$8 sps:$4 sm:$0xff]   ;;  %v17523_v50 = vld [vmem:[#allocation15 + $0x120] ss:$8 sps:$4 sm:$0xff]  }
 0x31d   :  { %1109 = vst [vmem:[#allocation4 + $0x1] sm:$0x80] %v1108_v60  ;;  %1111 = vst [vmem:[#allocation4 + $0x8] sm:$0x2] %v1110_v61  ;;  %v1092_v2 = vmul.f32 %v15233_v29, %v1081_v62  ;;  %v1102_v7 = vadd.f32 %v15234_v33, %v1091_v0  ;;  %v17501_v29 = vld [vmem:[#allocation15 + $0x24] ss:$8 sps:$4 sm:$0xff]  }
 0x31e   :  { %1112 = vst [vmem:[#allocation4 + $0x7] sm:$0x8] %v1110_v61  ;;  %1113 = vst [vmem:[#allocation4 + $0x6] sm:$0x20] %v1110_v61  ;;  %v1133_v3 = vrot.slane %v1104_v63, 1 }
 0x31f   :  { %v1103_v5 = vadd.f32 %v15234_v33, %v1092_v2  ;;  %v17504_v33 = vld [vmem:[#allocation15 + $0x34] ss:$8 sps:$4 sm:$0xff]   ;;  %v17526_v52 = vld [vmem:[#allocation15 + $0x130] ss:$8 sps:$4 sm:$0xff]   ;;  %v17531_v53 = vld [vmem:[#allocation15 + $0x144] ss:$8 sps:$4 sm:$0xff]  }
 0x320   :  { %v1137_v6 = vmax.f32 %v1104_v63, %v1133_v3  ;;  %v17528_v51 = vld [vmem:[#allocation15 + $0x134] ss:$8 sps:$4 sm:$0xff]   ;;  %v17529_v54 = vld [vmem:[#allocation15 + $0x140] ss:$8 sps:$4 sm:$0xff]   ;;  %v17532_v56 = vld [vmem:[#allocation15 + $0x150] ss:$8 sps:$4 sm:$0xff]  }
 0x321   :  { %v1124_v8 = vrot.slane %v1103_v5, 1  ;;  %v1135_v9 = vmax.f32 %v1103_v5, %v1133_v3  ;;  %v17534_v55 = vld [vmem:[#allocation15 + $0x154] ss:$8 sps:$4 sm:$0xff]   ;;  %v17537_v57 = vld [vmem:[#allocation15 + $0x164] ss:$8 sps:$4 sm:$0xff]   ;;  %v1508_v63 = vrot.slane %v18456_v12, 1 }
 0x322   :  { %1138 = vst [vmem:[#allocation4 + $0x24] sm:$0x2] %v1137_v6  ;;  %1139 = vst [vmem:[#allocation4 + $0x23] sm:$0x8] %v1137_v6  ;;  %v17535_v58 = vld [vmem:[#allocation15 + $0x160] ss:$8 sps:$4 sm:$0xff]  }
 0x323   :  { %1140 = vst [vmem:[#allocation4 + $0x22] sm:$0x20] %v1137_v6  ;;  %v1126_v10 = vmax.f32 %v1102_v7, %v1124_v8  ;;  %v1128_v11 = vmax.f32 %v1103_v5, %v1124_v8  ;;  %1136 = vst [vmem:[#allocation4 + $0x1d] sm:$0x80] %v1135_v9  ;;  %v17540_v60 = vld [vmem:[#allocation15 + $0x174] ss:$8 sps:$4 sm:$0xff]  }
 0x324   :  { %v17538_v61 = vld [vmem:[#allocation15 + $0x170] ss:$8 sps:$4 sm:$0xff]   ;;  %v17543_v6 = vld [vmem:[#allocation18 + $0x104] ss:$8 sps:$4 sm:$0xff]   ;;  %v17546_v7 = vld [vmem:[#allocation18 + $0x114] ss:$8 sps:$4 sm:$0xff]  }
 0x325   :  { %v1142_v13 = vld [vmem:[#allocation4 + $0x8] sm:$0xff]  ;;  %1127 = vst [vmem:[#allocation4 + $0x19] sm:$0x80] %v1126_v10  ;;  %1129 = vst [vmem:[#allocation4 + $0x20] sm:$0x2] %v1128_v11  ;;  %2056 = vmatprep.subr.bf16.mxu1 %v17543_v6 }
 0x326   :  { %1130 = vst [vmem:[#allocation4 + $0x1f] sm:$0x8] %v1128_v11  ;;  %1131 = vst [vmem:[#allocation4 + $0x1e] sm:$0x20] %v1128_v11  ;;  %v18459_v14 = vpack.c.bf16 %v1142_v13, %v18440_v4  ;;  %v17541_v5 = vld [vmem:[#allocation18 + $0x100] ss:$8 sps:$4 sm:$0xff]  }
 0x327   :  { %2057 = vmatpush1.bf16.msra.mxu1 %v17541_v5  ;;  %v17544_v8 = vld [vmem:[#allocation18 + $0x110] ss:$8 sps:$4 sm:$0xff]   ;;  %v17549_v9 = vld [vmem:[#allocation18 + $0x124] ss:$8 sps:$4 sm:$0xff]   ;;  %v17547_v10 = vld [vmem:[#allocation18 + $0x120] ss:$8 sps:$4 sm:$0xff]  }
 0x328   :  { %v1186_v16 = vshll.u32 %v18459_v14, 16  ;;  %v1184_v17 = vshrl.u32 %v18459_v14, 16  ;;  %v1507_v62 = vrot.slane %v18459_v14, 1  ;;  %2058 = vmatprep.subr.bf16.mxu1 %v17546_v7  ;;  %v17552_v11 = vld [vmem:[#allocation18 + $0x134] ss:$8 sps:$4 sm:$0xff]  }
 0x329   :  { %v17555_v13 = vld [vmem:[#allocation18 + $0x144] ss:$8 sps:$4 sm:$0xff]   ;;  %v17558_v15 = vld [vmem:[#allocation18 + $0x154] ss:$8 sps:$4 sm:$0xff]   ;;  %v17571_v26 = vld [vmem:[#allocation18 + $0x1a0] ss:$8 sps:$4 sm:$0xff]  }
 0x32a   :  { %v1188_v18 = vrot.slane %v1186_v16, 1  ;;  %v1509_v0 = vsel %vm478_vm3, %v1507_v62, %v1508_v63  ;;  %v17556_v16 = vld [vmem:[#allocation18 + $0x150] ss:$8 sps:$4 sm:$0xff]  }
 0x32b   :  { %2059 = vmatpush1.bf16.msra.mxu1 %v17544_v8  ;;  %v1712_v5 = vld [vmem:[#allocation16 + $0x2] ss:$4 sm:$0x3] }
 0x32c   :  { %v1189_v21 = vor.u32 %v1188_v18, %v1184_v17  ;;  %2060 = vmatprep.subr.bf16.mxu1 %v17549_v9  ;;  %v17561_v17 = vld [vmem:[#allocation18 + $0x164] ss:$8 sps:$4 sm:$0xff]   ;;  %v17559_v18 = vld [vmem:[#allocation18 + $0x160] ss:$8 sps:$4 sm:$0xff]  }
 0x32d   :  { %v1145_v23 = vld [vmem:[#allocation4 + $0x20] sm:$0xff] }
 0x32e   :  { %v1194_v24 = vsel %vm287_vm2, %v1189_v21, %v1193_v19  ;;  %v18466_v25 = vpack.c.bf16 %v18440_v4, %v1145_v23  ;;  %v17564_v19 = vld [vmem:[#allocation18 + $0x174] ss:$8 sps:$4 sm:$0xff]   ;;  %v17567_v21 = vld [vmem:[#allocation18 + $0x184] ss:$8 sps:$4 sm:$0xff]  }
 0x32f   :  { %1322 = vmatmul.mubr.bf16.vlgmr.msra.gmra.mrb[20].mxu0 %v1194_v24  ;;  %2061 = vmatpush1.bf16.msra.mxu1 %v17547_v10  ;;  %v17570_v23 = vld [vmem:[#allocation18 + $0x194] ss:$8 sps:$4 sm:$0xff]   ;;  %v17568_v24 = vld [vmem:[#allocation18 + $0x190] ss:$8 sps:$4 sm:$0xff]  }
 0x330   :  { %1429 = vmatpush1.bf16.msra.mxu0 %v17493_v20  ;;  %1331 = vmatprep.mubr.bf16.mxu0 %v18126_v59  ;;  %v1199_v28 = vshll.u32 %v18466_v25, 16  ;;  %v1203_v1 = vshrl.u32 %v18466_v25, 16  ;;  %v1510_v2 = vrot.slane %v18466_v25, 1  ;;  %v17562_v20 = vld [vmem:[#allocation18 + $0x170] ss:$8 sps:$4 sm:$0xff]  }
 0x331   :  { %1430 = vmatprep.subr.bf16.mxu0 %v17498_v22  ;;  %2062 = vmatprep.subr.bf16.mxu1 %v17552_v11  ;;  %v17565_v22 = vld [vmem:[#allocation18 + $0x180] ss:$8 sps:$4 sm:$0xff]  }
 0x332   :  { %v1201_v31 = vrot.slane %v1199_v28, 1  ;;  %v1511_v3 = vsel %vm478_vm3, %v1508_v63, %v1510_v2  ;;  %v17574_v28 = vld [vmem:[#allocation18 + $0x1b0] ss:$8 sps:$4 sm:$0xff]  }
 0x334   :  { %1431 = vmatpush1.bf16.msra.mxu0 %v17496_v27  ;;  %v1202_v34 = vsel %vm287_vm2, %v1197_v30, %v1201_v31  ;;  %v1205_v38 = vor.u32 %v1203_v1, %v1201_v31  ;;  %v17576_v27 = vld [vmem:[#allocation18 + $0x1b4] ss:$8 sps:$4 sm:$0xff]   ;;  %v17577_v30 = vld [vmem:[#allocation18 + $0x1c0] ss:$8 sps:$4 sm:$0xff]   ;;  %v17591_v1 = vld [vmem:[#allocation18 + $0x4] ss:$8 sps:$4 sm:$0xff]  }
 0x335   :  { %1432 = vmatprep.subr.bf16.mxu0 %v17501_v29  ;;  %v17579_v29 = vld [vmem:[#allocation18 + $0x1c4] ss:$8 sps:$4 sm:$0xff]   ;;  %v17582_v31 = vld [vmem:[#allocation18 + $0x1d4] ss:$8 sps:$4 sm:$0xff]  }
 0x337   :  { %1332 = vmatmul.mubr.bf16.gmra.mrb[24].mxu0 %v1202_v34  ;;  %v17583_v34 = vld [vmem:[#allocation18 + $0x1e0] ss:$8 sps:$4 sm:$0xff]  }
 0x338   :  { %1433 = vmatpush1.bf16.msra.mxu0 %v17499_v32  ;;  %1339 = vmatprep.mubr.bf16.mxu0 %v18126_v59  ;;  %v17580_v32 = vld [vmem:[#allocation18 + $0x1d0] ss:$8 sps:$4 sm:$0xff]  }
 0x339   :  { %1434 = vmatprep.subr.bf16.mxu0 %v17504_v33  ;;  %v17585_v33 = vld [vmem:[#allocation18 + $0x1e4] ss:$8 sps:$4 sm:$0xff]  }
 0x33c   :  { %1435 = vmatpush1.bf16.msra.mxu0 %v17502_v35  ;;  %v17588_v35 = vld [vmem:[#allocation18 + $0x1f4] ss:$8 sps:$4 sm:$0xff]  }
 0x33d   :  { %1436 = vmatprep.subr.bf16.mxu0 %v17507_v36  ;;  %v17586_v36 = vld [vmem:[#allocation18 + $0x1f0] ss:$8 sps:$4 sm:$0xff]  }
 0x33f   :  { %1340 = vmatmul.mubr.bf16.gmra.mrb[28].mxu0 %v1205_v38 }
 0x340   :  { %1437 = vmatpush1.bf16.msra.mxu0 %v17505_v37  ;;  %1460 = vmatprep.mubr.bf16.mxu0 %v18126_v59 }
 0x341   :  { %1438 = vmatprep.subr.bf16.mxu0 %v17510_v39 }
 0x344   :  { %1439 = vmatpush1.bf16.msra.mxu0 %v17508_v40 }
 0x345   :  { %1440 = vmatprep.subr.bf16.mxu0 %v17513_v41 }
 0x348   :  { %1441 = vmatpush1.bf16.msra.mxu0 %v17511_v42 }
 0x349   :  { %1442 = vmatprep.subr.bf16.mxu0 %v17516_v43 }
 0x34c   :  { %1443 = vmatpush1.bf16.msra.mxu0 %v17514_v44 }
 0x34d   :  { %1595 = vmatprep.subr.bf16.mxu0 %v17519_v45 }
 0x34f   :  { %1461 = vmatmul.mubr.bf16.vlgmr.msra.gmra.mrb[20].mxu0 %v18459_v14  ;;  %v17553_v14 = vld [vmem:[#allocation18 + $0x140] ss:$8 sps:$4 sm:$0xff]  }
 0x350   :  { %1596 = vmatpush1.bf16.msra.mxu0 %v17517_v46  ;;  %1470 = vmatprep.mubr.bf16.mxu0 %v18126_v59 }
 0x351   :  { %1597 = vmatprep.subr.bf16.mxu0 %v17522_v47 }
 0x354   :  { %1598 = vmatpush1.bf16.msra.mxu0 %v17520_v48 }
 0x355   :  { %1599 = vmatprep.subr.bf16.mxu0 %v17525_v49 }
 0x357   :  { %1471 = vmatmul.mubr.bf16.gmra.mrb[32].mxu0 %v18456_v12  ;;  %v17550_v12 = vld [vmem:[#allocation18 + $0x130] ss:$8 sps:$4 sm:$0xff]  }
 0x358   :  { %1600 = vmatpush1.bf16.msra.mxu0 %v17523_v50  ;;  %1478 = vmatprep.mubr.bf16.mxu0 %v18126_v59 }
 0x359   :  { %1601 = vmatprep.subr.bf16.mxu0 %v17528_v51  ;;  %2063 = vmatpush1.bf16.msra.mxu1 %v17550_v12 }
 0x35a   :  { %2064 = vmatprep.subr.bf16.mxu1 %v17555_v13 }
 0x35c   :  { %1602 = vmatpush1.bf16.msra.mxu0 %v17526_v52 }
 0x35d   :  { %1603 = vmatprep.subr.bf16.mxu0 %v17531_v53  ;;  %2065 = vmatpush1.bf16.msra.mxu1 %v17553_v14 }
 0x35e   :  { %2066 = vmatprep.subr.bf16.mxu1 %v17558_v15 }
 0x35f   :  { %1479 = vmatmul.mubr.bf16.gmra.mrb[36].mxu0 %v18466_v25  ;;  %v17573_v25 = vld [vmem:[#allocation18 + $0x1a4] ss:$8 sps:$4 sm:$0xff]  }
 0x360   :  { %1604 = vmatpush1.bf16.msra.mxu0 %v17529_v54  ;;  %1627 = vmatprep.mubr.bf16.mxu0 %v18126_v59  ;;  %v1664_v54 = vlaneseq }
 0x361   :  { %1605 = vmatprep.subr.bf16.mxu0 %v17534_v55  ;;  %2067 = vmatpush1.bf16.msra.mxu1 %v17556_v16 }
 0x362   :  { %2068 = vmatprep.subr.bf16.mxu1 %v17561_v17  ;;  %vm18639_vm5 = vcmp.lt.s32.totalorder %v1664_v54, 256 }
 0x364   :  { %1606 = vmatpush1.bf16.msra.mxu0 %v17532_v56 }
 0x365   :  { %1607 = vmatprep.subr.bf16.mxu0 %v17537_v57  ;;  %2069 = vmatpush1.bf16.msra.mxu1 %v17559_v18 }
 0x366   :  { %2070 = vmatprep.subr.bf16.mxu1 %v17564_v19 }
 0x368   :  { %1608 = vmatpush1.bf16.msra.mxu0 %v17535_v58  ;;  %v18489_v58 = vshrl.u32 %v1664_v54, 7 }
 0x369   :  { %1609 = vmatprep.subr.bf16.mxu0 %v17540_v60  ;;  %2071 = vmatpush1.bf16.msra.mxu1 %v17562_v20 }
 0x36a   :  { %2072 = vmatprep.subr.bf16.mxu1 %v17567_v21  ;;  %v18492_v60 = vsub.s32 0, %v18489_v58  ;;  %v18495_v62 = vsub.s32 1, %v18489_v58 }
 0x36c   :  { %1610 = vmatpush1.bf16.msra.mxu0 %v17538_v61  ;;  %v1662_v61 = vld [vmem:[#allocation16] ss:$4 sm:$0x3]  ;;  %v18506_v13 = vrot.slane %v1712_v5, %v18492_v60  ;;  %v18509_v17 = vrot.slane %v1712_v5, %v18495_v62 }
 0x36d   :  { %2073 = vmatpush1.bf16.msra.mxu1 %v17565_v22  ;;  %v1667_v63 = vrot.slane %v1662_v61, %v18492_v60 }
 0x36e   :  { %2074 = vmatprep.subr.bf16.mxu1 %v17570_v23 }
 0x36f   :  { %1628 = vmatmul.mubr.bf16.vlgmr.msra.gmra.mrb[20].mxu0 %v1509_v0  ;;  %v1691_v0 = vld [vmem:[#allocation16 + $0x1] ss:$4 sm:$0x3] }
 0x370   :  { %1637 = vmatprep.mubr.bf16.mxu0 %v18126_v59  ;;  %v18500_v7 = vrot.slane %v1691_v0, %v18492_v60  ;;  %v18503_v10 = vrot.slane %v1691_v0, %v18495_v62 }
 0x371   :  { %2075 = vmatpush1.bf16.msra.mxu1 %v17568_v24 }
 0x372   :  { %2076 = vmatprep.subr.bf16.mxu1 %v17573_v25 }
 0x375   :  { %2077 = vmatpush1.bf16.msra.mxu1 %v17571_v26 }
 0x376   :  { %2078 = vmatprep.subr.bf16.mxu1 %v17576_v27 }
 0x377   :  { %1638 = vmatmul.mubr.bf16.gmra.mrb[40].mxu0 %v1511_v3 }
 0x378   :  { %1645 = vmatprep.mubr.bf16.mxu0 %v18126_v59 }
 0x379   :  { %2079 = vmatpush1.bf16.msra.mxu1 %v17574_v28 }
 0x37a   :  { %2080 = vmatprep.subr.bf16.mxu1 %v17579_v29 }
 0x37d   :  { %2081 = vmatpush1.bf16.msra.mxu1 %v17577_v30 }
 0x37e   :  { %2082 = vmatprep.subr.bf16.mxu1 %v17582_v31 }
 0x37f   :  { %1646 = vmatmul.mubr.bf16.gmra.mrb[44].mxu0 %v1510_v2  ;;  %v1671_v2 = vrot.slane %v1662_v61, %v18495_v62 }
 0x381   :  { %2083 = vmatpush1.bf16.msra.mxu1 %v17580_v32 }
 0x382   :  { %2084 = vmatprep.subr.bf16.mxu1 %v17585_v33 }
 0x385   :  { %2085 = vmatpush1.bf16.msra.mxu1 %v17583_v34 }
 0x386   :  { %2086 = vmatprep.subr.bf16.mxu1 %v17588_v35 }
 0x389   :  { %2087 = vmatpush1.bf16.msra.mxu1 %v17586_v36 }
 0x38a   :  { %2275 = vmatprep.subr.bf16.mxu1 %v17591_v1 }
 0x40a   :  { %v1333_v37 = vpop.f32.mrb[24].mxu0 }
 0x40b   :  { %v1334_v38 = vpop.f32.mrb[25].mxu0 }
 0x40c   :  { %v1335_v39 = vpop.f32.mrb[26].mxu0 }
 0x40d   :  { %v1337_v40 = vpop.f32.mrb[27].mxu0 }
 0x412   :  { %v1341_v41 = vpop.f32.mrb[28].mxu0 }
 0x413   :  { %v1343_v42 = vpop.f32.mrb[29].mxu0 }
 0x414   :  { %v1345_v43 = vpop.f32.mrb[30].mxu0 }
 0x415   :  { %v1346_v44 = vpop.f32.mrb[31].mxu0 }
 0x42a   :  { %v1472_v45 = vpop.f32.mrb[32].mxu0 }
 0x42b   :  { %v1473_v46 = vpop.f32.mrb[33].mxu0 }
 0x42c   :  { %v1474_v47 = vpop.f32.mrb[34].mxu0 }
 0x42d   :  { %v1475_v48 = vadd.f32 %v1474_v47, %v1335_v39  ;;  %v1476_v49 = vpop.f32.mrb[35].mxu0 }
 0x42e   :  { %v1477_v50 = vadd.f32 %v1476_v49, %v1337_v40 }
 0x432   :  { %v1480_v51 = vpop.f32.mrb[36].mxu0 }
 0x433   :  { %v1481_v52 = vadd.f32 %v1480_v51, %v1341_v41  ;;  %v1482_v53 = vpop.f32.mrb[37].mxu0 }
 0x434   :  { %v1483_v55 = vadd.f32 %v1482_v53, %v1343_v42  ;;  %v1484_v56 = vpop.f32.mrb[38].mxu0 }
 0x435   :  { %v1485_v57 = vpop.f32.mrb[39].mxu0  ;;  %v1854_v56 = vrot.slane %v18126_v59, 1 }
 0x442   :  { %v1629_v3 = vpop.f32.mrb[20].mxu0 }
 0x443   :  { %v1674_v6 = vadd.f32 %v1667_v63, %v1629_v3  ;;  %v1631_v8 = vpop.f32.mrb[21].mxu0 }
 0x444   :  { %v1675_v9 = vadd.f32 %v1671_v2, %v1631_v8  ;;  %v1633_v11 = vpop.f32.mrb[22].mxu0 }
 0x445   :  { %v1682_v12 = vmax.f32 %v1674_v6, 0.0  ;;  %v1676_v14 = vadd.f32 %v1667_v63, %v1633_v11  ;;  %v1635_v15 = vpop.f32.mrb[23].mxu0 }
 0x446   :  { %v1683_v16 = vmax.f32 %v1675_v9, 0.0  ;;  %v1677_v18 = vadd.f32 %v1671_v2, %v1635_v15  ;;  %v17589_v15 = vld [vmem:[#allocation18] ss:$8 sps:$4 sm:$0xff]  }
 0x447   :  { %v1703_v19 = vmul.f32 %v18500_v7, %v1682_v12  ;;  %v1684_v20 = vmax.f32 %v1676_v14, 0.0 }
 0x448   :  { %v1704_v21 = vmul.f32 %v18503_v10, %v1683_v16  ;;  %v1685_v22 = vmax.f32 %v1677_v18, 0.0 }
 0x449   :  { %v1724_v23 = vadd.f32 %v18506_v13, %v1703_v19  ;;  %v1705_v24 = vmul.f32 %v18500_v7, %v1684_v20  ;;  %v17594_v19 = vld [vmem:[#allocation18 + $0x14] ss:$8 sps:$4 sm:$0xff]  }
 0x44a   :  { %v1725_v25 = vadd.f32 %v18509_v17, %v1704_v21  ;;  %v1706_v26 = vmul.f32 %v18503_v10, %v1685_v22  ;;  %v1639_v27 = vpop.f32.mrb[40].mxu0 }
 0x44b   :  { %v1726_v28 = vadd.f32 %v18506_v13, %v1705_v24  ;;  %v1640_v29 = vpop.f32.mrb[41].mxu0  ;;  %v1737_v32 = vrot.slane %v1724_v23, 7  ;;  %v17592_v23 = vld [vmem:[#allocation18 + $0x10] ss:$8 sps:$4 sm:$0xff]  }
 0x44c   :  { %v1727_v30 = vadd.f32 %v18509_v17, %v1706_v26  ;;  %v1641_v31 = vpop.f32.mrb[42].mxu0  ;;  %v1740_v36 = vrot.slane %v1725_v25, 7 }
 0x44d   :  { %v1738_v33 = vrot.slane %v1726_v28, 7  ;;  %v1658_v34 = vadd.f32 %v1641_v31, %v1475_v48  ;;  %v1643_v35 = vpop.f32.mrb[43].mxu0 }
 0x44e   :  { %v1741_v1 = vrot.slane %v1727_v30, 7  ;;  %v1659_v37 = vadd.f32 %v1643_v35, %v1477_v50 }
 0x44f   :  { %v1739_v38 = vsel %vm1736_vm4, %v1737_v32, %v1738_v33  ;;  %v1678_v39 = vadd.f32 %v1667_v63, %v1658_v34  ;;  %v17598_v33 = vld [vmem:[#allocation18 + $0x30] ss:$8 sps:$4 sm:$0xff]  }
 0x450   :  { %v18521_v40 = vpack.c.bf16 %v1739_v38, %v18440_v4  ;;  %v1742_v41 = vsel %vm1736_vm4, %v1740_v36, %v1741_v1  ;;  %v1679_v42 = vadd.f32 %v1671_v2, %v1659_v37  ;;  %v17603_v1 = vld [vmem:[#allocation18 + $0x44] ss:$8 sps:$4 sm:$0xff]  }
 0x451   :  { %v18525_v43 = vpack.c.bf16 %v1742_v41, %v18440_v4  ;;  %v1686_v44 = vmax.f32 %v1678_v39, 0.0  ;;  %v17601_v39 = vld [vmem:[#allocation18 + $0x40] ss:$8 sps:$4 sm:$0xff]   ;;  %v17606_v41 = vld [vmem:[#allocation18 + $0x54] ss:$8 sps:$4 sm:$0xff]  }
 0x452   :  { %v1687_v45 = vmax.f32 %v1679_v42, 0.0  ;;  %v1647_v46 = vpop.f32.mrb[44].mxu0  ;;  %v1847_v47 = vshll.u32 %v18521_v40, 16  ;;  %v1845_v57 = vshrl.u32 %v18521_v40, 16  ;;  %v17604_v42 = vld [vmem:[#allocation18 + $0x50] ss:$8 sps:$4 sm:$0xff]  }
 0x453   :  { %v1660_v48 = vadd.f32 %v1647_v46, %v1481_v52  ;;  %v1649_v49 = vpop.f32.mrb[45].mxu0  ;;  %v1859_v50 = vshll.u32 %v18525_v43, 16  ;;  %v1707_v0 = vmul.f32 %v18500_v7, %v1686_v44  ;;  %v1857_v6 = vshrl.u32 %v18525_v43, 16 }
 0x454   :  { %v1661_v51 = vadd.f32 %v1649_v49, %v1483_v55  ;;  %v1651_v53 = vpop.f32.mrb[46].mxu0  ;;  %v1849_v61 = vrot.slane %v1847_v47, 1  ;;  %v1708_v9 = vmul.f32 %v18503_v10, %v1687_v45  ;;  %v17609_v45 = vld [vmem:[#allocation18 + $0x64] ss:$8 sps:$4 sm:$0xff]   ;;  %v17607_v47 = vld [vmem:[#allocation18 + $0x60] ss:$8 sps:$4 sm:$0xff]  }
 0x455   :  { %v1680_v3 = vadd.f32 %v1667_v63, %v1660_v48  ;;  %v1652_v5 = vpop.f32.mrb[47].mxu0  ;;  %v1861_v8 = vrot.slane %v1859_v50, 1  ;;  %v1728_v59 = vadd.f32 %v18506_v13, %v1707_v0  ;;  %v17612_v48 = vld [vmem:[#allocation18 + $0x74] ss:$8 sps:$4 sm:$0xff]   ;;  %v17610_v49 = vld [vmem:[#allocation18 + $0x70] ss:$8 sps:$4 sm:$0xff]  }
 0x456   :  { %v1681_v52 = vadd.f32 %v1671_v2, %v1661_v51  ;;  %v1850_v11 = vor.u32 %v1849_v61, %v1845_v57  ;;  %v1729_v63 = vadd.f32 %v18509_v17, %v1708_v9  ;;  %v17615_v50 = vld [vmem:[#allocation18 + $0x84] ss:$8 sps:$4 sm:$0xff]   ;;  %v17613_v51 = vld [vmem:[#allocation18 + $0x80] ss:$8 sps:$4 sm:$0xff]   ;;  %v17618_v53 = vld [vmem:[#allocation18 + $0x94] ss:$8 sps:$4 sm:$0xff]  }
 0x457   :  { %v1688_v12 = vmax.f32 %v1680_v3, 0.0  ;;  %v1862_v14 = vor.u32 %v1861_v8, %v1857_v6  ;;  %v1751_v24 = vrot.slane %v1728_v59, 7  ;;  %v17621_v57 = vld [vmem:[#allocation18 + $0xa4] ss:$8 sps:$4 sm:$0xff]   ;;  %v17619_v61 = vld [vmem:[#allocation18 + $0xa0] ss:$8 sps:$4 sm:$0xff]  }
 0x458   :  { %v1689_v55 = vmax.f32 %v1681_v52, 0.0  ;;  %v1855_v21 = vsel %vm287_vm2, %v1850_v11, %v1854_v56  ;;  %v1754_v26 = vrot.slane %v1729_v63, 7  ;;  %v17624_v0 = vld [vmem:[#allocation18 + $0xb4] ss:$8 sps:$4 sm:$0xff]   ;;  %v17622_v3 = vld [vmem:[#allocation18 + $0xb0] ss:$8 sps:$4 sm:$0xff]  }
 0x459   :  { %v1709_v16 = vmul.f32 %v18500_v7, %v1688_v12  ;;  %v1867_v18 = vsel %vm287_vm2, %v1862_v14, %v1854_v56  ;;  %v17597_v7 = vld [vmem:[#allocation18 + $0x24] ss:$8 sps:$4 sm:$0xff]   ;;  %v17625_v6 = vld [vmem:[#allocation18 + $0xc0] ss:$8 sps:$4 sm:$0xff]   ;;  %v17630_v8 = vld [vmem:[#allocation18 + $0xd4] ss:$8 sps:$4 sm:$0xff]  }
 0x45a   :  { %v1710_v20 = vmul.f32 %v18503_v10, %v1689_v55  ;;  %2088 = vmatprep.mubr.bf16.mxu1 %v1867_v18  ;;  %v17627_v5 = vld [vmem:[#allocation18 + $0xc4] ss:$8 sps:$4 sm:$0xff]   ;;  %v17628_v9 = vld [vmem:[#allocation18 + $0xd0] ss:$8 sps:$4 sm:$0xff]   ;;  %v17631_v11 = vld [vmem:[#allocation18 + $0xe0] ss:$8 sps:$4 sm:$0xff]  }
 0x45b   :  { %v1730_v2 = vadd.f32 %v18506_v13, %v1709_v16  ;;  %2089 = vmatmul.mubr.bf16.vlgmr.msra.gmra.mrb[28].mxu1 %v1855_v21  ;;  %v17595_v13 = vld [vmem:[#allocation18 + $0x20] ss:$8 sps:$4 sm:$0xff]   ;;  %v17633_v52 = vld [vmem:[#allocation18 + $0xe4] ss:$8 sps:$4 sm:$0xff]   ;;  %v17636_v12 = vld [vmem:[#allocation18 + $0xf4] ss:$8 sps:$4 sm:$0xff]  }
 0x45c   :  { %v1731_v22 = vadd.f32 %v18509_v17, %v1710_v20  ;;  %2276 = vmatpush1.bf16.msra.mxu1 %v17589_v15  ;;  %v17600_v17 = vld [vmem:[#allocation18 + $0x34] ss:$8 sps:$4 sm:$0xff]   ;;  %v17634_v14 = vld [vmem:[#allocation18 + $0xf0] ss:$8 sps:$4 sm:$0xff]   ;;  %v17639_v55 = vld [vmem:[#allocation18 + $0x204] ss:$8 sps:$4 sm:$0xff]  }
 0x45d   :  { %v1752_v25 = vrot.slane %v1730_v2, 7  ;;  %2277 = vmatprep.subr.bf16.mxu1 %v17594_v19  ;;  %v17637_v15 = vld [vmem:[#allocation18 + $0x200] ss:$8 sps:$4 sm:$0xff]   ;;  %v17642_v59 = vld [vmem:[#allocation18 + $0x214] ss:$8 sps:$4 sm:$0xff]   ;;  %v18127_v18 = vmov 0.0|0.0  }
 0x45e   :  { %v1755_v27 = vrot.slane %v1731_v22, 7  ;;  %v17640_v16 = vld [vmem:[#allocation18 + $0x210] ss:$8 sps:$4 sm:$0xff]   ;;  %v17645_v19 = vld [vmem:[#allocation18 + $0x224] ss:$8 sps:$4 sm:$0xff]   ;;  %v2374_v22 = vrot.slane %v18127_v18, 1 }
 0x45f   :  { %v1753_v28 = vsel %vm1736_vm4, %v1751_v24, %v1752_v25  ;;  %v17643_v63 = vld [vmem:[#allocation18 + $0x220] ss:$8 sps:$4 sm:$0xff]   ;;  %v17648_v20 = vld [vmem:[#allocation18 + $0x234] ss:$8 sps:$4 sm:$0xff]   ;;  %v17646_v21 = vld [vmem:[#allocation18 + $0x230] ss:$8 sps:$4 sm:$0xff]  }
 0x460   :  { %v18544_v10 = vpack.c.bf16 %v18440_v4, %v1753_v28  ;;  %v1756_v29 = vsel %vm1736_vm4, %v1754_v26, %v1755_v27  ;;  %2278 = vmatpush1.bf16.msra.mxu1 %v17592_v23  ;;  %v17651_v2 = vld [vmem:[#allocation18 + $0x244] ss:$8 sps:$4 sm:$0xff]   ;;  %v2376_v23 = vrot.slane %v18525_v43, 1  ;;  %v17649_v24 = vld [vmem:[#allocation18 + $0x240] ss:$8 sps:$4 sm:$0xff]  }
 0x461   :  { %v18548_v30 = vpack.c.bf16 %v18440_v4, %v1756_v29  ;;  %2279 = vmatprep.subr.bf16.mxu1 %v17597_v7  ;;  %v17654_v25 = vld [vmem:[#allocation18 + $0x254] ss:$8 sps:$4 sm:$0xff]   ;;  %v17652_v26 = vld [vmem:[#allocation18 + $0x250] ss:$8 sps:$4 sm:$0xff]   ;;  %v17657_v27 = vld [vmem:[#allocation18 + $0x264] ss:$8 sps:$4 sm:$0xff]  }
 0x462   :  { %v1872_v31 = vshll.u32 %v18544_v10, 16  ;;  %v1884_v44 = vshrl.u32 %v18544_v10, 16  ;;  %v2378_v7 = vsel %vm478_vm3, %v2376_v23, %v2374_v22  ;;  %v17655_v28 = vld [vmem:[#allocation18 + $0x260] ss:$8 sps:$4 sm:$0xff]   ;;  %v17660_v29 = vld [vmem:[#allocation18 + $0x274] ss:$8 sps:$4 sm:$0xff]  }
 0x463   :  { %v1880_v32 = vshll.u32 %v18548_v30, 16  ;;  %v1887_v36 = vshrl.u32 %v18548_v30, 16 }
 0x464   :  { %2280 = vmatpush1.bf16.msra.mxu1 %v17595_v13  ;;  %v1874_v34 = vrot.slane %v1872_v31, 1  ;;  %v17658_v13 = vld [vmem:[#allocation18 + $0x270] ss:$8 sps:$4 sm:$0xff]   ;;  %v17666_v31 = vld [vmem:[#allocation18 + $0x294] ss:$8 sps:$4 sm:$0xff]  }
 0x465   :  { %2281 = vmatprep.subr.bf16.mxu1 %v17600_v17  ;;  %v1882_v35 = vrot.slane %v1880_v32, 1  ;;  %v17661_v17 = vld [vmem:[#allocation18 + $0x280] ss:$8 sps:$4 sm:$0xff]   ;;  %v17664_v32 = vld [vmem:[#allocation18 + $0x290] ss:$8 sps:$4 sm:$0xff]  }
 0x466   :  { %v1875_v4 = vsel %vm287_vm2, %v1854_v56, %v1874_v34  ;;  %v1886_v46 = vor.u32 %v1884_v44, %v1874_v34  ;;  %v17667_v34 = vld [vmem:[#allocation18 + $0x2a0] ss:$8 sps:$4 sm:$0xff]   ;;  %v17682_v44 = vld [vmem:[#allocation18 + $0x2f0] ss:$8 sps:$4 sm:$0xff]  }
 0x467   :  { %v1883_v37 = vsel %vm287_vm2, %v1854_v56, %v1882_v35  ;;  %v1889_v38 = vor.u32 %v1887_v36, %v1882_v35  ;;  %v17616_v56 = vld [vmem:[#allocation18 + $0x90] ss:$8 sps:$4 sm:$0xff]   ;;  %v17672_v35 = vld [vmem:[#allocation18 + $0x2b4] ss:$8 sps:$4 sm:$0xff]  }
 0x468   :  { %2282 = vmatpush1.bf16.msra.mxu1 %v17598_v33  ;;  %2098 = vmatprep.mubr.bf16.mxu1 %v1883_v37  ;;  %v17669_v33 = vld [vmem:[#allocation18 + $0x2a4] ss:$8 sps:$4 sm:$0xff]   ;;  %v17670_v36 = vld [vmem:[#allocation18 + $0x2b0] ss:$8 sps:$4 sm:$0xff]   ;;  %v17673_v37 = vld [vmem:[#allocation18 + $0x2c0] ss:$8 sps:$4 sm:$0xff]  }
 0x469   :  { %2099 = vmatmul.mubr.bf16.gmra.mrb[32].mxu1 %v1875_v4  ;;  %2283 = vmatprep.subr.bf16.mxu1 %v17603_v1  ;;  %v17675_v1 = vld [vmem:[#allocation18 + $0x2c4] ss:$8 sps:$4 sm:$0xff]   ;;  %v17676_v4 = vld [vmem:[#allocation18 + $0x2d0] ss:$8 sps:$4 sm:$0xff]  }
 0x46a   :  { %2106 = vmatprep.mubr.bf16.mxu1 %v1889_v38  ;;  %v17678_v38 = vld [vmem:[#allocation18 + $0x2d4] ss:$8 sps:$4 sm:$0xff]  }
 0x46c   :  { %2284 = vmatpush1.bf16.msra.mxu1 %v17601_v39  ;;  %v17681_v39 = vld [vmem:[#allocation18 + $0x2e4] ss:$8 sps:$4 sm:$0xff]  }
 0x46d   :  { %2285 = vmatprep.subr.bf16.mxu1 %v17606_v41  ;;  %v17679_v41 = vld [vmem:[#allocation18 + $0x2e0] ss:$8 sps:$4 sm:$0xff]  }
 0x470   :  { %2286 = vmatpush1.bf16.msra.mxu1 %v17604_v42  ;;  %v17684_v42 = vld [vmem:[#allocation18 + $0x2f4] ss:$8 sps:$4 sm:$0xff]  }
 0x471   :  { %2107 = vmatmul.mubr.bf16.gmra.mrb[36].mxu1 %v1886_v46  ;;  %2287 = vmatprep.subr.bf16.mxu1 %v17609_v45  ;;  %v2373_v45 = vrot.slane %v18521_v40, 1  ;;  %v2381_v46 = vrot.slane %v18548_v30, 1 }
 0x472   :  { %2307 = vmatprep.mubr.bf16.mxu1 %v18525_v43  ;;  %v17663_v43 = vld [vmem:[#allocation18 + $0x284] ss:$8 sps:$4 sm:$0xff]  }
 0x474   :  { %2288 = vmatpush1.bf16.msra.mxu1 %v17607_v47  ;;  %v2375_v47 = vsel %vm478_vm3, %v2373_v45, %v2374_v22 }
 0x475   :  { %2289 = vmatprep.subr.bf16.mxu1 %v17612_v48  ;;  %v2382_v48 = vsel %vm478_vm3, %v2374_v22, %v2381_v46 }
 0x478   :  { %2290 = vmatpush1.bf16.msra.mxu1 %v17610_v49  ;;  %v2379_v49 = vrot.slane %v18544_v10, 1 }
 0x479   :  { %2291 = vmatprep.subr.bf16.mxu1 %v17615_v50 }
 0x47a   :  { %v2380_v50 = vsel %vm478_vm3, %v2374_v22, %v2379_v49 }
 0x47c   :  { %2292 = vmatpush1.bf16.msra.mxu1 %v17613_v51  ;;  %v2985_v51 = vld [vmem:[#allocation21] sm:$0xff] }
 0x47d   :  { %2293 = vmatprep.subr.bf16.mxu1 %v17618_v53  ;;  %v2989_v53 = vld [vmem:[#allocation21 + $0x20] sm:$0xff] }
 0x480   :  { %2294 = vmatpush1.bf16.msra.mxu1 %v17616_v56  ;;  %v2986_v56 = vld [vmem:[#allocation21 + $0x8] sm:$0xff] }
 0x481   :  { %2295 = vmatprep.subr.bf16.mxu1 %v17621_v57  ;;  %v15380_v57 = vcombine.high %v2985_v51, %v2989_v53 }
 0x483   :  { %9171 = vmatprep.subr.bf16.mxu0 %v15380_v57 }
 0x484   :  { %2296 = vmatpush1.bf16.msra.mxu1 %v17619_v61  ;;  %v2993_v61 = vld [vmem:[#allocation21 + $0x40] sm:$0xff] }
 0x485   :  { %2297 = vmatprep.subr.bf16.mxu1 %v17624_v0  ;;  %v2997_v0 = vld [vmem:[#allocation21 + $0x60] sm:$0xff] }
 0x488   :  { %2298 = vmatpush1.bf16.msra.mxu1 %v17622_v3 }
 0x489   :  { %2299 = vmatprep.subr.bf16.mxu1 %v17627_v5 }
 0x48c   :  { %2300 = vmatpush1.bf16.msra.mxu1 %v17625_v6  ;;  %v15388_v6 = vcombine.high %v2993_v61, %v2997_v0 }
 0x48d   :  { %2301 = vmatprep.subr.bf16.mxu1 %v17630_v8  ;;  %v2994_v8 = vld [vmem:[#allocation21 + $0x48] sm:$0xff] }
 0x490   :  { %2302 = vmatpush1.bf16.msra.mxu1 %v17628_v9  ;;  %v2998_v9 = vld [vmem:[#allocation21 + $0x68] sm:$0xff] }
 0x491   :  { %2303 = vmatprep.subr.bf16.mxu1 %v17633_v52  ;;  %v3001_v52 = vld [vmem:[#allocation21 + $0x80] sm:$0xff] }
 0x494   :  { %2304 = vmatpush1.bf16.msra.mxu1 %v17631_v11  ;;  %v3005_v11 = vld [vmem:[#allocation21 + $0xa0] sm:$0xff] }
 0x495   :  { %2305 = vmatprep.subr.bf16.mxu1 %v17636_v12  ;;  %v3002_v12 = vld [vmem:[#allocation21 + $0x88] sm:$0xff] }
 0x498   :  { %2306 = vmatpush1.bf16.msra.mxu1 %v17634_v14  ;;  %v3006_v14 = vld [vmem:[#allocation21 + $0xa8] sm:$0xff] }
 0x499   :  { %2549 = vmatprep.subr.bf16.mxu1 %v17639_v55  ;;  %v15387_v55 = vcombine.low %v2993_v61, %v2997_v0  ;;  %v3053_v61 = vld [vmem:[#allocation21 + $0x220] sm:$0xff]  ;;  %v3050_v0 = vld [vmem:[#allocation21 + $0x208] sm:$0xff] }
 0x49b   :  { %2308 = vmatmul.mubr.bf16.vlgmr.msra.gmra.mrb[28].mxu1 %v18521_v40  ;;  %v15379_v40 = vcombine.low %v2985_v51, %v2989_v53  ;;  %v3046_v51 = vld [vmem:[#allocation21 + $0x1e8] sm:$0xff] }
 0x49c   :  { %2550 = vmatpush1.bf16.msra.mxu1 %v17637_v15  ;;  %2317 = vmatprep.mubr.bf16.mxu1 %v18127_v18  ;;  %v15389_v15 = vcombine.low %v2994_v8, %v2998_v9 }
 0x49d   :  { %2551 = vmatprep.subr.bf16.mxu1 %v17642_v59  ;;  %9172 = vmatpush1.bf16.msra.mxu0 %v15379_v40  ;;  %v15396_v59 = vcombine.high %v3001_v52, %v3005_v11 }
 0x49e   :  { %9173 = vmatprep.subr.bf16.mxu0 %v15388_v6  ;;  %v3054_v6 = vld [vmem:[#allocation21 + $0x228] sm:$0xff] }
 0x4a0   :  { %2552 = vmatpush1.bf16.msra.mxu1 %v17640_v16  ;;  %v15398_v16 = vcombine.high %v3002_v12, %v3006_v14 }
 0x4a1   :  { %2553 = vmatprep.subr.bf16.mxu1 %v17645_v19  ;;  %v3013_v19 = vld [vmem:[#allocation21 + $0xe0] sm:$0xff]  ;;  %9174 = vmatpush1.bf16.msra.mxu0 %v15387_v55  ;;  %v3058_v55 = vld [vmem:[#allocation21 + $0x248] sm:$0xff] }
 0x4a2   :  { %9175 = vmatprep.subr.bf16.mxu0 %v15396_v59  ;;  %v3062_v59 = vld [vmem:[#allocation21 + $0x268] sm:$0xff] }
 0x4a3   :  { %2318 = vmatmul.mubr.bf16.gmra.mrb[40].mxu1 %v18127_v18  ;;  %v3009_v18 = vld [vmem:[#allocation21 + $0xc0] sm:$0xff] }
 0x4a4   :  { %2325 = vmatprep.mubr.bf16.mxu1 %v18548_v30  ;;  %2554 = vmatpush1.bf16.msra.mxu1 %v17643_v63  ;;  %v2990_v30 = vld [vmem:[#allocation21 + $0x28] sm:$0xff]  ;;  %v15404_v22 = vcombine.high %v3009_v18, %v3013_v19 }
 0x4a5   :  { %2555 = vmatprep.subr.bf16.mxu1 %v17648_v20  ;;  %v15381_v3 = vcombine.low %v2986_v56, %v2990_v30  ;;  %v15382_v5 = vcombine.high %v2986_v56, %v2990_v30  ;;  %v3010_v63 = vld [vmem:[#allocation21 + $0xc8] sm:$0xff]  ;;  %v3049_v30 = vld [vmem:[#allocation21 + $0x200] sm:$0xff] }
 0x4a6   :  { %v3014_v20 = vld [vmem:[#allocation21 + $0xe8] sm:$0xff] }
 0x4a7   :  { %v15406_v23 = vcombine.high %v3010_v63, %v3014_v20 }
 0x4a8   :  { %2556 = vmatpush1.bf16.msra.mxu1 %v17646_v21  ;;  %v15395_v21 = vcombine.low %v3001_v52, %v3005_v11  ;;  %v15445_v52 = vcombine.low %v3050_v0, %v3054_v6 }
 0x4a9   :  { %2557 = vmatprep.subr.bf16.mxu1 %v17651_v2  ;;  %v15397_v2 = vcombine.low %v3002_v12, %v3006_v14  ;;  %v3057_v12 = vld [vmem:[#allocation21 + $0x240] sm:$0xff] }
 0x4aa   :  { %9176 = vmatpush1.bf16.msra.mxu0 %v15395_v21  ;;  %v3061_v14 = vld [vmem:[#allocation21 + $0x260] sm:$0xff] }
 0x4ab   :  { %2326 = vmatmul.mubr.bf16.gmra.mrb[44].mxu1 %v18544_v10  ;;  %v15390_v10 = vcombine.high %v2994_v8, %v2998_v9  ;;  %9177 = vmatprep.subr.bf16.mxu0 %v15404_v22  ;;  %v15443_v9 = vcombine.low %v3049_v30, %v3053_v61  ;;  %v3065_v21 = vld [vmem:[#allocation21 + $0x280] sm:$0xff]  ;;  %v3066_v22 = vld [vmem:[#allocation21 + $0x288] sm:$0xff] }
 0x4ac   :  { %2558 = vmatpush1.bf16.msra.mxu1 %v17649_v24  ;;  %2581 = vmatprep.mubr.bf16.mxu1 %v2378_v7  ;;  %v15403_v24 = vcombine.low %v3009_v18, %v3013_v19  ;;  %v3017_v7 = vld [vmem:[#allocation21 + $0x100] sm:$0xff]  ;;  %v15453_v18 = vcombine.low %v3058_v55, %v3062_v59  ;;  %v15454_v19 = vcombine.high %v3058_v55, %v3062_v59  ;;  %v18580_v59 = vld [vmem:[#allocation21 + $0x408] sm:$0xff] }
 0x4ad   :  { %2559 = vmatprep.subr.bf16.mxu1 %v17654_v25  ;;  %v15405_v25 = vcombine.low %v3010_v63, %v3014_v20  ;;  %v18576_v55 = vld [vmem:[#allocation21 + $0x400] sm:$0xff] }
 0x4ae   :  { %9178 = vmatpush1.bf16.msra.mxu0 %v15403_v24 }
 0x4b0   :  { %2560 = vmatpush1.bf16.msra.mxu1 %v17652_v26  ;;  %v3021_v26 = vld [vmem:[#allocation21 + $0x120] sm:$0xff] }
 0x4b1   :  { %2561 = vmatprep.subr.bf16.mxu1 %v17657_v27  ;;  %v3018_v27 = vld [vmem:[#allocation21 + $0x108] sm:$0xff] }
 0x4b4   :  { %2562 = vmatpush1.bf16.msra.mxu1 %v17655_v28  ;;  %v15412_v28 = vcombine.high %v3017_v7, %v3021_v26 }
 0x4b5   :  { %2563 = vmatprep.subr.bf16.mxu1 %v17660_v29  ;;  %v3022_v29 = vld [vmem:[#allocation21 + $0x128] sm:$0xff] }
 0x4b6   :  { %9179 = vmatprep.subr.bf16.mxu0 %v15412_v28 }
 0x4b8   :  { %2564 = vmatpush1.bf16.msra.mxu1 %v17658_v13  ;;  %v15411_v13 = vcombine.low %v3017_v7, %v3021_v26 }
 0x4b9   :  { %2565 = vmatprep.subr.bf16.mxu1 %v17663_v43  ;;  %v15413_v43 = vcombine.low %v3018_v27, %v3022_v29 }
 0x4ba   :  { %9180 = vmatpush1.bf16.msra.mxu0 %v15411_v13  ;;  %v3077_v13 = vld [vmem:[#allocation21 + $0x2e0] sm:$0xff] }
 0x4bc   :  { %2566 = vmatpush1.bf16.msra.mxu1 %v17661_v17  ;;  %v15414_v17 = vcombine.high %v3018_v27, %v3022_v29  ;;  %v3073_v29 = vld [vmem:[#allocation21 + $0x2c0] sm:$0xff] }
 0x4bd   :  { %2567 = vmatprep.subr.bf16.mxu1 %v17666_v31  ;;  %v3025_v31 = vld [vmem:[#allocation21 + $0x140] sm:$0xff] }
 0x4c0   :  { %2568 = vmatpush1.bf16.msra.mxu1 %v17664_v32  ;;  %v3029_v32 = vld [vmem:[#allocation21 + $0x160] sm:$0xff] }
 0x4c1   :  { %2569 = vmatprep.subr.bf16.mxu1 %v17669_v33  ;;  %v15420_v33 = vcombine.high %v3025_v31, %v3029_v32 }
 0x4c3   :  { %9181 = vmatprep.subr.bf16.mxu0 %v15420_v33 }
 0x4c4   :  { %2570 = vmatpush1.bf16.msra.mxu1 %v17667_v34  ;;  %v3026_v34 = vld [vmem:[#allocation21 + $0x148] sm:$0xff] }
 0x4c5   :  { %2571 = vmatprep.subr.bf16.mxu1 %v17672_v35  ;;  %v3030_v35 = vld [vmem:[#allocation21 + $0x168] sm:$0xff] }
 0x4c8   :  { %2572 = vmatpush1.bf16.msra.mxu1 %v17670_v36  ;;  %v15419_v36 = vcombine.low %v3025_v31, %v3029_v32  ;;  %v3078_v31 = vld [vmem:[#allocation21 + $0x2e8] sm:$0xff]  ;;  %v15467_v32 = vcombine.low %v3073_v29, %v3077_v13 }
 0x4c9   :  { %2573 = vmatprep.subr.bf16.mxu1 %v17675_v1  ;;  %v15421_v1 = vcombine.low %v3026_v34, %v3030_v35 }
 0x4ca   :  { %9182 = vmatpush1.bf16.msra.mxu0 %v15419_v36  ;;  %v3085_v36 = vld [vmem:[#allocation21 + $0x320] sm:$0xff] }
 0x4cc   :  { %2574 = vmatpush1.bf16.msra.mxu1 %v17673_v37  ;;  %v15422_v37 = vcombine.high %v3026_v34, %v3030_v35  ;;  %v3081_v35 = vld [vmem:[#allocation21 + $0x300] sm:$0xff] }
 0x4cd   :  { %2575 = vmatprep.subr.bf16.mxu1 %v17678_v38  ;;  %v3033_v38 = vld [vmem:[#allocation21 + $0x180] sm:$0xff] }
 0x4d0   :  { %2576 = vmatpush1.bf16.msra.mxu1 %v17676_v4  ;;  %v3037_v4 = vld [vmem:[#allocation21 + $0x1a0] sm:$0xff] }
 0x4d1   :  { %2577 = vmatprep.subr.bf16.mxu1 %v17681_v39  ;;  %v3034_v39 = vld [vmem:[#allocation21 + $0x188] sm:$0xff] }
 0x4d4   :  { %2578 = vmatpush1.bf16.msra.mxu1 %v17679_v41  ;;  %v15428_v41 = vcombine.high %v3033_v38, %v3037_v4 }
 0x4d5   :  { %2579 = vmatprep.subr.bf16.mxu1 %v17684_v42  ;;  %v3038_v42 = vld [vmem:[#allocation21 + $0x1a8] sm:$0xff] }
 0x4d6   :  { %v15429_v45 = vcombine.low %v3034_v39, %v3038_v42  ;;  %9183 = vmatprep.subr.bf16.mxu0 %v15428_v41 }
 0x4d8   :  { %2580 = vmatpush1.bf16.msra.mxu1 %v17682_v44  ;;  %v15427_v44 = vcombine.low %v3033_v38, %v3037_v4  ;;  %v3086_v38 = vld [vmem:[#allocation21 + $0x328] sm:$0xff]  ;;  %v15475_v4 = vcombine.low %v3081_v35, %v3085_v36 }
 0x4d9   :  { %9499 = vmatprep.subr.bf16.mxu1 %v15382_v5  ;;  %v15444_v5 = vcombine.high %v3049_v30, %v3053_v61  ;;  %v3102_v30 = vld [vmem:[#allocation21 + $0x3a8] sm:$0xff]  ;;  %v3105_v61 = vld [vmem:[#allocation21 + $0x3c0] sm:$0xff] }
 0x4da   :  { %9184 = vmatpush1.bf16.msra.mxu0 %v15427_v44  ;;  %v3093_v44 = vld [vmem:[#allocation21 + $0x360] sm:$0xff] }
 0x4db   :  { %2582 = vmatmul.mubr.bf16.vlgmr.msra.gmra.mrb[28].mxu1 %v2375_v47  ;;  %v3041_v47 = vld [vmem:[#allocation21 + $0x1c0] sm:$0xff] }
 0x4dc   :  { %2591 = vmatprep.mubr.bf16.mxu1 %v2382_v48  ;;  %9500 = vmatpush1.bf16.msra.mxu1 %v15381_v3  ;;  %v3045_v48 = vld [vmem:[#allocation21 + $0x1e0] sm:$0xff] }
 0x4dd   :  { %9501 = vmatprep.subr.bf16.mxu1 %v15390_v10  ;;  %v15435_v53 = vcombine.low %v3041_v47, %v3045_v48  ;;  %v15446_v10 = vcombine.high %v3050_v0, %v3054_v6  ;;  %v3109_v0 = vld [vmem:[#allocation21 + $0x3e0] sm:$0xff] }
 0x4de   :  { %v15500_v6 = vcombine.high %v3105_v61, %v3109_v0 }
 0x4e0   :  { %9502 = vmatpush1.bf16.msra.mxu1 %v15389_v15  ;;  %v15452_v15 = vcombine.high %v3057_v12, %v3061_v14 }
 0x4e1   :  { %9503 = vmatprep.subr.bf16.mxu1 %v15398_v16  ;;  %v15451_v16 = vcombine.low %v3057_v12, %v3061_v14  ;;  %v15499_v12 = vcombine.low %v3105_v61, %v3109_v0 }
 0x4e3   :  { %2592 = vmatmul.mubr.bf16.gmra.mrb[48].mxu1 %v2380_v50  ;;  %v15436_v50 = vcombine.high %v3041_v47, %v3045_v48  ;;  %v3094_v47 = vld [vmem:[#allocation21 + $0x368] sm:$0xff] }
 0x4e4   :  { %2599 = vmatprep.mubr.bf16.mxu1 %v2381_v46  ;;  %9504 = vmatpush1.bf16.msra.mxu1 %v15397_v2  ;;  %v15430_v46 = vcombine.high %v3034_v39, %v3038_v42  ;;  %v3069_v2 = vld [vmem:[#allocation21 + $0x2a0] sm:$0xff] }
 0x4e5   :  { %9505 = vmatprep.subr.bf16.mxu1 %v15406_v23  ;;  %9185 = vmatprep.subr.bf16.mxu0 %v15436_v50  ;;  %v15460_v24 = vcombine.high %v3065_v21, %v3069_v2  ;;  %v15459_v26 = vcombine.low %v3065_v21, %v3069_v2  ;;  %v3089_v42 = vld [vmem:[#allocation21 + $0x340] sm:$0xff] }
 0x4e6   :  { %9186 = vmatpush1.bf16.msra.mxu0 %v15435_v53  ;;  %v15483_v48 = vcombine.low %v3089_v42, %v3093_v44  ;;  %v3101_v53 = vld [vmem:[#allocation21 + $0x3a0] sm:$0xff] }
 0x4e7   :  { %9187 = vmatprep.subr.bf16.mxu0 %v15444_v5 }
 0x4e8   :  { %9506 = vmatpush1.bf16.msra.mxu1 %v15405_v25  ;;  %v3070_v25 = vld [vmem:[#allocation21 + $0x2a8] sm:$0xff] }
 0x4e9   :  { %9507 = vmatprep.subr.bf16.mxu1 %v15414_v17  ;;  %v15461_v27 = vcombine.low %v3066_v22, %v3070_v25  ;;  %v15462_v28 = vcombine.high %v3066_v22, %v3070_v25  ;;  %v15468_v17 = vcombine.high %v3073_v29, %v3077_v13 }
 0x4ea   :  { %9188 = vmatpush1.bf16.msra.mxu0 %v15443_v9  ;;  %v3106_v9 = vld [vmem:[#allocation21 + $0x3c8] sm:$0xff] }
 0x4eb   :  { %2600 = vmatmul.mubr.bf16.gmra.mrb[52].mxu1 %v2379_v49  ;;  %v3042_v49 = vld [vmem:[#allocation21 + $0x1c8] sm:$0xff]  ;;  %9189 = vmatprep.subr.bf16.mxu0 %v15452_v15  ;;  %v18578_v15 = vld [vmem:[#allocation21 + $0x420] sm:$0xff] }
 0x4ec   :  { %9508 = vmatpush1.bf16.msra.mxu1 %v15413_v43  ;;  %v15437_v56 = vcombine.low %v3042_v49, %v3046_v51  ;;  %v15438_v40 = vcombine.high %v3042_v49, %v3046_v51  ;;  %v3074_v43 = vld [vmem:[#allocation21 + $0x2c8] sm:$0xff]  ;;  %v3097_v51 = vld [vmem:[#allocation21 + $0x380] sm:$0xff] }
 0x4ed   :  { %9509 = vmatprep.subr.bf16.mxu1 %v15422_v37  ;;  %v15469_v33 = vcombine.low %v3074_v43, %v3078_v31  ;;  %v15470_v34 = vcombine.high %v3074_v43, %v3078_v31  ;;  %v15476_v37 = vcombine.high %v3081_v35, %v3085_v36  ;;  %v2616_v31 = vld [vmem:[#allocation19] ss:$4 sm:$0x3]  ;;  %v18128_v35 = vmov 1966171168  }
 0x4ee   :  { %9190 = vmatpush1.bf16.msra.mxu0 %v15451_v16  ;;  %v15508_v16 = vcombine.high %v18576_v55, %v18578_v15  ;;  %v2690_v36 = vunpack.c.l.s4 %v18128_v35 }
 0x4ef   :  { %9191 = vmatprep.subr.bf16.mxu0 %v15460_v24 }
 0x4f0   :  { %9510 = vmatpush1.bf16.msra.mxu1 %v15421_v1  ;;  %v3082_v1 = vld [vmem:[#allocation21 + $0x308] sm:$0xff] }
 0x4f1   :  { %9511 = vmatprep.subr.bf16.mxu1 %v15430_v46  ;;  %v15477_v39 = vcombine.low %v3082_v1, %v3086_v38  ;;  %v15478_v41 = vcombine.high %v3082_v1, %v3086_v38  ;;  %v15484_v46 = vcombine.high %v3089_v42, %v3093_v44 }
 0x4f2   :  { %9192 = vmatpush1.bf16.msra.mxu0 %v15459_v26 }
 0x4f3   :  { %9193 = vmatprep.subr.bf16.mxu0 %v15468_v17 }
 0x4f4   :  { %9512 = vmatpush1.bf16.msra.mxu1 %v15429_v45  ;;  %v3090_v45 = vld [vmem:[#allocation21 + $0x348] sm:$0xff] }
 0x4f5   :  { %9513 = vmatprep.subr.bf16.mxu1 %v15438_v40  ;;  %v15485_v49 = vcombine.low %v3090_v45, %v3094_v47  ;;  %v15486_v50 = vcombine.high %v3090_v45, %v3094_v47  ;;  %v15491_v40 = vcombine.low %v3097_v51, %v3101_v53  ;;  %v2691_v47 = vunpack.c.0.s8 %v2690_v36 }
 0x4f6   :  { %9194 = vmatpush1.bf16.msra.mxu0 %v15467_v32  ;;  %v18601_v32 = vrot.slane %v2616_v31, %v18492_v60 }
 0x4f7   :  { %9195 = vmatprep.subr.bf16.mxu0 %v15476_v37 }
 0x4f8   :  { %9514 = vmatpush1.bf16.msra.mxu1 %v15437_v56  ;;  %v3098_v56 = vld [vmem:[#allocation21 + $0x388] sm:$0xff] }
 0x4f9   :  { %9515 = vmatprep.subr.bf16.mxu1 %v15446_v10  ;;  %v15494_v5 = vcombine.high %v3098_v56, %v3102_v30 }
 0x4fa   :  { %9196 = vmatpush1.bf16.msra.mxu0 %v15475_v4 }
 0x4fb   :  { %9197 = vmatprep.subr.bf16.mxu0 %v15484_v46 }
 0x4fc   :  { %9516 = vmatpush1.bf16.msra.mxu1 %v15445_v52  ;;  %v3110_v52 = vld [vmem:[#allocation21 + $0x3e8] sm:$0xff] }
 0x4fd   :  { %9517 = vmatprep.subr.bf16.mxu1 %v15454_v19  ;;  %v15502_v10 = vcombine.high %v3106_v9, %v3110_v52  ;;  %v15501_v14 = vcombine.low %v3106_v9, %v3110_v52  ;;  %v15507_v19 = vcombine.low %v18576_v55, %v18578_v15 }
 0x4fe   :  { %9198 = vmatpush1.bf16.msra.mxu0 %v15483_v48 }
 0x500   :  { %9518 = vmatpush1.bf16.msra.mxu1 %v15453_v18  ;;  %v18584_v18 = vld [vmem:[#allocation21 + $0x428] sm:$0xff] }
 0x501   :  { %9519 = vmatprep.subr.bf16.mxu1 %v15462_v28  ;;  %v15509_v21 = vcombine.low %v18580_v59, %v18584_v18  ;;  %v15510_v2 = vcombine.high %v18580_v59, %v18584_v18 }
 0x504   :  { %9520 = vmatpush1.bf16.msra.mxu1 %v15461_v27 }
 0x505   :  { %9521 = vmatprep.subr.bf16.mxu1 %v15470_v34 }
 0x508   :  { %9522 = vmatpush1.bf16.msra.mxu1 %v15469_v33  ;;  %v2645_v33 = vld [vmem:[#allocation19 + $0x1] ss:$4 sm:$0x3] }
 0x509   :  { %9523 = vmatprep.subr.bf16.mxu1 %v15478_v41  ;;  %v18608_v1 = vrot.slane %v2645_v33, %v18492_v60  ;;  %v18612_v38 = vrot.slane %v2645_v33, %v18495_v62 }
 0x50c   :  { %9524 = vmatpush1.bf16.msra.mxu1 %v15477_v39 }
 0x50d   :  { %9525 = vmatprep.subr.bf16.mxu1 %v15486_v50 }
 0x510   :  { %9526 = vmatpush1.bf16.msra.mxu1 %v15485_v49 }
 0x511   :  { %9527 = vmatprep.subr.bf16.mxu1 %v15494_v5 }
 0x53c   :  { %v2100_v57 = vpop.f32.mrb[32].mxu1 }
 0x53d   :  { %v2101_v3 = vpop.f32.mrb[33].mxu1  ;;  %v15492_v57 = vcombine.high %v3097_v51, %v3101_v53 }
 0x53e   :  { %v18568_v8 = vpop.f32.mrb[34].mxu1  ;;  %v15493_v3 = vcombine.low %v3098_v56, %v3102_v30  ;;  %v18628_v30 = vsub.s32 %v2691_v47, %v18489_v58 }
 0x53f   :  { %v18570_v11 = vpop.f32.mrb[35].mxu1  ;;  %9199 = vmatprep.subr.bf16.mxu0 %v15492_v57 }
 0x540   :  { %9200 = vmatpush1.bf16.msra.mxu0 %v15491_v40  ;;  %9528 = vmatpush1.bf16.msra.mxu1 %v15493_v3 }
 0x541   :  { %9201 = vmatprep.subr.bf16.mxu0 %v15500_v6  ;;  %9529 = vmatprep.subr.bf16.mxu1 %v15502_v10 }
 0x544   :  { %v18572_v63 = vpop.f32.mrb[36].mxu1  ;;  %9202 = vmatpush1.bf16.msra.mxu0 %v15499_v12  ;;  %9530 = vmatpush1.bf16.msra.mxu1 %v15501_v14 }
 0x545   :  { %v18574_v20 = vpop.f32.mrb[37].mxu1  ;;  %9212 = vmatprep.subr.bf16.mxu0 %v15508_v16  ;;  %9540 = vmatprep.subr.bf16.mxu1 %v15510_v2 }
 0x546   :  { %v2112_v23 = vpop.f32.mrb[38].mxu1 }
 0x547   :  { %v2113_v7 = vpop.f32.mrb[39].mxu1 }
 0x576   :  { %v2319_v22 = vpop.f32.mrb[40].mxu1 }
 0x577   :  { %v2320_v23 = vpop.f32.mrb[41].mxu1 }
 0x578   :  { %v2321_v24 = vpop.f32.mrb[42].mxu1 }
 0x579   :  { %v2322_v25 = vadd.f32 %v2321_v24, %v18568_v8  ;;  %v2323_v7 = vpop.f32.mrb[43].mxu1  ;;  %v18604_v8 = vrot.slane %v2616_v31, %v18495_v62 }
 0x57a   :  { %v2324_v26 = vadd.f32 %v2323_v7, %v18570_v11  ;;  %v2666_v11 = vld [vmem:[#allocation19 + $0x2] ss:$4 sm:$0x3] }
 0x57b   :  { %v18615_v41 = vrot.slane %v2666_v11, %v18492_v60  ;;  %v18619_v46 = vrot.slane %v2666_v11, %v18495_v62 }
 0x57e   :  { %v2327_v27 = vpop.f32.mrb[44].mxu1 }
 0x57f   :  { %v18595_v28 = vadd.f32 %v2327_v27, %v18572_v63  ;;  %v2329_v29 = vpop.f32.mrb[45].mxu1 }
 0x580   :  { %v18598_v13 = vadd.f32 %v2329_v29, %v18574_v20  ;;  %v2331_v43 = vpop.f32.mrb[46].mxu1 }
 0x581   :  { %v2332_v17 = vpop.f32.mrb[47].mxu1 }
 0x5ae   :  { %v2583_v34 = vpop.f32.mrb[28].mxu1 }
 0x5af   :  { %v2628_v63 = vadd.f32 %v18601_v32, %v2583_v34  ;;  %v2585_v20 = vpop.f32.mrb[29].mxu1 }
 0x5b0   :  { %v2629_v37 = vadd.f32 %v18604_v8, %v2585_v20  ;;  %v2587_v4 = vpop.f32.mrb[30].mxu1 }
 0x5b1   :  { %v2636_v39 = vmax.f32 %v2628_v63, 0.0  ;;  %v2630_v42 = vadd.f32 %v18601_v32, %v2587_v4  ;;  %v2589_v44 = vpop.f32.mrb[31].mxu1 }
 0x5b2   :  { %v2637_v45 = vmax.f32 %v2629_v37, 0.0  ;;  %v2631_v48 = vadd.f32 %v18604_v8, %v2589_v44 }
 0x5b3   :  { %v2657_v49 = vmul.f32 %v18608_v1, %v2636_v39  ;;  %v2638_v50 = vmax.f32 %v2630_v42, 0.0 }
 0x5b4   :  { %v2658_v51 = vmul.f32 %v18612_v38, %v2637_v45  ;;  %v2639_v53 = vmax.f32 %v2631_v48, 0.0 }
 0x5b5   :  { %v2678_v56 = vadd.f32 %v18615_v41, %v2657_v49  ;;  %v2659_v40 = vmul.f32 %v18608_v1, %v2638_v50 }
 0x5b6   :  { %v2679_v57 = vadd.f32 %v18619_v46, %v2658_v51  ;;  %v2660_v61 = vmul.f32 %v18612_v38, %v2639_v53  ;;  %v2593_v0 = vpop.f32.mrb[48].mxu1 }
 0x5b7   :  { %v2680_v3 = vadd.f32 %v18615_v41, %v2659_v40  ;;  %v2594_v5 = vpop.f32.mrb[49].mxu1 }
 0x5b8   :  { %v2688_v6 = vcombine.high %v2678_v56, %v2679_v57  ;;  %v2681_v9 = vadd.f32 %v18619_v46, %v2660_v61  ;;  %v2595_v52 = vpop.f32.mrb[50].mxu1 }
 0x5b9   :  { %v2612_v10 = vadd.f32 %v2595_v52, %v2322_v25  ;;  %v2597_v12 = vpop.f32.mrb[51].mxu1 }
 0x5ba   :  { %v2695_v14 = vrot.slane %v2688_v6, %v18628_v30  ;;  %v2713_v16 = vcombine.low %v2680_v3, %v2681_v9  ;;  %v2750_v2 = vcombine.high %v2680_v3, %v2681_v9  ;;  %v2613_v22 = vadd.f32 %v2597_v12, %v2324_v26 }
 0x5bb   :  { %v2632_v23 = vadd.f32 %v18601_v32, %v2612_v10  ;;  %v18129_v12 = vmov 1983009808  }
 0x5bc   :  { %v2696_v24 = vcombine.high %v2695_v14, %v2695_v14  ;;  %v2720_v7 = vrot.slane %v2713_v16, %v18628_v30  ;;  %v2757_v27 = vrot.slane %v2750_v2, %v18628_v30  ;;  %v2633_v29 = vadd.f32 %v18604_v8, %v2613_v22 }
 0x5bd   :  { %v2640_v25 = vmax.f32 %v2632_v23, 0.0 }
 0x5be   :  { %v2703_v17 = vrot.slane %v2696_v24, %v18628_v30  ;;  %v2727_v31 = vrot.slane %v2720_v7, %v18628_v30  ;;  %v2731_v26 = vcombine.high %v2720_v7, %v2720_v7  ;;  %v2764_v33 = vrot.slane %v2757_v27, %v18628_v30  ;;  %v2601_v34 = vpop.f32.mrb[52].mxu1 }
 0x5bf   :  { %v2768_v11 = vcombine.high %v2757_v27, %v2757_v27  ;;  %v2661_v35 = vmul.f32 %v18608_v1, %v2640_v25  ;;  %v2641_v36 = vmax.f32 %v2633_v29, 0.0  ;;  %v2614_v63 = vadd.f32 %v2601_v34, %v18595_v28  ;;  %v2603_v20 = vpop.f32.mrb[53].mxu1  ;;  %v3125_v34 = vld [vmem:[#allocation21 + $0x460] sm:$0xff] }
 0x5c0   :  { %v2704_v54 = vcombine.high %v2703_v17, %v2703_v17  ;;  %2730 = vst.msk [vmem:[#allocation6 + $0x4] ss:$2 sm:$0x3] %vm18639_vm5, %v2727_v31  ;;  %v2738_v37 = vrot.slane %v2731_v26, %v18628_v30  ;;  %v2742_v4 = vcombine.high %v2727_v31, %v2727_v31  ;;  %2767 = vst.msk [vmem:[#allocation6 + $0x14] ss:$2 sm:$0x3] %vm18639_vm5, %v2764_v33 }
 0x5c1   :  { %v2779_v39 = vcombine.high %v2764_v33, %v2764_v33  ;;  %v2605_v42 = vpop.f32.mrb[54].mxu1  ;;  %v2775_v44 = vrot.slane %v2768_v11, %v18628_v30  ;;  %v2682_v45 = vadd.f32 %v18615_v41, %v2661_v35  ;;  %v2662_v47 = vmul.f32 %v18612_v38, %v2641_v36  ;;  %v3121_v33 = vld [vmem:[#allocation21 + $0x440] sm:$0xff]  ;;  %v3122_v11 = vld [vmem:[#allocation21 + $0x448] sm:$0xff] }
 0x5c2   :  { %v2634_v28 = vadd.f32 %v18601_v32, %v2614_v63  ;;  %v2606_v48 = vpop.f32.mrb[55].mxu1  ;;  %2710 = vst.msk [vmem:[#allocation6] ss:$2 sm:$0x3] %vm18639_vm5, %v2704_v54  ;;  %v2746_v49 = vcombine.high %v2738_v37, %v2738_v37  ;;  %v2615_v50 = vadd.f32 %v2603_v20, %v18598_v13  ;;  %v3126_v35 = vld [vmem:[#allocation21 + $0x468] sm:$0xff]  ;;  %v3129_v20 = vld [vmem:[#allocation21 + $0x480] sm:$0xff] }
 0x5c3   :  { %2741 = vst.msk [vmem:[#allocation6 + $0x8] ss:$2 sm:$0x3] %vm18639_vm5, %v2738_v37  ;;  %2745 = vst.msk [vmem:[#allocation6 + $0xc] ss:$2 sm:$0x3] %vm18639_vm5, %v2742_v4  ;;  %v2683_v32 = vadd.f32 %v18619_v46, %v2662_v47  ;;  %v15516_v37 = vcombine.high %v3121_v33, %v3125_v34  ;;  %v15518_v4 = vcombine.high %v3122_v11, %v3126_v35 }
 0x5c4   :  { %2782 = vst.msk [vmem:[#allocation6 + $0x1c] ss:$2 sm:$0x3] %vm18639_vm5, %v2779_v39  ;;  %2778 = vst.msk [vmem:[#allocation6 + $0x18] ss:$2 sm:$0x3] %vm18639_vm5, %v2775_v44  ;;  %v2635_v53 = vadd.f32 %v18604_v8, %v2615_v50  ;;  %v2887_v8 = vunpack.c.l.s4 %v18129_v12  ;;  %v15517_v47 = vcombine.low %v3122_v11, %v3126_v35 }
 0x5c5   :  { %v2642_v51 = vmax.f32 %v2634_v28, 0.0  ;;  %2749 = vst.msk [vmem:[#allocation6 + $0x10] ss:$2 sm:$0x3] %vm18639_vm5, %v2746_v49  ;;  %v2785_v56 = vcombine.high %v2682_v45, %v2683_v32  ;;  %v3133_v39 = vld [vmem:[#allocation21 + $0x4a0] sm:$0xff]  ;;  %v3130_v42 = vld [vmem:[#allocation21 + $0x488] sm:$0xff]  ;;  %v15515_v45 = vcombine.low %v3121_v33, %v3125_v34 }
 0x5c6   :  { %v2643_v57 = vmax.f32 %v2635_v53, 0.0  ;;  %v2888_v2 = vunpack.c.0.s8 %v2887_v8  ;;  %v3134_v44 = vld [vmem:[#allocation21 + $0x4a8] sm:$0xff]  ;;  %v15524_v28 = vcombine.high %v3129_v20, %v3133_v39  ;;  %v3137_v49 = vld [vmem:[#allocation21 + $0x4c0] sm:$0xff]  ;;  %v15523_v55 = vcombine.low %v3129_v20, %v3133_v39 }
 0x5c7   :  { %v2663_v40 = vmul.f32 %v18608_v1, %v2642_v51  ;;  %v2792_v61 = vrot.slane %v2785_v56, %v18628_v30  ;;  %v15526_v48 = vcombine.high %v3130_v42, %v3134_v44  ;;  %v3141_v50 = vld [vmem:[#allocation21 + $0x4e0] sm:$0xff]  ;;  %v3138_v32 = vld [vmem:[#allocation21 + $0x4c8] sm:$0xff]  ;;  %v15525_v15 = vcombine.low %v3130_v42, %v3134_v44 }
 0x5c8   :  { %v2664_v13 = vmul.f32 %v18612_v38, %v2643_v57  ;;  %v18701_v29 = vsub.s32 %v2888_v2, %v18489_v58  ;;  %v3142_v51 = vld [vmem:[#allocation21 + $0x4e8] sm:$0xff]  ;;  %v15532_v59 = vcombine.high %v3137_v49, %v3141_v50  ;;  %v3161_v8 = vld [vmem:[#allocation21 + $0x580] sm:$0xff] }
 0x5c9   :  { %v2684_v0 = vadd.f32 %v18615_v41, %v2663_v40  ;;  %v2793_v3 = vcombine.high %v2792_v61, %v2792_v61  ;;  %v15534_v18 = vcombine.high %v3138_v32, %v3142_v51  ;;  %v3146_v53 = vld [vmem:[#allocation21 + $0x508] sm:$0xff]  ;;  %v15531_v40 = vcombine.low %v3137_v49, %v3141_v50  ;;  %v3181_v33 = vld [vmem:[#allocation21 + $0x620] sm:$0xff] }
 0x5ca   :  { %v2685_v5 = vadd.f32 %v18619_v46, %v2664_v13  ;;  %v3150_v56 = vld [vmem:[#allocation21 + $0x528] sm:$0xff]  ;;  %v15533_v57 = vcombine.low %v3138_v32, %v3142_v51  ;;  %v3153_v13 = vld [vmem:[#allocation21 + $0x540] sm:$0xff] }
 0x5cb   :  { %v2800_v6 = vrot.slane %v2793_v3, %v18628_v30  ;;  %v3157_v3 = vld [vmem:[#allocation21 + $0x560] sm:$0xff]  ;;  %v3178_v34 = vld [vmem:[#allocation21 + $0x608] sm:$0xff] }
 0x5cc   :  { %v2807_v9 = vcombine.low %v2684_v0, %v2685_v5  ;;  %v2844_v52 = vcombine.high %v2684_v0, %v2685_v5  ;;  %v15542_v0 = vcombine.high %v3146_v53, %v3150_v56  ;;  %v3154_v5 = vld [vmem:[#allocation21 + $0x548] sm:$0xff]  ;;  %v3189_v39 = vld [vmem:[#allocation21 + $0x660] sm:$0xff] }
 0x5cd   :  { %v2801_v10 = vcombine.high %v2800_v6, %v2800_v6  ;;  %v3158_v6 = vld [vmem:[#allocation21 + $0x568] sm:$0xff]  ;;  %v3193_v49 = vld [vmem:[#allocation21 + $0x680] sm:$0xff] }
 0x5ce   :  { %v2814_v14 = vrot.slane %v2807_v9, %v18628_v30  ;;  %v2851_v1 = vrot.slane %v2844_v52, %v18628_v30  ;;  %v15541_v52 = vcombine.low %v3146_v53, %v3150_v56  ;;  %v15550_v12 = vcombine.high %v3154_v5, %v3158_v6  ;;  %v3182_v11 = vld [vmem:[#allocation21 + $0x628] sm:$0xff]  ;;  %v3197_v50 = vld [vmem:[#allocation21 + $0x6a0] sm:$0xff] }
 0x5cf   :  { %2804 = vst.msk [vmem:[#allocation6 + $0x1] ss:$2 sm:$0x3] %vm18639_vm5, %v2801_v10  ;;  %v15548_v10 = vcombine.high %v3153_v13, %v3157_v3  ;;  %v3186_v42 = vld [vmem:[#allocation21 + $0x648] sm:$0xff] }
 0x5d0   :  { %v2821_v41 = vrot.slane %v2814_v14, %v18628_v30  ;;  %v2825_v38 = vcombine.high %v2814_v14, %v2814_v14  ;;  %v2858_v16 = vrot.slane %v2851_v1, %v18628_v30  ;;  %v2862_v46 = vcombine.high %v2851_v1, %v2851_v1  ;;  %v3165_v14 = vld [vmem:[#allocation21 + $0x5a0] sm:$0xff]  ;;  %v3162_v1 = vld [vmem:[#allocation21 + $0x588] sm:$0xff] }
 0x5d1   :  { %v3190_v44 = vld [vmem:[#allocation21 + $0x668] sm:$0xff] }
 0x5d2   :  { %2824 = vst.msk [vmem:[#allocation6 + $0x5] ss:$2 sm:$0x3] %vm18639_vm5, %v2821_v41  ;;  %v2832_v22 = vrot.slane %v2825_v38, %v18628_v30  ;;  %v2836_v23 = vcombine.high %v2821_v41, %v2821_v41  ;;  %2861 = vst.msk [vmem:[#allocation6 + $0x15] ss:$2 sm:$0x3] %vm18639_vm5, %v2858_v16  ;;  %v2869_v24 = vrot.slane %v2862_v46, %v18628_v30 }
 0x5d3   :  { %v2873_v7 = vcombine.high %v2858_v16, %v2858_v16  ;;  %v3166_v41 = vld [vmem:[#allocation21 + $0x5a8] sm:$0xff]  ;;  %v15547_v38 = vcombine.low %v3153_v13, %v3157_v3  ;;  %v15549_v16 = vcombine.low %v3154_v5, %v3158_v6  ;;  %v15556_v46 = vcombine.high %v3161_v8, %v3165_v14  ;;  %v3209_v13 = vld [vmem:[#allocation21 + $0x700] sm:$0xff] }
 0x5d4   :  { %2835 = vst.msk [vmem:[#allocation6 + $0x9] ss:$2 sm:$0x3] %vm18639_vm5, %v2832_v22  ;;  %2839 = vst.msk [vmem:[#allocation6 + $0xd] ss:$2 sm:$0x3] %vm18639_vm5, %v2836_v23  ;;  %v2840_v27 = vcombine.high %v2832_v22, %v2832_v22  ;;  %v15558_v2 = vcombine.high %v3162_v1, %v3166_v41 }
 0x5d5   :  { %2872 = vst.msk [vmem:[#allocation6 + $0x19] ss:$2 sm:$0x3] %vm18639_vm5, %v2869_v24  ;;  %2876 = vst.msk [vmem:[#allocation6 + $0x1d] ss:$2 sm:$0x3] %vm18639_vm5, %v2873_v7 }
 0x5d6   :  { %2843 = vst.msk [vmem:[#allocation6 + $0x11] ss:$2 sm:$0x3] %vm18639_vm5, %v2840_v27  ;;  %v3169_v22 = vld [vmem:[#allocation21 + $0x5c0] sm:$0xff]  ;;  %v3170_v24 = vld [vmem:[#allocation21 + $0x5c8] sm:$0xff]  ;;  %v15555_v27 = vcombine.low %v3161_v8, %v3165_v14 }
 0x5d7   :  { %v3173_v23 = vld [vmem:[#allocation21 + $0x5e0] sm:$0xff]  ;;  %v3174_v7 = vld [vmem:[#allocation21 + $0x5e8] sm:$0xff] }
 0x5d8   :  { %v15563_v35 = vcombine.low %v3169_v22, %v3173_v23  ;;  %v3194_v32 = vld [vmem:[#allocation21 + $0x688] sm:$0xff]  ;;  %v3213_v3 = vld [vmem:[#allocation21 + $0x720] sm:$0xff] }
 0x5d9   :  { %v2877_v30 = vld [vmem:[#allocation6] sm:$0xff]  ;;  %v3198_v51 = vld [vmem:[#allocation21 + $0x6a8] sm:$0xff] }
 0x5da   :  { %v2892_v25 = vrot.slane %v2877_v30, %v18701_v29  ;;  %v2885_v17 = vcombine.high %v2877_v30, %v2877_v30  ;;  %v15557_v30 = vcombine.low %v3162_v1, %v3166_v41  ;;  %v3202_v53 = vld [vmem:[#allocation21 + $0x6c8] sm:$0xff]  ;;  %v3217_v8 = vld [vmem:[#allocation21 + $0x740] sm:$0xff] }
 0x5db   :  { %v3206_v56 = vld [vmem:[#allocation21 + $0x6e8] sm:$0xff]  ;;  %v3221_v14 = vld [vmem:[#allocation21 + $0x760] sm:$0xff] }
 0x5dc   :  { %v2900_v31 = vcombine.high %v2892_v25, %v2892_v25  ;;  %v18705_v26 = vrot.slane %v2885_v17, %v18701_v29  ;;  %v18711_v63 = vpack.c.bf16 %v2892_v25, %v2892_v25  ;;  %v15564_v25 = vcombine.high %v3169_v22, %v3173_v23  ;;  %v3210_v5 = vld [vmem:[#allocation21 + $0x708] sm:$0xff]  ;;  %v3225_v22 = vld [vmem:[#allocation21 + $0x780] sm:$0xff] }
 0x5dd   :  { %v15566_v17 = vcombine.high %v3170_v24, %v3174_v7  ;;  %v3214_v6 = vld [vmem:[#allocation21 + $0x728] sm:$0xff]  ;;  %v3229_v23 = vld [vmem:[#allocation21 + $0x7a0] sm:$0xff] }
 0x5de   :  { %v18707_v36 = vpack.c.bf16 %v2900_v31, %v2900_v31  ;;  %v2901_v43 = vcombine.high %v18705_v26, %v18705_v26  ;;  %v3177_v31 = vld [vmem:[#allocation21 + $0x600] sm:$0xff]  ;;  %v3218_v1 = vld [vmem:[#allocation21 + $0x748] sm:$0xff] }
 0x5df   :  { %v15572_v20 = vcombine.high %v3177_v31, %v3181_v33  ;;  %v3222_v41 = vld [vmem:[#allocation21 + $0x768] sm:$0xff] }
 0x5e0   :  { %9203 = vmatprep.mubr.bf16.mxu0 %v18707_v36  ;;  %9531 = vmatprep.mubr.bf16.mxu1 %v18707_v36  ;;  %v18715_v54 = vpack.c.bf16 %v2901_v43, %v2901_v43  ;;  %v15565_v43 = vcombine.low %v3170_v24, %v3174_v7  ;;  %v3226_v24 = vld [vmem:[#allocation21 + $0x788] sm:$0xff] }
 0x5e1   :  { %9204 = vmatmul.mubr.bf16.vlgmr.msra.gmra.mrb[48].mxu0 %v18711_v63  ;;  %9532 = vmatmul.mubr.bf16.vlgmr.msra.gmra.mrb[56].mxu1 %v18711_v63  ;;  %v3230_v7 = vld [vmem:[#allocation21 + $0x7a8] sm:$0xff] }
 0x5e2   :  { %9213 = vmatpush1.bf16.msra.mxu0 %v15507_v19  ;;  %9541 = vmatpush1.bf16.msra.mxu1 %v15509_v21  ;;  %v3145_v19 = vld [vmem:[#allocation21 + $0x500] sm:$0xff] }
 0x5e3   :  { %9244 = vmatprep.mubr.bf16.mxu0 %v18715_v54  ;;  %9572 = vmatprep.mubr.bf16.mxu1 %v18715_v54  ;;  %v3149_v21 = vld [vmem:[#allocation21 + $0x520] sm:$0xff] }
 0x5e4   :  { %9214 = vmatprep.subr.bf16.mxu0 %v15516_v37  ;;  %9542 = vmatprep.subr.bf16.mxu1 %v15518_v4  ;;  %v15540_v61 = vcombine.high %v3145_v19, %v3149_v21  ;;  %v15539_v9 = vcombine.low %v3145_v19, %v3149_v21  ;;  %v15574_v37 = vcombine.high %v3178_v34, %v3182_v11  ;;  %v3185_v4 = vld [vmem:[#allocation21 + $0x640] sm:$0xff] }
 0x5e5   :  { %v3201_v19 = vld [vmem:[#allocation21 + $0x6c0] sm:$0xff] }
 0x5e6   :  { %9215 = vmatpush1.bf16.msra.mxu0 %v15515_v45  ;;  %9543 = vmatpush1.bf16.msra.mxu1 %v15517_v47  ;;  %v15571_v45 = vcombine.low %v3177_v31, %v3181_v33  ;;  %v15573_v47 = vcombine.low %v3178_v34, %v3182_v11  ;;  %v3205_v21 = vld [vmem:[#allocation21 + $0x6e0] sm:$0xff]  ;;  %v3234_v34 = vld [vmem:[#allocation21 + $0x7c8] sm:$0xff] }
 0x5e7   :  { %9216 = vmatprep.subr.bf16.mxu0 %v15524_v28  ;;  %9544 = vmatprep.subr.bf16.mxu1 %v15526_v48  ;;  %v15580_v28 = vcombine.high %v3185_v4, %v3189_v39  ;;  %v15582_v48 = vcombine.high %v3186_v42, %v3190_v44  ;;  %v3233_v31 = vld [vmem:[#allocation21 + $0x7c0] sm:$0xff]  ;;  %v3238_v11 = vld [vmem:[#allocation21 + $0x7e8] sm:$0xff] }
 0x5e8   :  { %v3237_v33 = vld [vmem:[#allocation21 + $0x7e0] sm:$0xff] }
 0x5ea   :  { %9217 = vmatpush1.bf16.msra.mxu0 %v15523_v55  ;;  %9545 = vmatpush1.bf16.msra.mxu1 %v15525_v15  ;;  %v15579_v55 = vcombine.low %v3185_v4, %v3189_v39  ;;  %v15581_v15 = vcombine.low %v3186_v42, %v3190_v44  ;;  %v15630_v4 = vcombine.high %v3234_v34, %v3238_v11  ;;  %v3241_v39 = vld [vmem:[#allocation21 + $0x800] sm:$0xff]  ;;  %v3242_v44 = vld [vmem:[#allocation21 + $0x808] sm:$0xff] }
 0x5eb   :  { %9218 = vmatprep.subr.bf16.mxu0 %v15532_v59  ;;  %9546 = vmatprep.subr.bf16.mxu1 %v15534_v18  ;;  %v15588_v59 = vcombine.high %v3193_v49, %v3197_v50  ;;  %v15590_v18 = vcombine.high %v3194_v32, %v3198_v51  ;;  %v3245_v42 = vld [vmem:[#allocation21 + $0x820] sm:$0xff] }
 0x5ee   :  { %9219 = vmatpush1.bf16.msra.mxu0 %v15531_v40  ;;  %9547 = vmatpush1.bf16.msra.mxu1 %v15533_v57  ;;  %v15587_v40 = vcombine.low %v3193_v49, %v3197_v50  ;;  %v15589_v57 = vcombine.low %v3194_v32, %v3198_v51  ;;  %v15636_v49 = vcombine.high %v3241_v39, %v3245_v42  ;;  %v3249_v51 = vld [vmem:[#allocation21 + $0x840] sm:$0xff] }
 0x5ef   :  { %9220 = vmatprep.subr.bf16.mxu0 %v15540_v61  ;;  %9548 = vmatprep.subr.bf16.mxu1 %v15542_v0  ;;  %v15596_v61 = vcombine.high %v3201_v19, %v3205_v21  ;;  %v15598_v0 = vcombine.high %v3202_v53, %v3206_v56 }
 0x5f2   :  { %9221 = vmatpush1.bf16.msra.mxu0 %v15539_v9  ;;  %9549 = vmatpush1.bf16.msra.mxu1 %v15541_v52  ;;  %v15595_v9 = vcombine.low %v3201_v19, %v3205_v21  ;;  %v15597_v52 = vcombine.low %v3202_v53, %v3206_v56  ;;  %v18737_v19 = vpack.c.bf16 %v18705_v26, %v18705_v26 }
 0x5f3   :  { %9222 = vmatprep.subr.bf16.mxu0 %v15548_v10  ;;  %9550 = vmatprep.subr.bf16.mxu1 %v15550_v12  ;;  %v15604_v10 = vcombine.high %v3209_v13, %v3213_v3  ;;  %v15606_v12 = vcombine.high %v3210_v5, %v3214_v6 }
 0x5f6   :  { %9223 = vmatpush1.bf16.msra.mxu0 %v15547_v38  ;;  %9551 = vmatpush1.bf16.msra.mxu1 %v15549_v16  ;;  %v15603_v38 = vcombine.low %v3209_v13, %v3213_v3  ;;  %v15605_v16 = vcombine.low %v3210_v5, %v3214_v6  ;;  %v3262_v13 = vld [vmem:[#allocation21 + $0x8a8] sm:$0xff] }
 0x5f7   :  { %9224 = vmatprep.subr.bf16.mxu0 %v15556_v46  ;;  %9552 = vmatprep.subr.bf16.mxu1 %v15558_v2  ;;  %v15612_v46 = vcombine.high %v3217_v8, %v3221_v14  ;;  %v15614_v2 = vcombine.high %v3218_v1, %v3222_v41 }
 0x5fa   :  { %9225 = vmatpush1.bf16.msra.mxu0 %v15555_v27  ;;  %9553 = vmatpush1.bf16.msra.mxu1 %v15557_v30  ;;  %v15611_v27 = vcombine.low %v3217_v8, %v3221_v14  ;;  %v15613_v30 = vcombine.low %v3218_v1, %v3222_v41 }
 0x5fb   :  { %9226 = vmatprep.subr.bf16.mxu0 %v15564_v25  ;;  %9554 = vmatprep.subr.bf16.mxu1 %v15566_v17  ;;  %v15620_v25 = vcombine.high %v3225_v22, %v3229_v23  ;;  %v15622_v17 = vcombine.high %v3226_v24, %v3230_v7 }
 0x5fe   :  { %9227 = vmatpush1.bf16.msra.mxu0 %v15563_v35  ;;  %9555 = vmatpush1.bf16.msra.mxu1 %v15565_v43  ;;  %v18727_v35 = vld [vmem:[#allocation6 + $0x8] sm:$0xff]  ;;  %v15619_v43 = vcombine.low %v3225_v22, %v3229_v23 }
 0x5ff   :  { %9228 = vmatprep.subr.bf16.mxu0 %v15572_v20  ;;  %9556 = vmatprep.subr.bf16.mxu1 %v15574_v37  ;;  %v15621_v20 = vcombine.low %v3226_v24, %v3230_v7  ;;  %v15628_v37 = vcombine.high %v3233_v31, %v3237_v33 }
 0x602   :  { %9229 = vmatpush1.bf16.msra.mxu0 %v15571_v45  ;;  %9557 = vmatpush1.bf16.msra.mxu1 %v15573_v47  ;;  %v3246_v45 = vld [vmem:[#allocation21 + $0x828] sm:$0xff]  ;;  %v18731_v47 = vrot.slane %v18727_v35, %v18701_v29 }
 0x603   :  { %9230 = vmatprep.subr.bf16.mxu0 %v15580_v28  ;;  %9558 = vmatprep.subr.bf16.mxu1 %v15582_v48  ;;  %v15627_v28 = vcombine.low %v3233_v31, %v3237_v33  ;;  %v15629_v48 = vcombine.low %v3234_v34, %v3238_v11  ;;  %v15638_v50 = vcombine.high %v3242_v44, %v3246_v45 }
 0x604   :  { %v2917_v32 = vcombine.high %v18731_v47, %v18731_v47  ;;  %v15637_v21 = vcombine.low %v3242_v44, %v3246_v45 }
 0x606   :  { %9231 = vmatpush1.bf16.msra.mxu0 %v15579_v55  ;;  %9559 = vmatpush1.bf16.msra.mxu1 %v15581_v15  ;;  %v3253_v55 = vld [vmem:[#allocation21 + $0x860] sm:$0xff]  ;;  %v3250_v15 = vld [vmem:[#allocation21 + $0x848] sm:$0xff]  ;;  %v18739_v53 = vpack.c.bf16 %v2917_v32, %v2917_v32 }
 0x607   :  { %9232 = vmatprep.subr.bf16.mxu0 %v15588_v59  ;;  %9560 = vmatprep.subr.bf16.mxu1 %v15590_v18  ;;  %v3254_v59 = vld [vmem:[#allocation21 + $0x868] sm:$0xff]  ;;  %v15635_v18 = vcombine.low %v3241_v39, %v3245_v42  ;;  %v15644_v56 = vcombine.high %v3249_v51, %v3253_v55  ;;  %v15643_v26 = vcombine.low %v3249_v51, %v3253_v55 }
 0x608   :  { %v15645_v3 = vcombine.low %v3250_v15, %v3254_v59 }
 0x60a   :  { %9233 = vmatpush1.bf16.msra.mxu0 %v15587_v40  ;;  %9561 = vmatpush1.bf16.msra.mxu1 %v15589_v57  ;;  %v15646_v40 = vcombine.high %v3250_v15, %v3254_v59  ;;  %v3257_v57 = vld [vmem:[#allocation21 + $0x880] sm:$0xff] }
 0x60b   :  { %9234 = vmatprep.subr.bf16.mxu0 %v15596_v61  ;;  %9562 = vmatprep.subr.bf16.mxu1 %v15598_v0  ;;  %v3261_v61 = vld [vmem:[#allocation21 + $0x8a0] sm:$0xff]  ;;  %v3258_v0 = vld [vmem:[#allocation21 + $0x888] sm:$0xff] }
 0x60c   :  { %v15652_v5 = vcombine.high %v3257_v57, %v3261_v61  ;;  %v15654_v6 = vcombine.high %v3258_v0, %v3262_v13  ;;  %v15651_v8 = vcombine.low %v3257_v57, %v3261_v61  ;;  %v15653_v14 = vcombine.low %v3258_v0, %v3262_v13  ;;  %v3305_v59 = vld [vmem:[#allocation21 + $0xa00] sm:$0xff] }
 0x60d   :  { %v3313_v13 = vld [vmem:[#allocation21 + $0xa40] sm:$0xff] }
 0x60e   :  { %9235 = vmatpush1.bf16.msra.mxu0 %v15595_v9  ;;  %9563 = vmatpush1.bf16.msra.mxu1 %v15597_v52  ;;  %v3265_v9 = vld [vmem:[#allocation21 + $0x8c0] sm:$0xff] }
 0x60f   :  { %9236 = vmatprep.subr.bf16.mxu0 %v15604_v10  ;;  %9564 = vmatprep.subr.bf16.mxu1 %v15606_v12  ;;  %v3269_v52 = vld [vmem:[#allocation21 + $0x8e0] sm:$0xff]  ;;  %v3266_v10 = vld [vmem:[#allocation21 + $0x8c8] sm:$0xff] }
 0x610   :  { %v3270_v12 = vld [vmem:[#allocation21 + $0x8e8] sm:$0xff]  ;;  %v15660_v1 = vcombine.high %v3265_v9, %v3269_v52  ;;  %v15659_v22 = vcombine.low %v3265_v9, %v3269_v52 }
 0x611   :  { %v15662_v41 = vcombine.high %v3266_v10, %v3270_v12  ;;  %v15661_v23 = vcombine.low %v3266_v10, %v3270_v12  ;;  %v3321_v12 = vld [vmem:[#allocation21 + $0xa80] sm:$0xff] }
 0x612   :  { %9237 = vmatpush1.bf16.msra.mxu0 %v15603_v38  ;;  %9565 = vmatpush1.bf16.msra.mxu1 %v15605_v16  ;;  %v3273_v38 = vld [vmem:[#allocation21 + $0x900] sm:$0xff] }
 0x613   :  { %9238 = vmatprep.subr.bf16.mxu0 %v15612_v46  ;;  %9566 = vmatprep.subr.bf16.mxu1 %v15614_v2  ;;  %v3277_v16 = vld [vmem:[#allocation21 + $0x920] sm:$0xff]  ;;  %v3274_v46 = vld [vmem:[#allocation21 + $0x908] sm:$0xff] }
 0x614   :  { %v3278_v2 = vld [vmem:[#allocation21 + $0x928] sm:$0xff]  ;;  %v15668_v24 = vcombine.high %v3273_v38, %v3277_v16  ;;  %v15667_v31 = vcombine.low %v3273_v38, %v3277_v16 }
 0x615   :  { %v15670_v7 = vcombine.high %v3274_v46, %v3278_v2  ;;  %v15669_v33 = vcombine.low %v3274_v46, %v3278_v2  ;;  %v3329_v2 = vld [vmem:[#allocation21 + $0xac0] sm:$0xff] }
 0x616   :  { %9239 = vmatpush1.bf16.msra.mxu0 %v15611_v27  ;;  %9567 = vmatpush1.bf16.msra.mxu1 %v15613_v30  ;;  %v3281_v27 = vld [vmem:[#allocation21 + $0x940] sm:$0xff] }
 0x617   :  { %9240 = vmatprep.subr.bf16.mxu0 %v15620_v25  ;;  %9568 = vmatprep.subr.bf16.mxu1 %v15622_v17  ;;  %v3285_v30 = vld [vmem:[#allocation21 + $0x960] sm:$0xff]  ;;  %v3282_v25 = vld [vmem:[#allocation21 + $0x948] sm:$0xff] }
 0x618   :  { %v3286_v17 = vld [vmem:[#allocation21 + $0x968] sm:$0xff]  ;;  %v15676_v34 = vcombine.high %v3281_v27, %v3285_v30  ;;  %v15675_v39 = vcombine.low %v3281_v27, %v3285_v30 }
 0x619   :  { %v15678_v11 = vcombine.high %v3282_v25, %v3286_v17  ;;  %v15677_v42 = vcombine.low %v3282_v25, %v3286_v17  ;;  %v3337_v17 = vld [vmem:[#allocation21 + $0xb00] sm:$0xff] }
 0x61a   :  { %9241 = vmatpush1.bf16.msra.mxu0 %v15619_v43  ;;  %9569 = vmatpush1.bf16.msra.mxu1 %v15621_v20  ;;  %v3289_v43 = vld [vmem:[#allocation21 + $0x980] sm:$0xff] }
 0x61b   :  { %9242 = vmatprep.subr.bf16.mxu0 %v15628_v37  ;;  %9570 = vmatprep.subr.bf16.mxu1 %v15630_v4  ;;  %v3293_v20 = vld [vmem:[#allocation21 + $0x9a0] sm:$0xff]  ;;  %v3290_v37 = vld [vmem:[#allocation21 + $0x988] sm:$0xff] }
 0x61c   :  { %v3294_v4 = vld [vmem:[#allocation21 + $0x9a8] sm:$0xff]  ;;  %v15684_v44 = vcombine.high %v3289_v43, %v3293_v20  ;;  %v15683_v32 = vcombine.low %v3289_v43, %v3293_v20 }
 0x61d   :  { %v15686_v45 = vcombine.high %v3290_v37, %v3294_v4  ;;  %v15685_v51 = vcombine.low %v3290_v37, %v3294_v4  ;;  %v3345_v4 = vld [vmem:[#allocation21 + $0xb40] sm:$0xff] }
 0x61e   :  { %9243 = vmatpush1.bf16.msra.mxu0 %v15627_v28  ;;  %9571 = vmatpush1.bf16.msra.mxu1 %v15629_v48  ;;  %v3297_v28 = vld [vmem:[#allocation21 + $0x9c0] sm:$0xff] }
 0x61f   :  { %9253 = vmatprep.subr.bf16.mxu0 %v15636_v49  ;;  %9581 = vmatprep.subr.bf16.mxu1 %v15638_v50  ;;  %v3301_v48 = vld [vmem:[#allocation21 + $0x9e0] sm:$0xff]  ;;  %v3298_v49 = vld [vmem:[#allocation21 + $0x9c8] sm:$0xff] }
 0x620   :  { %v3302_v50 = vld [vmem:[#allocation21 + $0x9e8] sm:$0xff]  ;;  %v15692_v55 = vcombine.high %v3297_v28, %v3301_v48 }
 0x621   :  { %9245 = vmatmul.mubr.bf16.vlgmr.msra.gmra.mrb[48].mxu0 %v18737_v19  ;;  %9573 = vmatmul.mubr.bf16.vlgmr.msra.gmra.mrb[56].mxu1 %v18737_v19  ;;  %v15694_v15 = vcombine.high %v3298_v49, %v3302_v50  ;;  %v15693_v57 = vcombine.low %v3298_v49, %v3302_v50  ;;  %v3353_v50 = vld [vmem:[#allocation21 + $0xb80] sm:$0xff] }
 0x622   :  { %9254 = vmatpush1.bf16.msra.mxu0 %v15635_v18  ;;  %9285 = vmatprep.mubr.bf16.mxu0 %v18739_v53  ;;  %v3309_v18 = vld [vmem:[#allocation21 + $0xa20] sm:$0xff] }
 0x623   :  { %9582 = vmatpush1.bf16.msra.mxu1 %v15637_v21  ;;  %9613 = vmatprep.mubr.bf16.mxu1 %v18739_v53  ;;  %v3306_v21 = vld [vmem:[#allocation21 + $0xa08] sm:$0xff]  ;;  %v15700_v61 = vcombine.high %v3305_v59, %v3309_v18 }
 0x624   :  { %9255 = vmatprep.subr.bf16.mxu0 %v15644_v56  ;;  %9583 = vmatprep.subr.bf16.mxu1 %v15646_v40  ;;  %v3310_v56 = vld [vmem:[#allocation21 + $0xa28] sm:$0xff]  ;;  %v15691_v40 = vcombine.low %v3297_v28, %v3301_v48 }
 0x625   :  { %v15702_v0 = vcombine.high %v3306_v21, %v3310_v56  ;;  %v15701_v9 = vcombine.low %v3306_v21, %v3310_v56  ;;  %v3361_v56 = vld [vmem:[#allocation21 + $0xbc0] sm:$0xff] }
 0x626   :  { %9256 = vmatpush1.bf16.msra.mxu0 %v15643_v26  ;;  %v3317_v26 = vld [vmem:[#allocation21 + $0xa60] sm:$0xff] }
 0x627   :  { %9584 = vmatpush1.bf16.msra.mxu1 %v15645_v3  ;;  %9257 = vmatprep.subr.bf16.mxu0 %v15652_v5  ;;  %v3314_v3 = vld [vmem:[#allocation21 + $0xa48] sm:$0xff]  ;;  %v15708_v52 = vcombine.high %v3313_v13, %v3317_v26 }
 0x628   :  { %9585 = vmatprep.subr.bf16.mxu1 %v15654_v6  ;;  %v3318_v5 = vld [vmem:[#allocation21 + $0xa68] sm:$0xff]  ;;  %v15699_v6 = vcombine.low %v3305_v59, %v3309_v18 }
 0x629   :  { %v15710_v10 = vcombine.high %v3314_v3, %v3318_v5  ;;  %v15709_v38 = vcombine.low %v3314_v3, %v3318_v5 }
 0x62a   :  { %9258 = vmatpush1.bf16.msra.mxu0 %v15651_v8  ;;  %v3325_v8 = vld [vmem:[#allocation21 + $0xaa0] sm:$0xff] }
 0x62b   :  { %9586 = vmatpush1.bf16.msra.mxu1 %v15653_v14  ;;  %9259 = vmatprep.subr.bf16.mxu0 %v15660_v1  ;;  %v3322_v14 = vld [vmem:[#allocation21 + $0xa88] sm:$0xff]  ;;  %v15716_v16 = vcombine.high %v3321_v12, %v3325_v8 }
 0x62c   :  { %9587 = vmatprep.subr.bf16.mxu1 %v15662_v41  ;;  %v3326_v1 = vld [vmem:[#allocation21 + $0xaa8] sm:$0xff]  ;;  %v15707_v41 = vcombine.low %v3313_v13, %v3317_v26 }
 0x62d   :  { %v15718_v46 = vcombine.high %v3322_v14, %v3326_v1  ;;  %v15717_v27 = vcombine.low %v3322_v14, %v3326_v1 }
 0x62e   :  { %9260 = vmatpush1.bf16.msra.mxu0 %v15659_v22  ;;  %v3333_v22 = vld [vmem:[#allocation21 + $0xae0] sm:$0xff] }
 0x62f   :  { %9588 = vmatpush1.bf16.msra.mxu1 %v15661_v23  ;;  %9261 = vmatprep.subr.bf16.mxu0 %v15668_v24  ;;  %v3330_v23 = vld [vmem:[#allocation21 + $0xac8] sm:$0xff]  ;;  %v15724_v30 = vcombine.high %v3329_v2, %v3333_v22 }
 0x630   :  { %9589 = vmatprep.subr.bf16.mxu1 %v15670_v7  ;;  %v3334_v24 = vld [vmem:[#allocation21 + $0xae8] sm:$0xff]  ;;  %v15715_v7 = vcombine.low %v3321_v12, %v3325_v8 }
 0x631   :  { %v15726_v25 = vcombine.high %v3330_v23, %v3334_v24  ;;  %v15725_v43 = vcombine.low %v3330_v23, %v3334_v24  ;;  %v18754_v23 = vpack.c.bf16 %v18731_v47, %v18731_v47 }
 0x632   :  { %9262 = vmatpush1.bf16.msra.mxu0 %v15667_v31  ;;  %v3341_v31 = vld [vmem:[#allocation21 + $0xb20] sm:$0xff] }
 0x633   :  { %9590 = vmatpush1.bf16.msra.mxu1 %v15669_v33  ;;  %9263 = vmatprep.subr.bf16.mxu0 %v15676_v34  ;;  %v3338_v33 = vld [vmem:[#allocation21 + $0xb08] sm:$0xff]  ;;  %v15732_v20 = vcombine.high %v3337_v17, %v3341_v31 }
 0x634   :  { %9591 = vmatprep.subr.bf16.mxu1 %v15678_v11  ;;  %v3342_v34 = vld [vmem:[#allocation21 + $0xb28] sm:$0xff]  ;;  %v15723_v11 = vcombine.low %v3329_v2, %v3333_v22 }
 0x635   :  { %v15734_v37 = vcombine.high %v3338_v33, %v3342_v34  ;;  %v15733_v28 = vcombine.low %v3338_v33, %v3342_v34  ;;  %v3378_v2 = vld [vmem:[#allocation21 + $0xc48] sm:$0xff] }
 0x636   :  { %9264 = vmatpush1.bf16.msra.mxu0 %v15675_v39  ;;  %v3349_v39 = vld [vmem:[#allocation21 + $0xb60] sm:$0xff]  ;;  %v3382_v22 = vld [vmem:[#allocation21 + $0xc68] sm:$0xff] }
 0x637   :  { %9592 = vmatpush1.bf16.msra.mxu1 %v15677_v42  ;;  %9265 = vmatprep.subr.bf16.mxu0 %v15684_v44  ;;  %v3346_v42 = vld [vmem:[#allocation21 + $0xb48] sm:$0xff]  ;;  %v15740_v48 = vcombine.high %v3345_v4, %v3349_v39  ;;  %v15773_v47 = vcombine.low %v3378_v2, %v3382_v22 }
 0x638   :  { %9593 = vmatprep.subr.bf16.mxu1 %v15686_v45  ;;  %v3350_v44 = vld [vmem:[#allocation21 + $0xb68] sm:$0xff]  ;;  %v15731_v45 = vcombine.low %v3337_v17, %v3341_v31  ;;  %v15774_v17 = vcombine.high %v3378_v2, %v3382_v22  ;;  %v3433_v22 = vld [vmem:[#allocation21 + $0xe00] sm:$0xff] }
 0x639   :  { %v15742_v49 = vcombine.high %v3346_v42, %v3350_v44  ;;  %v15741_v59 = vcombine.low %v3346_v42, %v3350_v44  ;;  %v3386_v31 = vld [vmem:[#allocation21 + $0xc88] sm:$0xff] }
 0x63a   :  { %9266 = vmatpush1.bf16.msra.mxu0 %v15683_v32  ;;  %v3357_v32 = vld [vmem:[#allocation21 + $0xba0] sm:$0xff]  ;;  %v3390_v33 = vld [vmem:[#allocation21 + $0xca8] sm:$0xff] }
 0x63b   :  { %9594 = vmatpush1.bf16.msra.mxu1 %v15685_v51  ;;  %9267 = vmatprep.subr.bf16.mxu0 %v15692_v55  ;;  %v3354_v51 = vld [vmem:[#allocation21 + $0xb88] sm:$0xff]  ;;  %v15748_v18 = vcombine.high %v3353_v50, %v3357_v32  ;;  %v15747_v13 = vcombine.low %v3353_v50, %v3357_v32  ;;  %v15781_v44 = vcombine.low %v3386_v31, %v3390_v33 }
 0x63c   :  { %9595 = vmatprep.subr.bf16.mxu1 %v15694_v15  ;;  %v3358_v55 = vld [vmem:[#allocation21 + $0xba8] sm:$0xff]  ;;  %v15739_v15 = vcombine.low %v3345_v4, %v3349_v39 }
 0x63d   :  { %v15750_v21 = vcombine.high %v3354_v51, %v3358_v55  ;;  %v15749_v26 = vcombine.low %v3354_v51, %v3358_v55  ;;  %v3394_v4 = vld [vmem:[#allocation21 + $0xcc8] sm:$0xff] }
 0x63e   :  { %9268 = vmatpush1.bf16.msra.mxu0 %v15691_v40  ;;  %v3365_v40 = vld [vmem:[#allocation21 + $0xbe0] sm:$0xff]  ;;  %v3398_v39 = vld [vmem:[#allocation21 + $0xce8] sm:$0xff] }
 0x63f   :  { %9596 = vmatpush1.bf16.msra.mxu1 %v15693_v57  ;;  %9269 = vmatprep.subr.bf16.mxu0 %v15700_v61  ;;  %v3362_v57 = vld [vmem:[#allocation21 + $0xbc8] sm:$0xff]  ;;  %v15756_v3 = vcombine.high %v3361_v56, %v3365_v40  ;;  %v15755_v8 = vcombine.low %v3361_v56, %v3365_v40  ;;  %v15789_v55 = vcombine.low %v3394_v4, %v3398_v39 }
 0x640   :  { %9597 = vmatprep.subr.bf16.mxu1 %v15702_v0  ;;  %v3366_v61 = vld [vmem:[#allocation21 + $0xbe8] sm:$0xff]  ;;  %v2902_v0 = vcombine.high %v18727_v35, %v18727_v35 }
 0x641   :  { %v15758_v5 = vcombine.high %v3362_v57, %v3366_v61  ;;  %v15757_v35 = vcombine.low %v3362_v57, %v3366_v61  ;;  %v3402_v50 = vld [vmem:[#allocation21 + $0xd08] sm:$0xff] }
 0x642   :  { %9270 = vmatpush1.bf16.msra.mxu0 %v15699_v6  ;;  %v3369_v6 = vld [vmem:[#allocation21 + $0xc00] sm:$0xff]  ;;  %v18748_v12 = vrot.slane %v2902_v0, %v18701_v29  ;;  %v3406_v32 = vld [vmem:[#allocation21 + $0xd28] sm:$0xff] }
 0x643   :  { %9598 = vmatpush1.bf16.msra.mxu1 %v15701_v9  ;;  %9271 = vmatprep.subr.bf16.mxu0 %v15708_v52  ;;  %v3373_v9 = vld [vmem:[#allocation21 + $0xc20] sm:$0xff]  ;;  %v3370_v52 = vld [vmem:[#allocation21 + $0xc08] sm:$0xff]  ;;  %v15797_v61 = vcombine.low %v3402_v50, %v3406_v32 }
 0x644   :  { %9599 = vmatprep.subr.bf16.mxu1 %v15710_v10  ;;  %v3374_v10 = vld [vmem:[#allocation21 + $0xc28] sm:$0xff]  ;;  %v15764_v14 = vcombine.high %v3369_v6, %v3373_v9 }
 0x645   :  { %v15766_v1 = vcombine.high %v3370_v52, %v3374_v10  ;;  %v15765_v24 = vcombine.low %v3370_v52, %v3374_v10  ;;  %v3410_v56 = vld [vmem:[#allocation21 + $0xd48] sm:$0xff] }
 0x646   :  { %9272 = vmatpush1.bf16.msra.mxu0 %v15707_v41  ;;  %v2918_v41 = vcombine.high %v18748_v12, %v18748_v12  ;;  %v3414_v40 = vld [vmem:[#allocation21 + $0xd68] sm:$0xff] }
 0x647   :  { %9600 = vmatpush1.bf16.msra.mxu1 %v15709_v38  ;;  %9273 = vmatprep.subr.bf16.mxu0 %v15716_v16  ;;  %v3377_v38 = vld [vmem:[#allocation21 + $0xc40] sm:$0xff]  ;;  %v15805_v52 = vcombine.low %v3410_v56, %v3414_v40 }
 0x648   :  { %9601 = vmatprep.subr.bf16.mxu1 %v15718_v46  ;;  %v3381_v16 = vld [vmem:[#allocation21 + $0xc60] sm:$0xff]  ;;  %v15763_v46 = vcombine.low %v3369_v6, %v3373_v9  ;;  %v3422_v6 = vld [vmem:[#allocation21 + $0xda8] sm:$0xff] }
 0x649   :  { %v15771_v34 = vcombine.low %v3377_v38, %v3381_v16 }
 0x64a   :  { %9274 = vmatpush1.bf16.msra.mxu0 %v15715_v7  ;;  %v15772_v7 = vcombine.high %v3377_v38, %v3381_v16 }
 0x64b   :  { %9602 = vmatpush1.bf16.msra.mxu1 %v15717_v27  ;;  %9275 = vmatprep.subr.bf16.mxu0 %v15724_v30  ;;  %v3385_v27 = vld [vmem:[#allocation21 + $0xc80] sm:$0xff] }
 0x64c   :  { %9603 = vmatprep.subr.bf16.mxu1 %v15726_v25  ;;  %v3389_v30 = vld [vmem:[#allocation21 + $0xca0] sm:$0xff]  ;;  %v18757_v25 = vpack.c.bf16 %v2918_v41, %v2918_v41  ;;  %v3430_v41 = vld [vmem:[#allocation21 + $0xde8] sm:$0xff] }
 0x64d   :  { %v15779_v42 = vcombine.low %v3385_v27, %v3389_v30 }
 0x64e   :  { %9276 = vmatpush1.bf16.msra.mxu0 %v15723_v11  ;;  %v15780_v11 = vcombine.high %v3385_v27, %v3389_v30  ;;  %v3438_v27 = vld [vmem:[#allocation21 + $0xe28] sm:$0xff] }
 0x64f   :  { %9604 = vmatpush1.bf16.msra.mxu1 %v15725_v43  ;;  %9277 = vmatprep.subr.bf16.mxu0 %v15732_v20  ;;  %v15782_v43 = vcombine.high %v3386_v31, %v3390_v33  ;;  %v3393_v20 = vld [vmem:[#allocation21 + $0xcc0] sm:$0xff] }
 0x650   :  { %9605 = vmatprep.subr.bf16.mxu1 %v15734_v37  ;;  %v3397_v37 = vld [vmem:[#allocation21 + $0xce0] sm:$0xff] }
 0x651   :  { %v15787_v51 = vcombine.low %v3393_v20, %v3397_v37 }
 0x652   :  { %9278 = vmatpush1.bf16.msra.mxu0 %v15731_v45  ;;  %v15788_v45 = vcombine.high %v3393_v20, %v3397_v37 }
 0x653   :  { %9606 = vmatpush1.bf16.msra.mxu1 %v15733_v28  ;;  %9279 = vmatprep.subr.bf16.mxu0 %v15740_v48  ;;  %v15790_v28 = vcombine.high %v3394_v4, %v3398_v39  ;;  %v3401_v48 = vld [vmem:[#allocation21 + $0xd00] sm:$0xff] }
 0x654   :  { %9607 = vmatprep.subr.bf16.mxu1 %v15742_v49  ;;  %v3405_v49 = vld [vmem:[#allocation21 + $0xd20] sm:$0xff] }
 0x655   :  { %v15795_v57 = vcombine.low %v3401_v48, %v3405_v49 }
 0x656   :  { %9280 = vmatpush1.bf16.msra.mxu0 %v15739_v15  ;;  %v15796_v15 = vcombine.high %v3401_v48, %v3405_v49 }
 0x657   :  { %9608 = vmatpush1.bf16.msra.mxu1 %v15741_v59  ;;  %9281 = vmatprep.subr.bf16.mxu0 %v15748_v18  ;;  %v15798_v59 = vcombine.high %v3402_v50, %v3406_v32  ;;  %v3409_v18 = vld [vmem:[#allocation21 + $0xd40] sm:$0xff] }
 0x658   :  { %9609 = vmatprep.subr.bf16.mxu1 %v15750_v21  ;;  %v3413_v21 = vld [vmem:[#allocation21 + $0xd60] sm:$0xff] }
 0x659   :  { %v15804_v0 = vcombine.high %v3409_v18, %v3413_v21  ;;  %v15803_v9 = vcombine.low %v3409_v18, %v3413_v21 }
 0x65a   :  { %9282 = vmatpush1.bf16.msra.mxu0 %v15747_v13  ;;  %v15806_v13 = vcombine.high %v3410_v56, %v3414_v40 }
 0x65b   :  { %9610 = vmatpush1.bf16.msra.mxu1 %v15749_v26  ;;  %9283 = vmatprep.subr.bf16.mxu0 %v15756_v3  ;;  %v3417_v26 = vld [vmem:[#allocation21 + $0xd80] sm:$0xff] }
 0x65c   :  { %9611 = vmatprep.subr.bf16.mxu1 %v15758_v5  ;;  %v3421_v3 = vld [vmem:[#allocation21 + $0xda0] sm:$0xff]  ;;  %v3418_v5 = vld [vmem:[#allocation21 + $0xd88] sm:$0xff] }
 0x65d   :  { %v15812_v10 = vcombine.high %v3417_v26, %v3421_v3  ;;  %v15811_v38 = vcombine.low %v3417_v26, %v3421_v3  ;;  %v15813_v16 = vcombine.low %v3418_v5, %v3422_v6 }
 0x65e   :  { %9284 = vmatpush1.bf16.msra.mxu0 %v15755_v8  ;;  %v15814_v8 = vcombine.high %v3418_v5, %v3422_v6 }
 0x65f   :  { %9612 = vmatpush1.bf16.msra.mxu1 %v15757_v35  ;;  %9294 = vmatprep.subr.bf16.mxu0 %v15764_v14  ;;  %v3425_v35 = vld [vmem:[#allocation21 + $0xdc0] sm:$0xff] }
 0x660   :  { %9622 = vmatprep.subr.bf16.mxu1 %v15766_v1  ;;  %v3429_v14 = vld [vmem:[#allocation21 + $0xde0] sm:$0xff]  ;;  %v3426_v1 = vld [vmem:[#allocation21 + $0xdc8] sm:$0xff] }
 0x661   :  { %9286 = vmatmul.mubr.bf16.vlgmr.msra.gmra.mrb[48].mxu0 %v18754_v23  ;;  %v15822_v2 = vcombine.high %v3426_v1, %v3430_v41  ;;  %v15819_v30 = vcombine.low %v3425_v35, %v3429_v14 }
 0x662   :  { %9614 = vmatmul.mubr.bf16.vlgmr.msra.gmra.mrb[56].mxu1 %v18754_v23  ;;  %9295 = vmatpush1.bf16.msra.mxu0 %v15763_v46  ;;  %v15820_v46 = vcombine.high %v3425_v35, %v3429_v14 }
 0x663   :  { %9326 = vmatprep.mubr.bf16.mxu0 %v18757_v25  ;;  %9623 = vmatpush1.bf16.msra.mxu1 %v15765_v24  ;;  %v3437_v24 = vld [vmem:[#allocation21 + $0xe20] sm:$0xff] }
 0x664   :  { %9654 = vmatprep.mubr.bf16.mxu1 %v18757_v25  ;;  %9296 = vmatprep.subr.bf16.mxu0 %v15772_v7  ;;  %v3434_v7 = vld [vmem:[#allocation21 + $0xe08] sm:$0xff]  ;;  %v15828_v31 = vcombine.high %v3433_v22, %v3437_v24  ;;  %v15827_v20 = vcombine.low %v3433_v22, %v3437_v24 }
 0x665   :  { %9624 = vmatprep.subr.bf16.mxu1 %v15774_v17  ;;  %v15821_v17 = vcombine.low %v3426_v1, %v3430_v41  ;;  %v15830_v33 = vcombine.high %v3434_v7, %v3438_v27  ;;  %v15829_v37 = vcombine.low %v3434_v7, %v3438_v27 }
 0x666   :  { %9297 = vmatpush1.bf16.msra.mxu0 %v15771_v34  ;;  %v3441_v34 = vld [vmem:[#allocation21 + $0xe40] sm:$0xff] }
 0x667   :  { %9625 = vmatpush1.bf16.msra.mxu1 %v15773_v47  ;;  %9298 = vmatprep.subr.bf16.mxu0 %v15780_v11  ;;  %v3445_v47 = vld [vmem:[#allocation21 + $0xe60] sm:$0xff]  ;;  %v3442_v11 = vld [vmem:[#allocation21 + $0xe48] sm:$0xff] }
 0x668   :  { %9626 = vmatprep.subr.bf16.mxu1 %v15782_v43  ;;  %v3446_v43 = vld [vmem:[#allocation21 + $0xe68] sm:$0xff]  ;;  %v15836_v4 = vcombine.high %v3441_v34, %v3445_v47  ;;  %v15835_v48 = vcombine.low %v3441_v34, %v3445_v47 }
 0x669   :  { %v15838_v39 = vcombine.high %v3442_v11, %v3446_v43  ;;  %v15837_v49 = vcombine.low %v3442_v11, %v3446_v43  ;;  %v18762_v47 = vld [vmem:[#allocation6 + $0x10] sm:$0xff] }
 0x66a   :  { %9299 = vmatpush1.bf16.msra.mxu0 %v15779_v42  ;;  %v3449_v42 = vld [vmem:[#allocation21 + $0xe80] sm:$0xff] }
 0x66b   :  { %9627 = vmatpush1.bf16.msra.mxu1 %v15781_v44  ;;  %9300 = vmatprep.subr.bf16.mxu0 %v15788_v45  ;;  %v3453_v44 = vld [vmem:[#allocation21 + $0xea0] sm:$0xff]  ;;  %v3450_v45 = vld [vmem:[#allocation21 + $0xe88] sm:$0xff] }
 0x66c   :  { %9628 = vmatprep.subr.bf16.mxu1 %v15790_v28  ;;  %v3454_v28 = vld [vmem:[#allocation21 + $0xea8] sm:$0xff]  ;;  %v15844_v50 = vcombine.high %v3449_v42, %v3453_v44  ;;  %v15843_v18 = vcombine.low %v3449_v42, %v3453_v44  ;;  %v18766_v44 = vrot.slane %v18762_v47, %v18701_v29 }
 0x66d   :  { %v15846_v32 = vcombine.high %v3450_v45, %v3454_v28  ;;  %v15845_v21 = vcombine.low %v3450_v45, %v3454_v28  ;;  %v3502_v42 = vld [vmem:[#allocation21 + $0x1028] sm:$0xff] }
 0x66e   :  { %9301 = vmatpush1.bf16.msra.mxu0 %v15787_v51  ;;  %v3457_v51 = vld [vmem:[#allocation21 + $0xec0] sm:$0xff] }
 0x66f   :  { %9629 = vmatpush1.bf16.msra.mxu1 %v15789_v55  ;;  %9302 = vmatprep.subr.bf16.mxu0 %v15796_v15  ;;  %v3461_v55 = vld [vmem:[#allocation21 + $0xee0] sm:$0xff]  ;;  %v3458_v15 = vld [vmem:[#allocation21 + $0xec8] sm:$0xff] }
 0x670   :  { %9630 = vmatprep.subr.bf16.mxu1 %v15798_v59  ;;  %v3462_v59 = vld [vmem:[#allocation21 + $0xee8] sm:$0xff]  ;;  %v15852_v56 = vcombine.high %v3457_v51, %v3461_v55  ;;  %v15851_v26 = vcombine.low %v3457_v51, %v3461_v55  ;;  %v3509_v51 = vld [vmem:[#allocation21 + $0x1060] sm:$0xff] }
 0x671   :  { %v15854_v40 = vcombine.high %v3458_v15, %v3462_v59  ;;  %v15853_v3 = vcombine.low %v3458_v15, %v3462_v59  ;;  %v3506_v15 = vld [vmem:[#allocation21 + $0x1048] sm:$0xff] }
 0x672   :  { %9303 = vmatpush1.bf16.msra.mxu0 %v15795_v57  ;;  %v3465_v57 = vld [vmem:[#allocation21 + $0xf00] sm:$0xff]  ;;  %v3510_v59 = vld [vmem:[#allocation21 + $0x1068] sm:$0xff] }
 0x673   :  { %9631 = vmatpush1.bf16.msra.mxu1 %v15797_v61  ;;  %9304 = vmatprep.subr.bf16.mxu0 %v15804_v0  ;;  %v3469_v61 = vld [vmem:[#allocation21 + $0xf20] sm:$0xff]  ;;  %v3466_v0 = vld [vmem:[#allocation21 + $0xf08] sm:$0xff] }
 0x674   :  { %9632 = vmatprep.subr.bf16.mxu1 %v15806_v13  ;;  %v3470_v13 = vld [vmem:[#allocation21 + $0xf28] sm:$0xff]  ;;  %v15860_v5 = vcombine.high %v3465_v57, %v3469_v61  ;;  %v15859_v35 = vcombine.low %v3465_v57, %v3469_v61  ;;  %v3517_v57 = vld [vmem:[#allocation21 + $0x10a0] sm:$0xff] }
 0x675   :  { %v15862_v6 = vcombine.high %v3466_v0, %v3470_v13  ;;  %v15861_v14 = vcombine.low %v3466_v0, %v3470_v13  ;;  %v15902_v0 = vcombine.high %v3506_v15, %v3510_v59  ;;  %v3514_v13 = vld [vmem:[#allocation21 + $0x1088] sm:$0xff] }
 0x676   :  { %9305 = vmatpush1.bf16.msra.mxu0 %v15803_v9  ;;  %v3473_v9 = vld [vmem:[#allocation21 + $0xf40] sm:$0xff] }
 0x677   :  { %9633 = vmatpush1.bf16.msra.mxu1 %v15805_v52  ;;  %9306 = vmatprep.subr.bf16.mxu0 %v15812_v10  ;;  %v3477_v52 = vld [vmem:[#allocation21 + $0xf60] sm:$0xff]  ;;  %v3474_v10 = vld [vmem:[#allocation21 + $0xf48] sm:$0xff] }
 0x678   :  { %9634 = vmatprep.subr.bf16.mxu1 %v15814_v8  ;;  %v3478_v8 = vld [vmem:[#allocation21 + $0xf68] sm:$0xff]  ;;  %v15868_v1 = vcombine.high %v3473_v9, %v3477_v52  ;;  %v15867_v22 = vcombine.low %v3473_v9, %v3477_v52  ;;  %v3521_v9 = vld [vmem:[#allocation21 + $0x10c0] sm:$0xff] }
 0x679   :  { %v15870_v41 = vcombine.high %v3474_v10, %v3478_v8  ;;  %v15869_v24 = vcombine.low %v3474_v10, %v3478_v8  ;;  %v3525_v52 = vld [vmem:[#allocation21 + $0x10e0] sm:$0xff]  ;;  %v3522_v10 = vld [vmem:[#allocation21 + $0x10c8] sm:$0xff] }
 0x67a   :  { %9307 = vmatpush1.bf16.msra.mxu0 %v15811_v38  ;;  %v3481_v38 = vld [vmem:[#allocation21 + $0xf80] sm:$0xff]  ;;  %v3526_v8 = vld [vmem:[#allocation21 + $0x10e8] sm:$0xff] }
 0x67b   :  { %9635 = vmatpush1.bf16.msra.mxu1 %v15813_v16  ;;  %9308 = vmatprep.subr.bf16.mxu0 %v15820_v46  ;;  %v3485_v16 = vld [vmem:[#allocation21 + $0xfa0] sm:$0xff]  ;;  %v3482_v46 = vld [vmem:[#allocation21 + $0xf88] sm:$0xff] }
 0x67c   :  { %9636 = vmatprep.subr.bf16.mxu1 %v15822_v2  ;;  %v3486_v2 = vld [vmem:[#allocation21 + $0xfa8] sm:$0xff]  ;;  %v15876_v7 = vcombine.high %v3481_v38, %v3485_v16  ;;  %v15875_v34 = vcombine.low %v3481_v38, %v3485_v16  ;;  %v3529_v38 = vld [vmem:[#allocation21 + $0x1100] sm:$0xff] }
 0x67d   :  { %v15878_v27 = vcombine.high %v3482_v46, %v3486_v2  ;;  %v15877_v11 = vcombine.low %v3482_v46, %v3486_v2  ;;  %v3533_v16 = vld [vmem:[#allocation21 + $0x1120] sm:$0xff]  ;;  %v3530_v46 = vld [vmem:[#allocation21 + $0x1108] sm:$0xff] }
 0x67e   :  { %9309 = vmatpush1.bf16.msra.mxu0 %v15819_v30  ;;  %v3489_v30 = vld [vmem:[#allocation21 + $0xfc0] sm:$0xff]  ;;  %v3534_v2 = vld [vmem:[#allocation21 + $0x1128] sm:$0xff] }
 0x67f   :  { %9637 = vmatpush1.bf16.msra.mxu1 %v15821_v17  ;;  %9310 = vmatprep.subr.bf16.mxu0 %v15828_v31  ;;  %v3493_v17 = vld [vmem:[#allocation21 + $0xfe0] sm:$0xff]  ;;  %v3490_v31 = vld [vmem:[#allocation21 + $0xfc8] sm:$0xff] }
 0x680   :  { %9638 = vmatprep.subr.bf16.mxu1 %v15830_v33  ;;  %v3494_v33 = vld [vmem:[#allocation21 + $0xfe8] sm:$0xff]  ;;  %v15884_v43 = vcombine.high %v3489_v30, %v3493_v17  ;;  %v15883_v45 = vcombine.low %v3489_v30, %v3493_v17  ;;  %v3537_v30 = vld [vmem:[#allocation21 + $0x1140] sm:$0xff] }
 0x681   :  { %v15885_v28 = vcombine.low %v3490_v31, %v3494_v33  ;;  %v3541_v17 = vld [vmem:[#allocation21 + $0x1160] sm:$0xff] }
 0x682   :  { %9311 = vmatpush1.bf16.msra.mxu0 %v15827_v20  ;;  %v15886_v20 = vcombine.high %v3490_v31, %v3494_v33  ;;  %v3538_v31 = vld [vmem:[#allocation21 + $0x1148] sm:$0xff] }
 0x683   :  { %9639 = vmatpush1.bf16.msra.mxu1 %v15829_v37  ;;  %9312 = vmatprep.subr.bf16.mxu0 %v15836_v4  ;;  %v3497_v37 = vld [vmem:[#allocation21 + $0x1000] sm:$0xff]  ;;  %v3542_v33 = vld [vmem:[#allocation21 + $0x1168] sm:$0xff] }
 0x684   :  { %9640 = vmatprep.subr.bf16.mxu1 %v15838_v39  ;;  %v3501_v4 = vld [vmem:[#allocation21 + $0x1020] sm:$0xff]  ;;  %v3498_v39 = vld [vmem:[#allocation21 + $0x1008] sm:$0xff] }
 0x685   :  { %v15891_v55 = vcombine.low %v3497_v37, %v3501_v4 }
 0x686   :  { %9313 = vmatpush1.bf16.msra.mxu0 %v15835_v48  ;;  %v15892_v48 = vcombine.high %v3497_v37, %v3501_v4  ;;  %v3545_v37 = vld [vmem:[#allocation21 + $0x1180] sm:$0xff] }
 0x687   :  { %9641 = vmatpush1.bf16.msra.mxu1 %v15837_v49  ;;  %9314 = vmatprep.subr.bf16.mxu0 %v15844_v50  ;;  %v15894_v49 = vcombine.high %v3498_v39, %v3502_v42  ;;  %v2934_v50 = vcombine.high %v18766_v44, %v18766_v44  ;;  %v3549_v4 = vld [vmem:[#allocation21 + $0x11a0] sm:$0xff] }
 0x688   :  { %9642 = vmatprep.subr.bf16.mxu1 %v15846_v32  ;;  %v3505_v32 = vld [vmem:[#allocation21 + $0x1040] sm:$0xff] }
 0x689   :  { %v18775_v61 = vpack.c.bf16 %v2934_v50, %v2934_v50  ;;  %v3553_v50 = vld [vmem:[#allocation21 + $0x11c0] sm:$0xff] }
 0x68a   :  { %9315 = vmatpush1.bf16.msra.mxu0 %v15843_v18  ;;  %v18772_v18 = vpack.c.bf16 %v18748_v12, %v18748_v12  ;;  %v15901_v12 = vcombine.low %v3506_v15, %v3510_v59  ;;  %v15939_v15 = vcombine.low %v3545_v37, %v3549_v4 }
 0x68b   :  { %9643 = vmatpush1.bf16.msra.mxu1 %v15845_v21  ;;  %9316 = vmatprep.subr.bf16.mxu0 %v15852_v56  ;;  %v15893_v21 = vcombine.low %v3498_v39, %v3502_v42  ;;  %v15900_v56 = vcombine.high %v3505_v32, %v3509_v51  ;;  %v3546_v39 = vld [vmem:[#allocation21 + $0x1188] sm:$0xff] }
 0x68c   :  { %9644 = vmatprep.subr.bf16.mxu1 %v15854_v40  ;;  %v3513_v40 = vld [vmem:[#allocation21 + $0x1080] sm:$0xff]  ;;  %v3550_v42 = vld [vmem:[#allocation21 + $0x11a8] sm:$0xff] }
 0x68d   :  { %v15941_v59 = vcombine.low %v3546_v39, %v3550_v42 }
 0x68e   :  { %9317 = vmatpush1.bf16.msra.mxu0 %v15851_v26  ;;  %v3518_v26 = vld [vmem:[#allocation21 + $0x10a8] sm:$0xff] }
 0x68f   :  { %9645 = vmatpush1.bf16.msra.mxu1 %v15853_v3  ;;  %9318 = vmatprep.subr.bf16.mxu0 %v15860_v5  ;;  %v15899_v3 = vcombine.low %v3505_v32, %v3509_v51  ;;  %v15908_v5 = vcombine.high %v3513_v40, %v3517_v57  ;;  %v3557_v32 = vld [vmem:[#allocation21 + $0x11e0] sm:$0xff]  ;;  %v3554_v51 = vld [vmem:[#allocation21 + $0x11c8] sm:$0xff] }
 0x690   :  { %9646 = vmatprep.subr.bf16.mxu1 %v15862_v6  ;;  %v15910_v6 = vcombine.high %v3514_v13, %v3518_v26 }
 0x692   :  { %9319 = vmatpush1.bf16.msra.mxu0 %v15859_v35  ;;  %v15907_v35 = vcombine.low %v3513_v40, %v3517_v57  ;;  %v3561_v40 = vld [vmem:[#allocation21 + $0x1200] sm:$0xff] }
 0x693   :  { %9647 = vmatpush1.bf16.msra.mxu1 %v15861_v14  ;;  %9320 = vmatprep.subr.bf16.mxu0 %v15868_v1  ;;  %v15909_v14 = vcombine.low %v3514_v13, %v3518_v26  ;;  %v15916_v1 = vcombine.high %v3521_v9, %v3525_v52  ;;  %v3565_v57 = vld [vmem:[#allocation21 + $0x1220] sm:$0xff]  ;;  %v3566_v13 = vld [vmem:[#allocation21 + $0x1228] sm:$0xff]  ;;  %v15947_v26 = vcombine.low %v3553_v50, %v3557_v32 }
 0x694   :  { %9648 = vmatprep.subr.bf16.mxu1 %v15870_v41  ;;  %v15918_v41 = vcombine.high %v3522_v10, %v3526_v8 }
 0x696   :  { %9321 = vmatpush1.bf16.msra.mxu0 %v15867_v22  ;;  %v15915_v22 = vcombine.low %v3521_v9, %v3525_v52  ;;  %v3573_v9 = vld [vmem:[#allocation21 + $0x1260] sm:$0xff]  ;;  %v3570_v52 = vld [vmem:[#allocation21 + $0x1248] sm:$0xff] }
 0x697   :  { %9649 = vmatpush1.bf16.msra.mxu1 %v15869_v24  ;;  %9322 = vmatprep.subr.bf16.mxu0 %v15876_v7  ;;  %v15917_v24 = vcombine.low %v3522_v10, %v3526_v8  ;;  %v15924_v7 = vcombine.high %v3529_v38, %v3533_v16  ;;  %v3574_v10 = vld [vmem:[#allocation21 + $0x1268] sm:$0xff]  ;;  %v15955_v8 = vcombine.low %v3561_v40, %v3565_v57 }
 0x698   :  { %9650 = vmatprep.subr.bf16.mxu1 %v15878_v27  ;;  %v15926_v27 = vcombine.high %v3530_v46, %v3534_v2 }
 0x69a   :  { %9323 = vmatpush1.bf16.msra.mxu0 %v15875_v34  ;;  %v15923_v34 = vcombine.low %v3529_v38, %v3533_v16  ;;  %v3581_v38 = vld [vmem:[#allocation21 + $0x12a0] sm:$0xff]  ;;  %v3578_v16 = vld [vmem:[#allocation21 + $0x1288] sm:$0xff] }
 0x69b   :  { %9651 = vmatpush1.bf16.msra.mxu1 %v15877_v11  ;;  %9324 = vmatprep.subr.bf16.mxu0 %v15884_v43  ;;  %v15925_v11 = vcombine.low %v3530_v46, %v3534_v2  ;;  %v15932_v43 = vcombine.high %v3537_v30, %v3541_v17  ;;  %v3582_v46 = vld [vmem:[#allocation21 + $0x12a8] sm:$0xff] }
 0x69c   :  { %9652 = vmatprep.subr.bf16.mxu1 %v15886_v20  ;;  %v15934_v20 = vcombine.high %v3538_v31, %v3542_v33 }
 0x69e   :  { %9325 = vmatpush1.bf16.msra.mxu0 %v15883_v45  ;;  %v15931_v45 = vcombine.low %v3537_v30, %v3541_v17  ;;  %v3589_v30 = vld [vmem:[#allocation21 + $0x12e0] sm:$0xff]  ;;  %v3586_v17 = vld [vmem:[#allocation21 + $0x12c8] sm:$0xff] }
 0x69f   :  { %9653 = vmatpush1.bf16.msra.mxu1 %v15885_v28  ;;  %9335 = vmatprep.subr.bf16.mxu0 %v15892_v48  ;;  %v15933_v28 = vcombine.low %v3538_v31, %v3542_v33  ;;  %v15940_v48 = vcombine.high %v3545_v37, %v3549_v4  ;;  %v3590_v31 = vld [vmem:[#allocation21 + $0x12e8] sm:$0xff]  ;;  %v3597_v37 = vld [vmem:[#allocation21 + $0x1320] sm:$0xff] }
 0x6a0   :  { %9663 = vmatprep.subr.bf16.mxu1 %v15894_v49  ;;  %v15942_v49 = vcombine.high %v3546_v39, %v3550_v42  ;;  %v3594_v4 = vld [vmem:[#allocation21 + $0x1308] sm:$0xff] }
 0x6a1   :  { %9327 = vmatmul.mubr.bf16.vlgmr.msra.gmra.mrb[48].mxu0 %v18772_v18  ;;  %v3598_v39 = vld [vmem:[#allocation21 + $0x1328] sm:$0xff] }
 0x6a2   :  { %9655 = vmatmul.mubr.bf16.vlgmr.msra.gmra.mrb[56].mxu1 %v18772_v18  ;;  %9336 = vmatpush1.bf16.msra.mxu0 %v15891_v55  ;;  %v3558_v55 = vld [vmem:[#allocation21 + $0x11e8] sm:$0xff] }
 0x6a3   :  { %9367 = vmatprep.mubr.bf16.mxu0 %v18775_v61  ;;  %9664 = vmatpush1.bf16.msra.mxu1 %v15893_v21  ;;  %v15948_v21 = vcombine.high %v3553_v50, %v3557_v32  ;;  %v3605_v50 = vld [vmem:[#allocation21 + $0x1360] sm:$0xff]  ;;  %v3602_v32 = vld [vmem:[#allocation21 + $0x1348] sm:$0xff] }
 0x6a4   :  { %9695 = vmatprep.mubr.bf16.mxu1 %v18775_v61  ;;  %9337 = vmatprep.subr.bf16.mxu0 %v15900_v56  ;;  %v15950_v56 = vcombine.high %v3554_v51, %v3558_v55 }
 0x6a5   :  { %9665 = vmatprep.subr.bf16.mxu1 %v15902_v0  ;;  %v3562_v0 = vld [vmem:[#allocation21 + $0x1208] sm:$0xff] }
 0x6a6   :  { %9338 = vmatpush1.bf16.msra.mxu0 %v15899_v3  ;;  %v15949_v3 = vcombine.low %v3554_v51, %v3558_v55  ;;  %v3606_v51 = vld [vmem:[#allocation21 + $0x1368] sm:$0xff] }
 0x6a7   :  { %9666 = vmatpush1.bf16.msra.mxu1 %v15901_v12  ;;  %9339 = vmatprep.subr.bf16.mxu0 %v15908_v5  ;;  %v15956_v12 = vcombine.high %v3561_v40, %v3565_v57  ;;  %v15958_v5 = vcombine.high %v3562_v0, %v3566_v13  ;;  %v3613_v40 = vld [vmem:[#allocation21 + $0x13a0] sm:$0xff]  ;;  %v3610_v57 = vld [vmem:[#allocation21 + $0x1388] sm:$0xff] }
 0x6a8   :  { %9667 = vmatprep.subr.bf16.mxu1 %v15910_v6  ;;  %v3569_v6 = vld [vmem:[#allocation21 + $0x1240] sm:$0xff] }
 0x6a9   :  { %v15963_v2 = vcombine.low %v3569_v6, %v3573_v9 }
 0x6aa   :  { %9340 = vmatpush1.bf16.msra.mxu0 %v15907_v35  ;;  %v15957_v35 = vcombine.low %v3562_v0, %v3566_v13  ;;  %v3614_v0 = vld [vmem:[#allocation21 + $0x13a8] sm:$0xff] }
 0x6ab   :  { %9668 = vmatpush1.bf16.msra.mxu1 %v15909_v14  ;;  %9341 = vmatprep.subr.bf16.mxu0 %v15916_v1  ;;  %v15964_v14 = vcombine.high %v3569_v6, %v3573_v9  ;;  %v15966_v1 = vcombine.high %v3570_v52, %v3574_v10  ;;  %v3621_v6 = vld [vmem:[#allocation21 + $0x13e0] sm:$0xff]  ;;  %v3618_v9 = vld [vmem:[#allocation21 + $0x13c8] sm:$0xff] }
 0x6ac   :  { %9669 = vmatprep.subr.bf16.mxu1 %v15918_v41  ;;  %v3577_v41 = vld [vmem:[#allocation21 + $0x1280] sm:$0xff] }
 0x6ad   :  { %v15971_v33 = vcombine.low %v3577_v41, %v3581_v38 }
 0x6ae   :  { %9342 = vmatpush1.bf16.msra.mxu0 %v15915_v22  ;;  %v15965_v22 = vcombine.low %v3570_v52, %v3574_v10  ;;  %v3622_v52 = vld [vmem:[#allocation21 + $0x13e8] sm:$0xff]  ;;  %v2919_v10 = vcombine.high %v18762_v47, %v18762_v47 }
 0x6af   :  { %9670 = vmatpush1.bf16.msra.mxu1 %v15917_v24  ;;  %9343 = vmatprep.subr.bf16.mxu0 %v15924_v7  ;;  %v15972_v24 = vcombine.high %v3577_v41, %v3581_v38  ;;  %v15974_v7 = vcombine.high %v3578_v16, %v3582_v46  ;;  %v3625_v41 = vld [vmem:[#allocation21 + $0x1400] sm:$0xff]  ;;  %v16013_v47 = vcombine.low %v3618_v9, %v3622_v52 }
 0x6b0   :  { %9671 = vmatprep.subr.bf16.mxu1 %v15926_v27  ;;  %v3585_v27 = vld [vmem:[#allocation21 + $0x12c0] sm:$0xff] }
 0x6b1   :  { %v15979_v42 = vcombine.low %v3585_v27, %v3589_v30  ;;  %v3629_v38 = vld [vmem:[#allocation21 + $0x1420] sm:$0xff] }
 0x6b2   :  { %9344 = vmatpush1.bf16.msra.mxu0 %v15923_v34  ;;  %v15973_v34 = vcombine.low %v3578_v16, %v3582_v46  ;;  %v3626_v16 = vld [vmem:[#allocation21 + $0x1408] sm:$0xff] }
 0x6b3   :  { %9672 = vmatpush1.bf16.msra.mxu1 %v15925_v11  ;;  %9345 = vmatprep.subr.bf16.mxu0 %v15932_v43  ;;  %v15980_v11 = vcombine.high %v3585_v27, %v3589_v30  ;;  %v15982_v43 = vcombine.high %v3586_v17, %v3590_v31  ;;  %v3630_v46 = vld [vmem:[#allocation21 + $0x1428] sm:$0xff]  ;;  %v3633_v30 = vld [vmem:[#allocation21 + $0x1440] sm:$0xff] }
 0x6b4   :  { %9673 = vmatprep.subr.bf16.mxu1 %v15934_v20  ;;  %v3593_v20 = vld [vmem:[#allocation21 + $0x1300] sm:$0xff] }
 0x6b5   :  { %v15987_v55 = vcombine.low %v3593_v20, %v3597_v37 }
 0x6b6   :  { %9346 = vmatpush1.bf16.msra.mxu0 %v15931_v45  ;;  %v15981_v45 = vcombine.low %v3586_v17, %v3590_v31  ;;  %v3637_v17 = vld [vmem:[#allocation21 + $0x1460] sm:$0xff]  ;;  %v16019_v31 = vcombine.low %v3625_v41, %v3629_v38 }
 0x6b7   :  { %9674 = vmatpush1.bf16.msra.mxu1 %v15933_v28  ;;  %9347 = vmatprep.subr.bf16.mxu0 %v15940_v48  ;;  %v15988_v28 = vcombine.high %v3593_v20, %v3597_v37  ;;  %v15990_v48 = vcombine.high %v3594_v4, %v3598_v39  ;;  %v16028_v20 = vcombine.high %v3633_v30, %v3637_v17  ;;  %v3641_v37 = vld [vmem:[#allocation21 + $0x1480] sm:$0xff] }
 0x6b8   :  { %9675 = vmatprep.subr.bf16.mxu1 %v15942_v49  ;;  %v3601_v49 = vld [vmem:[#allocation21 + $0x1340] sm:$0xff] }
 0x6b9   :  { %v15995_v13 = vcombine.low %v3601_v49, %v3605_v50 }
 0x6ba   :  { %9348 = vmatpush1.bf16.msra.mxu0 %v15939_v15  ;;  %v15989_v15 = vcombine.low %v3594_v4, %v3598_v39  ;;  %v3645_v4 = vld [vmem:[#allocation21 + $0x14a0] sm:$0xff] }
 0x6bb   :  { %9676 = vmatpush1.bf16.msra.mxu1 %v15941_v59  ;;  %9349 = vmatprep.subr.bf16.mxu0 %v15948_v21  ;;  %v15996_v59 = vcombine.high %v3601_v49, %v3605_v50  ;;  %v15998_v21 = vcombine.high %v3602_v32, %v3606_v51  ;;  %v16036_v49 = vcombine.high %v3641_v37, %v3645_v4 }
 0x6bc   :  { %9677 = vmatprep.subr.bf16.mxu1 %v15950_v56  ;;  %v3609_v56 = vld [vmem:[#allocation21 + $0x1380] sm:$0xff] }
 0x6be   :  { %9350 = vmatpush1.bf16.msra.mxu0 %v15947_v26  ;;  %v15997_v26 = vcombine.low %v3602_v32, %v3606_v51  ;;  %v3649_v32 = vld [vmem:[#allocation21 + $0x14c0] sm:$0xff] }
 0x6bf   :  { %9678 = vmatpush1.bf16.msra.mxu1 %v15949_v3  ;;  %9351 = vmatprep.subr.bf16.mxu0 %v15956_v12  ;;  %v16004_v3 = vcombine.high %v3609_v56, %v3613_v40  ;;  %v16006_v12 = vcombine.high %v3610_v57, %v3614_v0  ;;  %v3653_v51 = vld [vmem:[#allocation21 + $0x14e0] sm:$0xff] }
 0x6c0   :  { %9679 = vmatprep.subr.bf16.mxu1 %v15958_v5  ;;  %v3617_v5 = vld [vmem:[#allocation21 + $0x13c0] sm:$0xff] }
 0x6c2   :  { %9352 = vmatpush1.bf16.msra.mxu0 %v15955_v8  ;;  %v16003_v8 = vcombine.low %v3609_v56, %v3613_v40  ;;  %v16044_v56 = vcombine.high %v3649_v32, %v3653_v51 }
 0x6c3   :  { %9680 = vmatpush1.bf16.msra.mxu1 %v15957_v35  ;;  %9353 = vmatprep.subr.bf16.mxu0 %v15964_v14  ;;  %v16005_v35 = vcombine.low %v3610_v57, %v3614_v0  ;;  %v16012_v14 = vcombine.high %v3617_v5, %v3621_v6  ;;  %v3657_v57 = vld [vmem:[#allocation21 + $0x1500] sm:$0xff] }
 0x6c4   :  { %9681 = vmatprep.subr.bf16.mxu1 %v15966_v1  ;;  %v16014_v1 = vcombine.high %v3618_v9, %v3622_v52  ;;  %v3661_v0 = vld [vmem:[#allocation21 + $0x1520] sm:$0xff] }
 0x6c5   :  { %v3665_v9 = vld [vmem:[#allocation21 + $0x1540] sm:$0xff] }
 0x6c6   :  { %9354 = vmatpush1.bf16.msra.mxu0 %v15963_v2  ;;  %v18783_v2 = vrot.slane %v2919_v10, %v18701_v29  ;;  %v3669_v52 = vld [vmem:[#allocation21 + $0x1560] sm:$0xff]  ;;  %v3666_v10 = vld [vmem:[#allocation21 + $0x1548] sm:$0xff] }
 0x6c7   :  { %9682 = vmatpush1.bf16.msra.mxu1 %v15965_v22  ;;  %9355 = vmatprep.subr.bf16.mxu0 %v15972_v24  ;;  %v16011_v22 = vcombine.low %v3617_v5, %v3621_v6  ;;  %v16020_v24 = vcombine.high %v3625_v41, %v3629_v38  ;;  %v16052_v5 = vcombine.high %v3657_v57, %v3661_v0  ;;  %v3673_v38 = vld [vmem:[#allocation21 + $0x1580] sm:$0xff] }
 0x6c8   :  { %9683 = vmatprep.subr.bf16.mxu1 %v15974_v7  ;;  %v16022_v7 = vcombine.high %v3626_v16, %v3630_v46  ;;  %v2935_v27 = vcombine.high %v18783_v2, %v18783_v2 }
 0x6ca   :  { %9356 = vmatpush1.bf16.msra.mxu0 %v15971_v33  ;;  %v3634_v33 = vld [vmem:[#allocation21 + $0x1448] sm:$0xff]  ;;  %v18792_v39 = vpack.c.bf16 %v2935_v27, %v2935_v27 }
 0x6cb   :  { %9684 = vmatpush1.bf16.msra.mxu1 %v15973_v34  ;;  %9357 = vmatprep.subr.bf16.mxu0 %v15980_v11  ;;  %v3638_v34 = vld [vmem:[#allocation21 + $0x1468] sm:$0xff]  ;;  %v18789_v11 = vpack.c.bf16 %v18766_v44, %v18766_v44 }
 0x6cc   :  { %9685 = vmatprep.subr.bf16.mxu1 %v15982_v43  ;;  %v16021_v43 = vcombine.low %v3626_v16, %v3630_v46  ;;  %v16029_v44 = vcombine.low %v3634_v33, %v3638_v34  ;;  %v3677_v16 = vld [vmem:[#allocation21 + $0x15a0] sm:$0xff]  ;;  %v3674_v46 = vld [vmem:[#allocation21 + $0x1588] sm:$0xff] }
 0x6ce   :  { %9358 = vmatpush1.bf16.msra.mxu0 %v15979_v42  ;;  %v16030_v42 = vcombine.high %v3634_v33, %v3638_v34  ;;  %v3686_v33 = vld [vmem:[#allocation21 + $0x15e8] sm:$0xff]  ;;  %v16067_v34 = vcombine.low %v3673_v38, %v3677_v16 }
 0x6cf   :  { %9686 = vmatpush1.bf16.msra.mxu1 %v15981_v45  ;;  %9359 = vmatprep.subr.bf16.mxu0 %v15988_v28  ;;  %v3642_v45 = vld [vmem:[#allocation21 + $0x1488] sm:$0xff] }
 0x6d0   :  { %9687 = vmatprep.subr.bf16.mxu1 %v15990_v48  ;;  %v3646_v28 = vld [vmem:[#allocation21 + $0x14a8] sm:$0xff]  ;;  %v16027_v48 = vcombine.low %v3633_v30, %v3637_v17  ;;  %v3681_v30 = vld [vmem:[#allocation21 + $0x15c0] sm:$0xff] }
 0x6d1   :  { %v16038_v50 = vcombine.high %v3642_v45, %v3646_v28  ;;  %v3685_v17 = vld [vmem:[#allocation21 + $0x15e0] sm:$0xff] }
 0x6d2   :  { %9360 = vmatpush1.bf16.msra.mxu0 %v15987_v55  ;;  %v3650_v55 = vld [vmem:[#allocation21 + $0x14c8] sm:$0xff] }
 0x6d3   :  { %9688 = vmatpush1.bf16.msra.mxu1 %v15989_v15  ;;  %9361 = vmatprep.subr.bf16.mxu0 %v15996_v59  ;;  %v3654_v15 = vld [vmem:[#allocation21 + $0x14e8] sm:$0xff]  ;;  %v16035_v59 = vcombine.low %v3641_v37, %v3645_v4  ;;  %v3689_v4 = vld [vmem:[#allocation21 + $0x1600] sm:$0xff] }
 0x6d4   :  { %9689 = vmatprep.subr.bf16.mxu1 %v15998_v21  ;;  %v16037_v21 = vcombine.low %v3642_v45, %v3646_v28  ;;  %v16046_v40 = vcombine.high %v3650_v55, %v3654_v15  ;;  %v3690_v45 = vld [vmem:[#allocation21 + $0x1608] sm:$0xff] }
 0x6d5   :  { %v3694_v28 = vld [vmem:[#allocation21 + $0x1628] sm:$0xff] }
 0x6d6   :  { %9362 = vmatpush1.bf16.msra.mxu0 %v15995_v13  ;;  %v3658_v13 = vld [vmem:[#allocation21 + $0x1508] sm:$0xff] }
 0x6d7   :  { %9690 = vmatpush1.bf16.msra.mxu1 %v15997_v26  ;;  %9363 = vmatprep.subr.bf16.mxu0 %v16004_v3  ;;  %v3662_v26 = vld [vmem:[#allocation21 + $0x1528] sm:$0xff]  ;;  %v16043_v3 = vcombine.low %v3649_v32, %v3653_v51  ;;  %v3697_v32 = vld [vmem:[#allocation21 + $0x1640] sm:$0xff] }
 0x6d8   :  { %9691 = vmatprep.subr.bf16.mxu1 %v16006_v12  ;;  %v16045_v12 = vcombine.low %v3650_v55, %v3654_v15  ;;  %v16054_v6 = vcombine.high %v3658_v13, %v3662_v26  ;;  %v3701_v51 = vld [vmem:[#allocation21 + $0x1660] sm:$0xff]  ;;  %v3698_v55 = vld [vmem:[#allocation21 + $0x1648] sm:$0xff] }
 0x6d9   :  { %v3702_v15 = vld [vmem:[#allocation21 + $0x1668] sm:$0xff] }
 0x6da   :  { %9364 = vmatpush1.bf16.msra.mxu0 %v16003_v8  ;;  %v3670_v8 = vld [vmem:[#allocation21 + $0x1568] sm:$0xff] }
 0x6db   :  { %9692 = vmatpush1.bf16.msra.mxu1 %v16005_v35  ;;  %9365 = vmatprep.subr.bf16.mxu0 %v16012_v14  ;;  %v16051_v35 = vcombine.low %v3657_v57, %v3661_v0  ;;  %v16053_v14 = vcombine.low %v3658_v13, %v3662_v26  ;;  %v16062_v41 = vcombine.high %v3666_v10, %v3670_v8  ;;  %v3705_v57 = vld [vmem:[#allocation21 + $0x1680] sm:$0xff]  ;;  %v3706_v13 = vld [vmem:[#allocation21 + $0x1688] sm:$0xff] }
 0x6dc   :  { %9693 = vmatprep.subr.bf16.mxu1 %v16014_v1  ;;  %v16060_v1 = vcombine.high %v3665_v9, %v3669_v52  ;;  %v3709_v0 = vld [vmem:[#allocation21 + $0x16a0] sm:$0xff]  ;;  %v3710_v26 = vld [vmem:[#allocation21 + $0x16a8] sm:$0xff] }
 0x6de   :  { %9366 = vmatpush1.bf16.msra.mxu0 %v16011_v22  ;;  %v3678_v22 = vld [vmem:[#allocation21 + $0x15a8] sm:$0xff] }
 0x6df   :  { %9694 = vmatpush1.bf16.msra.mxu1 %v16013_v47  ;;  %9376 = vmatprep.subr.bf16.mxu0 %v16020_v24  ;;  %v16059_v47 = vcombine.low %v3665_v9, %v3669_v52  ;;  %v16061_v24 = vcombine.low %v3666_v10, %v3670_v8  ;;  %v16070_v27 = vcombine.high %v3674_v46, %v3678_v22  ;;  %v3713_v9 = vld [vmem:[#allocation21 + $0x16c0] sm:$0xff]  ;;  %v3714_v10 = vld [vmem:[#allocation21 + $0x16c8] sm:$0xff] }
 0x6e0   :  { %9704 = vmatprep.subr.bf16.mxu1 %v16022_v7  ;;  %v16068_v7 = vcombine.high %v3673_v38, %v3677_v16  ;;  %v3717_v52 = vld [vmem:[#allocation21 + $0x16e0] sm:$0xff]  ;;  %v3718_v8 = vld [vmem:[#allocation21 + $0x16e8] sm:$0xff] }
 0x6e1   :  { %9368 = vmatmul.mubr.bf16.vlgmr.msra.gmra.mrb[48].mxu0 %v18789_v11  ;;  %v3721_v38 = vld [vmem:[#allocation21 + $0x1700] sm:$0xff] }
 0x6e2   :  { %9696 = vmatmul.mubr.bf16.vlgmr.msra.gmra.mrb[56].mxu1 %v18789_v11  ;;  %9377 = vmatpush1.bf16.msra.mxu0 %v16019_v31  ;;  %v3682_v31 = vld [vmem:[#allocation21 + $0x15c8] sm:$0xff]  ;;  %v3725_v16 = vld [vmem:[#allocation21 + $0x1720] sm:$0xff] }
 0x6e3   :  { %9408 = vmatprep.mubr.bf16.mxu0 %v18792_v39  ;;  %9705 = vmatpush1.bf16.msra.mxu1 %v16021_v43  ;;  %v16069_v43 = vcombine.low %v3674_v46, %v3678_v22  ;;  %v16078_v37 = vcombine.high %v3682_v31, %v3686_v33  ;;  %v3722_v46 = vld [vmem:[#allocation21 + $0x1708] sm:$0xff] }
 0x6e4   :  { %9736 = vmatprep.mubr.bf16.mxu1 %v18792_v39  ;;  %9378 = vmatprep.subr.bf16.mxu0 %v16028_v20  ;;  %v16076_v20 = vcombine.high %v3681_v30, %v3685_v17  ;;  %v3726_v22 = vld [vmem:[#allocation21 + $0x1728] sm:$0xff] }
 0x6e5   :  { %9706 = vmatprep.subr.bf16.mxu1 %v16030_v42  ;;  %v3693_v42 = vld [vmem:[#allocation21 + $0x1620] sm:$0xff] }
 0x6e6   :  { %9379 = vmatpush1.bf16.msra.mxu0 %v16027_v48  ;;  %v16075_v48 = vcombine.low %v3681_v30, %v3685_v17  ;;  %v3729_v30 = vld [vmem:[#allocation21 + $0x1740] sm:$0xff] }
 0x6e7   :  { %9707 = vmatpush1.bf16.msra.mxu1 %v16029_v44  ;;  %9380 = vmatprep.subr.bf16.mxu0 %v16036_v49  ;;  %v16077_v44 = vcombine.low %v3682_v31, %v3686_v33  ;;  %v16084_v49 = vcombine.high %v3689_v4, %v3693_v42  ;;  %v3733_v17 = vld [vmem:[#allocation21 + $0x1760] sm:$0xff]  ;;  %v3730_v31 = vld [vmem:[#allocation21 + $0x1748] sm:$0xff] }
 0x6e8   :  { %9708 = vmatprep.subr.bf16.mxu1 %v16038_v50  ;;  %v16086_v50 = vcombine.high %v3690_v45, %v3694_v28  ;;  %v3734_v33 = vld [vmem:[#allocation21 + $0x1768] sm:$0xff] }
 0x6ea   :  { %9381 = vmatpush1.bf16.msra.mxu0 %v16035_v59  ;;  %v16083_v59 = vcombine.low %v3689_v4, %v3693_v42  ;;  %v3737_v4 = vld [vmem:[#allocation21 + $0x1780] sm:$0xff] }
 0x6eb   :  { %9709 = vmatpush1.bf16.msra.mxu1 %v16037_v21  ;;  %9382 = vmatprep.subr.bf16.mxu0 %v16044_v56  ;;  %v16085_v21 = vcombine.low %v3690_v45, %v3694_v28  ;;  %v16092_v56 = vcombine.high %v3697_v32, %v3701_v51  ;;  %v3741_v42 = vld [vmem:[#allocation21 + $0x17a0] sm:$0xff]  ;;  %v3738_v45 = vld [vmem:[#allocation21 + $0x1788] sm:$0xff] }
 0x6ec   :  { %9710 = vmatprep.subr.bf16.mxu1 %v16046_v40  ;;  %v16094_v40 = vcombine.high %v3698_v55, %v3702_v15  ;;  %v3742_v28 = vld [vmem:[#allocation21 + $0x17a8] sm:$0xff] }
 0x6ee   :  { %9383 = vmatpush1.bf16.msra.mxu0 %v16043_v3  ;;  %v16091_v3 = vcombine.low %v3697_v32, %v3701_v51  ;;  %v3745_v32 = vld [vmem:[#allocation21 + $0x17c0] sm:$0xff] }
 0x6ef   :  { %9711 = vmatpush1.bf16.msra.mxu1 %v16045_v12  ;;  %9384 = vmatprep.subr.bf16.mxu0 %v16052_v5  ;;  %v16093_v12 = vcombine.low %v3698_v55, %v3702_v15  ;;  %v16100_v5 = vcombine.high %v3705_v57, %v3709_v0  ;;  %v3749_v51 = vld [vmem:[#allocation21 + $0x17e0] sm:$0xff]  ;;  %v3746_v55 = vld [vmem:[#allocation21 + $0x17c8] sm:$0xff] }
 0x6f0   :  { %9712 = vmatprep.subr.bf16.mxu1 %v16054_v6  ;;  %v16102_v6 = vcombine.high %v3706_v13, %v3710_v26  ;;  %v3750_v15 = vld [vmem:[#allocation21 + $0x17e8] sm:$0xff] }
 0x6f2   :  { %9385 = vmatpush1.bf16.msra.mxu0 %v16051_v35  ;;  %v16099_v35 = vcombine.low %v3705_v57, %v3709_v0  ;;  %v16142_v57 = vcombine.high %v3746_v55, %v3750_v15  ;;  %v3753_v0 = vld [vmem:[#allocation21 + $0x1800] sm:$0xff] }
 0x6f3   :  { %9713 = vmatpush1.bf16.msra.mxu1 %v16053_v14  ;;  %9386 = vmatprep.subr.bf16.mxu0 %v16060_v1  ;;  %v16101_v14 = vcombine.low %v3706_v13, %v3710_v26  ;;  %v16108_v1 = vcombine.high %v3713_v9, %v3717_v52  ;;  %v3757_v13 = vld [vmem:[#allocation21 + $0x1820] sm:$0xff]  ;;  %v3754_v26 = vld [vmem:[#allocation21 + $0x1808] sm:$0xff] }
 0x6f4   :  { %9714 = vmatprep.subr.bf16.mxu1 %v16062_v41  ;;  %v16110_v41 = vcombine.high %v3714_v10, %v3718_v8 }
 0x6f6   :  { %9387 = vmatpush1.bf16.msra.mxu0 %v16059_v47  ;;  %v16107_v47 = vcombine.low %v3713_v9, %v3717_v52  ;;  %v16148_v9 = vcombine.high %v3753_v0, %v3757_v13 }
 0x6f7   :  { %9715 = vmatpush1.bf16.msra.mxu1 %v16061_v24  ;;  %9388 = vmatprep.subr.bf16.mxu0 %v16068_v7  ;;  %v16109_v24 = vcombine.low %v3714_v10, %v3718_v8  ;;  %v16116_v7 = vcombine.high %v3721_v38, %v3725_v16  ;;  %v3761_v8 = vld [vmem:[#allocation21 + $0x1840] sm:$0xff] }
 0x6f8   :  { %9716 = vmatprep.subr.bf16.mxu1 %v16070_v27  ;;  %v16118_v27 = vcombine.high %v3722_v46, %v3726_v22 }
 0x6fa   :  { %9389 = vmatpush1.bf16.msra.mxu0 %v16067_v34  ;;  %v16115_v34 = vcombine.low %v3721_v38, %v3725_v16  ;;  %v18807_v38 = vpack.c.bf16 %v18783_v2, %v18783_v2 }
 0x6fb   :  { %9717 = vmatpush1.bf16.msra.mxu1 %v16069_v43  ;;  %9390 = vmatprep.subr.bf16.mxu0 %v16076_v20  ;;  %v16117_v43 = vcombine.low %v3722_v46, %v3726_v22  ;;  %v16124_v20 = vcombine.high %v3729_v30, %v3733_v17  ;;  %v3769_v22 = vld [vmem:[#allocation21 + $0x1880] sm:$0xff] }
 0x6fc   :  { %9718 = vmatprep.subr.bf16.mxu1 %v16078_v37  ;;  %v16126_v37 = vcombine.high %v3730_v31, %v3734_v33 }
 0x6fe   :  { %9391 = vmatpush1.bf16.msra.mxu0 %v16075_v48  ;;  %v16123_v48 = vcombine.low %v3729_v30, %v3733_v17  ;;  %v3774_v30 = vld [vmem:[#allocation21 + $0x18a8] sm:$0xff] }
 0x6ff   :  { %9719 = vmatpush1.bf16.msra.mxu1 %v16077_v44  ;;  %9392 = vmatprep.subr.bf16.mxu0 %v16084_v49  ;;  %v16125_v44 = vcombine.low %v3730_v31, %v3734_v33  ;;  %v16132_v49 = vcombine.high %v3737_v4, %v3741_v42 }
 0x700   :  { %9720 = vmatprep.subr.bf16.mxu1 %v16086_v50  ;;  %v16134_v50 = vcombine.high %v3738_v45, %v3742_v28 }
 0x702   :  { %9393 = vmatpush1.bf16.msra.mxu0 %v16083_v59  ;;  %v16131_v59 = vcombine.low %v3737_v4, %v3741_v42 }
 0x703   :  { %9721 = vmatpush1.bf16.msra.mxu1 %v16085_v21  ;;  %9394 = vmatprep.subr.bf16.mxu0 %v16092_v56  ;;  %v18797_v21 = vld [vmem:[#allocation6 + $0x18] sm:$0xff]  ;;  %v16133_v56 = vcombine.low %v3738_v45, %v3742_v28 }
 0x704   :  { %9722 = vmatprep.subr.bf16.mxu1 %v16094_v40  ;;  %v16140_v40 = vcombine.high %v3745_v32, %v3749_v51 }
 0x706   :  { %9395 = vmatpush1.bf16.msra.mxu0 %v16091_v3  ;;  %v3758_v3 = vld [vmem:[#allocation21 + $0x1828] sm:$0xff] }
 0x707   :  { %9723 = vmatpush1.bf16.msra.mxu1 %v16093_v12  ;;  %9396 = vmatprep.subr.bf16.mxu0 %v16100_v5  ;;  %v18801_v12 = vrot.slane %v18797_v21, %v18701_v29  ;;  %v16139_v5 = vcombine.low %v3745_v32, %v3749_v51  ;;  %v16150_v52 = vcombine.high %v3754_v26, %v3758_v3 }
 0x708   :  { %9724 = vmatprep.subr.bf16.mxu1 %v16102_v6  ;;  %v16141_v6 = vcombine.low %v3746_v55, %v3750_v15  ;;  %v16149_v16 = vcombine.low %v3754_v26, %v3758_v3 }
 0x709   :  { %v2951_v10 = vcombine.high %v18801_v12, %v18801_v12 }
 0x70a   :  { %9397 = vmatpush1.bf16.msra.mxu0 %v16099_v35  ;;  %v3765_v35 = vld [vmem:[#allocation21 + $0x1860] sm:$0xff] }
 0x70b   :  { %9725 = vmatpush1.bf16.msra.mxu1 %v16101_v14  ;;  %9398 = vmatprep.subr.bf16.mxu0 %v16108_v1  ;;  %v16147_v14 = vcombine.low %v3753_v0, %v3757_v13  ;;  %v3762_v1 = vld [vmem:[#allocation21 + $0x1848] sm:$0xff]  ;;  %v16156_v46 = vcombine.high %v3761_v8, %v3765_v35  ;;  %v16155_v17 = vcombine.low %v3761_v8, %v3765_v35 }
 0x70c   :  { %9726 = vmatprep.subr.bf16.mxu1 %v16110_v41  ;;  %v3766_v41 = vld [vmem:[#allocation21 + $0x1868] sm:$0xff] }
 0x70d   :  { %v16157_v2 = vcombine.low %v3762_v1, %v3766_v41 }
 0x70e   :  { %9399 = vmatpush1.bf16.msra.mxu0 %v16107_v47  ;;  %v3773_v47 = vld [vmem:[#allocation21 + $0x18a0] sm:$0xff] }
 0x70f   :  { %9727 = vmatpush1.bf16.msra.mxu1 %v16109_v24  ;;  %9400 = vmatprep.subr.bf16.mxu0 %v16116_v7  ;;  %v18810_v24 = vpack.c.bf16 %v2951_v10, %v2951_v10  ;;  %v16158_v7 = vcombine.high %v3762_v1, %v3766_v41  ;;  %v16164_v31 = vcombine.high %v3769_v22, %v3773_v47  ;;  %v3809_v1 = vld [vmem:[#allocation21 + $0x19c0] sm:$0xff] }
 0x710   :  { %9728 = vmatprep.subr.bf16.mxu1 %v16118_v27  ;;  %v3770_v27 = vld [vmem:[#allocation21 + $0x1888] sm:$0xff]  ;;  %v16163_v4 = vcombine.low %v3769_v22, %v3773_v47  ;;  %v3813_v41 = vld [vmem:[#allocation21 + $0x19e0] sm:$0xff] }
 0x711   :  { %v16166_v33 = vcombine.high %v3770_v27, %v3774_v30  ;;  %v16165_v42 = vcombine.low %v3770_v27, %v3774_v30  ;;  %v3817_v30 = vld [vmem:[#allocation21 + $0x1a00] sm:$0xff] }
 0x712   :  { %9401 = vmatpush1.bf16.msra.mxu0 %v16115_v34  ;;  %v3777_v34 = vld [vmem:[#allocation21 + $0x18c0] sm:$0xff] }
 0x713   :  { %9729 = vmatpush1.bf16.msra.mxu1 %v16117_v43  ;;  %9402 = vmatprep.subr.bf16.mxu0 %v16124_v20  ;;  %v3781_v43 = vld [vmem:[#allocation21 + $0x18e0] sm:$0xff]  ;;  %v3778_v20 = vld [vmem:[#allocation21 + $0x18c8] sm:$0xff] }
 0x714   :  { %9730 = vmatprep.subr.bf16.mxu1 %v16126_v37  ;;  %v3782_v37 = vld [vmem:[#allocation21 + $0x18e8] sm:$0xff]  ;;  %v16172_v45 = vcombine.high %v3777_v34, %v3781_v43  ;;  %v16171_v32 = vcombine.low %v3777_v34, %v3781_v43 }
 0x715   :  { %v16174_v28 = vcombine.high %v3778_v20, %v3782_v37  ;;  %v16173_v51 = vcombine.low %v3778_v20, %v3782_v37  ;;  %v3825_v37 = vld [vmem:[#allocation21 + $0x1a40] sm:$0xff] }
 0x716   :  { %9403 = vmatpush1.bf16.msra.mxu0 %v16123_v48  ;;  %v3785_v48 = vld [vmem:[#allocation21 + $0x1900] sm:$0xff] }
 0x717   :  { %9731 = vmatpush1.bf16.msra.mxu1 %v16125_v44  ;;  %9404 = vmatprep.subr.bf16.mxu0 %v16132_v49  ;;  %v3789_v44 = vld [vmem:[#allocation21 + $0x1920] sm:$0xff]  ;;  %v3786_v49 = vld [vmem:[#allocation21 + $0x1908] sm:$0xff] }
 0x718   :  { %9732 = vmatprep.subr.bf16.mxu1 %v16134_v50  ;;  %v3790_v50 = vld [vmem:[#allocation21 + $0x1928] sm:$0xff]  ;;  %v16180_v55 = vcombine.high %v3785_v48, %v3789_v44  ;;  %v16179_v0 = vcombine.low %v3785_v48, %v3789_v44 }
 0x719   :  { %v16182_v15 = vcombine.high %v3786_v49, %v3790_v50  ;;  %v16181_v13 = vcombine.low %v3786_v49, %v3790_v50  ;;  %v3833_v50 = vld [vmem:[#allocation21 + $0x1a80] sm:$0xff] }
 0x71a   :  { %9405 = vmatpush1.bf16.msra.mxu0 %v16131_v59  ;;  %v3793_v59 = vld [vmem:[#allocation21 + $0x1940] sm:$0xff] }
 0x71b   :  { %9733 = vmatpush1.bf16.msra.mxu1 %v16133_v56  ;;  %9406 = vmatprep.subr.bf16.mxu0 %v16140_v40  ;;  %v3797_v56 = vld [vmem:[#allocation21 + $0x1960] sm:$0xff]  ;;  %v3794_v40 = vld [vmem:[#allocation21 + $0x1948] sm:$0xff] }
 0x71c   :  { %9734 = vmatprep.subr.bf16.mxu1 %v16142_v57  ;;  %v3798_v57 = vld [vmem:[#allocation21 + $0x1968] sm:$0xff]  ;;  %v16188_v26 = vcombine.high %v3793_v59, %v3797_v56  ;;  %v16187_v10 = vcombine.low %v3793_v59, %v3797_v56 }
 0x71d   :  { %v16190_v3 = vcombine.high %v3794_v40, %v3798_v57  ;;  %v16189_v8 = vcombine.low %v3794_v40, %v3798_v57  ;;  %v3841_v57 = vld [vmem:[#allocation21 + $0x1ac0] sm:$0xff] }
 0x71e   :  { %9407 = vmatpush1.bf16.msra.mxu0 %v16139_v5  ;;  %v3801_v5 = vld [vmem:[#allocation21 + $0x1980] sm:$0xff] }
 0x71f   :  { %9735 = vmatpush1.bf16.msra.mxu1 %v16141_v6  ;;  %9417 = vmatprep.subr.bf16.mxu0 %v16148_v9  ;;  %v3805_v6 = vld [vmem:[#allocation21 + $0x19a0] sm:$0xff]  ;;  %v3802_v9 = vld [vmem:[#allocation21 + $0x1988] sm:$0xff] }
 0x720   :  { %9745 = vmatprep.subr.bf16.mxu1 %v16150_v52  ;;  %v3806_v52 = vld [vmem:[#allocation21 + $0x19a8] sm:$0xff]  ;;  %v16196_v35 = vcombine.high %v3801_v5, %v3805_v6  ;;  %v16195_v22 = vcombine.low %v3801_v5, %v3805_v6 }
 0x721   :  { %9409 = vmatmul.mubr.bf16.vlgmr.msra.gmra.mrb[48].mxu0 %v18807_v38  ;;  %v16197_v47 = vcombine.low %v3802_v9, %v3806_v52 }
 0x722   :  { %9737 = vmatmul.mubr.bf16.vlgmr.msra.gmra.mrb[56].mxu1 %v18807_v38  ;;  %9418 = vmatpush1.bf16.msra.mxu0 %v16147_v14  ;;  %v16198_v14 = vcombine.high %v3802_v9, %v3806_v52  ;;  %v3849_v52 = vld [vmem:[#allocation21 + $0x1b00] sm:$0xff] }
 0x723   :  { %9449 = vmatprep.mubr.bf16.mxu0 %v18810_v24  ;;  %9746 = vmatpush1.bf16.msra.mxu1 %v16149_v16  ;;  %v3810_v16 = vld [vmem:[#allocation21 + $0x19c8] sm:$0xff] }
 0x724   :  { %9777 = vmatprep.mubr.bf16.mxu1 %v18810_v24  ;;  %9419 = vmatprep.subr.bf16.mxu0 %v16156_v46  ;;  %v3814_v46 = vld [vmem:[#allocation21 + $0x19e8] sm:$0xff] }
 0x725   :  { %9747 = vmatprep.subr.bf16.mxu1 %v16158_v7  ;;  %v16204_v7 = vcombine.high %v3809_v1, %v3813_v41  ;;  %v16206_v27 = vcombine.high %v3810_v16, %v3814_v46  ;;  %v16205_v34 = vcombine.low %v3810_v16, %v3814_v46  ;;  %v3857_v46 = vld [vmem:[#allocation21 + $0x1b40] sm:$0xff] }
 0x726   :  { %9420 = vmatpush1.bf16.msra.mxu0 %v16155_v17  ;;  %v3821_v17 = vld [vmem:[#allocation21 + $0x1a20] sm:$0xff] }
 0x727   :  { %9748 = vmatpush1.bf16.msra.mxu1 %v16157_v2  ;;  %9421 = vmatprep.subr.bf16.mxu0 %v16164_v31  ;;  %v3818_v2 = vld [vmem:[#allocation21 + $0x1a08] sm:$0xff]  ;;  %v16212_v43 = vcombine.high %v3817_v30, %v3821_v17 }
 0x728   :  { %9749 = vmatprep.subr.bf16.mxu1 %v16166_v33  ;;  %v3822_v31 = vld [vmem:[#allocation21 + $0x1a28] sm:$0xff]  ;;  %v16203_v33 = vcombine.low %v3809_v1, %v3813_v41 }
 0x729   :  { %v16214_v20 = vcombine.high %v3818_v2, %v3822_v31  ;;  %v16213_v48 = vcombine.low %v3818_v2, %v3822_v31  ;;  %v3865_v31 = vld [vmem:[#allocation21 + $0x1b80] sm:$0xff] }
 0x72a   :  { %9422 = vmatpush1.bf16.msra.mxu0 %v16163_v4  ;;  %v3829_v4 = vld [vmem:[#allocation21 + $0x1a60] sm:$0xff] }
 0x72b   :  { %9750 = vmatpush1.bf16.msra.mxu1 %v16165_v42  ;;  %9423 = vmatprep.subr.bf16.mxu0 %v16172_v45  ;;  %v3826_v42 = vld [vmem:[#allocation21 + $0x1a48] sm:$0xff]  ;;  %v16220_v44 = vcombine.high %v3825_v37, %v3829_v4 }
 0x72c   :  { %9751 = vmatprep.subr.bf16.mxu1 %v16174_v28  ;;  %v3830_v45 = vld [vmem:[#allocation21 + $0x1a68] sm:$0xff]  ;;  %v16211_v28 = vcombine.low %v3817_v30, %v3821_v17 }
 0x72d   :  { %v16222_v49 = vcombine.high %v3826_v42, %v3830_v45  ;;  %v16221_v59 = vcombine.low %v3826_v42, %v3830_v45  ;;  %v3873_v45 = vld [vmem:[#allocation21 + $0x1bc0] sm:$0xff] }
 0x72e   :  { %9424 = vmatpush1.bf16.msra.mxu0 %v16171_v32  ;;  %v3837_v32 = vld [vmem:[#allocation21 + $0x1aa0] sm:$0xff] }
 0x72f   :  { %9752 = vmatpush1.bf16.msra.mxu1 %v16173_v51  ;;  %9425 = vmatprep.subr.bf16.mxu0 %v16180_v55  ;;  %v3834_v51 = vld [vmem:[#allocation21 + $0x1a88] sm:$0xff]  ;;  %v16228_v56 = vcombine.high %v3833_v50, %v3837_v32 }
 0x730   :  { %9753 = vmatprep.subr.bf16.mxu1 %v16182_v15  ;;  %v3838_v55 = vld [vmem:[#allocation21 + $0x1aa8] sm:$0xff]  ;;  %v16219_v15 = vcombine.low %v3825_v37, %v3829_v4 }
 0x731   :  { %v16230_v40 = vcombine.high %v3834_v51, %v3838_v55  ;;  %v16229_v5 = vcombine.low %v3834_v51, %v3838_v55 }
 0x732   :  { %9426 = vmatpush1.bf16.msra.mxu0 %v16179_v0  ;;  %v3845_v0 = vld [vmem:[#allocation21 + $0x1ae0] sm:$0xff] }
 0x733   :  { %9754 = vmatpush1.bf16.msra.mxu1 %v16181_v13  ;;  %9427 = vmatprep.subr.bf16.mxu0 %v16188_v26  ;;  %v3842_v13 = vld [vmem:[#allocation21 + $0x1ac8] sm:$0xff]  ;;  %v16236_v6 = vcombine.high %v3841_v57, %v3845_v0 }
 0x734   :  { %9755 = vmatprep.subr.bf16.mxu1 %v16190_v3  ;;  %v3846_v26 = vld [vmem:[#allocation21 + $0x1ae8] sm:$0xff]  ;;  %v16227_v3 = vcombine.low %v3833_v50, %v3837_v32 }
 0x735   :  { %v16238_v9 = vcombine.high %v3842_v13, %v3846_v26  ;;  %v16237_v1 = vcombine.low %v3842_v13, %v3846_v26 }
 0x736   :  { %9428 = vmatpush1.bf16.msra.mxu0 %v16187_v10  ;;  %v3853_v10 = vld [vmem:[#allocation21 + $0x1b20] sm:$0xff] }
 0x737   :  { %9756 = vmatpush1.bf16.msra.mxu1 %v16189_v8  ;;  %9429 = vmatprep.subr.bf16.mxu0 %v16196_v35  ;;  %v3850_v8 = vld [vmem:[#allocation21 + $0x1b08] sm:$0xff]  ;;  %v16244_v41 = vcombine.high %v3849_v52, %v3853_v10 }
 0x738   :  { %9757 = vmatprep.subr.bf16.mxu1 %v16198_v14  ;;  %v3854_v35 = vld [vmem:[#allocation21 + $0x1b28] sm:$0xff]  ;;  %v16235_v14 = vcombine.low %v3841_v57, %v3845_v0 }
 0x739   :  { %v16246_v16 = vcombine.high %v3850_v8, %v3854_v35  ;;  %v16245_v30 = vcombine.low %v3850_v8, %v3854_v35 }
 0x73a   :  { %9430 = vmatpush1.bf16.msra.mxu0 %v16195_v22  ;;  %v3861_v22 = vld [vmem:[#allocation21 + $0x1b60] sm:$0xff] }
 0x73b   :  { %9758 = vmatpush1.bf16.msra.mxu1 %v16197_v47  ;;  %9431 = vmatprep.subr.bf16.mxu0 %v16204_v7  ;;  %v3858_v47 = vld [vmem:[#allocation21 + $0x1b48] sm:$0xff]  ;;  %v16252_v17 = vcombine.high %v3857_v46, %v3861_v22 }
 0x73c   :  { %9759 = vmatprep.subr.bf16.mxu1 %v16206_v27  ;;  %v3862_v7 = vld [vmem:[#allocation21 + $0x1b68] sm:$0xff]  ;;  %v16243_v27 = vcombine.low %v3849_v52, %v3853_v10 }
 0x73d   :  { %v16254_v2 = vcombine.high %v3858_v47, %v3862_v7  ;;  %v16253_v37 = vcombine.low %v3858_v47, %v3862_v7  ;;  %v3890_v52 = vld [vmem:[#allocation21 + $0x1c48] sm:$0xff] }
 0x73e   :  { %9432 = vmatpush1.bf16.msra.mxu0 %v16203_v33  ;;  %v3869_v33 = vld [vmem:[#allocation21 + $0x1ba0] sm:$0xff]  ;;  %v3894_v10 = vld [vmem:[#allocation21 + $0x1c68] sm:$0xff] }
 0x73f   :  { %9760 = vmatpush1.bf16.msra.mxu1 %v16205_v34  ;;  %9433 = vmatprep.subr.bf16.mxu0 %v16212_v43  ;;  %v3866_v34 = vld [vmem:[#allocation21 + $0x1b88] sm:$0xff]  ;;  %v16260_v4 = vcombine.high %v3865_v31, %v3869_v33  ;;  %v16259_v50 = vcombine.low %v3865_v31, %v3869_v33 }
 0x740   :  { %9761 = vmatprep.subr.bf16.mxu1 %v16214_v20  ;;  %v3870_v43 = vld [vmem:[#allocation21 + $0x1ba8] sm:$0xff]  ;;  %v16251_v20 = vcombine.low %v3857_v46, %v3861_v22 }
 0x741   :  { %v16262_v42 = vcombine.high %v3866_v34, %v3870_v43  ;;  %v16261_v32 = vcombine.low %v3866_v34, %v3870_v43  ;;  %v3898_v46 = vld [vmem:[#allocation21 + $0x1c88] sm:$0xff] }
 0x742   :  { %9434 = vmatpush1.bf16.msra.mxu0 %v16211_v28  ;;  %v3877_v28 = vld [vmem:[#allocation21 + $0x1be0] sm:$0xff]  ;;  %v3902_v22 = vld [vmem:[#allocation21 + $0x1ca8] sm:$0xff] }
 0x743   :  { %9762 = vmatpush1.bf16.msra.mxu1 %v16213_v48  ;;  %9435 = vmatprep.subr.bf16.mxu0 %v16220_v44  ;;  %v3874_v48 = vld [vmem:[#allocation21 + $0x1bc8] sm:$0xff]  ;;  %v16268_v51 = vcombine.high %v3873_v45, %v3877_v28  ;;  %v16267_v0 = vcombine.low %v3873_v45, %v3877_v28  ;;  %v16293_v34 = vcombine.low %v3898_v46, %v3902_v22 }
 0x744   :  { %9763 = vmatprep.subr.bf16.mxu1 %v16222_v49  ;;  %v3878_v44 = vld [vmem:[#allocation21 + $0x1be8] sm:$0xff]  ;;  %v2936_v49 = vcombine.high %v18797_v21, %v18797_v21 }
 0x745   :  { %v16270_v55 = vcombine.high %v3874_v48, %v3878_v44  ;;  %v16269_v21 = vcombine.low %v3874_v48, %v3878_v44  ;;  %v3910_v31 = vld [vmem:[#allocation21 + $0x1ce8] sm:$0xff] }
 0x746   :  { %9436 = vmatpush1.bf16.msra.mxu0 %v16219_v15  ;;  %v3881_v15 = vld [vmem:[#allocation21 + $0x1c00] sm:$0xff]  ;;  %v18818_v57 = vrot.slane %v2936_v49, %v18701_v29  ;;  %v18824_v29 = vpack.c.bf16 %v18801_v12, %v18801_v12  ;;  %v16285_v12 = vcombine.low %v3890_v52, %v3894_v10  ;;  %v3918_v45 = vld [vmem:[#allocation21 + $0x1d28] sm:$0xff] }
 0x747   :  { %9764 = vmatpush1.bf16.msra.mxu1 %v16221_v59  ;;  %9437 = vmatprep.subr.bf16.mxu0 %v16228_v56  ;;  %v3885_v59 = vld [vmem:[#allocation21 + $0x1c20] sm:$0xff]  ;;  %v3882_v56 = vld [vmem:[#allocation21 + $0x1c08] sm:$0xff] }
 0x748   :  { %9765 = vmatprep.subr.bf16.mxu1 %v16230_v40  ;;  %v3886_v40 = vld [vmem:[#allocation21 + $0x1c28] sm:$0xff]  ;;  %v16276_v13 = vcombine.high %v3881_v15, %v3885_v59 }
 0x749   :  { %v16278_v26 = vcombine.high %v3882_v56, %v3886_v40  ;;  %v16277_v8 = vcombine.low %v3882_v56, %v3886_v40 }
 0x74a   :  { %9438 = vmatpush1.bf16.msra.mxu0 %v16227_v3  ;;  %v2952_v3 = vcombine.high %v18818_v57, %v18818_v57 }
 0x74b   :  { %9766 = vmatpush1.bf16.msra.mxu1 %v16229_v5  ;;  %9439 = vmatprep.subr.bf16.mxu0 %v16236_v6  ;;  %v3889_v5 = vld [vmem:[#allocation21 + $0x1c40] sm:$0xff] }
 0x74c   :  { %9767 = vmatprep.subr.bf16.mxu1 %v16238_v9  ;;  %v3893_v6 = vld [vmem:[#allocation21 + $0x1c60] sm:$0xff]  ;;  %v16275_v9 = vcombine.low %v3881_v15, %v3885_v59 }
 0x74d   :  { %v16284_v35 = vcombine.high %v3889_v5, %v3893_v6  ;;  %v16283_v47 = vcombine.low %v3889_v5, %v3893_v6 }
 0x74e   :  { %9440 = vmatpush1.bf16.msra.mxu0 %v16235_v14  ;;  %v3897_v14 = vld [vmem:[#allocation21 + $0x1c80] sm:$0xff] }
 0x74f   :  { %9768 = vmatpush1.bf16.msra.mxu1 %v16237_v1  ;;  %9441 = vmatprep.subr.bf16.mxu0 %v16244_v41  ;;  %v3901_v1 = vld [vmem:[#allocation21 + $0x1ca0] sm:$0xff]  ;;  %v18827_v41 = vpack.c.bf16 %v2952_v3, %v2952_v3 }
 0x750   :  { %9769 = vmatprep.subr.bf16.mxu1 %v16246_v16  ;;  %v16286_v16 = vcombine.high %v3890_v52, %v3894_v10  ;;  %v16292_v7 = vcombine.high %v3897_v14, %v3901_v1  ;;  %v16291_v33 = vcombine.low %v3897_v14, %v3901_v1  ;;  %v3937_v52 = vld [vmem:[#allocation21 + $0x1dc0] sm:$0xff] }
 0x751   :  { %v3941_v10 = vld [vmem:[#allocation21 + $0x1de0] sm:$0xff] }
 0x752   :  { %9442 = vmatpush1.bf16.msra.mxu0 %v16243_v27  ;;  %v16294_v27 = vcombine.high %v3898_v46, %v3902_v22  ;;  %v3945_v22 = vld [vmem:[#allocation21 + $0x1e00] sm:$0xff] }
 0x753   :  { %9770 = vmatpush1.bf16.msra.mxu1 %v16245_v30  ;;  %9443 = vmatprep.subr.bf16.mxu0 %v16252_v17  ;;  %v3905_v30 = vld [vmem:[#allocation21 + $0x1cc0] sm:$0xff] }
 0x754   :  { %9771 = vmatprep.subr.bf16.mxu1 %v16254_v2  ;;  %v3909_v17 = vld [vmem:[#allocation21 + $0x1ce0] sm:$0xff]  ;;  %v3906_v2 = vld [vmem:[#allocation21 + $0x1cc8] sm:$0xff] }
 0x755   :  { %v16300_v43 = vcombine.high %v3905_v30, %v3909_v17  ;;  %v16299_v28 = vcombine.low %v3905_v30, %v3909_v17  ;;  %v16301_v48 = vcombine.low %v3906_v2, %v3910_v31 }
 0x756   :  { %9444 = vmatpush1.bf16.msra.mxu0 %v16251_v20  ;;  %v16302_v20 = vcombine.high %v3906_v2, %v3910_v31  ;;  %v3953_v31 = vld [vmem:[#allocation21 + $0x1e40] sm:$0xff] }
 0x757   :  { %9772 = vmatpush1.bf16.msra.mxu1 %v16253_v37  ;;  %9445 = vmatprep.subr.bf16.mxu0 %v16260_v4  ;;  %v3913_v37 = vld [vmem:[#allocation21 + $0x1d00] sm:$0xff] }
 0x758   :  { %9773 = vmatprep.subr.bf16.mxu1 %v16262_v42  ;;  %v3917_v4 = vld [vmem:[#allocation21 + $0x1d20] sm:$0xff]  ;;  %v3914_v42 = vld [vmem:[#allocation21 + $0x1d08] sm:$0xff] }
 0x759   :  { %v16308_v44 = vcombine.high %v3913_v37, %v3917_v4  ;;  %v16310_v49 = vcombine.high %v3914_v42, %v3918_v45  ;;  %v16307_v15 = vcombine.low %v3913_v37, %v3917_v4  ;;  %v16309_v59 = vcombine.low %v3914_v42, %v3918_v45  ;;  %v3961_v45 = vld [vmem:[#allocation21 + $0x1e80] sm:$0xff] }
 0x75a   :  { %9446 = vmatpush1.bf16.msra.mxu0 %v16259_v50  ;;  %v3921_v50 = vld [vmem:[#allocation21 + $0x1d40] sm:$0xff] }
 0x75b   :  { %9774 = vmatpush1.bf16.msra.mxu1 %v16261_v32  ;;  %9447 = vmatprep.subr.bf16.mxu0 %v16268_v51  ;;  %v3925_v32 = vld [vmem:[#allocation21 + $0x1d60] sm:$0xff]  ;;  %v3922_v51 = vld [vmem:[#allocation21 + $0x1d48] sm:$0xff] }
 0x75c   :  { %9775 = vmatprep.subr.bf16.mxu1 %v16270_v55  ;;  %v3926_v55 = vld [vmem:[#allocation21 + $0x1d68] sm:$0xff]  ;;  %v16316_v56 = vcombine.high %v3921_v50, %v3925_v32  ;;  %v16315_v3 = vcombine.low %v3921_v50, %v3925_v32 }
 0x75d   :  { %v16318_v40 = vcombine.high %v3922_v51, %v3926_v55  ;;  %v16317_v5 = vcombine.low %v3922_v51, %v3926_v55  ;;  %v3969_v55 = vld [vmem:[#allocation21 + $0x1ec0] sm:$0xff] }
 0x75e   :  { %9448 = vmatpush1.bf16.msra.mxu0 %v16267_v0  ;;  %v3929_v0 = vld [vmem:[#allocation21 + $0x1d80] sm:$0xff] }
 0x75f   :  { %9776 = vmatpush1.bf16.msra.mxu1 %v16269_v21  ;;  %9458 = vmatprep.subr.bf16.mxu0 %v16276_v13  ;;  %v3933_v21 = vld [vmem:[#allocation21 + $0x1da0] sm:$0xff]  ;;  %v3930_v13 = vld [vmem:[#allocation21 + $0x1d88] sm:$0xff] }
 0x760   :  { %9786 = vmatprep.subr.bf16.mxu1 %v16278_v26  ;;  %v3934_v26 = vld [vmem:[#allocation21 + $0x1da8] sm:$0xff]  ;;  %v16324_v6 = vcombine.high %v3929_v0, %v3933_v21  ;;  %v16323_v14 = vcombine.low %v3929_v0, %v3933_v21 }
 0x761   :  { %9450 = vmatmul.mubr.bf16.vlgmr.msra.gmra.mrb[48].mxu0 %v18824_v29  ;;  %v16325_v1 = vcombine.low %v3930_v13, %v3934_v26 }
 0x762   :  { %9778 = vmatmul.mubr.bf16.vlgmr.msra.gmra.mrb[56].mxu1 %v18824_v29  ;;  %9459 = vmatpush1.bf16.msra.mxu0 %v16275_v9  ;;  %v16326_v9 = vcombine.high %v3930_v13, %v3934_v26  ;;  %v3977_v26 = vld [vmem:[#allocation21 + $0x1f00] sm:$0xff] }
 0x763   :  { %9490 = vmatprep.mubr.bf16.mxu0 %v18827_v41  ;;  %9787 = vmatpush1.bf16.msra.mxu1 %v16277_v8  ;;  %v3938_v8 = vld [vmem:[#allocation21 + $0x1dc8] sm:$0xff] }
 0x764   :  { %9818 = vmatprep.mubr.bf16.mxu1 %v18827_v41  ;;  %9460 = vmatprep.subr.bf16.mxu0 %v16284_v35  ;;  %v3942_v35 = vld [vmem:[#allocation21 + $0x1de8] sm:$0xff] }
 0x765   :  { %9788 = vmatprep.subr.bf16.mxu1 %v16286_v16  ;;  %v16332_v16 = vcombine.high %v3937_v52, %v3941_v10  ;;  %v16334_v46 = vcombine.high %v3938_v8, %v3942_v35  ;;  %v16333_v30 = vcombine.low %v3938_v8, %v3942_v35  ;;  %v3985_v35 = vld [vmem:[#allocation21 + $0x1f40] sm:$0xff] }
 0x766   :  { %9461 = vmatpush1.bf16.msra.mxu0 %v16283_v47  ;;  %v3949_v47 = vld [vmem:[#allocation21 + $0x1e20] sm:$0xff] }
 0x767   :  { %9789 = vmatpush1.bf16.msra.mxu1 %v16285_v12  ;;  %9462 = vmatprep.subr.bf16.mxu0 %v16292_v7  ;;  %v3946_v12 = vld [vmem:[#allocation21 + $0x1e08] sm:$0xff]  ;;  %v16340_v17 = vcombine.high %v3945_v22, %v3949_v47 }
 0x768   :  { %9790 = vmatprep.subr.bf16.mxu1 %v16294_v27  ;;  %v3950_v7 = vld [vmem:[#allocation21 + $0x1e28] sm:$0xff]  ;;  %v16331_v27 = vcombine.low %v3937_v52, %v3941_v10 }
 0x769   :  { %v16342_v2 = vcombine.high %v3946_v12, %v3950_v7  ;;  %v16341_v37 = vcombine.low %v3946_v12, %v3950_v7  ;;  %v3993_v7 = vld [vmem:[#allocation21 + $0x1f80] sm:$0xff] }
 0x76a   :  { %9463 = vmatpush1.bf16.msra.mxu0 %v16291_v33  ;;  %v3957_v33 = vld [vmem:[#allocation21 + $0x1e60] sm:$0xff] }
 0x76b   :  { %9791 = vmatpush1.bf16.msra.mxu1 %v16293_v34  ;;  %9464 = vmatprep.subr.bf16.mxu0 %v16300_v43  ;;  %v3954_v34 = vld [vmem:[#allocation21 + $0x1e48] sm:$0xff]  ;;  %v16348_v4 = vcombine.high %v3953_v31, %v3957_v33 }
 0x76c   :  { %9792 = vmatprep.subr.bf16.mxu1 %v16302_v20  ;;  %v3958_v43 = vld [vmem:[#allocation21 + $0x1e68] sm:$0xff]  ;;  %v16339_v20 = vcombine.low %v3945_v22, %v3949_v47 }
 0x76d   :  { %v16350_v42 = vcombine.high %v3954_v34, %v3958_v43  ;;  %v16349_v50 = vcombine.low %v3954_v34, %v3958_v43  ;;  %v4001_v43 = vld [vmem:[#allocation21 + $0x1fc0] sm:$0xff] }
 0x76e   :  { %9465 = vmatpush1.bf16.msra.mxu0 %v16299_v28  ;;  %v3965_v28 = vld [vmem:[#allocation21 + $0x1ea0] sm:$0xff] }
 0x76f   :  { %9793 = vmatpush1.bf16.msra.mxu1 %v16301_v48  ;;  %9466 = vmatprep.subr.bf16.mxu0 %v16308_v44  ;;  %v3962_v48 = vld [vmem:[#allocation21 + $0x1e88] sm:$0xff]  ;;  %v16356_v32 = vcombine.high %v3961_v45, %v3965_v28 }
 0x770   :  { %9794 = vmatprep.subr.bf16.mxu1 %v16310_v49  ;;  %v3966_v44 = vld [vmem:[#allocation21 + $0x1ea8] sm:$0xff]  ;;  %v16347_v49 = vcombine.low %v3953_v31, %v3957_v33 }
 0x771   :  { %v16358_v51 = vcombine.high %v3962_v48, %v3966_v44  ;;  %v16357_v0 = vcombine.low %v3962_v48, %v3966_v44  ;;  %v2987_v44 = vld [vmem:[#allocation21 + $0x10] sm:$0xff] }
 0x772   :  { %9467 = vmatpush1.bf16.msra.mxu0 %v16307_v15  ;;  %v3973_v15 = vld [vmem:[#allocation21 + $0x1ee0] sm:$0xff] }
 0x773   :  { %9795 = vmatpush1.bf16.msra.mxu1 %v16309_v59  ;;  %9468 = vmatprep.subr.bf16.mxu0 %v16316_v56  ;;  %v3970_v59 = vld [vmem:[#allocation21 + $0x1ec8] sm:$0xff]  ;;  %v16364_v21 = vcombine.high %v3969_v55, %v3973_v15 }
 0x774   :  { %9796 = vmatprep.subr.bf16.mxu1 %v16318_v40  ;;  %v3974_v56 = vld [vmem:[#allocation21 + $0x1ee8] sm:$0xff]  ;;  %v16355_v40 = vcombine.low %v3961_v45, %v3965_v28 }
 0x775   :  { %v16366_v13 = vcombine.high %v3970_v59, %v3974_v56  ;;  %v16365_v52 = vcombine.low %v3970_v59, %v3974_v56  ;;  %v2995_v56 = vld [vmem:[#allocation21 + $0x50] sm:$0xff] }
 0x776   :  { %9469 = vmatpush1.bf16.msra.mxu0 %v16315_v3  ;;  %v3981_v3 = vld [vmem:[#allocation21 + $0x1f20] sm:$0xff] }
 0x777   :  { %9797 = vmatpush1.bf16.msra.mxu1 %v16317_v5  ;;  %9470 = vmatprep.subr.bf16.mxu0 %v16324_v6  ;;  %v3978_v5 = vld [vmem:[#allocation21 + $0x1f08] sm:$0xff]  ;;  %v16372_v10 = vcombine.high %v3977_v26, %v3981_v3 }
 0x778   :  { %9798 = vmatprep.subr.bf16.mxu1 %v16326_v9  ;;  %v3982_v6 = vld [vmem:[#allocation21 + $0x1f28] sm:$0xff]  ;;  %v16363_v9 = vcombine.low %v3969_v55, %v3973_v15 }
 0x779   :  { %v16374_v8 = vcombine.high %v3978_v5, %v3982_v6  ;;  %v16373_v22 = vcombine.low %v3978_v5, %v3982_v6  ;;  %v3003_v6 = vld [vmem:[#allocation21 + $0x90] sm:$0xff] }
 0x77a   :  { %9471 = vmatpush1.bf16.msra.mxu0 %v16323_v14  ;;  %v3989_v14 = vld [vmem:[#allocation21 + $0x1f60] sm:$0xff] }
 0x77b   :  { %9799 = vmatpush1.bf16.msra.mxu1 %v16325_v1  ;;  %9472 = vmatprep.subr.bf16.mxu0 %v16332_v16  ;;  %v3986_v1 = vld [vmem:[#allocation21 + $0x1f48] sm:$0xff]  ;;  %v16380_v47 = vcombine.high %v3985_v35, %v3989_v14 }
 0x77c   :  { %9800 = vmatprep.subr.bf16.mxu1 %v16334_v46  ;;  %v3990_v16 = vld [vmem:[#allocation21 + $0x1f68] sm:$0xff]  ;;  %v16371_v46 = vcombine.low %v3977_v26, %v3981_v3  ;;  %v18834_v26 = vpack.c.bf16 %v18818_v57, %v18818_v57 }
 0x77d   :  { %v16382_v12 = vcombine.high %v3986_v1, %v3990_v16  ;;  %v16381_v31 = vcombine.low %v3986_v1, %v3990_v16  ;;  %v3011_v16 = vld [vmem:[#allocation21 + $0xd0] sm:$0xff] }
 0x77e   :  { %9473 = vmatpush1.bf16.msra.mxu0 %v16331_v27  ;;  %v3997_v27 = vld [vmem:[#allocation21 + $0x1fa0] sm:$0xff] }
 0x77f   :  { %9801 = vmatpush1.bf16.msra.mxu1 %v16333_v30  ;;  %9474 = vmatprep.subr.bf16.mxu0 %v16340_v17  ;;  %v3994_v30 = vld [vmem:[#allocation21 + $0x1f88] sm:$0xff]  ;;  %v16388_v33 = vcombine.high %v3993_v7, %v3997_v27 }
 0x780   :  { %9802 = vmatprep.subr.bf16.mxu1 %v16342_v2  ;;  %v3998_v17 = vld [vmem:[#allocation21 + $0x1fa8] sm:$0xff]  ;;  %v16379_v2 = vcombine.low %v3985_v35, %v3989_v14 }
 0x781   :  { %v16390_v34 = vcombine.high %v3994_v30, %v3998_v17  ;;  %v16389_v45 = vcombine.low %v3994_v30, %v3998_v17  ;;  %v3019_v17 = vld [vmem:[#allocation21 + $0x110] sm:$0xff] }
 0x782   :  { %9475 = vmatpush1.bf16.msra.mxu0 %v16339_v20  ;;  %v4005_v20 = vld [vmem:[#allocation21 + $0x1fe0] sm:$0xff] }
 0x783   :  { %9803 = vmatpush1.bf16.msra.mxu1 %v16341_v37  ;;  %9476 = vmatprep.subr.bf16.mxu0 %v16348_v4  ;;  %v4002_v37 = vld [vmem:[#allocation21 + $0x1fc8] sm:$0xff]  ;;  %v16396_v28 = vcombine.high %v4001_v43, %v4005_v20 }
 0x784   :  { %9804 = vmatprep.subr.bf16.mxu1 %v16350_v42  ;;  %v4006_v4 = vld [vmem:[#allocation21 + $0x1fe8] sm:$0xff]  ;;  %v16387_v42 = vcombine.low %v3993_v7, %v3997_v27 }
 0x785   :  { %v16398_v48 = vcombine.high %v4002_v37, %v4006_v4  ;;  %v16397_v55 = vcombine.low %v4002_v37, %v4006_v4  ;;  %v3027_v37 = vld [vmem:[#allocation21 + $0x150] sm:$0xff] }
 0x786   :  { %9477 = vmatpush1.bf16.msra.mxu0 %v16347_v49  ;;  %v2991_v49 = vld [vmem:[#allocation21 + $0x30] sm:$0xff] }
 0x787   :  { %9805 = vmatpush1.bf16.msra.mxu1 %v16349_v50  ;;  %9478 = vmatprep.subr.bf16.mxu0 %v16356_v32  ;;  %v2988_v50 = vld [vmem:[#allocation21 + $0x18] sm:$0xff]  ;;  %v15384_v15 = vcombine.high %v2987_v44, %v2991_v49  ;;  %v3031_v4 = vld [vmem:[#allocation21 + $0x170] sm:$0xff] }
 0x788   :  { %9806 = vmatprep.subr.bf16.mxu1 %v16358_v51  ;;  %v2992_v32 = vld [vmem:[#allocation21 + $0x38] sm:$0xff]  ;;  %v16395_v51 = vcombine.low %v4001_v43, %v4005_v20 }
 0x789   :  { %v15386_v59 = vcombine.high %v2988_v50, %v2992_v32  ;;  %v15385_v3 = vcombine.low %v2988_v50, %v2992_v32  ;;  %v3035_v50 = vld [vmem:[#allocation21 + $0x190] sm:$0xff] }
 0x78a   :  { %9479 = vmatpush1.bf16.msra.mxu0 %v16355_v40  ;;  %v2999_v40 = vld [vmem:[#allocation21 + $0x70] sm:$0xff] }
 0x78b   :  { %9807 = vmatpush1.bf16.msra.mxu1 %v16357_v0  ;;  %9480 = vmatprep.subr.bf16.mxu0 %v16364_v21  ;;  %v15383_v0 = vcombine.low %v2987_v44, %v2991_v49  ;;  %v2996_v21 = vld [vmem:[#allocation21 + $0x58] sm:$0xff]  ;;  %v15392_v5 = vcombine.high %v2995_v56, %v2999_v40  ;;  %v15391_v35 = vcombine.low %v2995_v56, %v2999_v40  ;;  %v3039_v32 = vld [vmem:[#allocation21 + $0x1b0] sm:$0xff] }
 0x78c   :  { %9808 = vmatprep.subr.bf16.mxu1 %v16366_v13  ;;  %v3000_v13 = vld [vmem:[#allocation21 + $0x78] sm:$0xff]  ;;  %v15424_v44 = vcombine.high %v3027_v37, %v3031_v4  ;;  %v15432_v56 = vcombine.high %v3035_v50, %v3039_v32 }
 0x78d   :  { %v15393_v57 = vcombine.low %v2996_v21, %v3000_v13 }
 0x78e   :  { %9481 = vmatpush1.bf16.msra.mxu0 %v16363_v9  ;;  %v3007_v9 = vld [vmem:[#allocation21 + $0xb0] sm:$0xff] }
 0x78f   :  { %9809 = vmatpush1.bf16.msra.mxu1 %v16365_v52  ;;  %9482 = vmatprep.subr.bf16.mxu0 %v16372_v10  ;;  %v15394_v52 = vcombine.high %v2996_v21, %v3000_v13  ;;  %v3004_v10 = vld [vmem:[#allocation21 + $0x98] sm:$0xff]  ;;  %v15400_v14 = vcombine.high %v3003_v6, %v3007_v9  ;;  %v3047_v21 = vld [vmem:[#allocation21 + $0x1f0] sm:$0xff] }
 0x790   :  { %9810 = vmatprep.subr.bf16.mxu1 %v16374_v8  ;;  %v3008_v8 = vld [vmem:[#allocation21 + $0xb8] sm:$0xff] }
 0x791   :  { %v15402_v1 = vcombine.high %v3004_v10, %v3008_v8  ;;  %v15401_v7 = vcombine.low %v3004_v10, %v3008_v8  ;;  %v3044_v13 = vld [vmem:[#allocation21 + $0x1d8] sm:$0xff]  ;;  %v3051_v10 = vld [vmem:[#allocation21 + $0x210] sm:$0xff] }
 0x792   :  { %9483 = vmatpush1.bf16.msra.mxu0 %v16371_v46  ;;  %v3015_v46 = vld [vmem:[#allocation21 + $0xf0] sm:$0xff] }
 0x793   :  { %9811 = vmatpush1.bf16.msra.mxu1 %v16373_v22  ;;  %9484 = vmatprep.subr.bf16.mxu0 %v16380_v47  ;;  %v3012_v22 = vld [vmem:[#allocation21 + $0xd8] sm:$0xff]  ;;  %v15408_v27 = vcombine.high %v3011_v16, %v3015_v46  ;;  %v3055_v8 = vld [vmem:[#allocation21 + $0x230] sm:$0xff] }
 0x794   :  { %9812 = vmatprep.subr.bf16.mxu1 %v16382_v12  ;;  %v3016_v47 = vld [vmem:[#allocation21 + $0xf8] sm:$0xff]  ;;  %v15399_v12 = vcombine.low %v3003_v6, %v3007_v9 }
 0x795   :  { %v15410_v30 = vcombine.high %v3012_v22, %v3016_v47 }
 0x796   :  { %9485 = vmatpush1.bf16.msra.mxu0 %v16379_v2  ;;  %v3023_v2 = vld [vmem:[#allocation21 + $0x130] sm:$0xff] }
 0x797   :  { %9813 = vmatpush1.bf16.msra.mxu1 %v16381_v31  ;;  %9486 = vmatprep.subr.bf16.mxu0 %v16388_v33  ;;  %v3020_v31 = vld [vmem:[#allocation21 + $0x118] sm:$0xff]  ;;  %v15416_v43 = vcombine.high %v3019_v17, %v3023_v2 }
 0x798   :  { %9814 = vmatprep.subr.bf16.mxu1 %v16390_v34  ;;  %v3024_v33 = vld [vmem:[#allocation21 + $0x138] sm:$0xff]  ;;  %v15409_v34 = vcombine.low %v3012_v22, %v3016_v47  ;;  %v3059_v22 = vld [vmem:[#allocation21 + $0x250] sm:$0xff] }
 0x799   :  { %v15418_v20 = vcombine.high %v3020_v31, %v3024_v33  ;;  %v3063_v47 = vld [vmem:[#allocation21 + $0x270] sm:$0xff] }
 0x79a   :  { %9487 = vmatpush1.bf16.msra.mxu0 %v16387_v42  ;;  %v3028_v42 = vld [vmem:[#allocation21 + $0x158] sm:$0xff] }
 0x79b   :  { %9815 = vmatpush1.bf16.msra.mxu1 %v16389_v45  ;;  %9488 = vmatprep.subr.bf16.mxu0 %v16396_v28  ;;  %v3032_v45 = vld [vmem:[#allocation21 + $0x178] sm:$0xff]  ;;  %v15415_v28 = vcombine.low %v3019_v17, %v3023_v2  ;;  %v15456_v17 = vcombine.high %v3059_v22, %v3063_v47 }
 0x79c   :  { %9816 = vmatprep.subr.bf16.mxu1 %v16398_v48  ;;  %v15417_v48 = vcombine.low %v3020_v31, %v3024_v33  ;;  %v15426_v49 = vcombine.high %v3028_v42, %v3032_v45  ;;  %v3067_v31 = vld [vmem:[#allocation21 + $0x290] sm:$0xff] }
 0x79d   :  { %v3071_v33 = vld [vmem:[#allocation21 + $0x2b0] sm:$0xff] }
 0x79e   :  { %9489 = vmatpush1.bf16.msra.mxu0 %v16395_v51  ;;  %v3036_v51 = vld [vmem:[#allocation21 + $0x198] sm:$0xff] }
 0x79f   :  { %9817 = vmatpush1.bf16.msra.mxu1 %v16397_v55  ;;  %9827 = vmatprep.subr.bf16.mxu0 %v15384_v15  ;;  %v3040_v55 = vld [vmem:[#allocation21 + $0x1b8] sm:$0xff]  ;;  %v15423_v15 = vcombine.low %v3027_v37, %v3031_v4  ;;  %v15464_v37 = vcombine.high %v3067_v31, %v3071_v33 }
 0x7a0   :  { %10155 = vmatprep.subr.bf16.mxu1 %v15386_v59  ;;  %v15425_v59 = vcombine.low %v3028_v42, %v3032_v45  ;;  %v15434_v40 = vcombine.high %v3036_v51, %v3040_v55  ;;  %v15433_v6 = vcombine.low %v3036_v51, %v3040_v55  ;;  %v3075_v42 = vld [vmem:[#allocation21 + $0x2d0] sm:$0xff] }
 0x7a1   :  { %9491 = vmatmul.mubr.bf16.vlgmr.msra.gmra.mrb[48].mxu0 %v18834_v26  ;;  %v3079_v45 = vld [vmem:[#allocation21 + $0x2f0] sm:$0xff] }
 0x7a2   :  { %9819 = vmatmul.mubr.bf16.vlgmr.msra.gmra.mrb[56].mxu1 %v18834_v26  ;;  %9828 = vmatpush1.bf16.msra.mxu0 %v15383_v0  ;;  %v3043_v0 = vld [vmem:[#allocation21 + $0x1d0] sm:$0xff] }
 0x7a3   :  { %9859 = vmatprep.mubr.bf16.mxu0 %v18707_v36  ;;  %10156 = vmatpush1.bf16.msra.mxu1 %v15385_v3  ;;  %v3048_v3 = vld [vmem:[#allocation21 + $0x1f8] sm:$0xff]  ;;  %v15440_v9 = vcombine.high %v3043_v0, %v3047_v21  ;;  %v3083_v51 = vld [vmem:[#allocation21 + $0x310] sm:$0xff] }
 0x7a4   :  { %10187 = vmatprep.mubr.bf16.mxu1 %v18707_v36  ;;  %9829 = vmatprep.subr.bf16.mxu0 %v15392_v5  ;;  %v15407_v36 = vcombine.low %v3011_v16, %v3015_v46  ;;  %v15431_v5 = vcombine.low %v3035_v50, %v3039_v32  ;;  %v15448_v16 = vcombine.high %v3051_v10, %v3055_v8  ;;  %v3087_v55 = vld [vmem:[#allocation21 + $0x330] sm:$0xff] }
 0x7a5   :  { %10157 = vmatprep.subr.bf16.mxu1 %v15394_v52  ;;  %v15442_v52 = vcombine.high %v3044_v13, %v3048_v3  ;;  %v15472_v50 = vcombine.high %v3075_v42, %v3079_v45 }
 0x7a6   :  { %9830 = vmatpush1.bf16.msra.mxu0 %v15391_v35  ;;  %v3052_v35 = vld [vmem:[#allocation21 + $0x218] sm:$0xff] }
 0x7a7   :  { %10158 = vmatpush1.bf16.msra.mxu1 %v15393_v57  ;;  %9831 = vmatprep.subr.bf16.mxu0 %v15400_v14  ;;  %v3056_v57 = vld [vmem:[#allocation21 + $0x238] sm:$0xff]  ;;  %v15439_v14 = vcombine.low %v3043_v0, %v3047_v21  ;;  %v15480_v0 = vcombine.high %v3083_v51, %v3087_v55 }
 0x7a8   :  { %10159 = vmatprep.subr.bf16.mxu1 %v15402_v1  ;;  %v15441_v1 = vcombine.low %v3044_v13, %v3048_v3  ;;  %v15450_v46 = vcombine.high %v3052_v35, %v3056_v57  ;;  %v3091_v13 = vld [vmem:[#allocation21 + $0x350] sm:$0xff] }
 0x7a9   :  { %v3095_v3 = vld [vmem:[#allocation21 + $0x370] sm:$0xff] }
 0x7aa   :  { %9832 = vmatpush1.bf16.msra.mxu0 %v15399_v12  ;;  %v3060_v12 = vld [vmem:[#allocation21 + $0x258] sm:$0xff] }
 0x7ab   :  { %10160 = vmatpush1.bf16.msra.mxu1 %v15401_v7  ;;  %9833 = vmatprep.subr.bf16.mxu0 %v15408_v27  ;;  %v3064_v7 = vld [vmem:[#allocation21 + $0x278] sm:$0xff]  ;;  %v15447_v27 = vcombine.low %v3051_v10, %v3055_v8  ;;  %v15488_v10 = vcombine.high %v3091_v13, %v3095_v3 }
 0x7ac   :  { %10161 = vmatprep.subr.bf16.mxu1 %v15410_v30  ;;  %v15449_v30 = vcombine.low %v3052_v35, %v3056_v57  ;;  %v15458_v2 = vcombine.high %v3060_v12, %v3064_v7  ;;  %v3099_v35 = vld [vmem:[#allocation21 + $0x390] sm:$0xff] }
 0x7ad   :  { %v3103_v57 = vld [vmem:[#allocation21 + $0x3b0] sm:$0xff] }
 0x7ae   :  { %9834 = vmatpush1.bf16.msra.mxu0 %v15407_v36  ;;  %v3068_v36 = vld [vmem:[#allocation21 + $0x298] sm:$0xff] }
 0x7af   :  { %10162 = vmatpush1.bf16.msra.mxu1 %v15409_v34  ;;  %9835 = vmatprep.subr.bf16.mxu0 %v15416_v43  ;;  %v3072_v34 = vld [vmem:[#allocation21 + $0x2b8] sm:$0xff]  ;;  %v15455_v43 = vcombine.low %v3059_v22, %v3063_v47  ;;  %v15496_v22 = vcombine.high %v3099_v35, %v3103_v57 }
 0x7b0   :  { %10163 = vmatprep.subr.bf16.mxu1 %v15418_v20  ;;  %v15457_v20 = vcombine.low %v3060_v12, %v3064_v7  ;;  %v15466_v4 = vcombine.high %v3068_v36, %v3072_v34  ;;  %v3107_v12 = vld [vmem:[#allocation21 + $0x3d0] sm:$0xff] }
 0x7b1   :  { %v3111_v7 = vld [vmem:[#allocation21 + $0x3f0] sm:$0xff] }
 0x7b2   :  { %9836 = vmatpush1.bf16.msra.mxu0 %v15415_v28  ;;  %v3076_v28 = vld [vmem:[#allocation21 + $0x2d8] sm:$0xff] }
 0x7b3   :  { %10164 = vmatpush1.bf16.msra.mxu1 %v15417_v48  ;;  %9837 = vmatprep.subr.bf16.mxu0 %v15424_v44  ;;  %v3080_v48 = vld [vmem:[#allocation21 + $0x2f8] sm:$0xff]  ;;  %v15463_v44 = vcombine.low %v3067_v31, %v3071_v33  ;;  %v15504_v31 = vcombine.high %v3107_v12, %v3111_v7 }
 0x7b4   :  { %10165 = vmatprep.subr.bf16.mxu1 %v15426_v49  ;;  %v15465_v49 = vcombine.low %v3068_v36, %v3072_v34  ;;  %v15474_v32 = vcombine.high %v3076_v28, %v3080_v48  ;;  %v3115_v36 = vld [vmem:[#allocation21 + $0x410] sm:$0xff] }
 0x7b5   :  { %v3119_v34 = vld [vmem:[#allocation21 + $0x430] sm:$0xff] }
 0x7b6   :  { %9838 = vmatpush1.bf16.msra.mxu0 %v15423_v15  ;;  %v3084_v15 = vld [vmem:[#allocation21 + $0x318] sm:$0xff] }
 0x7b7   :  { %10166 = vmatpush1.bf16.msra.mxu1 %v15425_v59  ;;  %9839 = vmatprep.subr.bf16.mxu0 %v15432_v56  ;;  %v3088_v59 = vld [vmem:[#allocation21 + $0x338] sm:$0xff]  ;;  %v15471_v56 = vcombine.low %v3075_v42, %v3079_v45  ;;  %v15512_v42 = vcombine.high %v3115_v36, %v3119_v34 }
 0x7b8   :  { %10167 = vmatprep.subr.bf16.mxu1 %v15434_v40  ;;  %v15473_v40 = vcombine.low %v3076_v28, %v3080_v48  ;;  %v15482_v21 = vcombine.high %v3084_v15, %v3088_v59  ;;  %v3123_v28 = vld [vmem:[#allocation21 + $0x450] sm:$0xff] }
 0x7b9   :  { %v3127_v48 = vld [vmem:[#allocation21 + $0x470] sm:$0xff] }
 0x7ba   :  { %9840 = vmatpush1.bf16.msra.mxu0 %v15431_v5  ;;  %v3092_v5 = vld [vmem:[#allocation21 + $0x358] sm:$0xff] }
 0x7bb   :  { %10168 = vmatpush1.bf16.msra.mxu1 %v15433_v6  ;;  %9841 = vmatprep.subr.bf16.mxu0 %v15440_v9  ;;  %v3096_v6 = vld [vmem:[#allocation21 + $0x378] sm:$0xff]  ;;  %v15479_v9 = vcombine.low %v3083_v51, %v3087_v55  ;;  %v15520_v51 = vcombine.high %v3123_v28, %v3127_v48  ;;  %v3131_v55 = vld [vmem:[#allocation21 + $0x490] sm:$0xff] }
 0x7bc   :  { %10169 = vmatprep.subr.bf16.mxu1 %v15442_v52  ;;  %v15481_v52 = vcombine.low %v3084_v15, %v3088_v59  ;;  %v15490_v8 = vcombine.high %v3092_v5, %v3096_v6  ;;  %v3135_v15 = vld [vmem:[#allocation21 + $0x4b0] sm:$0xff] }
 0x7be   :  { %9842 = vmatpush1.bf16.msra.mxu0 %v15439_v14  ;;  %v3100_v14 = vld [vmem:[#allocation21 + $0x398] sm:$0xff] }
 0x7bf   :  { %10170 = vmatpush1.bf16.msra.mxu1 %v15441_v1  ;;  %9843 = vmatprep.subr.bf16.mxu0 %v15448_v16  ;;  %v3104_v1 = vld [vmem:[#allocation21 + $0x3b8] sm:$0xff]  ;;  %v15487_v16 = vcombine.low %v3091_v13, %v3095_v3  ;;  %v15528_v13 = vcombine.high %v3131_v55, %v3135_v15 }
 0x7c0   :  { %10171 = vmatprep.subr.bf16.mxu1 %v15450_v46  ;;  %v15489_v46 = vcombine.low %v3092_v5, %v3096_v6  ;;  %v15498_v47 = vcombine.high %v3100_v14, %v3104_v1  ;;  %v3139_v5 = vld [vmem:[#allocation21 + $0x4d0] sm:$0xff] }
 0x7c1   :  { %v3143_v6 = vld [vmem:[#allocation21 + $0x4f0] sm:$0xff] }
 0x7c2   :  { %9844 = vmatpush1.bf16.msra.mxu0 %v15447_v27  ;;  %v3108_v27 = vld [vmem:[#allocation21 + $0x3d8] sm:$0xff] }
 0x7c3   :  { %10172 = vmatpush1.bf16.msra.mxu1 %v15449_v30  ;;  %9845 = vmatprep.subr.bf16.mxu0 %v15456_v17  ;;  %v3112_v30 = vld [vmem:[#allocation21 + $0x3f8] sm:$0xff]  ;;  %v15495_v17 = vcombine.low %v3099_v35, %v3103_v57  ;;  %v3147_v57 = vld [vmem:[#allocation21 + $0x510] sm:$0xff] }
 0x7c4   :  { %10173 = vmatprep.subr.bf16.mxu1 %v15458_v2  ;;  %v15497_v2 = vcombine.low %v3100_v14, %v3104_v1  ;;  %v15506_v33 = vcombine.high %v3108_v27, %v3112_v30  ;;  %v3151_v14 = vld [vmem:[#allocation21 + $0x530] sm:$0xff]  ;;  %v3148_v1 = vld [vmem:[#allocation21 + $0x518] sm:$0xff] }
 0x7c6   :  { %9846 = vmatpush1.bf16.msra.mxu0 %v15455_v43  ;;  %v3116_v43 = vld [vmem:[#allocation21 + $0x418] sm:$0xff] }
 0x7c7   :  { %10174 = vmatpush1.bf16.msra.mxu1 %v15457_v20  ;;  %9847 = vmatprep.subr.bf16.mxu0 %v15464_v37  ;;  %v3120_v20 = vld [vmem:[#allocation21 + $0x438] sm:$0xff]  ;;  %v15503_v37 = vcombine.low %v3107_v12, %v3111_v7  ;;  %v3155_v12 = vld [vmem:[#allocation21 + $0x550] sm:$0xff] }
 0x7c8   :  { %10175 = vmatprep.subr.bf16.mxu1 %v15466_v4  ;;  %v15505_v4 = vcombine.low %v3108_v27, %v3112_v30  ;;  %v15514_v45 = vcombine.high %v3116_v43, %v3120_v20  ;;  %v3159_v7 = vld [vmem:[#allocation21 + $0x570] sm:$0xff]  ;;  %v3156_v27 = vld [vmem:[#allocation21 + $0x558] sm:$0xff] }
 0x7c9   :  { %v3160_v30 = vld [vmem:[#allocation21 + $0x578] sm:$0xff] }
 0x7ca   :  { %9848 = vmatpush1.bf16.msra.mxu0 %v15463_v44  ;;  %v15511_v44 = vcombine.low %v3115_v36, %v3119_v34  ;;  %v3163_v36 = vld [vmem:[#allocation21 + $0x590] sm:$0xff] }
 0x7cb   :  { %10176 = vmatpush1.bf16.msra.mxu1 %v15465_v49  ;;  %9849 = vmatprep.subr.bf16.mxu0 %v15472_v50  ;;  %v3124_v49 = vld [vmem:[#allocation21 + $0x458] sm:$0xff]  ;;  %v3167_v34 = vld [vmem:[#allocation21 + $0x5b0] sm:$0xff] }
 0x7cc   :  { %10177 = vmatprep.subr.bf16.mxu1 %v15474_v32  ;;  %v3128_v50 = vld [vmem:[#allocation21 + $0x478] sm:$0xff]  ;;  %v15513_v32 = vcombine.low %v3116_v43, %v3120_v20 }
 0x7cd   :  { %v15522_v59 = vcombine.high %v3124_v49, %v3128_v50  ;;  %v3164_v43 = vld [vmem:[#allocation21 + $0x598] sm:$0xff] }
 0x7ce   :  { %9850 = vmatpush1.bf16.msra.mxu0 %v15471_v56  ;;  %v3132_v56 = vld [vmem:[#allocation21 + $0x498] sm:$0xff] }
 0x7cf   :  { %10178 = vmatpush1.bf16.msra.mxu1 %v15473_v40  ;;  %9851 = vmatprep.subr.bf16.mxu0 %v15480_v0  ;;  %v3136_v40 = vld [vmem:[#allocation21 + $0x4b8] sm:$0xff]  ;;  %v15519_v0 = vcombine.low %v3123_v28, %v3127_v48  ;;  %v3171_v28 = vld [vmem:[#allocation21 + $0x5d0] sm:$0xff] }
 0x7d0   :  { %10179 = vmatprep.subr.bf16.mxu1 %v15482_v21  ;;  %v15521_v21 = vcombine.low %v3124_v49, %v3128_v50  ;;  %v15530_v3 = vcombine.high %v3132_v56, %v3136_v40  ;;  %v3168_v20 = vld [vmem:[#allocation21 + $0x5b8] sm:$0xff]  ;;  %v3175_v48 = vld [vmem:[#allocation21 + $0x5f0] sm:$0xff]  ;;  %v15559_v50 = vcombine.low %v3163_v36, %v3167_v34 }
 0x7d1   :  { %v3176_v49 = vld [vmem:[#allocation21 + $0x5f8] sm:$0xff] }
 0x7d2   :  { %9852 = vmatpush1.bf16.msra.mxu0 %v15479_v9  ;;  %v3140_v9 = vld [vmem:[#allocation21 + $0x4d8] sm:$0xff] }
 0x7d3   :  { %10180 = vmatpush1.bf16.msra.mxu1 %v15481_v52  ;;  %9853 = vmatprep.subr.bf16.mxu0 %v15488_v10  ;;  %v3144_v52 = vld [vmem:[#allocation21 + $0x4f8] sm:$0xff]  ;;  %v15527_v10 = vcombine.low %v3131_v55, %v3135_v15  ;;  %v3179_v15 = vld [vmem:[#allocation21 + $0x610] sm:$0xff] }
 0x7d4   :  { %10181 = vmatprep.subr.bf16.mxu1 %v15490_v8  ;;  %v15536_v8 = vcombine.high %v3139_v5, %v3143_v6  ;;  %v15538_v35 = vcombine.high %v3140_v9, %v3144_v52 }
 0x7d6   :  { %9854 = vmatpush1.bf16.msra.mxu0 %v15487_v16  ;;  %v3152_v16 = vld [vmem:[#allocation21 + $0x538] sm:$0xff] }
 0x7d7   :  { %10182 = vmatpush1.bf16.msra.mxu1 %v15489_v46  ;;  %9855 = vmatprep.subr.bf16.mxu0 %v15496_v22  ;;  %v15537_v46 = vcombine.low %v3140_v9, %v3144_v52  ;;  %v15544_v22 = vcombine.high %v3147_v57, %v3151_v14  ;;  %v3188_v9 = vld [vmem:[#allocation21 + $0x658] sm:$0xff] }
 0x7d8   :  { %10183 = vmatprep.subr.bf16.mxu1 %v15498_v47  ;;  %v15546_v47 = vcombine.high %v3148_v1, %v3152_v16  ;;  %v3192_v52 = vld [vmem:[#allocation21 + $0x678] sm:$0xff] }
 0x7da   :  { %9856 = vmatpush1.bf16.msra.mxu0 %v15495_v17  ;;  %v15543_v17 = vcombine.low %v3147_v57, %v3151_v14  ;;  %v3195_v57 = vld [vmem:[#allocation21 + $0x690] sm:$0xff] }
 0x7db   :  { %10184 = vmatpush1.bf16.msra.mxu1 %v15497_v2  ;;  %9857 = vmatprep.subr.bf16.mxu0 %v15504_v31  ;;  %v15545_v2 = vcombine.low %v3148_v1, %v3152_v16  ;;  %v15552_v31 = vcombine.high %v3155_v12, %v3159_v7  ;;  %v3199_v14 = vld [vmem:[#allocation21 + $0x6b0] sm:$0xff]  ;;  %v3196_v1 = vld [vmem:[#allocation21 + $0x698] sm:$0xff] }
 0x7dc   :  { %10185 = vmatprep.subr.bf16.mxu1 %v15506_v33  ;;  %v15554_v33 = vcombine.high %v3156_v27, %v3160_v30  ;;  %v3200_v16 = vld [vmem:[#allocation21 + $0x6b8] sm:$0xff] }
 0x7de   :  { %9858 = vmatpush1.bf16.msra.mxu0 %v15503_v37  ;;  %v15551_v37 = vcombine.low %v3155_v12, %v3159_v7  ;;  %v3203_v12 = vld [vmem:[#allocation21 + $0x6d0] sm:$0xff] }
 0x7df   :  { %10186 = vmatpush1.bf16.msra.mxu1 %v15505_v4  ;;  %9868 = vmatprep.subr.bf16.mxu0 %v15512_v42  ;;  %v15553_v4 = vcombine.low %v3156_v27, %v3160_v30  ;;  %v15560_v42 = vcombine.high %v3163_v36, %v3167_v34  ;;  %v3207_v7 = vld [vmem:[#allocation21 + $0x6f0] sm:$0xff]  ;;  %v3204_v27 = vld [vmem:[#allocation21 + $0x6d8] sm:$0xff] }
 0x7e0   :  { %10196 = vmatprep.subr.bf16.mxu1 %v15514_v45  ;;  %v15562_v45 = vcombine.high %v3164_v43, %v3168_v20  ;;  %v3208_v30 = vld [vmem:[#allocation21 + $0x6f8] sm:$0xff]  ;;  %v3211_v36 = vld [vmem:[#allocation21 + $0x710] sm:$0xff] }
 0x7e1   :  { %9860 = vmatmul.mubr.bf16.vlgmr.msra.gmra.mrb[52].mxu0 %v18711_v63  ;;  %v3215_v34 = vld [vmem:[#allocation21 + $0x730] sm:$0xff] }
 0x7e2   :  { %10188 = vmatmul.mubr.bf16.vlgmr.msra.gmra.mrb[60].mxu1 %v18711_v63  ;;  %9869 = vmatpush1.bf16.msra.mxu0 %v15511_v44  ;;  %v15529_v63 = vcombine.low %v3132_v56, %v3136_v40  ;;  %v3172_v44 = vld [vmem:[#allocation21 + $0x5d8] sm:$0xff] }
 0x7e3   :  { %9900 = vmatprep.mubr.bf16.mxu0 %v18715_v54  ;;  %10197 = vmatpush1.bf16.msra.mxu1 %v15513_v32  ;;  %v15561_v32 = vcombine.low %v3164_v43, %v3168_v20  ;;  %v15570_v55 = vcombine.high %v3172_v44, %v3176_v49  ;;  %v3180_v56 = vld [vmem:[#allocation21 + $0x618] sm:$0xff] }
 0x7e4   :  { %10228 = vmatprep.mubr.bf16.mxu1 %v18715_v54  ;;  %9870 = vmatprep.subr.bf16.mxu0 %v15520_v51  ;;  %v15535_v54 = vcombine.low %v3139_v5, %v3143_v6  ;;  %v15568_v51 = vcombine.high %v3171_v28, %v3175_v48  ;;  %v3184_v40 = vld [vmem:[#allocation21 + $0x638] sm:$0xff]  ;;  %v3187_v5 = vld [vmem:[#allocation21 + $0x650] sm:$0xff] }
 0x7e5   :  { %10198 = vmatprep.subr.bf16.mxu1 %v15522_v59  ;;  %v3183_v59 = vld [vmem:[#allocation21 + $0x630] sm:$0xff]  ;;  %v3212_v43 = vld [vmem:[#allocation21 + $0x718] sm:$0xff] }
 0x7e6   :  { %9871 = vmatpush1.bf16.msra.mxu0 %v15519_v0  ;;  %v15567_v0 = vcombine.low %v3171_v28, %v3175_v48  ;;  %v3191_v6 = vld [vmem:[#allocation21 + $0x670] sm:$0xff]  ;;  %v3216_v20 = vld [vmem:[#allocation21 + $0x738] sm:$0xff] }
 0x7e7   :  { %10199 = vmatpush1.bf16.msra.mxu1 %v15521_v21  ;;  %9872 = vmatprep.subr.bf16.mxu0 %v15528_v13  ;;  %v15569_v21 = vcombine.low %v3172_v44, %v3176_v49  ;;  %v15576_v13 = vcombine.high %v3179_v15, %v3183_v59  ;;  %v3219_v28 = vld [vmem:[#allocation21 + $0x750] sm:$0xff]  ;;  %v3220_v44 = vld [vmem:[#allocation21 + $0x758] sm:$0xff] }
 0x7e8   :  { %10200 = vmatprep.subr.bf16.mxu1 %v15530_v3  ;;  %v15578_v3 = vcombine.high %v3180_v56, %v3184_v40  ;;  %v3223_v48 = vld [vmem:[#allocation21 + $0x770] sm:$0xff]  ;;  %v3224_v49 = vld [vmem:[#allocation21 + $0x778] sm:$0xff] }
 0x7ea   :  { %9873 = vmatpush1.bf16.msra.mxu0 %v15527_v10  ;;  %v15575_v10 = vcombine.low %v3179_v15, %v3183_v59  ;;  %v3227_v15 = vld [vmem:[#allocation21 + $0x790] sm:$0xff] }
 0x7eb   :  { %10201 = vmatpush1.bf16.msra.mxu1 %v15529_v63  ;;  %9874 = vmatprep.subr.bf16.mxu0 %v15536_v8  ;;  %v15577_v63 = vcombine.low %v3180_v56, %v3184_v40  ;;  %v15584_v8 = vcombine.high %v3187_v5, %v3191_v6  ;;  %v3231_v59 = vld [vmem:[#allocation21 + $0x7b0] sm:$0xff]  ;;  %v3228_v56 = vld [vmem:[#allocation21 + $0x798] sm:$0xff] }
 0x7ec   :  { %10202 = vmatprep.subr.bf16.mxu1 %v15538_v35  ;;  %v15586_v35 = vcombine.high %v3188_v9, %v3192_v52  ;;  %v3232_v40 = vld [vmem:[#allocation21 + $0x7b8] sm:$0xff] }
 0x7ee   :  { %9875 = vmatpush1.bf16.msra.mxu0 %v15535_v54  ;;  %v15583_v54 = vcombine.low %v3187_v5, %v3191_v6  ;;  %v3235_v5 = vld [vmem:[#allocation21 + $0x7d0] sm:$0xff] }
 0x7ef   :  { %10203 = vmatpush1.bf16.msra.mxu1 %v15537_v46  ;;  %9876 = vmatprep.subr.bf16.mxu0 %v15544_v22  ;;  %v15585_v46 = vcombine.low %v3188_v9, %v3192_v52  ;;  %v15592_v22 = vcombine.high %v3195_v57, %v3199_v14  ;;  %v3239_v6 = vld [vmem:[#allocation21 + $0x7f0] sm:$0xff]  ;;  %v3236_v9 = vld [vmem:[#allocation21 + $0x7d8] sm:$0xff] }
 0x7f0   :  { %10204 = vmatprep.subr.bf16.mxu1 %v15546_v47  ;;  %v15594_v47 = vcombine.high %v3196_v1, %v3200_v16  ;;  %v3240_v52 = vld [vmem:[#allocation21 + $0x7f8] sm:$0xff] }
 0x7f2   :  { %9877 = vmatpush1.bf16.msra.mxu0 %v15543_v17  ;;  %v15591_v17 = vcombine.low %v3195_v57, %v3199_v14  ;;  %v3243_v57 = vld [vmem:[#allocation21 + $0x810] sm:$0xff] }
 0x7f3   :  { %10205 = vmatpush1.bf16.msra.mxu1 %v15545_v2  ;;  %9878 = vmatprep.subr.bf16.mxu0 %v15552_v31  ;;  %v15593_v2 = vcombine.low %v3196_v1, %v3200_v16  ;;  %v15600_v31 = vcombine.high %v3203_v12, %v3207_v7  ;;  %v3247_v14 = vld [vmem:[#allocation21 + $0x830] sm:$0xff]  ;;  %v3244_v1 = vld [vmem:[#allocation21 + $0x818] sm:$0xff] }
 0x7f4   :  { %10206 = vmatprep.subr.bf16.mxu1 %v15554_v33  ;;  %v15602_v33 = vcombine.high %v3204_v27, %v3208_v30  ;;  %v3248_v16 = vld [vmem:[#allocation21 + $0x838] sm:$0xff] }
 0x7f6   :  { %9879 = vmatpush1.bf16.msra.mxu0 %v15551_v37  ;;  %v15599_v37 = vcombine.low %v3203_v12, %v3207_v7  ;;  %v3251_v12 = vld [vmem:[#allocation21 + $0x850] sm:$0xff] }
 0x7f7   :  { %10207 = vmatpush1.bf16.msra.mxu1 %v15553_v4  ;;  %9880 = vmatprep.subr.bf16.mxu0 %v15560_v42  ;;  %v15601_v4 = vcombine.low %v3204_v27, %v3208_v30  ;;  %v15608_v42 = vcombine.high %v3211_v36, %v3215_v34  ;;  %v3255_v7 = vld [vmem:[#allocation21 + $0x870] sm:$0xff]  ;;  %v15639_v27 = vcombine.low %v3243_v57, %v3247_v14  ;;  %v3252_v30 = vld [vmem:[#allocation21 + $0x858] sm:$0xff] }
 0x7f8   :  { %10208 = vmatprep.subr.bf16.mxu1 %v15562_v45  ;;  %v15610_v45 = vcombine.high %v3212_v43, %v3216_v20 }
 0x7fa   :  { %9881 = vmatpush1.bf16.msra.mxu0 %v15559_v50  ;;  %v15607_v50 = vcombine.low %v3211_v36, %v3215_v34  ;;  %v3263_v36 = vld [vmem:[#allocation21 + $0x8b0] sm:$0xff] }
 0x7fb   :  { %10209 = vmatpush1.bf16.msra.mxu1 %v15561_v32  ;;  %9882 = vmatprep.subr.bf16.mxu0 %v15568_v51  ;;  %v15609_v32 = vcombine.low %v3212_v43, %v3216_v20  ;;  %v15616_v51 = vcombine.high %v3219_v28, %v3223_v48  ;;  %v3260_v43 = vld [vmem:[#allocation21 + $0x898] sm:$0xff] }
 0x7fc   :  { %10210 = vmatprep.subr.bf16.mxu1 %v15570_v55  ;;  %v15618_v55 = vcombine.high %v3220_v44, %v3224_v49  ;;  %v3264_v20 = vld [vmem:[#allocation21 + $0x8b8] sm:$0xff] }
 0x7fe   :  { %9883 = vmatpush1.bf16.msra.mxu0 %v15567_v0  ;;  %v15615_v0 = vcombine.low %v3219_v28, %v3223_v48  ;;  %v3267_v28 = vld [vmem:[#allocation21 + $0x8d0] sm:$0xff] }
 0x7ff   :  { %10211 = vmatpush1.bf16.msra.mxu1 %v15569_v21  ;;  %9884 = vmatprep.subr.bf16.mxu0 %v15576_v13  ;;  %v15617_v21 = vcombine.low %v3220_v44, %v3224_v49  ;;  %v15624_v13 = vcombine.high %v3227_v15, %v3231_v59  ;;  %v3271_v48 = vld [vmem:[#allocation21 + $0x8f0] sm:$0xff]  ;;  %v3268_v44 = vld [vmem:[#allocation21 + $0x8d8] sm:$0xff] }
 0x800   :  { %10212 = vmatprep.subr.bf16.mxu1 %v15578_v3  ;;  %v15626_v3 = vcombine.high %v3228_v56, %v3232_v40  ;;  %v3272_v49 = vld [vmem:[#allocation21 + $0x8f8] sm:$0xff] }
 0x802   :  { %9885 = vmatpush1.bf16.msra.mxu0 %v15575_v10  ;;  %v15623_v10 = vcombine.low %v3227_v15, %v3231_v59  ;;  %v3279_v15 = vld [vmem:[#allocation21 + $0x930] sm:$0xff]  ;;  %v3276_v59 = vld [vmem:[#allocation21 + $0x918] sm:$0xff] }
 0x803   :  { %10213 = vmatpush1.bf16.msra.mxu1 %v15577_v63  ;;  %9886 = vmatprep.subr.bf16.mxu0 %v15584_v8  ;;  %v15625_v63 = vcombine.low %v3228_v56, %v3232_v40  ;;  %v15632_v8 = vcombine.high %v3235_v5, %v3239_v6  ;;  %v3280_v56 = vld [vmem:[#allocation21 + $0x938] sm:$0xff]  ;;  %v15665_v40 = vcombine.low %v3268_v44, %v3272_v49 }
 0x804   :  { %10214 = vmatprep.subr.bf16.mxu1 %v15586_v35  ;;  %v15634_v35 = vcombine.high %v3236_v9, %v3240_v52 }
 0x806   :  { %9887 = vmatpush1.bf16.msra.mxu0 %v15583_v54  ;;  %v15631_v54 = vcombine.low %v3235_v5, %v3239_v6  ;;  %v3284_v5 = vld [vmem:[#allocation21 + $0x958] sm:$0xff] }
 0x807   :  { %10215 = vmatpush1.bf16.msra.mxu1 %v15585_v46  ;;  %9888 = vmatprep.subr.bf16.mxu0 %v15592_v22  ;;  %v15633_v46 = vcombine.low %v3236_v9, %v3240_v52  ;;  %v15640_v22 = vcombine.high %v3243_v57, %v3247_v14  ;;  %v3288_v6 = vld [vmem:[#allocation21 + $0x978] sm:$0xff]  ;;  %v15673_v52 = vcombine.low %v3276_v59, %v3280_v56 }
 0x808   :  { %10216 = vmatprep.subr.bf16.mxu1 %v15594_v47  ;;  %v15642_v47 = vcombine.high %v3244_v1, %v3248_v16  ;;  %v3292_v57 = vld [vmem:[#allocation21 + $0x998] sm:$0xff] }
 0x809   :  { %v3296_v14 = vld [vmem:[#allocation21 + $0x9b8] sm:$0xff] }
 0x80a   :  { %9889 = vmatpush1.bf16.msra.mxu0 %v15591_v17  ;;  %v3256_v17 = vld [vmem:[#allocation21 + $0x878] sm:$0xff] }
 0x80b   :  { %10217 = vmatpush1.bf16.msra.mxu1 %v15593_v2  ;;  %9890 = vmatprep.subr.bf16.mxu0 %v15600_v31  ;;  %v15641_v2 = vcombine.low %v3244_v1, %v3248_v16  ;;  %v15648_v31 = vcombine.high %v3251_v12, %v3255_v7  ;;  %v15650_v34 = vcombine.high %v3252_v30, %v3256_v17 }
 0x80c   :  { %10218 = vmatprep.subr.bf16.mxu1 %v15602_v33  ;;  %v3259_v33 = vld [vmem:[#allocation21 + $0x890] sm:$0xff]  ;;  %v15681_v16 = vcombine.low %v3284_v5, %v3288_v6 }
 0x80e   :  { %9891 = vmatpush1.bf16.msra.mxu0 %v15599_v37  ;;  %v15647_v37 = vcombine.low %v3251_v12, %v3255_v7  ;;  %v3300_v12 = vld [vmem:[#allocation21 + $0x9d8] sm:$0xff] }
 0x80f   :  { %10219 = vmatpush1.bf16.msra.mxu1 %v15601_v4  ;;  %9892 = vmatprep.subr.bf16.mxu0 %v15608_v42  ;;  %v15649_v4 = vcombine.low %v3252_v30, %v3256_v17  ;;  %v15656_v42 = vcombine.high %v3259_v33, %v3263_v36  ;;  %v3304_v7 = vld [vmem:[#allocation21 + $0x9f8] sm:$0xff]  ;;  %v15689_v30 = vcombine.low %v3292_v57, %v3296_v14 }
 0x810   :  { %10220 = vmatprep.subr.bf16.mxu1 %v15610_v45  ;;  %v15658_v45 = vcombine.high %v3260_v43, %v3264_v20 }
 0x812   :  { %9893 = vmatpush1.bf16.msra.mxu0 %v15607_v50  ;;  %v15655_v50 = vcombine.low %v3259_v33, %v3263_v36  ;;  %v3311_v33 = vld [vmem:[#allocation21 + $0xa30] sm:$0xff]  ;;  %v3308_v36 = vld [vmem:[#allocation21 + $0xa18] sm:$0xff] }
 0x813   :  { %10221 = vmatpush1.bf16.msra.mxu1 %v15609_v32  ;;  %9894 = vmatprep.subr.bf16.mxu0 %v15616_v51  ;;  %v15664_v32 = vcombine.high %v3267_v28, %v3271_v48  ;;  %v15666_v51 = vcombine.high %v3268_v44, %v3272_v49 }
 0x814   :  { %10222 = vmatprep.subr.bf16.mxu1 %v15618_v55  ;;  %v3275_v55 = vld [vmem:[#allocation21 + $0x910] sm:$0xff] }
 0x815   :  { %v15671_v9 = vcombine.low %v3275_v55, %v3279_v15 }
 0x816   :  { %9895 = vmatpush1.bf16.msra.mxu0 %v15615_v0  ;;  %v15672_v0 = vcombine.high %v3275_v55, %v3279_v15  ;;  %v3324_v55 = vld [vmem:[#allocation21 + $0xa98] sm:$0xff] }
 0x817   :  { %10223 = vmatpush1.bf16.msra.mxu1 %v15617_v21  ;;  %9896 = vmatprep.subr.bf16.mxu0 %v15624_v13  ;;  %v15674_v21 = vcombine.high %v3276_v59, %v3280_v56  ;;  %v3283_v13 = vld [vmem:[#allocation21 + $0x950] sm:$0xff]  ;;  %v3328_v15 = vld [vmem:[#allocation21 + $0xab8] sm:$0xff] }
 0x818   :  { %10224 = vmatprep.subr.bf16.mxu1 %v15626_v3  ;;  %v3287_v3 = vld [vmem:[#allocation21 + $0x970] sm:$0xff] }
 0x819   :  { %v15679_v1 = vcombine.low %v3283_v13, %v3287_v3 }
 0x81a   :  { %9897 = vmatpush1.bf16.msra.mxu0 %v15623_v10  ;;  %v15680_v10 = vcombine.high %v3283_v13, %v3287_v3  ;;  %v3332_v13 = vld [vmem:[#allocation21 + $0xad8] sm:$0xff] }
 0x81b   :  { %10225 = vmatpush1.bf16.msra.mxu1 %v15625_v63  ;;  %9898 = vmatprep.subr.bf16.mxu0 %v15632_v8  ;;  %v15682_v63 = vcombine.high %v3284_v5, %v3288_v6  ;;  %v3291_v8 = vld [vmem:[#allocation21 + $0x990] sm:$0xff]  ;;  %v3336_v3 = vld [vmem:[#allocation21 + $0xaf8] sm:$0xff]  ;;  %v15721_v6 = vcombine.low %v3324_v55, %v3328_v15 }
 0x81c   :  { %10226 = vmatprep.subr.bf16.mxu1 %v15634_v35  ;;  %v3295_v35 = vld [vmem:[#allocation21 + $0x9b0] sm:$0xff] }
 0x81e   :  { %9899 = vmatpush1.bf16.msra.mxu0 %v15631_v54  ;;  %v15688_v54 = vcombine.high %v3291_v8, %v3295_v35 }
 0x81f   :  { %10227 = vmatpush1.bf16.msra.mxu1 %v15633_v46  ;;  %9909 = vmatprep.subr.bf16.mxu0 %v15640_v22  ;;  %v15690_v46 = vcombine.high %v3292_v57, %v3296_v14  ;;  %v3299_v22 = vld [vmem:[#allocation21 + $0x9d0] sm:$0xff]  ;;  %v15729_v14 = vcombine.low %v3332_v13, %v3336_v3 }
 0x820   :  { %10237 = vmatprep.subr.bf16.mxu1 %v15642_v47  ;;  %v3303_v47 = vld [vmem:[#allocation21 + $0x9f0] sm:$0xff] }
 0x821   :  { %9901 = vmatmul.mubr.bf16.vlgmr.msra.gmra.mrb[52].mxu0 %v18737_v19  ;;  %v15696_v17 = vcombine.high %v3299_v22, %v3303_v47 }
 0x822   :  { %10229 = vmatmul.mubr.bf16.vlgmr.msra.gmra.mrb[60].mxu1 %v18737_v19  ;;  %9910 = vmatpush1.bf16.msra.mxu0 %v15639_v27  ;;  %v15657_v19 = vcombine.low %v3260_v43, %v3264_v20  ;;  %v15687_v27 = vcombine.low %v3291_v8, %v3295_v35  ;;  %v15695_v43 = vcombine.low %v3299_v22, %v3303_v47  ;;  %v3340_v8 = vld [vmem:[#allocation21 + $0xb18] sm:$0xff] }
 0x823   :  { %9941 = vmatprep.mubr.bf16.mxu0 %v18739_v53  ;;  %10238 = vmatpush1.bf16.msra.mxu1 %v15641_v2  ;;  %v15698_v2 = vcombine.high %v3300_v12, %v3304_v7  ;;  %v15697_v20 = vcombine.low %v3300_v12, %v3304_v7  ;;  %v3344_v35 = vld [vmem:[#allocation21 + $0xb38] sm:$0xff] }
 0x824   :  { %10269 = vmatprep.mubr.bf16.mxu1 %v18739_v53  ;;  %9911 = vmatprep.subr.bf16.mxu0 %v15648_v31  ;;  %v15663_v53 = vcombine.low %v3267_v28, %v3271_v48  ;;  %v3307_v31 = vld [vmem:[#allocation21 + $0xa10] sm:$0xff]  ;;  %v3316_v28 = vld [vmem:[#allocation21 + $0xa58] sm:$0xff]  ;;  %v15737_v7 = vcombine.low %v3340_v8, %v3344_v35 }
 0x825   :  { %10239 = vmatprep.subr.bf16.mxu1 %v15650_v34  ;;  %v3312_v34 = vld [vmem:[#allocation21 + $0xa38] sm:$0xff]  ;;  %v15703_v44 = vcombine.low %v3307_v31, %v3311_v33 }
 0x826   :  { %9912 = vmatpush1.bf16.msra.mxu0 %v15647_v37  ;;  %v15704_v37 = vcombine.high %v3307_v31, %v3311_v33  ;;  %v3320_v48 = vld [vmem:[#allocation21 + $0xa78] sm:$0xff]  ;;  %v15705_v49 = vcombine.low %v3308_v36, %v3312_v34 }
 0x827   :  { %10240 = vmatpush1.bf16.msra.mxu1 %v15649_v4  ;;  %9913 = vmatprep.subr.bf16.mxu0 %v15656_v42  ;;  %v15706_v4 = vcombine.high %v3308_v36, %v3312_v34  ;;  %v3315_v42 = vld [vmem:[#allocation21 + $0xa50] sm:$0xff]  ;;  %v15713_v56 = vcombine.low %v3316_v28, %v3320_v48  ;;  %v3348_v22 = vld [vmem:[#allocation21 + $0xb58] sm:$0xff] }
 0x828   :  { %10241 = vmatprep.subr.bf16.mxu1 %v15658_v45  ;;  %v3319_v45 = vld [vmem:[#allocation21 + $0xa70] sm:$0xff]  ;;  %v3352_v47 = vld [vmem:[#allocation21 + $0xb78] sm:$0xff] }
 0x829   :  { %v15711_v59 = vcombine.low %v3315_v42, %v3319_v45  ;;  %v3356_v31 = vld [vmem:[#allocation21 + $0xb98] sm:$0xff]  ;;  %v15745_v34 = vcombine.low %v3348_v22, %v3352_v47 }
 0x82a   :  { %9914 = vmatpush1.bf16.msra.mxu0 %v15655_v50  ;;  %v15712_v50 = vcombine.high %v3315_v42, %v3319_v45  ;;  %v3360_v33 = vld [vmem:[#allocation21 + $0xbb8] sm:$0xff] }
 0x82b   :  { %10242 = vmatpush1.bf16.msra.mxu1 %v15657_v19  ;;  %9915 = vmatprep.subr.bf16.mxu0 %v15664_v32  ;;  %v15714_v19 = vcombine.high %v3316_v28, %v3320_v48  ;;  %v3323_v32 = vld [vmem:[#allocation21 + $0xa90] sm:$0xff]  ;;  %v3364_v42 = vld [vmem:[#allocation21 + $0xbd8] sm:$0xff]  ;;  %v15753_v48 = vcombine.low %v3356_v31, %v3360_v33 }
 0x82c   :  { %10243 = vmatprep.subr.bf16.mxu1 %v15666_v51  ;;  %v3327_v51 = vld [vmem:[#allocation21 + $0xab0] sm:$0xff]  ;;  %v3368_v45 = vld [vmem:[#allocation21 + $0xbf8] sm:$0xff] }
 0x82d   :  { %v15719_v5 = vcombine.low %v3323_v32, %v3327_v51 }
 0x82e   :  { %9916 = vmatpush1.bf16.msra.mxu0 %v15663_v53  ;;  %v15720_v53 = vcombine.high %v3323_v32, %v3327_v51  ;;  %v3372_v32 = vld [vmem:[#allocation21 + $0xc18] sm:$0xff] }
 0x82f   :  { %10244 = vmatpush1.bf16.msra.mxu1 %v15665_v40  ;;  %9917 = vmatprep.subr.bf16.mxu0 %v15672_v0  ;;  %v15722_v40 = vcombine.high %v3324_v55, %v3328_v15  ;;  %v3331_v0 = vld [vmem:[#allocation21 + $0xad0] sm:$0xff]  ;;  %v3376_v51 = vld [vmem:[#allocation21 + $0xc38] sm:$0xff]  ;;  %v15761_v15 = vcombine.low %v3364_v42, %v3368_v45 }
 0x830   :  { %10245 = vmatprep.subr.bf16.mxu1 %v15674_v21  ;;  %v3335_v21 = vld [vmem:[#allocation21 + $0xaf0] sm:$0xff] }
 0x831   :  { %v15727_v57 = vcombine.low %v3331_v0, %v3335_v21 }
 0x832   :  { %9918 = vmatpush1.bf16.msra.mxu0 %v15671_v9  ;;  %v15728_v9 = vcombine.high %v3331_v0, %v3335_v21  ;;  %v3380_v21 = vld [vmem:[#allocation21 + $0xc58] sm:$0xff] }
 0x833   :  { %10246 = vmatpush1.bf16.msra.mxu1 %v15673_v52  ;;  %9919 = vmatprep.subr.bf16.mxu0 %v15680_v10  ;;  %v15730_v52 = vcombine.high %v3332_v13, %v3336_v3  ;;  %v3339_v10 = vld [vmem:[#allocation21 + $0xb10] sm:$0xff]  ;;  %v3384_v13 = vld [vmem:[#allocation21 + $0xc78] sm:$0xff]  ;;  %v15769_v3 = vcombine.low %v3372_v32, %v3376_v51 }
 0x834   :  { %10247 = vmatprep.subr.bf16.mxu1 %v15682_v63  ;;  %v3343_v63 = vld [vmem:[#allocation21 + $0xb30] sm:$0xff] }
 0x835   :  { %v15735_v12 = vcombine.low %v3339_v10, %v3343_v63 }
 0x836   :  { %9920 = vmatpush1.bf16.msra.mxu0 %v15679_v1  ;;  %v15736_v1 = vcombine.high %v3339_v10, %v3343_v63  ;;  %v3388_v10 = vld [vmem:[#allocation21 + $0xc98] sm:$0xff] }
 0x837   :  { %10248 = vmatpush1.bf16.msra.mxu1 %v15681_v16  ;;  %9921 = vmatprep.subr.bf16.mxu0 %v15688_v54  ;;  %v15738_v16 = vcombine.high %v3340_v8, %v3344_v35  ;;  %v3347_v54 = vld [vmem:[#allocation21 + $0xb50] sm:$0xff]  ;;  %v3392_v63 = vld [vmem:[#allocation21 + $0xcb8] sm:$0xff]  ;;  %v15777_v35 = vcombine.low %v3380_v21, %v3384_v13 }
 0x838   :  { %10249 = vmatprep.subr.bf16.mxu1 %v15690_v46  ;;  %v3351_v46 = vld [vmem:[#allocation21 + $0xb70] sm:$0xff] }
 0x839   :  { %v15743_v36 = vcombine.low %v3347_v54, %v3351_v46 }
 0x83a   :  { %9922 = vmatpush1.bf16.msra.mxu0 %v15687_v27  ;;  %v15744_v27 = vcombine.high %v3347_v54, %v3351_v46  ;;  %v3396_v54 = vld [vmem:[#allocation21 + $0xcd8] sm:$0xff] }
 0x83b   :  { %10250 = vmatpush1.bf16.msra.mxu1 %v15689_v30  ;;  %9923 = vmatprep.subr.bf16.mxu0 %v15696_v17  ;;  %v15746_v30 = vcombine.high %v3348_v22, %v3352_v47  ;;  %v3355_v17 = vld [vmem:[#allocation21 + $0xb90] sm:$0xff]  ;;  %v3400_v46 = vld [vmem:[#allocation21 + $0xcf8] sm:$0xff] }
 0x83c   :  { %10251 = vmatprep.subr.bf16.mxu1 %v15698_v2  ;;  %v3359_v2 = vld [vmem:[#allocation21 + $0xbb0] sm:$0xff] }
 0x83d   :  { %v15751_v28 = vcombine.low %v3355_v17, %v3359_v2 }
 0x83e   :  { %9924 = vmatpush1.bf16.msra.mxu0 %v15695_v43  ;;  %v15752_v43 = vcombine.high %v3355_v17, %v3359_v2  ;;  %v3408_v17 = vld [vmem:[#allocation21 + $0xd38] sm:$0xff]  ;;  %v15793_v2 = vcombine.low %v3396_v54, %v3400_v46 }
 0x83f   :  { %10252 = vmatpush1.bf16.msra.mxu1 %v15697_v20  ;;  %9925 = vmatprep.subr.bf16.mxu0 %v15704_v37  ;;  %v15754_v20 = vcombine.high %v3356_v31, %v3360_v33  ;;  %v3363_v37 = vld [vmem:[#allocation21 + $0xbd0] sm:$0xff] }
 0x840   :  { %10253 = vmatprep.subr.bf16.mxu1 %v15706_v4  ;;  %v3367_v4 = vld [vmem:[#allocation21 + $0xbf0] sm:$0xff] }
 0x841   :  { %v15759_v55 = vcombine.low %v3363_v37, %v3367_v4 }
 0x842   :  { %9926 = vmatpush1.bf16.msra.mxu0 %v15703_v44  ;;  %v15760_v44 = vcombine.high %v3363_v37, %v3367_v4 }
 0x843   :  { %10254 = vmatpush1.bf16.msra.mxu1 %v15705_v49  ;;  %9927 = vmatprep.subr.bf16.mxu0 %v15712_v50  ;;  %v15762_v49 = vcombine.high %v3364_v42, %v3368_v45  ;;  %v3371_v50 = vld [vmem:[#allocation21 + $0xc10] sm:$0xff] }
 0x844   :  { %10255 = vmatprep.subr.bf16.mxu1 %v15714_v19  ;;  %v3375_v19 = vld [vmem:[#allocation21 + $0xc30] sm:$0xff] }
 0x845   :  { %v15767_v0 = vcombine.low %v3371_v50, %v3375_v19 }
 0x846   :  { %9928 = vmatpush1.bf16.msra.mxu0 %v15711_v59  ;;  %v15768_v59 = vcombine.high %v3371_v50, %v3375_v19 }
 0x847   :  { %10256 = vmatpush1.bf16.msra.mxu1 %v15713_v56  ;;  %9929 = vmatprep.subr.bf16.mxu0 %v15720_v53  ;;  %v15770_v56 = vcombine.high %v3372_v32, %v3376_v51  ;;  %v3379_v53 = vld [vmem:[#allocation21 + $0xc50] sm:$0xff] }
 0x848   :  { %10257 = vmatprep.subr.bf16.mxu1 %v15722_v40  ;;  %v3383_v40 = vld [vmem:[#allocation21 + $0xc70] sm:$0xff] }
 0x849   :  { %v15775_v8 = vcombine.low %v3379_v53, %v3383_v40 }
 0x84a   :  { %9930 = vmatpush1.bf16.msra.mxu0 %v15719_v5  ;;  %v15776_v5 = vcombine.high %v3379_v53, %v3383_v40  ;;  %v3428_v40 = vld [vmem:[#allocation21 + $0xdd8] sm:$0xff] }
 0x84b   :  { %10258 = vmatpush1.bf16.msra.mxu1 %v15721_v6  ;;  %9931 = vmatprep.subr.bf16.mxu0 %v15728_v9  ;;  %v3387_v6 = vld [vmem:[#allocation21 + $0xc90] sm:$0xff] }
 0x84c   :  { %10259 = vmatprep.subr.bf16.mxu1 %v15730_v52  ;;  %v3391_v9 = vld [vmem:[#allocation21 + $0xcb0] sm:$0xff]  ;;  %v15778_v52 = vcombine.high %v3380_v21, %v3384_v13 }
 0x84d   :  { %v15783_v22 = vcombine.low %v3387_v6, %v3391_v9 }
 0x84e   :  { %9932 = vmatpush1.bf16.msra.mxu0 %v15727_v57  ;;  %v15784_v57 = vcombine.high %v3387_v6, %v3391_v9 }
 0x84f   :  { %10260 = vmatpush1.bf16.msra.mxu1 %v15729_v14  ;;  %9933 = vmatprep.subr.bf16.mxu0 %v15736_v1  ;;  %v15786_v14 = vcombine.high %v3388_v10, %v3392_v63  ;;  %v3395_v1 = vld [vmem:[#allocation21 + $0xcd0] sm:$0xff] }
 0x850   :  { %10261 = vmatprep.subr.bf16.mxu1 %v15738_v16  ;;  %v3399_v16 = vld [vmem:[#allocation21 + $0xcf0] sm:$0xff] }
 0x851   :  { %v15792_v47 = vcombine.high %v3395_v1, %v3399_v16 }
 0x852   :  { %9934 = vmatpush1.bf16.msra.mxu0 %v15735_v12  ;;  %v15794_v12 = vcombine.high %v3396_v54, %v3400_v46 }
 0x853   :  { %10262 = vmatpush1.bf16.msra.mxu1 %v15737_v7  ;;  %9935 = vmatprep.subr.bf16.mxu0 %v15744_v27  ;;  %v3403_v7 = vld [vmem:[#allocation21 + $0xd10] sm:$0xff] }
 0x854   :  { %10263 = vmatprep.subr.bf16.mxu1 %v15746_v30  ;;  %v3407_v27 = vld [vmem:[#allocation21 + $0xd30] sm:$0xff]  ;;  %v3404_v30 = vld [vmem:[#allocation21 + $0xd18] sm:$0xff] }
 0x855   :  { %v15800_v31 = vcombine.high %v3403_v7, %v3407_v27  ;;  %v15802_v33 = vcombine.high %v3404_v30, %v3408_v17  ;;  %v15799_v37 = vcombine.low %v3403_v7, %v3407_v27  ;;  %v15801_v4 = vcombine.low %v3404_v30, %v3408_v17 }
 0x856   :  { %9936 = vmatpush1.bf16.msra.mxu0 %v15743_v36  ;;  %v3411_v36 = vld [vmem:[#allocation21 + $0xd50] sm:$0xff] }
 0x857   :  { %10264 = vmatpush1.bf16.msra.mxu1 %v15745_v34  ;;  %9937 = vmatprep.subr.bf16.mxu0 %v15752_v43  ;;  %v3415_v34 = vld [vmem:[#allocation21 + $0xd70] sm:$0xff]  ;;  %v3412_v43 = vld [vmem:[#allocation21 + $0xd58] sm:$0xff] }
 0x858   :  { %10265 = vmatprep.subr.bf16.mxu1 %v15754_v20  ;;  %v3416_v20 = vld [vmem:[#allocation21 + $0xd78] sm:$0xff]  ;;  %v15808_v42 = vcombine.high %v3411_v36, %v3415_v34  ;;  %v15807_v50 = vcombine.low %v3411_v36, %v3415_v34 }
 0x859   :  { %v15810_v45 = vcombine.high %v3412_v43, %v3416_v20  ;;  %v15809_v19 = vcombine.low %v3412_v43, %v3416_v20 }
 0x85a   :  { %9938 = vmatpush1.bf16.msra.mxu0 %v15751_v28  ;;  %v3419_v28 = vld [vmem:[#allocation21 + $0xd90] sm:$0xff] }
 0x85b   :  { %10266 = vmatpush1.bf16.msra.mxu1 %v15753_v48  ;;  %9939 = vmatprep.subr.bf16.mxu0 %v15760_v44  ;;  %v3423_v48 = vld [vmem:[#allocation21 + $0xdb0] sm:$0xff]  ;;  %v3420_v44 = vld [vmem:[#allocation21 + $0xd98] sm:$0xff] }
 0x85c   :  { %10267 = vmatprep.subr.bf16.mxu1 %v15762_v49  ;;  %v3424_v49 = vld [vmem:[#allocation21 + $0xdb8] sm:$0xff]  ;;  %v15816_v32 = vcombine.high %v3419_v28, %v3423_v48 }
 0x85d   :  { %v15817_v9 = vcombine.low %v3420_v44, %v3424_v49 }
 0x85e   :  { %9940 = vmatpush1.bf16.msra.mxu0 %v15759_v55  ;;  %v15818_v55 = vcombine.high %v3420_v44, %v3424_v49 }
 0x85f   :  { %10268 = vmatpush1.bf16.msra.mxu1 %v15761_v15  ;;  %9950 = vmatprep.subr.bf16.mxu0 %v15768_v59  ;;  %v3427_v15 = vld [vmem:[#allocation21 + $0xdd0] sm:$0xff] }
 0x860   :  { %10278 = vmatprep.subr.bf16.mxu1 %v15770_v56  ;;  %v3431_v59 = vld [vmem:[#allocation21 + $0xdf0] sm:$0xff] }
 0x861   :  { %9942 = vmatmul.mubr.bf16.vlgmr.msra.gmra.mrb[52].mxu0 %v18754_v23 }
 0x862   :  { %10270 = vmatmul.mubr.bf16.vlgmr.msra.gmra.mrb[60].mxu1 %v18754_v23  ;;  %9951 = vmatpush1.bf16.msra.mxu0 %v15767_v0  ;;  %v15785_v23 = vcombine.low %v3388_v10, %v3392_v63  ;;  %v3432_v0 = vld [vmem:[#allocation21 + $0xdf8] sm:$0xff] }
 0x863   :  { %9982 = vmatprep.mubr.bf16.mxu0 %v18757_v25  ;;  %10279 = vmatpush1.bf16.msra.mxu1 %v15769_v3  ;;  %v15815_v3 = vcombine.low %v3419_v28, %v3423_v48  ;;  %v15826_v63 = vcombine.high %v3428_v40, %v3432_v0 }
 0x864   :  { %10310 = vmatprep.mubr.bf16.mxu1 %v18757_v25  ;;  %9952 = vmatprep.subr.bf16.mxu0 %v15776_v5  ;;  %v15791_v25 = vcombine.low %v3395_v1, %v3399_v16  ;;  %v15823_v1 = vcombine.low %v3427_v15, %v3431_v59  ;;  %v15825_v16 = vcombine.low %v3428_v40, %v3432_v0 }
 0x865   :  { %10280 = vmatprep.subr.bf16.mxu1 %v15778_v52  ;;  %v15824_v52 = vcombine.high %v3427_v15, %v3431_v59 }
 0x866   :  { %9953 = vmatpush1.bf16.msra.mxu0 %v15775_v8  ;;  %v3435_v8 = vld [vmem:[#allocation21 + $0xe10] sm:$0xff] }
 0x867   :  { %10281 = vmatpush1.bf16.msra.mxu1 %v15777_v35  ;;  %9954 = vmatprep.subr.bf16.mxu0 %v15784_v57  ;;  %v3439_v35 = vld [vmem:[#allocation21 + $0xe30] sm:$0xff]  ;;  %v3436_v57 = vld [vmem:[#allocation21 + $0xe18] sm:$0xff] }
 0x868   :  { %10282 = vmatprep.subr.bf16.mxu1 %v15786_v14  ;;  %v3440_v14 = vld [vmem:[#allocation21 + $0xe38] sm:$0xff]  ;;  %v15832_v54 = vcombine.high %v3435_v8, %v3439_v35  ;;  %v15831_v7 = vcombine.low %v3435_v8, %v3439_v35  ;;  %v3483_v8 = vld [vmem:[#allocation21 + $0xf90] sm:$0xff] }
 0x869   :  { %v15834_v46 = vcombine.high %v3436_v57, %v3440_v14  ;;  %v15833_v27 = vcombine.low %v3436_v57, %v3440_v14  ;;  %v3487_v35 = vld [vmem:[#allocation21 + $0xfb0] sm:$0xff]  ;;  %v3484_v57 = vld [vmem:[#allocation21 + $0xf98] sm:$0xff] }
 0x86a   :  { %9955 = vmatpush1.bf16.msra.mxu0 %v15783_v22  ;;  %v3443_v22 = vld [vmem:[#allocation21 + $0xe50] sm:$0xff]  ;;  %v3488_v14 = vld [vmem:[#allocation21 + $0xfb8] sm:$0xff] }
 0x86b   :  { %10283 = vmatpush1.bf16.msra.mxu1 %v15785_v23  ;;  %9956 = vmatprep.subr.bf16.mxu0 %v15792_v47  ;;  %v3447_v23 = vld [vmem:[#allocation21 + $0xe70] sm:$0xff]  ;;  %v3444_v47 = vld [vmem:[#allocation21 + $0xe58] sm:$0xff] }
 0x86c   :  { %10284 = vmatprep.subr.bf16.mxu1 %v15794_v12  ;;  %v3448_v12 = vld [vmem:[#allocation21 + $0xe78] sm:$0xff]  ;;  %v15840_v30 = vcombine.high %v3443_v22, %v3447_v23  ;;  %v15839_v36 = vcombine.low %v3443_v22, %v3447_v23  ;;  %v3491_v22 = vld [vmem:[#allocation21 + $0xfd0] sm:$0xff] }
 0x86d   :  { %v15842_v17 = vcombine.high %v3444_v47, %v3448_v12  ;;  %v15841_v34 = vcombine.low %v3444_v47, %v3448_v12  ;;  %v3495_v23 = vld [vmem:[#allocation21 + $0xff0] sm:$0xff]  ;;  %v3492_v47 = vld [vmem:[#allocation21 + $0xfd8] sm:$0xff] }
 0x86e   :  { %9957 = vmatpush1.bf16.msra.mxu0 %v15791_v25  ;;  %v3451_v25 = vld [vmem:[#allocation21 + $0xe90] sm:$0xff]  ;;  %v3496_v12 = vld [vmem:[#allocation21 + $0xff8] sm:$0xff] }
 0x86f   :  { %10285 = vmatpush1.bf16.msra.mxu1 %v15793_v2  ;;  %9958 = vmatprep.subr.bf16.mxu0 %v15800_v31  ;;  %v3455_v2 = vld [vmem:[#allocation21 + $0xeb0] sm:$0xff]  ;;  %v3452_v31 = vld [vmem:[#allocation21 + $0xe98] sm:$0xff] }
 0x870   :  { %10286 = vmatprep.subr.bf16.mxu1 %v15802_v33  ;;  %v3456_v33 = vld [vmem:[#allocation21 + $0xeb8] sm:$0xff]  ;;  %v15848_v43 = vcombine.high %v3451_v25, %v3455_v2  ;;  %v15847_v28 = vcombine.low %v3451_v25, %v3455_v2  ;;  %v3499_v25 = vld [vmem:[#allocation21 + $0x1010] sm:$0xff] }
 0x871   :  { %v15850_v20 = vcombine.high %v3452_v31, %v3456_v33  ;;  %v15849_v48 = vcombine.low %v3452_v31, %v3456_v33  ;;  %v3503_v2 = vld [vmem:[#allocation21 + $0x1030] sm:$0xff]  ;;  %v3500_v31 = vld [vmem:[#allocation21 + $0x1018] sm:$0xff] }
 0x872   :  { %9959 = vmatpush1.bf16.msra.mxu0 %v15799_v37  ;;  %v3459_v37 = vld [vmem:[#allocation21 + $0xed0] sm:$0xff]  ;;  %v3504_v33 = vld [vmem:[#allocation21 + $0x1038] sm:$0xff] }
 0x873   :  { %10287 = vmatpush1.bf16.msra.mxu1 %v15801_v4  ;;  %9960 = vmatprep.subr.bf16.mxu0 %v15808_v42  ;;  %v3463_v4 = vld [vmem:[#allocation21 + $0xef0] sm:$0xff]  ;;  %v3460_v42 = vld [vmem:[#allocation21 + $0xed8] sm:$0xff] }
 0x874   :  { %v18852_v51 = vpop.f32.mrb[48].mxu0  ;;  %10288 = vmatprep.subr.bf16.mxu1 %v15810_v45  ;;  %v3464_v45 = vld [vmem:[#allocation21 + $0xef8] sm:$0xff]  ;;  %v15856_v44 = vcombine.high %v3459_v37, %v3463_v4  ;;  %v15855_v15 = vcombine.low %v3459_v37, %v3463_v4  ;;  %v3507_v37 = vld [vmem:[#allocation21 + $0x1050] sm:$0xff] }
 0x875   :  { %v18854_v56 = vpop.f32.mrb[56].mxu1  ;;  %v18856_v53 = vpop.f32.mrb[49].mxu0  ;;  %v15858_v49 = vcombine.high %v3460_v42, %v3464_v45  ;;  %v15857_v59 = vcombine.low %v3460_v42, %v3464_v45  ;;  %v3511_v4 = vld [vmem:[#allocation21 + $0x1070] sm:$0xff]  ;;  %v15895_v42 = vcombine.low %v3499_v25, %v3503_v2  ;;  %v3508_v45 = vld [vmem:[#allocation21 + $0x1058] sm:$0xff] }
 0x876   :  { %v18858_v21 = vpop.f32.mrb[57].mxu1  ;;  %v9496_v13 = vpop.f32.mrb[50].mxu0  ;;  %9961 = vmatpush1.bf16.msra.mxu0 %v15807_v50  ;;  %v3467_v50 = vld [vmem:[#allocation21 + $0xf10] sm:$0xff] }
 0x877   :  { %v9824_v5 = vpop.f32.mrb[58].mxu1  ;;  %10289 = vmatpush1.bf16.msra.mxu1 %v15809_v19  ;;  %v9497_v6 = vpop.f32.mrb[51].mxu0  ;;  %9962 = vmatprep.subr.bf16.mxu0 %v15816_v32  ;;  %v3471_v19 = vld [vmem:[#allocation21 + $0xf30] sm:$0xff]  ;;  %v3468_v32 = vld [vmem:[#allocation21 + $0xf18] sm:$0xff] }
 0x878   :  { %v9825_v10 = vpop.f32.mrb[59].mxu1  ;;  %10290 = vmatprep.subr.bf16.mxu1 %v15818_v55  ;;  %v3472_v55 = vld [vmem:[#allocation21 + $0xf38] sm:$0xff]  ;;  %v15864_v40 = vcombine.high %v3467_v50, %v3471_v19  ;;  %v3475_v13 = vld [vmem:[#allocation21 + $0xf50] sm:$0xff] }
 0x879   :  { %v15866_v0 = vcombine.high %v3468_v32, %v3472_v55  ;;  %v3476_v5 = vld [vmem:[#allocation21 + $0xf58] sm:$0xff] }
 0x87a   :  { %9963 = vmatpush1.bf16.msra.mxu0 %v15815_v3  ;;  %v3479_v3 = vld [vmem:[#allocation21 + $0xf70] sm:$0xff]  ;;  %v3480_v6 = vld [vmem:[#allocation21 + $0xf78] sm:$0xff] }
 0x87b   :  { %10291 = vmatpush1.bf16.msra.mxu1 %v15817_v9  ;;  %9964 = vmatprep.subr.bf16.mxu0 %v15824_v52  ;;  %v15863_v9 = vcombine.low %v3467_v50, %v3471_v19  ;;  %v15865_v52 = vcombine.low %v3468_v32, %v3472_v55  ;;  %v15872_v10 = vcombine.high %v3475_v13, %v3479_v3  ;;  %v3519_v50 = vld [vmem:[#allocation21 + $0x10b0] sm:$0xff]  ;;  %v3516_v32 = vld [vmem:[#allocation21 + $0x1098] sm:$0xff] }
 0x87c   :  { %10292 = vmatprep.subr.bf16.mxu1 %v15826_v63  ;;  %v15874_v63 = vcombine.high %v3476_v5, %v3480_v6  ;;  %v3520_v55 = vld [vmem:[#allocation21 + $0x10b8] sm:$0xff] }
 0x87e   :  { %9965 = vmatpush1.bf16.msra.mxu0 %v15823_v1  ;;  %v15871_v1 = vcombine.low %v3475_v13, %v3479_v3  ;;  %v3523_v13 = vld [vmem:[#allocation21 + $0x10d0] sm:$0xff] }
 0x87f   :  { %10293 = vmatpush1.bf16.msra.mxu1 %v15825_v16  ;;  %9966 = vmatprep.subr.bf16.mxu0 %v15832_v54  ;;  %v15873_v16 = vcombine.low %v3476_v5, %v3480_v6  ;;  %v15880_v54 = vcombine.high %v3483_v8, %v3487_v35  ;;  %v3527_v3 = vld [vmem:[#allocation21 + $0x10f0] sm:$0xff]  ;;  %v3524_v5 = vld [vmem:[#allocation21 + $0x10d8] sm:$0xff] }
 0x880   :  { %10294 = vmatprep.subr.bf16.mxu1 %v15834_v46  ;;  %v15882_v46 = vcombine.high %v3484_v57, %v3488_v14  ;;  %v3528_v6 = vld [vmem:[#allocation21 + $0x10f8] sm:$0xff] }
 0x882   :  { %9967 = vmatpush1.bf16.msra.mxu0 %v15831_v7  ;;  %v15879_v7 = vcombine.low %v3483_v8, %v3487_v35  ;;  %v3535_v8 = vld [vmem:[#allocation21 + $0x1130] sm:$0xff]  ;;  %v3532_v35 = vld [vmem:[#allocation21 + $0x1118] sm:$0xff] }
 0x883   :  { %10295 = vmatpush1.bf16.msra.mxu1 %v15833_v27  ;;  %9968 = vmatprep.subr.bf16.mxu0 %v15840_v30  ;;  %v15881_v27 = vcombine.low %v3484_v57, %v3488_v14  ;;  %v15888_v30 = vcombine.high %v3491_v22, %v3495_v23  ;;  %v3536_v57 = vld [vmem:[#allocation21 + $0x1138] sm:$0xff]  ;;  %v15921_v14 = vcombine.low %v3524_v5, %v3528_v6 }
 0x884   :  { %10296 = vmatprep.subr.bf16.mxu1 %v15842_v17  ;;  %v15890_v17 = vcombine.high %v3492_v47, %v3496_v12 }
 0x886   :  { %9969 = vmatpush1.bf16.msra.mxu0 %v15839_v36  ;;  %v15887_v36 = vcombine.low %v3491_v22, %v3495_v23  ;;  %v3540_v22 = vld [vmem:[#allocation21 + $0x1158] sm:$0xff] }
 0x887   :  { %10297 = vmatpush1.bf16.msra.mxu1 %v15841_v34  ;;  %9970 = vmatprep.subr.bf16.mxu0 %v15848_v43  ;;  %v15889_v34 = vcombine.low %v3492_v47, %v3496_v12  ;;  %v15896_v43 = vcombine.high %v3499_v25, %v3503_v2  ;;  %v3544_v23 = vld [vmem:[#allocation21 + $0x1178] sm:$0xff]  ;;  %v15929_v12 = vcombine.low %v3532_v35, %v3536_v57 }
 0x888   :  { %10298 = vmatprep.subr.bf16.mxu1 %v15850_v20  ;;  %v15898_v20 = vcombine.high %v3500_v31, %v3504_v33  ;;  %v3548_v25 = vld [vmem:[#allocation21 + $0x1198] sm:$0xff] }
 0x889   :  { %v3552_v2 = vld [vmem:[#allocation21 + $0x11b8] sm:$0xff] }
 0x88a   :  { %9971 = vmatpush1.bf16.msra.mxu0 %v15847_v28  ;;  %v3512_v28 = vld [vmem:[#allocation21 + $0x1078] sm:$0xff] }
 0x88b   :  { %10299 = vmatpush1.bf16.msra.mxu1 %v15849_v48  ;;  %9972 = vmatprep.subr.bf16.mxu0 %v15856_v44  ;;  %v15897_v48 = vcombine.low %v3500_v31, %v3504_v33  ;;  %v15904_v44 = vcombine.high %v3507_v37, %v3511_v4  ;;  %v15906_v19 = vcombine.high %v3508_v45, %v3512_v28 }
 0x88c   :  { %10300 = vmatprep.subr.bf16.mxu1 %v15858_v49  ;;  %v3515_v49 = vld [vmem:[#allocation21 + $0x1090] sm:$0xff]  ;;  %v15937_v33 = vcombine.low %v3540_v22, %v3544_v23 }
 0x88e   :  { %9973 = vmatpush1.bf16.msra.mxu0 %v15855_v15  ;;  %v15903_v15 = vcombine.low %v3507_v37, %v3511_v4  ;;  %v3556_v37 = vld [vmem:[#allocation21 + $0x11d8] sm:$0xff] }
 0x88f   :  { %10301 = vmatpush1.bf16.msra.mxu1 %v15857_v59  ;;  %9974 = vmatprep.subr.bf16.mxu0 %v15864_v40  ;;  %v15905_v59 = vcombine.low %v3508_v45, %v3512_v28  ;;  %v15912_v40 = vcombine.high %v3515_v49, %v3519_v50  ;;  %v3560_v4 = vld [vmem:[#allocation21 + $0x11f8] sm:$0xff]  ;;  %v15945_v45 = vcombine.low %v3548_v25, %v3552_v2 }
 0x890   :  { %10302 = vmatprep.subr.bf16.mxu1 %v15866_v0  ;;  %v15914_v0 = vcombine.high %v3516_v32, %v3520_v55 }
 0x892   :  { %9975 = vmatpush1.bf16.msra.mxu0 %v15863_v9  ;;  %v15911_v9 = vcombine.low %v3515_v49, %v3519_v50  ;;  %v3567_v49 = vld [vmem:[#allocation21 + $0x1230] sm:$0xff]  ;;  %v3564_v50 = vld [vmem:[#allocation21 + $0x1218] sm:$0xff] }
 0x893   :  { %10303 = vmatpush1.bf16.msra.mxu1 %v15865_v52  ;;  %9976 = vmatprep.subr.bf16.mxu0 %v15872_v10  ;;  %v15920_v52 = vcombine.high %v3523_v13, %v3527_v3  ;;  %v15922_v10 = vcombine.high %v3524_v5, %v3528_v6 }
 0x894   :  { %10304 = vmatprep.subr.bf16.mxu1 %v15874_v63  ;;  %v3531_v63 = vld [vmem:[#allocation21 + $0x1110] sm:$0xff] }
 0x895   :  { %v15927_v47 = vcombine.low %v3531_v63, %v3535_v8 }
 0x896   :  { %9977 = vmatpush1.bf16.msra.mxu0 %v15871_v1  ;;  %v15928_v1 = vcombine.high %v3531_v63, %v3535_v8  ;;  %v3580_v63 = vld [vmem:[#allocation21 + $0x1298] sm:$0xff] }
 0x897   :  { %10305 = vmatpush1.bf16.msra.mxu1 %v15873_v16  ;;  %9978 = vmatprep.subr.bf16.mxu0 %v15880_v54  ;;  %v15930_v16 = vcombine.high %v3532_v35, %v3536_v57  ;;  %v3539_v54 = vld [vmem:[#allocation21 + $0x1150] sm:$0xff]  ;;  %v3584_v8 = vld [vmem:[#allocation21 + $0x12b8] sm:$0xff] }
 0x898   :  { %10306 = vmatprep.subr.bf16.mxu1 %v15882_v46  ;;  %v3543_v46 = vld [vmem:[#allocation21 + $0x1170] sm:$0xff] }
 0x899   :  { %v15935_v31 = vcombine.low %v3539_v54, %v3543_v46 }
 0x89a   :  { %9979 = vmatpush1.bf16.msra.mxu0 %v15879_v7  ;;  %v15936_v7 = vcombine.high %v3539_v54, %v3543_v46  ;;  %v3588_v54 = vld [vmem:[#allocation21 + $0x12d8] sm:$0xff] }
 0x89b   :  { %10307 = vmatpush1.bf16.msra.mxu1 %v15881_v27  ;;  %9980 = vmatprep.subr.bf16.mxu0 %v15888_v30  ;;  %v15938_v27 = vcombine.high %v3540_v22, %v3544_v23  ;;  %v3547_v30 = vld [vmem:[#allocation21 + $0x1190] sm:$0xff]  ;;  %v3592_v46 = vld [vmem:[#allocation21 + $0x12f8] sm:$0xff]  ;;  %v15977_v23 = vcombine.low %v3580_v63, %v3584_v8 }
 0x89c   :  { %10308 = vmatprep.subr.bf16.mxu1 %v15890_v17  ;;  %v3551_v17 = vld [vmem:[#allocation21 + $0x11b0] sm:$0xff] }
 0x89e   :  { %9981 = vmatpush1.bf16.msra.mxu0 %v15887_v36  ;;  %v15944_v36 = vcombine.high %v3547_v30, %v3551_v17 }
 0x89f   :  { %10309 = vmatpush1.bf16.msra.mxu1 %v15889_v34  ;;  %9991 = vmatprep.subr.bf16.mxu0 %v15896_v43  ;;  %v15946_v34 = vcombine.high %v3548_v25, %v3552_v2  ;;  %v3555_v43 = vld [vmem:[#allocation21 + $0x11d0] sm:$0xff]  ;;  %v15985_v2 = vcombine.low %v3588_v54, %v3592_v46 }
 0x8a0   :  { %10319 = vmatprep.subr.bf16.mxu1 %v15898_v20  ;;  %v3559_v20 = vld [vmem:[#allocation21 + $0x11f0] sm:$0xff] }
 0x8a1   :  { %9983 = vmatmul.mubr.bf16.vlgmr.msra.gmra.mrb[52].mxu0 %v18772_v18  ;;  %v15952_v28 = vcombine.high %v3555_v43, %v3559_v20 }
 0x8a2   :  { %10311 = vmatmul.mubr.bf16.vlgmr.msra.gmra.mrb[60].mxu1 %v18772_v18  ;;  %9992 = vmatpush1.bf16.msra.mxu0 %v15895_v42  ;;  %v15913_v18 = vcombine.low %v3516_v32, %v3520_v55  ;;  %v15943_v42 = vcombine.low %v3547_v30, %v3551_v17  ;;  %v15951_v32 = vcombine.low %v3555_v43, %v3559_v20  ;;  %v3596_v30 = vld [vmem:[#allocation21 + $0x1318] sm:$0xff] }
 0x8a3   :  { %10023 = vmatprep.mubr.bf16.mxu0 %v18775_v61  ;;  %10320 = vmatpush1.bf16.msra.mxu1 %v15897_v48  ;;  %v15954_v48 = vcombine.high %v3556_v37, %v3560_v4  ;;  %v15953_v55 = vcombine.low %v3556_v37, %v3560_v4  ;;  %v3600_v17 = vld [vmem:[#allocation21 + $0x1338] sm:$0xff] }
 0x8a4   :  { %10351 = vmatprep.mubr.bf16.mxu1 %v18775_v61  ;;  %9993 = vmatprep.subr.bf16.mxu0 %v15904_v44  ;;  %v15919_v61 = vcombine.low %v3523_v13, %v3527_v3  ;;  %v3563_v44 = vld [vmem:[#allocation21 + $0x1210] sm:$0xff]  ;;  %v3572_v13 = vld [vmem:[#allocation21 + $0x1258] sm:$0xff]  ;;  %v15993_v4 = vcombine.low %v3596_v30, %v3600_v17 }
 0x8a5   :  { %10321 = vmatprep.subr.bf16.mxu1 %v15906_v19  ;;  %v3568_v19 = vld [vmem:[#allocation21 + $0x1238] sm:$0xff]  ;;  %v15959_v5 = vcombine.low %v3563_v44, %v3567_v49 }
 0x8a6   :  { %9994 = vmatpush1.bf16.msra.mxu0 %v15903_v15  ;;  %v15960_v15 = vcombine.high %v3563_v44, %v3567_v49  ;;  %v3576_v3 = vld [vmem:[#allocation21 + $0x1278] sm:$0xff]  ;;  %v15961_v6 = vcombine.low %v3564_v50, %v3568_v19 }
 0x8a7   :  { %10322 = vmatpush1.bf16.msra.mxu1 %v15905_v59  ;;  %9995 = vmatprep.subr.bf16.mxu0 %v15912_v40  ;;  %v15962_v59 = vcombine.high %v3564_v50, %v3568_v19  ;;  %v3571_v40 = vld [vmem:[#allocation21 + $0x1250] sm:$0xff]  ;;  %v15969_v57 = vcombine.low %v3572_v13, %v3576_v3  ;;  %v3604_v43 = vld [vmem:[#allocation21 + $0x1358] sm:$0xff] }
 0x8a8   :  { %10323 = vmatprep.subr.bf16.mxu1 %v15914_v0  ;;  %v3575_v0 = vld [vmem:[#allocation21 + $0x1270] sm:$0xff]  ;;  %v3608_v20 = vld [vmem:[#allocation21 + $0x1378] sm:$0xff] }
 0x8a9   :  { %v15967_v35 = vcombine.low %v3571_v40, %v3575_v0  ;;  %v3612_v44 = vld [vmem:[#allocation21 + $0x1398] sm:$0xff]  ;;  %v16001_v19 = vcombine.low %v3604_v43, %v3608_v20 }
 0x8aa   :  { %9996 = vmatpush1.bf16.msra.mxu0 %v15911_v9  ;;  %v15968_v9 = vcombine.high %v3571_v40, %v3575_v0  ;;  %v3616_v49 = vld [vmem:[#allocation21 + $0x13b8] sm:$0xff] }
 0x8ab   :  { %10324 = vmatpush1.bf16.msra.mxu1 %v15913_v18  ;;  %9997 = vmatprep.subr.bf16.mxu0 %v15920_v52  ;;  %v15970_v18 = vcombine.high %v3572_v13, %v3576_v3  ;;  %v3579_v52 = vld [vmem:[#allocation21 + $0x1290] sm:$0xff]  ;;  %v3620_v40 = vld [vmem:[#allocation21 + $0x13d8] sm:$0xff]  ;;  %v16009_v3 = vcombine.low %v3612_v44, %v3616_v49 }
 0x8ac   :  { %10325 = vmatprep.subr.bf16.mxu1 %v15922_v10  ;;  %v3583_v10 = vld [vmem:[#allocation21 + $0x12b0] sm:$0xff]  ;;  %v3624_v0 = vld [vmem:[#allocation21 + $0x13f8] sm:$0xff] }
 0x8ad   :  { %v15975_v22 = vcombine.low %v3579_v52, %v3583_v10 }
 0x8ae   :  { %9998 = vmatpush1.bf16.msra.mxu0 %v15919_v61  ;;  %v15976_v61 = vcombine.high %v3579_v52, %v3583_v10  ;;  %v3628_v52 = vld [vmem:[#allocation21 + $0x1418] sm:$0xff] }
 0x8af   :  { %10326 = vmatpush1.bf16.msra.mxu1 %v15921_v14  ;;  %9999 = vmatprep.subr.bf16.mxu0 %v15928_v1  ;;  %v15978_v14 = vcombine.high %v3580_v63, %v3584_v8  ;;  %v3587_v1 = vld [vmem:[#allocation21 + $0x12d0] sm:$0xff]  ;;  %v3632_v10 = vld [vmem:[#allocation21 + $0x1438] sm:$0xff]  ;;  %v16017_v8 = vcombine.low %v3620_v40, %v3624_v0 }
 0x8b0   :  { %10327 = vmatprep.subr.bf16.mxu1 %v15930_v16  ;;  %v3591_v16 = vld [vmem:[#allocation21 + $0x12f0] sm:$0xff] }
 0x8b1   :  { %v15983_v25 = vcombine.low %v3587_v1, %v3591_v16 }
 0x8b2   :  { %10000 = vmatpush1.bf16.msra.mxu0 %v15927_v47  ;;  %v15984_v47 = vcombine.high %v3587_v1, %v3591_v16  ;;  %v3636_v16 = vld [vmem:[#allocation21 + $0x1458] sm:$0xff] }
 0x8b3   :  { %10328 = vmatpush1.bf16.msra.mxu1 %v15929_v12  ;;  %10001 = vmatprep.subr.bf16.mxu0 %v15936_v7  ;;  %v15986_v12 = vcombine.high %v3588_v54, %v3592_v46  ;;  %v3595_v7 = vld [vmem:[#allocation21 + $0x1310] sm:$0xff]  ;;  %v3640_v54 = vld [vmem:[#allocation21 + $0x1478] sm:$0xff]  ;;  %v16025_v46 = vcombine.low %v3628_v52, %v3632_v10 }
 0x8b4   :  { %10329 = vmatprep.subr.bf16.mxu1 %v15938_v27  ;;  %v3599_v27 = vld [vmem:[#allocation21 + $0x1330] sm:$0xff] }
 0x8b5   :  { %v15991_v37 = vcombine.low %v3595_v7, %v3599_v27 }
 0x8b6   :  { %10002 = vmatpush1.bf16.msra.mxu0 %v15935_v31  ;;  %v15992_v31 = vcombine.high %v3595_v7, %v3599_v27  ;;  %v3644_v7 = vld [vmem:[#allocation21 + $0x1498] sm:$0xff] }
 0x8b7   :  { %10330 = vmatpush1.bf16.msra.mxu1 %v15937_v33  ;;  %10003 = vmatprep.subr.bf16.mxu0 %v15944_v36  ;;  %v15994_v33 = vcombine.high %v3596_v30, %v3600_v17  ;;  %v3603_v36 = vld [vmem:[#allocation21 + $0x1350] sm:$0xff]  ;;  %v3648_v27 = vld [vmem:[#allocation21 + $0x14b8] sm:$0xff]  ;;  %v16033_v17 = vcombine.low %v3636_v16, %v3640_v54 }
 0x8b8   :  { %10331 = vmatprep.subr.bf16.mxu1 %v15946_v34  ;;  %v3607_v34 = vld [vmem:[#allocation21 + $0x1370] sm:$0xff] }
 0x8b9   :  { %v15999_v50 = vcombine.low %v3603_v36, %v3607_v34 }
 0x8ba   :  { %10004 = vmatpush1.bf16.msra.mxu0 %v15943_v42  ;;  %v16000_v42 = vcombine.high %v3603_v36, %v3607_v34  ;;  %v3652_v36 = vld [vmem:[#allocation21 + $0x14d8] sm:$0xff] }
 0x8bb   :  { %10332 = vmatpush1.bf16.msra.mxu1 %v15945_v45  ;;  %10005 = vmatprep.subr.bf16.mxu0 %v15952_v28  ;;  %v16002_v45 = vcombine.high %v3604_v43, %v3608_v20  ;;  %v3611_v28 = vld [vmem:[#allocation21 + $0x1390] sm:$0xff]  ;;  %v3656_v34 = vld [vmem:[#allocation21 + $0x14f8] sm:$0xff] }
 0x8bc   :  { %10333 = vmatprep.subr.bf16.mxu1 %v15954_v48  ;;  %v3615_v48 = vld [vmem:[#allocation21 + $0x13b0] sm:$0xff] }
 0x8bd   :  { %v16007_v13 = vcombine.low %v3611_v28, %v3615_v48 }
 0x8be   :  { %10006 = vmatpush1.bf16.msra.mxu0 %v15951_v32  ;;  %v16008_v32 = vcombine.high %v3611_v28, %v3615_v48  ;;  %v3664_v28 = vld [vmem:[#allocation21 + $0x1538] sm:$0xff]  ;;  %v16049_v48 = vcombine.low %v3652_v36, %v3656_v34 }
 0x8bf   :  { %10334 = vmatpush1.bf16.msra.mxu1 %v15953_v55  ;;  %10007 = vmatprep.subr.bf16.mxu0 %v15960_v15  ;;  %v16010_v55 = vcombine.high %v3612_v44, %v3616_v49  ;;  %v3619_v15 = vld [vmem:[#allocation21 + $0x13d0] sm:$0xff] }
 0x8c0   :  { %10335 = vmatprep.subr.bf16.mxu1 %v15962_v59  ;;  %v3623_v59 = vld [vmem:[#allocation21 + $0x13f0] sm:$0xff] }
 0x8c1   :  { %v16015_v63 = vcombine.low %v3619_v15, %v3623_v59 }
 0x8c2   :  { %10008 = vmatpush1.bf16.msra.mxu0 %v15959_v5  ;;  %v16016_v5 = vcombine.high %v3619_v15, %v3623_v59 }
 0x8c3   :  { %10336 = vmatpush1.bf16.msra.mxu1 %v15961_v6  ;;  %10009 = vmatprep.subr.bf16.mxu0 %v15968_v9  ;;  %v16018_v6 = vcombine.high %v3620_v40, %v3624_v0  ;;  %v3627_v9 = vld [vmem:[#allocation21 + $0x1410] sm:$0xff] }
 0x8c4   :  { %10337 = vmatprep.subr.bf16.mxu1 %v15970_v18  ;;  %v3631_v18 = vld [vmem:[#allocation21 + $0x1430] sm:$0xff] }
 0x8c5   :  { %v16023_v1 = vcombine.low %v3627_v9, %v3631_v18 }
 0x8c6   :  { %10010 = vmatpush1.bf16.msra.mxu0 %v15967_v35  ;;  %v16024_v35 = vcombine.high %v3627_v9, %v3631_v18 }
 0x8c7   :  { %10338 = vmatpush1.bf16.msra.mxu1 %v15969_v57  ;;  %10011 = vmatprep.subr.bf16.mxu0 %v15976_v61  ;;  %v16026_v57 = vcombine.high %v3628_v52, %v3632_v10  ;;  %v3635_v61 = vld [vmem:[#allocation21 + $0x1450] sm:$0xff] }
 0x8c8   :  { %10339 = vmatprep.subr.bf16.mxu1 %v15978_v14  ;;  %v3639_v14 = vld [vmem:[#allocation21 + $0x1470] sm:$0xff] }
 0x8c9   :  { %v16031_v30 = vcombine.low %v3635_v61, %v3639_v14 }
 0x8ca   :  { %10012 = vmatpush1.bf16.msra.mxu0 %v15975_v22  ;;  %v16032_v22 = vcombine.high %v3635_v61, %v3639_v14 }
 0x8cb   :  { %10340 = vmatpush1.bf16.msra.mxu1 %v15977_v23  ;;  %10013 = vmatprep.subr.bf16.mxu0 %v15984_v47  ;;  %v3643_v23 = vld [vmem:[#allocation21 + $0x1490] sm:$0xff] }
 0x8cc   :  { %10341 = vmatprep.subr.bf16.mxu1 %v15986_v12  ;;  %v3647_v47 = vld [vmem:[#allocation21 + $0x14b0] sm:$0xff]  ;;  %v16034_v12 = vcombine.high %v3636_v16, %v3640_v54 }
 0x8cd   :  { %v16039_v43 = vcombine.low %v3643_v23, %v3647_v47  ;;  %v3691_v54 = vld [vmem:[#allocation21 + $0x1610] sm:$0xff] }
 0x8ce   :  { %10014 = vmatpush1.bf16.msra.mxu0 %v15983_v25  ;;  %v16040_v25 = vcombine.high %v3643_v23, %v3647_v47  ;;  %v3696_v23 = vld [vmem:[#allocation21 + $0x1638] sm:$0xff] }
 0x8cf   :  { %10342 = vmatpush1.bf16.msra.mxu1 %v15985_v2  ;;  %10015 = vmatprep.subr.bf16.mxu0 %v15992_v31  ;;  %v16042_v2 = vcombine.high %v3644_v7, %v3648_v27  ;;  %v3651_v31 = vld [vmem:[#allocation21 + $0x14d0] sm:$0xff] }
 0x8d0   :  { %10343 = vmatprep.subr.bf16.mxu1 %v15994_v33  ;;  %v3655_v33 = vld [vmem:[#allocation21 + $0x14f0] sm:$0xff] }
 0x8d1   :  { %v16048_v20 = vcombine.high %v3651_v31, %v3655_v33 }
 0x8d2   :  { %10016 = vmatpush1.bf16.msra.mxu0 %v15991_v37  ;;  %v16050_v37 = vcombine.high %v3652_v36, %v3656_v34 }
 0x8d3   :  { %10344 = vmatpush1.bf16.msra.mxu1 %v15993_v4  ;;  %10017 = vmatprep.subr.bf16.mxu0 %v16000_v42  ;;  %v3659_v4 = vld [vmem:[#allocation21 + $0x1510] sm:$0xff] }
 0x8d4   :  { %10345 = vmatprep.subr.bf16.mxu1 %v16002_v45  ;;  %v3663_v42 = vld [vmem:[#allocation21 + $0x1530] sm:$0xff]  ;;  %v3660_v45 = vld [vmem:[#allocation21 + $0x1518] sm:$0xff] }
 0x8d5   :  { %v16056_v44 = vcombine.high %v3659_v4, %v3663_v42  ;;  %v16058_v49 = vcombine.high %v3660_v45, %v3664_v28  ;;  %v16055_v15 = vcombine.low %v3659_v4, %v3663_v42  ;;  %v16057_v59 = vcombine.low %v3660_v45, %v3664_v28 }
 0x8d6   :  { %10018 = vmatpush1.bf16.msra.mxu0 %v15999_v50  ;;  %v3667_v50 = vld [vmem:[#allocation21 + $0x1550] sm:$0xff] }
 0x8d7   :  { %10346 = vmatpush1.bf16.msra.mxu1 %v16001_v19  ;;  %10019 = vmatprep.subr.bf16.mxu0 %v16008_v32  ;;  %v3671_v19 = vld [vmem:[#allocation21 + $0x1570] sm:$0xff]  ;;  %v3668_v32 = vld [vmem:[#allocation21 + $0x1558] sm:$0xff] }
 0x8d8   :  { %10347 = vmatprep.subr.bf16.mxu1 %v16010_v55  ;;  %v3672_v55 = vld [vmem:[#allocation21 + $0x1578] sm:$0xff]  ;;  %v16064_v40 = vcombine.high %v3667_v50, %v3671_v19  ;;  %v16063_v9 = vcombine.low %v3667_v50, %v3671_v19 }
 0x8d9   :  { %v16066_v0 = vcombine.high %v3668_v32, %v3672_v55  ;;  %v16065_v18 = vcombine.low %v3668_v32, %v3672_v55 }
 0x8da   :  { %10020 = vmatpush1.bf16.msra.mxu0 %v16007_v13  ;;  %v3675_v13 = vld [vmem:[#allocation21 + $0x1590] sm:$0xff] }
 0x8db   :  { %10348 = vmatpush1.bf16.msra.mxu1 %v16009_v3  ;;  %10021 = vmatprep.subr.bf16.mxu0 %v16016_v5  ;;  %v3679_v3 = vld [vmem:[#allocation21 + $0x15b0] sm:$0xff]  ;;  %v3676_v5 = vld [vmem:[#allocation21 + $0x1598] sm:$0xff] }
 0x8dc   :  { %10349 = vmatprep.subr.bf16.mxu1 %v16018_v6  ;;  %v3680_v6 = vld [vmem:[#allocation21 + $0x15b8] sm:$0xff]  ;;  %v16072_v52 = vcombine.high %v3675_v13, %v3679_v3  ;;  %v16071_v61 = vcombine.low %v3675_v13, %v3679_v3 }
 0x8dd   :  { %v16074_v10 = vcombine.high %v3676_v5, %v3680_v6  ;;  %v16073_v14 = vcombine.low %v3676_v5, %v3680_v6 }
 0x8de   :  { %10022 = vmatpush1.bf16.msra.mxu0 %v16015_v63  ;;  %v3683_v63 = vld [vmem:[#allocation21 + $0x15d0] sm:$0xff] }
 0x8df   :  { %10350 = vmatpush1.bf16.msra.mxu1 %v16017_v8  ;;  %10032 = vmatprep.subr.bf16.mxu0 %v16024_v35  ;;  %v3687_v8 = vld [vmem:[#allocation21 + $0x15f0] sm:$0xff]  ;;  %v3684_v35 = vld [vmem:[#allocation21 + $0x15d8] sm:$0xff] }
 0x8e0   :  { %10360 = vmatprep.subr.bf16.mxu1 %v16026_v57  ;;  %v3688_v57 = vld [vmem:[#allocation21 + $0x15f8] sm:$0xff]  ;;  %v16079_v47 = vcombine.low %v3683_v63, %v3687_v8 }
 0x8e1   :  { %10024 = vmatmul.mubr.bf16.vlgmr.msra.gmra.mrb[52].mxu0 %v18789_v11  ;;  %v16082_v16 = vcombine.high %v3684_v35, %v3688_v57 }
 0x8e2   :  { %10352 = vmatmul.mubr.bf16.vlgmr.msra.gmra.mrb[60].mxu1 %v18789_v11  ;;  %10033 = vmatpush1.bf16.msra.mxu0 %v16023_v1  ;;  %v16041_v11 = vcombine.low %v3644_v7, %v3648_v27  ;;  %v16080_v1 = vcombine.high %v3683_v63, %v3687_v8 }
 0x8e3   :  { %10064 = vmatprep.mubr.bf16.mxu0 %v18792_v39  ;;  %10361 = vmatpush1.bf16.msra.mxu1 %v16025_v46  ;;  %v3695_v46 = vld [vmem:[#allocation21 + $0x1630] sm:$0xff] }
 0x8e4   :  { %10392 = vmatprep.mubr.bf16.mxu1 %v18792_v39  ;;  %10034 = vmatprep.subr.bf16.mxu0 %v16032_v22  ;;  %v16047_v39 = vcombine.low %v3651_v31, %v3655_v33  ;;  %v3692_v22 = vld [vmem:[#allocation21 + $0x1618] sm:$0xff]  ;;  %v16088_v7 = vcombine.high %v3691_v54, %v3695_v46  ;;  %v16087_v31 = vcombine.low %v3691_v54, %v3695_v46 }
 0x8e5   :  { %10362 = vmatprep.subr.bf16.mxu1 %v16034_v12  ;;  %v16081_v12 = vcombine.low %v3684_v35, %v3688_v57  ;;  %v16090_v27 = vcombine.high %v3692_v22, %v3696_v23  ;;  %v16089_v33 = vcombine.low %v3692_v22, %v3696_v23 }
 0x8e6   :  { %10035 = vmatpush1.bf16.msra.mxu0 %v16031_v30  ;;  %v3699_v30 = vld [vmem:[#allocation21 + $0x1650] sm:$0xff] }
 0x8e7   :  { %10363 = vmatpush1.bf16.msra.mxu1 %v16033_v17  ;;  %10036 = vmatprep.subr.bf16.mxu0 %v16040_v25  ;;  %v3703_v17 = vld [vmem:[#allocation21 + $0x1670] sm:$0xff]  ;;  %v3700_v25 = vld [vmem:[#allocation21 + $0x1658] sm:$0xff] }
 0x8e8   :  { %10364 = vmatprep.subr.bf16.mxu1 %v16042_v2  ;;  %v3704_v2 = vld [vmem:[#allocation21 + $0x1678] sm:$0xff]  ;;  %v16096_v36 = vcombine.high %v3699_v30, %v3703_v17  ;;  %v16095_v4 = vcombine.low %v3699_v30, %v3703_v17 }
 0x8e9   :  { %v16098_v34 = vcombine.high %v3700_v25, %v3704_v2  ;;  %v16097_v42 = vcombine.low %v3700_v25, %v3704_v2 }
 0x8ea   :  { %10037 = vmatpush1.bf16.msra.mxu0 %v16039_v43  ;;  %v3707_v43 = vld [vmem:[#allocation21 + $0x1690] sm:$0xff] }
 0x8eb   :  { %10365 = vmatpush1.bf16.msra.mxu1 %v16041_v11  ;;  %10038 = vmatprep.subr.bf16.mxu0 %v16048_v20  ;;  %v3711_v11 = vld [vmem:[#allocation21 + $0x16b0] sm:$0xff]  ;;  %v3708_v20 = vld [vmem:[#allocation21 + $0x1698] sm:$0xff] }
 0x8ec   :  { %10366 = vmatprep.subr.bf16.mxu1 %v16050_v37  ;;  %v3712_v37 = vld [vmem:[#allocation21 + $0x16b8] sm:$0xff]  ;;  %v16104_v45 = vcombine.high %v3707_v43, %v3711_v11  ;;  %v16103_v50 = vcombine.low %v3707_v43, %v3711_v11 }
 0x8ed   :  { %v16106_v28 = vcombine.high %v3708_v20, %v3712_v37  ;;  %v16105_v19 = vcombine.low %v3708_v20, %v3712_v37 }
 0x8ee   :  { %10039 = vmatpush1.bf16.msra.mxu0 %v16047_v39  ;;  %v3715_v39 = vld [vmem:[#allocation21 + $0x16d0] sm:$0xff] }
 0x8ef   :  { %10367 = vmatpush1.bf16.msra.mxu1 %v16049_v48  ;;  %10040 = vmatprep.subr.bf16.mxu0 %v16056_v44  ;;  %v3719_v48 = vld [vmem:[#allocation21 + $0x16f0] sm:$0xff]  ;;  %v3716_v44 = vld [vmem:[#allocation21 + $0x16d8] sm:$0xff] }
 0x8f0   :  { %10368 = vmatprep.subr.bf16.mxu1 %v16058_v49  ;;  %v3720_v49 = vld [vmem:[#allocation21 + $0x16f8] sm:$0xff]  ;;  %v16112_v32 = vcombine.high %v3715_v39, %v3719_v48  ;;  %v16111_v13 = vcombine.low %v3715_v39, %v3719_v48 }
 0x8f1   :  { %v16114_v55 = vcombine.high %v3716_v44, %v3720_v49  ;;  %v16113_v3 = vcombine.low %v3716_v44, %v3720_v49  ;;  %v3768_v39 = vld [vmem:[#allocation21 + $0x1878] sm:$0xff]  ;;  %v3771_v49 = vld [vmem:[#allocation21 + $0x1890] sm:$0xff] }
 0x8f2   :  { %10041 = vmatpush1.bf16.msra.mxu0 %v16055_v15  ;;  %v3723_v15 = vld [vmem:[#allocation21 + $0x1710] sm:$0xff] }
 0x8f3   :  { %10369 = vmatpush1.bf16.msra.mxu1 %v16057_v59  ;;  %10042 = vmatprep.subr.bf16.mxu0 %v16064_v40  ;;  %v3727_v59 = vld [vmem:[#allocation21 + $0x1730] sm:$0xff]  ;;  %v3724_v40 = vld [vmem:[#allocation21 + $0x1718] sm:$0xff] }
 0x8f4   :  { %10370 = vmatprep.subr.bf16.mxu1 %v16066_v0  ;;  %v3728_v0 = vld [vmem:[#allocation21 + $0x1738] sm:$0xff]  ;;  %v16120_v5 = vcombine.high %v3723_v15, %v3727_v59  ;;  %v16119_v63 = vcombine.low %v3723_v15, %v3727_v59 }
 0x8f5   :  { %v16122_v6 = vcombine.high %v3724_v40, %v3728_v0  ;;  %v16121_v8 = vcombine.low %v3724_v40, %v3728_v0 }
 0x8f6   :  { %10043 = vmatpush1.bf16.msra.mxu0 %v16063_v9  ;;  %v3731_v9 = vld [vmem:[#allocation21 + $0x1750] sm:$0xff] }
 0x8f7   :  { %10371 = vmatpush1.bf16.msra.mxu1 %v16065_v18  ;;  %10044 = vmatprep.subr.bf16.mxu0 %v16072_v52  ;;  %v3735_v18 = vld [vmem:[#allocation21 + $0x1770] sm:$0xff]  ;;  %v3732_v52 = vld [vmem:[#allocation21 + $0x1758] sm:$0xff] }
 0x8f8   :  { %10372 = vmatprep.subr.bf16.mxu1 %v16074_v10  ;;  %v3736_v10 = vld [vmem:[#allocation21 + $0x1778] sm:$0xff]  ;;  %v16128_v35 = vcombine.high %v3731_v9, %v3735_v18  ;;  %v16127_v54 = vcombine.low %v3731_v9, %v3735_v18 }
 0x8f9   :  { %v16130_v57 = vcombine.high %v3732_v52, %v3736_v10  ;;  %v16129_v46 = vcombine.low %v3732_v52, %v3736_v10  ;;  %v3787_v10 = vld [vmem:[#allocation21 + $0x1910] sm:$0xff] }
 0x8fa   :  { %10045 = vmatpush1.bf16.msra.mxu0 %v16071_v61  ;;  %v3739_v61 = vld [vmem:[#allocation21 + $0x1790] sm:$0xff] }
 0x8fb   :  { %10373 = vmatpush1.bf16.msra.mxu1 %v16073_v14  ;;  %10046 = vmatprep.subr.bf16.mxu0 %v16080_v1  ;;  %v3743_v14 = vld [vmem:[#allocation21 + $0x17b0] sm:$0xff]  ;;  %v3740_v1 = vld [vmem:[#allocation21 + $0x1798] sm:$0xff] }
 0x8fc   :  { %10374 = vmatprep.subr.bf16.mxu1 %v16082_v16  ;;  %v3744_v16 = vld [vmem:[#allocation21 + $0x17b8] sm:$0xff]  ;;  %v16136_v22 = vcombine.high %v3739_v61, %v3743_v14  ;;  %v16135_v30 = vcombine.low %v3739_v61, %v3743_v14 }
 0x8fd   :  { %v16138_v23 = vcombine.high %v3740_v1, %v3744_v16  ;;  %v16137_v17 = vcombine.low %v3740_v1, %v3744_v16  ;;  %v3795_v1 = vld [vmem:[#allocation21 + $0x1950] sm:$0xff] }
 0x8fe   :  { %10047 = vmatpush1.bf16.msra.mxu0 %v16079_v47  ;;  %v3747_v47 = vld [vmem:[#allocation21 + $0x17d0] sm:$0xff] }
 0x8ff   :  { %10375 = vmatpush1.bf16.msra.mxu1 %v16081_v12  ;;  %10048 = vmatprep.subr.bf16.mxu0 %v16088_v7  ;;  %v3751_v12 = vld [vmem:[#allocation21 + $0x17f0] sm:$0xff]  ;;  %v3748_v7 = vld [vmem:[#allocation21 + $0x17d8] sm:$0xff] }
 0x900   :  { %10376 = vmatprep.subr.bf16.mxu1 %v16090_v27  ;;  %v3752_v27 = vld [vmem:[#allocation21 + $0x17f8] sm:$0xff]  ;;  %v16144_v25 = vcombine.high %v3747_v47, %v3751_v12  ;;  %v16143_v43 = vcombine.low %v3747_v47, %v3751_v12  ;;  %v3799_v16 = vld [vmem:[#allocation21 + $0x1970] sm:$0xff] }
 0x901   :  { %v16146_v2 = vcombine.high %v3748_v7, %v3752_v27  ;;  %v16145_v11 = vcombine.low %v3748_v7, %v3752_v27  ;;  %v16192_v47 = vcombine.high %v3795_v1, %v3799_v16  ;;  %v3803_v7 = vld [vmem:[#allocation21 + $0x1990] sm:$0xff] }
 0x902   :  { %10049 = vmatpush1.bf16.msra.mxu0 %v16087_v31  ;;  %v3755_v31 = vld [vmem:[#allocation21 + $0x1810] sm:$0xff] }
 0x903   :  { %10377 = vmatpush1.bf16.msra.mxu1 %v16089_v33  ;;  %10050 = vmatprep.subr.bf16.mxu0 %v16096_v36  ;;  %v3759_v33 = vld [vmem:[#allocation21 + $0x1830] sm:$0xff]  ;;  %v3756_v36 = vld [vmem:[#allocation21 + $0x1818] sm:$0xff] }
 0x904   :  { %10378 = vmatprep.subr.bf16.mxu1 %v16098_v34  ;;  %v3760_v34 = vld [vmem:[#allocation21 + $0x1838] sm:$0xff]  ;;  %v16152_v20 = vcombine.high %v3755_v31, %v3759_v33  ;;  %v3807_v27 = vld [vmem:[#allocation21 + $0x19b0] sm:$0xff] }
 0x905   :  { %v16154_v37 = vcombine.high %v3756_v36, %v3760_v34  ;;  %v16153_v48 = vcombine.low %v3756_v36, %v3760_v34  ;;  %v3811_v36 = vld [vmem:[#allocation21 + $0x19d0] sm:$0xff] }
 0x906   :  { %10051 = vmatpush1.bf16.msra.mxu0 %v16095_v4  ;;  %v3763_v4 = vld [vmem:[#allocation21 + $0x1850] sm:$0xff] }
 0x907   :  { %10379 = vmatpush1.bf16.msra.mxu1 %v16097_v42  ;;  %10052 = vmatprep.subr.bf16.mxu0 %v16104_v45  ;;  %v3767_v42 = vld [vmem:[#allocation21 + $0x1870] sm:$0xff]  ;;  %v16151_v45 = vcombine.low %v3755_v31, %v3759_v33  ;;  %v16200_v31 = vcombine.high %v3803_v7, %v3807_v27 }
 0x908   :  { %10380 = vmatprep.subr.bf16.mxu1 %v16106_v28  ;;  %v3764_v28 = vld [vmem:[#allocation21 + $0x1858] sm:$0xff]  ;;  %v16160_v44 = vcombine.high %v3763_v4, %v3767_v42  ;;  %v16159_v15 = vcombine.low %v3763_v4, %v3767_v42  ;;  %v3815_v34 = vld [vmem:[#allocation21 + $0x19f0] sm:$0xff] }
 0x909   :  { %v16161_v59 = vcombine.low %v3764_v28, %v3768_v39  ;;  %v16208_v4 = vcombine.high %v3811_v36, %v3815_v34 }
 0x90a   :  { %10053 = vmatpush1.bf16.msra.mxu0 %v16103_v50  ;;  %v3775_v50 = vld [vmem:[#allocation21 + $0x18b0] sm:$0xff] }
 0x90b   :  { %10381 = vmatpush1.bf16.msra.mxu1 %v16105_v19  ;;  %10054 = vmatprep.subr.bf16.mxu0 %v16112_v32  ;;  %v16162_v19 = vcombine.high %v3764_v28, %v3768_v39  ;;  %v3772_v32 = vld [vmem:[#allocation21 + $0x1898] sm:$0xff]  ;;  %v16168_v40 = vcombine.high %v3771_v49, %v3775_v50  ;;  %v16167_v9 = vcombine.low %v3771_v49, %v3775_v50  ;;  %v3823_v28 = vld [vmem:[#allocation21 + $0x1a30] sm:$0xff] }
 0x90c   :  { %10382 = vmatprep.subr.bf16.mxu1 %v16114_v55  ;;  %v3776_v55 = vld [vmem:[#allocation21 + $0x18b8] sm:$0xff] }
 0x90d   :  { %v16170_v0 = vcombine.high %v3772_v32, %v3776_v55  ;;  %v3820_v39 = vld [vmem:[#allocation21 + $0x1a18] sm:$0xff] }
 0x90e   :  { %10055 = vmatpush1.bf16.msra.mxu0 %v16111_v13  ;;  %v3779_v13 = vld [vmem:[#allocation21 + $0x18d0] sm:$0xff] }
 0x90f   :  { %10383 = vmatpush1.bf16.msra.mxu1 %v16113_v3  ;;  %10056 = vmatprep.subr.bf16.mxu0 %v16120_v5  ;;  %v3783_v3 = vld [vmem:[#allocation21 + $0x18f0] sm:$0xff]  ;;  %v3780_v5 = vld [vmem:[#allocation21 + $0x18d8] sm:$0xff] }
 0x910   :  { %10384 = vmatprep.subr.bf16.mxu1 %v16122_v6  ;;  %v3784_v6 = vld [vmem:[#allocation21 + $0x18f8] sm:$0xff]  ;;  %v16176_v18 = vcombine.high %v3779_v13, %v3783_v3 }
 0x911   :  { %v16178_v52 = vcombine.high %v3780_v5, %v3784_v6 }
 0x912   :  { %10057 = vmatpush1.bf16.msra.mxu0 %v16119_v63  ;;  %v3791_v63 = vld [vmem:[#allocation21 + $0x1930] sm:$0xff] }
 0x913   :  { %10385 = vmatpush1.bf16.msra.mxu1 %v16121_v8  ;;  %10058 = vmatprep.subr.bf16.mxu0 %v16128_v35  ;;  %v3788_v8 = vld [vmem:[#allocation21 + $0x1918] sm:$0xff]  ;;  %v16184_v61 = vcombine.high %v3787_v10, %v3791_v63 }
 0x914   :  { %10386 = vmatprep.subr.bf16.mxu1 %v16130_v57  ;;  %v3792_v35 = vld [vmem:[#allocation21 + $0x1938] sm:$0xff]  ;;  %v16177_v57 = vcombine.low %v3780_v5, %v3784_v6  ;;  %v3835_v5 = vld [vmem:[#allocation21 + $0x1a90] sm:$0xff] }
 0x915   :  { %v16186_v14 = vcombine.high %v3788_v8, %v3792_v35  ;;  %v3839_v6 = vld [vmem:[#allocation21 + $0x1ab0] sm:$0xff] }
 0x916   :  { %10059 = vmatpush1.bf16.msra.mxu0 %v16127_v54  ;;  %v3796_v54 = vld [vmem:[#allocation21 + $0x1958] sm:$0xff] }
 0x917   :  { %10387 = vmatpush1.bf16.msra.mxu1 %v16129_v46  ;;  %10060 = vmatprep.subr.bf16.mxu0 %v16136_v22  ;;  %v3800_v46 = vld [vmem:[#allocation21 + $0x1978] sm:$0xff]  ;;  %v16183_v22 = vcombine.low %v3787_v10, %v3791_v63  ;;  %v16232_v10 = vcombine.high %v3835_v5, %v3839_v6 }
 0x918   :  { %10388 = vmatprep.subr.bf16.mxu1 %v16138_v23  ;;  %v16185_v23 = vcombine.low %v3788_v8, %v3792_v35  ;;  %v16194_v12 = vcombine.high %v3796_v54, %v3800_v46  ;;  %v3843_v8 = vld [vmem:[#allocation21 + $0x1ad0] sm:$0xff] }
 0x919   :  { %v3847_v35 = vld [vmem:[#allocation21 + $0x1af0] sm:$0xff] }
 0x91a   :  { %10061 = vmatpush1.bf16.msra.mxu0 %v16135_v30  ;;  %v3804_v30 = vld [vmem:[#allocation21 + $0x1998] sm:$0xff] }
 0x91b   :  { %10389 = vmatpush1.bf16.msra.mxu1 %v16137_v17  ;;  %10062 = vmatprep.subr.bf16.mxu0 %v16144_v25  ;;  %v3808_v17 = vld [vmem:[#allocation21 + $0x19b8] sm:$0xff]  ;;  %v16191_v25 = vcombine.low %v3795_v1, %v3799_v16  ;;  %v16240_v1 = vcombine.high %v3843_v8, %v3847_v35 }
 0x91c   :  { %10390 = vmatprep.subr.bf16.mxu1 %v16146_v2  ;;  %v16193_v2 = vcombine.low %v3796_v54, %v3800_v46  ;;  %v16202_v33 = vcombine.high %v3804_v30, %v3808_v17  ;;  %v3851_v54 = vld [vmem:[#allocation21 + $0x1b10] sm:$0xff] }
 0x91d   :  { %v3855_v46 = vld [vmem:[#allocation21 + $0x1b30] sm:$0xff] }
 0x91e   :  { %10063 = vmatpush1.bf16.msra.mxu0 %v16143_v43  ;;  %v3812_v43 = vld [vmem:[#allocation21 + $0x19d8] sm:$0xff] }
 0x91f   :  { %10391 = vmatpush1.bf16.msra.mxu1 %v16145_v11  ;;  %10073 = vmatprep.subr.bf16.mxu0 %v16152_v20  ;;  %v3816_v11 = vld [vmem:[#allocation21 + $0x19f8] sm:$0xff]  ;;  %v16199_v20 = vcombine.low %v3803_v7, %v3807_v27  ;;  %v16248_v7 = vcombine.high %v3851_v54, %v3855_v46 }
 0x920   :  { %10401 = vmatprep.subr.bf16.mxu1 %v16154_v37  ;;  %v16201_v37 = vcombine.low %v3804_v30, %v3808_v17  ;;  %v16210_v42 = vcombine.high %v3812_v43, %v3816_v11  ;;  %v16209_v49 = vcombine.low %v3812_v43, %v3816_v11  ;;  %v3859_v30 = vld [vmem:[#allocation21 + $0x1b50] sm:$0xff] }
 0x921   :  { %10065 = vmatmul.mubr.bf16.vlgmr.msra.gmra.mrb[52].mxu0 %v18807_v38  ;;  %v3863_v17 = vld [vmem:[#allocation21 + $0x1b70] sm:$0xff] }
 0x922   :  { %10393 = vmatmul.mubr.bf16.vlgmr.msra.gmra.mrb[60].mxu1 %v18807_v38  ;;  %10074 = vmatpush1.bf16.msra.mxu0 %v16151_v45  ;;  %v16169_v38 = vcombine.low %v3772_v32, %v3776_v55  ;;  %v3819_v45 = vld [vmem:[#allocation21 + $0x1a10] sm:$0xff] }
 0x923   :  { %10105 = vmatprep.mubr.bf16.mxu0 %v18810_v24  ;;  %10402 = vmatpush1.bf16.msra.mxu1 %v16153_v48  ;;  %v3824_v48 = vld [vmem:[#allocation21 + $0x1a38] sm:$0xff]  ;;  %v16216_v50 = vcombine.high %v3819_v45, %v3823_v28  ;;  %v3827_v32 = vld [vmem:[#allocation21 + $0x1a50] sm:$0xff] }
 0x924   :  { %10433 = vmatprep.mubr.bf16.mxu1 %v18810_v24  ;;  %10075 = vmatprep.subr.bf16.mxu0 %v16160_v44  ;;  %v16175_v24 = vcombine.low %v3779_v13, %v3783_v3  ;;  %v16207_v44 = vcombine.low %v3811_v36, %v3815_v34  ;;  %v3831_v55 = vld [vmem:[#allocation21 + $0x1a70] sm:$0xff]  ;;  %v16256_v36 = vcombine.high %v3859_v30, %v3863_v17 }
 0x925   :  { %10403 = vmatprep.subr.bf16.mxu1 %v16162_v19  ;;  %v16218_v19 = vcombine.high %v3820_v39, %v3824_v48  ;;  %v16224_v13 = vcombine.high %v3827_v32, %v3831_v55  ;;  %v3867_v43 = vld [vmem:[#allocation21 + $0x1b90] sm:$0xff] }
 0x926   :  { %10076 = vmatpush1.bf16.msra.mxu0 %v16159_v15  ;;  %v3828_v15 = vld [vmem:[#allocation21 + $0x1a58] sm:$0xff]  ;;  %v3871_v11 = vld [vmem:[#allocation21 + $0x1bb0] sm:$0xff] }
 0x927   :  { %10404 = vmatpush1.bf16.msra.mxu1 %v16161_v59  ;;  %10077 = vmatprep.subr.bf16.mxu0 %v16168_v40  ;;  %v3832_v59 = vld [vmem:[#allocation21 + $0x1a78] sm:$0xff]  ;;  %v16215_v40 = vcombine.low %v3819_v45, %v3823_v28  ;;  %v16264_v45 = vcombine.high %v3867_v43, %v3871_v11 }
 0x928   :  { %10405 = vmatprep.subr.bf16.mxu1 %v16170_v0  ;;  %v16217_v0 = vcombine.low %v3820_v39, %v3824_v48  ;;  %v16226_v3 = vcombine.high %v3828_v15, %v3832_v59  ;;  %v3875_v39 = vld [vmem:[#allocation21 + $0x1bd0] sm:$0xff] }
 0x929   :  { %v3879_v48 = vld [vmem:[#allocation21 + $0x1bf0] sm:$0xff] }
 0x92a   :  { %10078 = vmatpush1.bf16.msra.mxu0 %v16167_v9  ;;  %v3836_v9 = vld [vmem:[#allocation21 + $0x1a98] sm:$0xff] }
 0x92b   :  { %10406 = vmatpush1.bf16.msra.mxu1 %v16169_v38  ;;  %10079 = vmatprep.subr.bf16.mxu0 %v16176_v18  ;;  %v3840_v38 = vld [vmem:[#allocation21 + $0x1ab8] sm:$0xff]  ;;  %v16223_v18 = vcombine.low %v3827_v32, %v3831_v55  ;;  %v16272_v32 = vcombine.high %v3875_v39, %v3879_v48 }
 0x92c   :  { %10407 = vmatprep.subr.bf16.mxu1 %v16178_v52  ;;  %v16225_v52 = vcombine.low %v3828_v15, %v3832_v59  ;;  %v16234_v63 = vcombine.high %v3836_v9, %v3840_v38  ;;  %v3883_v15 = vld [vmem:[#allocation21 + $0x1c10] sm:$0xff] }
 0x92d   :  { %v3887_v59 = vld [vmem:[#allocation21 + $0x1c30] sm:$0xff] }
 0x92e   :  { %10080 = vmatpush1.bf16.msra.mxu0 %v16175_v24  ;;  %v3844_v24 = vld [vmem:[#allocation21 + $0x1ad8] sm:$0xff] }
 0x92f   :  { %10408 = vmatpush1.bf16.msra.mxu1 %v16177_v57  ;;  %10081 = vmatprep.subr.bf16.mxu0 %v16184_v61  ;;  %v3848_v57 = vld [vmem:[#allocation21 + $0x1af8] sm:$0xff]  ;;  %v16231_v61 = vcombine.low %v3835_v5, %v3839_v6  ;;  %v16280_v5 = vcombine.high %v3883_v15, %v3887_v59 }
 0x930   :  { %10409 = vmatprep.subr.bf16.mxu1 %v16186_v14  ;;  %v16233_v14 = vcombine.low %v3836_v9, %v3840_v38  ;;  %v16242_v16 = vcombine.high %v3844_v24, %v3848_v57  ;;  %v3891_v9 = vld [vmem:[#allocation21 + $0x1c50] sm:$0xff] }
 0x931   :  { %v3895_v38 = vld [vmem:[#allocation21 + $0x1c70] sm:$0xff] }
 0x932   :  { %10082 = vmatpush1.bf16.msra.mxu0 %v16183_v22  ;;  %v3852_v22 = vld [vmem:[#allocation21 + $0x1b18] sm:$0xff] }
 0x933   :  { %10410 = vmatpush1.bf16.msra.mxu1 %v16185_v23  ;;  %10083 = vmatprep.subr.bf16.mxu0 %v16192_v47  ;;  %v3856_v23 = vld [vmem:[#allocation21 + $0x1b38] sm:$0xff]  ;;  %v16239_v47 = vcombine.low %v3843_v8, %v3847_v35  ;;  %v16288_v8 = vcombine.high %v3891_v9, %v3895_v38  ;;  %v3899_v35 = vld [vmem:[#allocation21 + $0x1c90] sm:$0xff] }
 0x934   :  { %10411 = vmatprep.subr.bf16.mxu1 %v16194_v12  ;;  %v16241_v12 = vcombine.low %v3844_v24, %v3848_v57  ;;  %v16250_v27 = vcombine.high %v3852_v22, %v3856_v23  ;;  %v3903_v24 = vld [vmem:[#allocation21 + $0x1cb0] sm:$0xff] }
 0x936   :  { %10084 = vmatpush1.bf16.msra.mxu0 %v16191_v25  ;;  %v3860_v25 = vld [vmem:[#allocation21 + $0x1b58] sm:$0xff] }
 0x937   :  { %10412 = vmatpush1.bf16.msra.mxu1 %v16193_v2  ;;  %10085 = vmatprep.subr.bf16.mxu0 %v16200_v31  ;;  %v3864_v2 = vld [vmem:[#allocation21 + $0x1b78] sm:$0xff]  ;;  %v16247_v31 = vcombine.low %v3851_v54, %v3855_v46  ;;  %v16296_v54 = vcombine.high %v3899_v35, %v3903_v24 }
 0x938   :  { %10413 = vmatprep.subr.bf16.mxu1 %v16202_v33  ;;  %v16249_v33 = vcombine.low %v3852_v22, %v3856_v23  ;;  %v16258_v34 = vcombine.high %v3860_v25, %v3864_v2  ;;  %v3907_v22 = vld [vmem:[#allocation21 + $0x1cd0] sm:$0xff] }
 0x939   :  { %v3911_v23 = vld [vmem:[#allocation21 + $0x1cf0] sm:$0xff] }
 0x93a   :  { %10086 = vmatpush1.bf16.msra.mxu0 %v16199_v20  ;;  %v3868_v20 = vld [vmem:[#allocation21 + $0x1b98] sm:$0xff] }
 0x93b   :  { %10414 = vmatpush1.bf16.msra.mxu1 %v16201_v37  ;;  %10087 = vmatprep.subr.bf16.mxu0 %v16208_v4  ;;  %v3872_v37 = vld [vmem:[#allocation21 + $0x1bb8] sm:$0xff]  ;;  %v16255_v4 = vcombine.low %v3859_v30, %v3863_v17  ;;  %v3915_v17 = vld [vmem:[#allocation21 + $0x1d10] sm:$0xff] }
 0x93c   :  { %10415 = vmatprep.subr.bf16.mxu1 %v16210_v42  ;;  %v16257_v42 = vcombine.low %v3860_v25, %v3864_v2  ;;  %v16266_v28 = vcombine.high %v3868_v20, %v3872_v37  ;;  %v3919_v25 = vld [vmem:[#allocation21 + $0x1d30] sm:$0xff]  ;;  %v3916_v2 = vld [vmem:[#allocation21 + $0x1d18] sm:$0xff] }
 0x93e   :  { %10088 = vmatpush1.bf16.msra.mxu0 %v16207_v44  ;;  %v3876_v44 = vld [vmem:[#allocation21 + $0x1bd8] sm:$0xff] }
 0x93f   :  { %10416 = vmatpush1.bf16.msra.mxu1 %v16209_v49  ;;  %10089 = vmatprep.subr.bf16.mxu0 %v16216_v50  ;;  %v3880_v49 = vld [vmem:[#allocation21 + $0x1bf8] sm:$0xff]  ;;  %v16263_v50 = vcombine.low %v3867_v43, %v3871_v11  ;;  %v3923_v43 = vld [vmem:[#allocation21 + $0x1d50] sm:$0xff] }
 0x940   :  { %10417 = vmatprep.subr.bf16.mxu1 %v16218_v19  ;;  %v16265_v19 = vcombine.low %v3868_v20, %v3872_v37  ;;  %v16274_v55 = vcombine.high %v3876_v44, %v3880_v49  ;;  %v3927_v11 = vld [vmem:[#allocation21 + $0x1d70] sm:$0xff]  ;;  %v3924_v20 = vld [vmem:[#allocation21 + $0x1d58] sm:$0xff] }
 0x941   :  { %v3928_v37 = vld [vmem:[#allocation21 + $0x1d78] sm:$0xff] }
 0x942   :  { %10090 = vmatpush1.bf16.msra.mxu0 %v16215_v40  ;;  %v3884_v40 = vld [vmem:[#allocation21 + $0x1c18] sm:$0xff] }
 0x943   :  { %10418 = vmatpush1.bf16.msra.mxu1 %v16217_v0  ;;  %10091 = vmatprep.subr.bf16.mxu0 %v16224_v13  ;;  %v3888_v0 = vld [vmem:[#allocation21 + $0x1c38] sm:$0xff]  ;;  %v16271_v13 = vcombine.low %v3875_v39, %v3879_v48  ;;  %v3931_v39 = vld [vmem:[#allocation21 + $0x1d90] sm:$0xff] }
 0x944   :  { %10419 = vmatprep.subr.bf16.mxu1 %v16226_v3  ;;  %v16273_v3 = vcombine.low %v3876_v44, %v3880_v49  ;;  %v16282_v6 = vcombine.high %v3884_v40, %v3888_v0  ;;  %v3935_v48 = vld [vmem:[#allocation21 + $0x1db0] sm:$0xff]  ;;  %v3932_v44 = vld [vmem:[#allocation21 + $0x1d98] sm:$0xff] }
 0x945   :  { %v3936_v49 = vld [vmem:[#allocation21 + $0x1db8] sm:$0xff] }
 0x946   :  { %10092 = vmatpush1.bf16.msra.mxu0 %v16223_v18  ;;  %v16279_v18 = vcombine.low %v3883_v15, %v3887_v59  ;;  %v3939_v15 = vld [vmem:[#allocation21 + $0x1dd0] sm:$0xff] }
 0x947   :  { %10420 = vmatpush1.bf16.msra.mxu1 %v16225_v52  ;;  %10093 = vmatprep.subr.bf16.mxu0 %v16232_v10  ;;  %v3892_v52 = vld [vmem:[#allocation21 + $0x1c58] sm:$0xff]  ;;  %v3943_v59 = vld [vmem:[#allocation21 + $0x1df0] sm:$0xff] }
 0x948   :  { %10421 = vmatprep.subr.bf16.mxu1 %v16234_v63  ;;  %v3896_v10 = vld [vmem:[#allocation21 + $0x1c78] sm:$0xff]  ;;  %v16281_v63 = vcombine.low %v3884_v40, %v3888_v0 }
 0x949   :  { %v16290_v57 = vcombine.high %v3892_v52, %v3896_v10  ;;  %v3940_v40 = vld [vmem:[#allocation21 + $0x1dd8] sm:$0xff] }
 0x94a   :  { %10094 = vmatpush1.bf16.msra.mxu0 %v16231_v61  ;;  %v3900_v61 = vld [vmem:[#allocation21 + $0x1c98] sm:$0xff] }
 0x94b   :  { %10422 = vmatpush1.bf16.msra.mxu1 %v16233_v14  ;;  %10095 = vmatprep.subr.bf16.mxu0 %v16240_v1  ;;  %v3904_v14 = vld [vmem:[#allocation21 + $0x1cb8] sm:$0xff]  ;;  %v16287_v1 = vcombine.low %v3891_v9, %v3895_v38  ;;  %v3947_v9 = vld [vmem:[#allocation21 + $0x1e10] sm:$0xff] }
 0x94c   :  { %10423 = vmatprep.subr.bf16.mxu1 %v16242_v16  ;;  %v16289_v16 = vcombine.low %v3892_v52, %v3896_v10  ;;  %v16298_v46 = vcombine.high %v3900_v61, %v3904_v14  ;;  %v3944_v0 = vld [vmem:[#allocation21 + $0x1df8] sm:$0xff]  ;;  %v3951_v38 = vld [vmem:[#allocation21 + $0x1e30] sm:$0xff]  ;;  %v16335_v10 = vcombine.low %v3939_v15, %v3943_v59 }
 0x94d   :  { %v3952_v52 = vld [vmem:[#allocation21 + $0x1e38] sm:$0xff] }
 0x94e   :  { %10096 = vmatpush1.bf16.msra.mxu0 %v16239_v47  ;;  %v3908_v47 = vld [vmem:[#allocation21 + $0x1cd8] sm:$0xff] }
 0x94f   :  { %10424 = vmatpush1.bf16.msra.mxu1 %v16241_v12  ;;  %10097 = vmatprep.subr.bf16.mxu0 %v16248_v7  ;;  %v3912_v12 = vld [vmem:[#allocation21 + $0x1cf8] sm:$0xff]  ;;  %v16295_v7 = vcombine.low %v3899_v35, %v3903_v24  ;;  %v3955_v24 = vld [vmem:[#allocation21 + $0x1e50] sm:$0xff] }
 0x950   :  { %10425 = vmatprep.subr.bf16.mxu1 %v16250_v27  ;;  %v16304_v27 = vcombine.high %v3907_v22, %v3911_v23  ;;  %v16306_v30 = vcombine.high %v3908_v47, %v3912_v12 }
 0x952   :  { %10098 = vmatpush1.bf16.msra.mxu0 %v16247_v31  ;;  %v3920_v31 = vld [vmem:[#allocation21 + $0x1d38] sm:$0xff] }
 0x953   :  { %10426 = vmatpush1.bf16.msra.mxu1 %v16249_v33  ;;  %10099 = vmatprep.subr.bf16.mxu0 %v16256_v36  ;;  %v16305_v33 = vcombine.low %v3908_v47, %v3912_v12  ;;  %v16312_v36 = vcombine.high %v3915_v17, %v3919_v25  ;;  %v3964_v47 = vld [vmem:[#allocation21 + $0x1e98] sm:$0xff] }
 0x954   :  { %10427 = vmatprep.subr.bf16.mxu1 %v16258_v34  ;;  %v16314_v34 = vcombine.high %v3916_v2, %v3920_v31  ;;  %v3968_v12 = vld [vmem:[#allocation21 + $0x1eb8] sm:$0xff] }
 0x956   :  { %10100 = vmatpush1.bf16.msra.mxu0 %v16255_v4  ;;  %v16311_v4 = vcombine.low %v3915_v17, %v3919_v25  ;;  %v3971_v17 = vld [vmem:[#allocation21 + $0x1ed0] sm:$0xff] }
 0x957   :  { %10428 = vmatpush1.bf16.msra.mxu1 %v16257_v42  ;;  %10101 = vmatprep.subr.bf16.mxu0 %v16264_v45  ;;  %v16313_v42 = vcombine.low %v3916_v2, %v3920_v31  ;;  %v16320_v45 = vcombine.high %v3923_v43, %v3927_v11  ;;  %v3975_v25 = vld [vmem:[#allocation21 + $0x1ef0] sm:$0xff]  ;;  %v3972_v2 = vld [vmem:[#allocation21 + $0x1ed8] sm:$0xff] }
 0x958   :  { %10429 = vmatprep.subr.bf16.mxu1 %v16266_v28  ;;  %v16322_v28 = vcombine.high %v3924_v20, %v3928_v37  ;;  %v3976_v31 = vld [vmem:[#allocation21 + $0x1ef8] sm:$0xff] }
 0x95a   :  { %10102 = vmatpush1.bf16.msra.mxu0 %v16263_v50  ;;  %v16319_v50 = vcombine.low %v3923_v43, %v3927_v11  ;;  %v3979_v43 = vld [vmem:[#allocation21 + $0x1f10] sm:$0xff] }
 0x95b   :  { %10430 = vmatpush1.bf16.msra.mxu1 %v16265_v19  ;;  %10103 = vmatprep.subr.bf16.mxu0 %v16272_v32  ;;  %v16321_v19 = vcombine.low %v3924_v20, %v3928_v37  ;;  %v16328_v32 = vcombine.high %v3931_v39, %v3935_v48  ;;  %v3983_v11 = vld [vmem:[#allocation21 + $0x1f30] sm:$0xff]  ;;  %v3980_v20 = vld [vmem:[#allocation21 + $0x1f18] sm:$0xff] }
 0x95c   :  { %10431 = vmatprep.subr.bf16.mxu1 %v16274_v55  ;;  %v16330_v55 = vcombine.high %v3932_v44, %v3936_v49  ;;  %v3984_v37 = vld [vmem:[#allocation21 + $0x1f38] sm:$0xff] }
 0x95e   :  { %10104 = vmatpush1.bf16.msra.mxu0 %v16271_v13  ;;  %v16327_v13 = vcombine.low %v3931_v39, %v3935_v48  ;;  %v16378_v39 = vcombine.high %v3980_v20, %v3984_v37  ;;  %v3987_v48 = vld [vmem:[#allocation21 + $0x1f50] sm:$0xff] }
 0x95f   :  { %10432 = vmatpush1.bf16.msra.mxu1 %v16273_v3  ;;  %10114 = vmatprep.subr.bf16.mxu0 %v16280_v5  ;;  %v16329_v3 = vcombine.low %v3932_v44, %v3936_v49  ;;  %v16336_v5 = vcombine.high %v3939_v15, %v3943_v59  ;;  %v3991_v44 = vld [vmem:[#allocation21 + $0x1f70] sm:$0xff] }
 0x960   :  { %10442 = vmatprep.subr.bf16.mxu1 %v16282_v6  ;;  %v16338_v6 = vcombine.high %v3940_v40, %v3944_v0  ;;  %v16384_v15 = vcombine.high %v3987_v48, %v3991_v44 }
 0x961   :  { %10106 = vmatmul.mubr.bf16.vlgmr.msra.gmra.mrb[52].mxu0 %v18824_v29 }
 0x962   :  { %10434 = vmatmul.mubr.bf16.vlgmr.msra.gmra.mrb[60].mxu1 %v18824_v29  ;;  %10115 = vmatpush1.bf16.msra.mxu0 %v16279_v18  ;;  %v16297_v29 = vcombine.low %v3900_v61, %v3904_v14  ;;  %v3948_v18 = vld [vmem:[#allocation21 + $0x1e18] sm:$0xff] }
 0x963   :  { %10146 = vmatprep.mubr.bf16.mxu0 %v18827_v41  ;;  %10443 = vmatpush1.bf16.msra.mxu1 %v16281_v63  ;;  %v16337_v63 = vcombine.low %v3940_v40, %v3944_v0  ;;  %v16346_v35 = vcombine.high %v3948_v18, %v3952_v52  ;;  %v3956_v61 = vld [vmem:[#allocation21 + $0x1e58] sm:$0xff]  ;;  %v3995_v40 = vld [vmem:[#allocation21 + $0x1f90] sm:$0xff] }
 0x964   :  { %10474 = vmatprep.mubr.bf16.mxu1 %v18827_v41  ;;  %10116 = vmatprep.subr.bf16.mxu0 %v16288_v8  ;;  %v16303_v41 = vcombine.low %v3907_v22, %v3911_v23  ;;  %v16344_v8 = vcombine.high %v3947_v9, %v3951_v38  ;;  %v3960_v14 = vld [vmem:[#allocation21 + $0x1e78] sm:$0xff]  ;;  %v3963_v22 = vld [vmem:[#allocation21 + $0x1e90] sm:$0xff] }
 0x965   :  { %10444 = vmatprep.subr.bf16.mxu1 %v16290_v57  ;;  %v3959_v57 = vld [vmem:[#allocation21 + $0x1e70] sm:$0xff] }
 0x966   :  { %10117 = vmatpush1.bf16.msra.mxu0 %v16287_v1  ;;  %v16343_v1 = vcombine.low %v3947_v9, %v3951_v38  ;;  %v3967_v23 = vld [vmem:[#allocation21 + $0x1eb0] sm:$0xff]  ;;  %v16383_v9 = vcombine.low %v3987_v48, %v3991_v44 }
 0x967   :  { %10445 = vmatpush1.bf16.msra.mxu1 %v16289_v16  ;;  %10118 = vmatprep.subr.bf16.mxu0 %v16296_v54  ;;  %v16345_v16 = vcombine.low %v3948_v18, %v3952_v52  ;;  %v16352_v54 = vcombine.high %v3955_v24, %v3959_v57  ;;  %v3999_v0 = vld [vmem:[#allocation21 + $0x1fb0] sm:$0xff] }
 0x968   :  { %10446 = vmatprep.subr.bf16.mxu1 %v16298_v46  ;;  %v16354_v46 = vcombine.high %v3956_v61, %v3960_v14  ;;  %v16392_v18 = vcombine.high %v3995_v40, %v3999_v0 }
 0x96a   :  { %10119 = vmatpush1.bf16.msra.mxu0 %v16295_v7  ;;  %v16351_v7 = vcombine.low %v3955_v24, %v3959_v57  ;;  %v4004_v24 = vld [vmem:[#allocation21 + $0x1fd8] sm:$0xff] }
 0x96b   :  { %10447 = vmatpush1.bf16.msra.mxu1 %v16297_v29  ;;  %10120 = vmatprep.subr.bf16.mxu0 %v16304_v27  ;;  %v16353_v29 = vcombine.low %v3956_v61, %v3960_v14  ;;  %v16360_v27 = vcombine.high %v3963_v22, %v3967_v23  ;;  %v18885_v57 = vld [vmem:[#allocation22 + $0x2] ss:$4 sm:$0xff]  ;;  %v16391_v61 = vcombine.low %v3995_v40, %v3999_v0 }
 0x96c   :  { %10448 = vmatprep.subr.bf16.mxu1 %v16306_v30  ;;  %v16362_v30 = vcombine.high %v3964_v47, %v3968_v12  ;;  %v10633_v40 = vld [vmem:[#allocation24 + $0x100] sm:$0xff] }
 0x96d   :  { %v10637_v0 = vld [vmem:[#allocation24 + $0x120] sm:$0xff] }
 0x96e   :  { %10121 = vmatpush1.bf16.msra.mxu0 %v16303_v41  ;;  %v16359_v41 = vcombine.low %v3963_v22, %v3967_v23  ;;  %v10552_v23 = vrot.slane %v18885_v57, %v18495_v62 }
 0x96f   :  { %10449 = vmatpush1.bf16.msra.mxu1 %v16305_v33  ;;  %10122 = vmatprep.subr.bf16.mxu0 %v16312_v36  ;;  %v16361_v33 = vcombine.low %v3964_v47, %v3968_v12  ;;  %v16368_v36 = vcombine.high %v3971_v17, %v3975_v25  ;;  %v10602_v47 = vld [vmem:[#allocation24 + $0x8] sm:$0xff] }
 0x970   :  { %10450 = vmatprep.subr.bf16.mxu1 %v16314_v34  ;;  %v16370_v34 = vcombine.high %v3972_v2, %v3976_v31  ;;  %v10606_v12 = vld [vmem:[#allocation24 + $0x28] sm:$0xff] }
 0x972   :  { %10123 = vmatpush1.bf16.msra.mxu0 %v16311_v4  ;;  %v18876_v4 = vld [vmem:[#allocation22] ss:$4 sm:$0xff] }
 0x973   :  { %10451 = vmatpush1.bf16.msra.mxu1 %v16313_v42  ;;  %10124 = vmatprep.subr.bf16.mxu0 %v16320_v45  ;;  %v16367_v42 = vcombine.low %v3971_v17, %v3975_v25  ;;  %v16369_v45 = vcombine.low %v3972_v2, %v3976_v31  ;;  %v4018_v49 = vrot.slane %v18876_v4, %v18495_v62  ;;  %v10609_v25 = vld [vmem:[#allocation24 + $0x40] sm:$0xff] }
 0x974   :  { %10452 = vmatprep.subr.bf16.mxu1 %v16322_v28  ;;  %v16376_v28 = vcombine.high %v3979_v43, %v3983_v11  ;;  %v10613_v2 = vld [vmem:[#allocation24 + $0x60] sm:$0xff] }
 0x976   :  { %10125 = vmatpush1.bf16.msra.mxu0 %v16319_v50  ;;  %v3988_v50 = vld [vmem:[#allocation21 + $0x1f58] sm:$0xff] }
 0x977   :  { %10453 = vmatpush1.bf16.msra.mxu1 %v16321_v19  ;;  %10126 = vmatprep.subr.bf16.mxu0 %v16328_v32  ;;  %v3992_v19 = vld [vmem:[#allocation21 + $0x1f78] sm:$0xff]  ;;  %v16375_v32 = vcombine.low %v3979_v43, %v3983_v11  ;;  %v10617_v43 = vld [vmem:[#allocation24 + $0x80] sm:$0xff] }
 0x978   :  { %10454 = vmatprep.subr.bf16.mxu1 %v16330_v55  ;;  %v16377_v55 = vcombine.low %v3980_v20, %v3984_v37  ;;  %v16386_v59 = vcombine.high %v3988_v50, %v3992_v19  ;;  %v16385_v38 = vcombine.low %v3988_v50, %v3992_v19  ;;  %v10621_v11 = vld [vmem:[#allocation24 + $0xa0] sm:$0xff]  ;;  %v10626_v19 = vld [vmem:[#allocation24 + $0xc8] sm:$0xff] }
 0x979   :  { %v16420_v48 = vcombine.high %v10617_v43, %v10621_v11  ;;  %v10629_v50 = vld [vmem:[#allocation24 + $0xe0] sm:$0xff] }
 0x97a   :  { %10127 = vmatpush1.bf16.msra.mxu0 %v16327_v13  ;;  %v17224_v13 = vadd.f32 %v18856_v53, %v4018_v49  ;;  %v4008_v53 = vld [vmem:[#allocation21 + $0x1ff8] sm:$0xff]  ;;  %v10625_v49 = vld [vmem:[#allocation24 + $0xc0] sm:$0xff] }
 0x97b   :  { %10455 = vmatpush1.bf16.msra.mxu1 %v16329_v3  ;;  %10128 = vmatprep.subr.bf16.mxu0 %v16336_v5  ;;  %v3996_v3 = vld [vmem:[#allocation21 + $0x1f98] sm:$0xff] }
 0x97c   :  { %10456 = vmatprep.subr.bf16.mxu1 %v16338_v6  ;;  %v4000_v5 = vld [vmem:[#allocation21 + $0x1fb8] sm:$0xff] }
 0x97d   :  { %v18881_v6 = vld [vmem:[#allocation22 + $0x1] ss:$4 sm:$0xff]  ;;  %v16394_v52 = vcombine.high %v3996_v3, %v4000_v5  ;;  %v16393_v14 = vcombine.low %v3996_v3, %v4000_v5  ;;  %v16427_v5 = vcombine.low %v10625_v49, %v10629_v50 }
 0x97e   :  { %10129 = vmatpush1.bf16.msra.mxu0 %v16335_v10  ;;  %v4003_v10 = vld [vmem:[#allocation21 + $0x1fd0] sm:$0xff]  ;;  %v10638_v3 = vld [vmem:[#allocation24 + $0x128] sm:$0xff] }
 0x97f   :  { %10457 = vmatpush1.bf16.msra.mxu1 %v16337_v63  ;;  %10130 = vmatprep.subr.bf16.mxu0 %v16344_v8  ;;  %v4007_v63 = vld [vmem:[#allocation21 + $0x1ff0] sm:$0xff]  ;;  %v10484_v8 = vmax.f32 %v17224_v13, 0.0  ;;  %v10634_v13 = vld [vmem:[#allocation24 + $0x108] sm:$0xff] }
 0x980   :  { %10458 = vmatprep.subr.bf16.mxu1 %v16346_v35  ;;  %v10501_v35 = vrot.slane %v18881_v6, %v18495_v62 }
 0x982   :  { %10131 = vmatpush1.bf16.msra.mxu0 %v16343_v1  ;;  %v16400_v1 = vcombine.high %v4003_v10, %v4007_v63  ;;  %v10535_v22 = vmul.f32 %v10501_v35, %v10484_v8  ;;  %v10646_v8 = vld [vmem:[#allocation24 + $0x168] sm:$0xff]  ;;  %v16435_v35 = vcombine.low %v10633_v40, %v10637_v0 }
 0x983   :  { %10459 = vmatpush1.bf16.msra.mxu1 %v16345_v16  ;;  %10132 = vmatprep.subr.bf16.mxu0 %v16352_v54  ;;  %v16402_v16 = vcombine.high %v4004_v24, %v4008_v53  ;;  %v10601_v54 = vld [vmem:[#allocation24] sm:$0xff] }
 0x984   :  { %10460 = vmatprep.subr.bf16.mxu1 %v16354_v46  ;;  %v10605_v46 = vld [vmem:[#allocation24 + $0x20] sm:$0xff]  ;;  %v10586_v17 = vadd.f32 %v10552_v23, %v10535_v22 }
 0x985   :  { %v16403_v31 = vcombine.low %v10601_v54, %v10605_v46 }
 0x986   :  { %10133 = vmatpush1.bf16.msra.mxu0 %v16351_v7  ;;  %v16399_v7 = vcombine.low %v4003_v10, %v4007_v63  ;;  %v18889_v20 = vpack.c.bf16 %v10586_v17, %v10586_v17  ;;  %v10645_v10 = vld [vmem:[#allocation24 + $0x160] sm:$0xff]  ;;  %v10642_v63 = vld [vmem:[#allocation24 + $0x148] sm:$0xff] }
 0x987   :  { %10461 = vmatpush1.bf16.msra.mxu1 %v16353_v29  ;;  %10134 = vmatprep.subr.bf16.mxu0 %v16360_v27  ;;  %v16401_v29 = vcombine.low %v4004_v24, %v4008_v53  ;;  %v16404_v27 = vcombine.high %v10601_v54, %v10605_v46  ;;  %v16437_v24 = vcombine.low %v10634_v13, %v10638_v3  ;;  %v10654_v54 = vld [vmem:[#allocation24 + $0x1a8] sm:$0xff] }
 0x988   :  { %10462 = vmatprep.subr.bf16.mxu1 %v16362_v30  ;;  %v16406_v30 = vcombine.high %v10602_v47, %v10606_v12  ;;  %v16445_v22 = vcombine.low %v10642_v63, %v10646_v8 }
 0x98a   :  { %10135 = vmatpush1.bf16.msra.mxu0 %v16359_v41  ;;  %v10610_v41 = vld [vmem:[#allocation24 + $0x48] sm:$0xff] }
 0x98b   :  { %10463 = vmatpush1.bf16.msra.mxu1 %v16361_v33  ;;  %10136 = vmatprep.subr.bf16.mxu0 %v16368_v36  ;;  %v10614_v33 = vld [vmem:[#allocation24 + $0x68] sm:$0xff]  ;;  %v16405_v36 = vcombine.low %v10602_v47, %v10606_v12  ;;  %v10657_v12 = vld [vmem:[#allocation24 + $0x1c0] sm:$0xff] }
 0x98c   :  { %10464 = vmatprep.subr.bf16.mxu1 %v16370_v34  ;;  %v16412_v34 = vcombine.high %v10609_v25, %v10613_v2  ;;  %v16414_v37 = vcombine.high %v10610_v41, %v10614_v33 }
 0x98e   :  { %10137 = vmatpush1.bf16.msra.mxu0 %v16367_v42  ;;  %v10618_v42 = vld [vmem:[#allocation24 + $0x88] sm:$0xff] }
 0x98f   :  { %10465 = vmatpush1.bf16.msra.mxu1 %v16369_v45  ;;  %10138 = vmatprep.subr.bf16.mxu0 %v16376_v28  ;;  %v10622_v45 = vld [vmem:[#allocation24 + $0xa8] sm:$0xff]  ;;  %v16411_v28 = vcombine.low %v10609_v25, %v10613_v2 }
 0x990   :  { %10466 = vmatprep.subr.bf16.mxu1 %v16378_v39  ;;  %v16413_v39 = vcombine.low %v10610_v41, %v10614_v33  ;;  %v16422_v44 = vcombine.high %v10618_v42, %v10622_v45  ;;  %v10669_v41 = vld [vmem:[#allocation24 + $0x220] sm:$0xff]  ;;  %v10666_v33 = vld [vmem:[#allocation24 + $0x208] sm:$0xff] }
 0x992   :  { %10139 = vmatpush1.bf16.msra.mxu0 %v16375_v32  ;;  %v10630_v32 = vld [vmem:[#allocation24 + $0xe8] sm:$0xff] }
 0x993   :  { %10467 = vmatpush1.bf16.msra.mxu1 %v16377_v55  ;;  %10140 = vmatprep.subr.bf16.mxu0 %v16384_v15  ;;  %v16419_v55 = vcombine.low %v10617_v43, %v10621_v11  ;;  %v16428_v15 = vcombine.high %v10625_v49, %v10629_v50 }
 0x994   :  { %10468 = vmatprep.subr.bf16.mxu1 %v16386_v59  ;;  %v16430_v59 = vcombine.high %v10626_v19, %v10630_v32 }
 0x996   :  { %10141 = vmatpush1.bf16.msra.mxu0 %v16383_v9  ;;  %v16429_v9 = vcombine.low %v10626_v19, %v10630_v32  ;;  %v10681_v19 = vld [vmem:[#allocation24 + $0x280] sm:$0xff] }
 0x997   :  { %10469 = vmatpush1.bf16.msra.mxu1 %v16385_v38  ;;  %10142 = vmatprep.subr.bf16.mxu0 %v16392_v18  ;;  %v16436_v38 = vcombine.high %v10633_v40, %v10637_v0  ;;  %v16438_v18 = vcombine.high %v10634_v13, %v10638_v3  ;;  %v10685_v32 = vld [vmem:[#allocation24 + $0x2a0] sm:$0xff] }
 0x998   :  { %10470 = vmatprep.subr.bf16.mxu1 %v16394_v52  ;;  %v10641_v52 = vld [vmem:[#allocation24 + $0x140] sm:$0xff]  ;;  %v16484_v40 = vcombine.high %v10681_v19, %v10685_v32 }
 0x999   :  { %v16444_v53 = vcombine.high %v10641_v52, %v10645_v10  ;;  %v16443_v46 = vcombine.low %v10641_v52, %v10645_v10  ;;  %v10689_v13 = vld [vmem:[#allocation24 + $0x2c0] sm:$0xff] }
 0x99a   :  { %10143 = vmatpush1.bf16.msra.mxu0 %v16391_v61  ;;  %v16446_v61 = vcombine.high %v10642_v63, %v10646_v8  ;;  %v10693_v3 = vld [vmem:[#allocation24 + $0x2e0] sm:$0xff] }
 0x99b   :  { %10471 = vmatpush1.bf16.msra.mxu1 %v16393_v14  ;;  %10144 = vmatprep.subr.bf16.mxu0 %v16400_v1  ;;  %v10649_v14 = vld [vmem:[#allocation24 + $0x180] sm:$0xff]  ;;  %v16492_v52 = vcombine.high %v10689_v13, %v10693_v3 }
 0x99c   :  { %10472 = vmatprep.subr.bf16.mxu1 %v16402_v16  ;;  %v10653_v1 = vld [vmem:[#allocation24 + $0x1a0] sm:$0xff]  ;;  %v10650_v16 = vld [vmem:[#allocation24 + $0x188] sm:$0xff] }
 0x99d   :  { %v16452_v23 = vcombine.high %v10649_v14, %v10653_v1  ;;  %v16454_v47 = vcombine.high %v10650_v16, %v10654_v54  ;;  %v16453_v17 = vcombine.low %v10650_v16, %v10654_v54  ;;  %v10697_v63 = vld [vmem:[#allocation24 + $0x300] sm:$0xff] }
 0x99e   :  { %10145 = vmatpush1.bf16.msra.mxu0 %v16399_v7  ;;  %v10661_v7 = vld [vmem:[#allocation24 + $0x1e0] sm:$0xff] }
 0x99f   :  { %10473 = vmatpush1.bf16.msra.mxu1 %v16401_v29  ;;  %13715 = vmatprep.subr.bf16.mxu0 %v16404_v27  ;;  %v10658_v29 = vld [vmem:[#allocation24 + $0x1c8] sm:$0xff]  ;;  %v16460_v25 = vcombine.high %v10657_v12, %v10661_v7  ;;  %v10701_v8 = vld [vmem:[#allocation24 + $0x320] sm:$0xff] }
 0x9a0   :  { %13879 = vmatprep.subr.bf16.mxu1 %v16406_v30  ;;  %v10662_v27 = vld [vmem:[#allocation24 + $0x1e8] sm:$0xff]  ;;  %v16451_v30 = vcombine.low %v10649_v14, %v10653_v1  ;;  %v4014_v14 = vrot.slane %v18876_v4, %v18492_v60  ;;  %v16500_v16 = vcombine.high %v10697_v63, %v10701_v8 }
 0x9a1   :  { %10147 = vmatmul.mubr.bf16.vlgmr.msra.gmra.mrb[52].mxu0 %v18834_v26  ;;  %v16462_v2 = vcombine.high %v10658_v29, %v10662_v27  ;;  %v16461_v43 = vcombine.low %v10658_v29, %v10662_v27 }
 0x9a2   :  { %10475 = vmatmul.mubr.bf16.vlgmr.msra.gmra.mrb[60].mxu1 %v18834_v26  ;;  %13716 = vmatpush1.bf16.msra.mxu0 %v16403_v31  ;;  %v16421_v26 = vcombine.low %v10618_v42, %v10622_v45  ;;  %v10665_v31 = vld [vmem:[#allocation24 + $0x200] sm:$0xff]  ;;  %v17223_v29 = vadd.f32 %v18852_v51, %v4014_v14 }
 0x9a3   :  { %13747 = vmatprep.mubr.bf16.mxu0 %v18889_v20  ;;  %13880 = vmatpush1.bf16.msra.mxu1 %v16405_v36  ;;  %v10670_v36 = vld [vmem:[#allocation24 + $0x228] sm:$0xff]  ;;  %v16468_v11 = vcombine.high %v10665_v31, %v10669_v41  ;;  %v10673_v42 = vld [vmem:[#allocation24 + $0x240] sm:$0xff] }
 0x9a4   :  { %13911 = vmatprep.mubr.bf16.mxu1 %v18889_v20  ;;  %13717 = vmatprep.subr.bf16.mxu0 %v16412_v34  ;;  %v16459_v34 = vcombine.low %v10657_v12, %v10661_v7  ;;  %v10677_v45 = vld [vmem:[#allocation24 + $0x260] sm:$0xff]  ;;  %v10710_v12 = vld [vmem:[#allocation24 + $0x368] sm:$0xff]  ;;  %v16499_v7 = vcombine.low %v10697_v63, %v10701_v8 }
 0x9a5   :  { %13881 = vmatprep.subr.bf16.mxu1 %v16414_v37  ;;  %v16470_v37 = vcombine.high %v10666_v33, %v10670_v36  ;;  %v16476_v49 = vcombine.high %v10673_v42, %v10677_v45  ;;  %v10741_v63 = vld [vmem:[#allocation24 + $0x460] sm:$0xff] }
 0x9a6   :  { %13718 = vmatpush1.bf16.msra.mxu0 %v16411_v28  ;;  %v10674_v28 = vld [vmem:[#allocation24 + $0x248] sm:$0xff] }
 0x9a7   :  { %13882 = vmatpush1.bf16.msra.mxu1 %v16413_v39  ;;  %13719 = vmatprep.subr.bf16.mxu0 %v16420_v48  ;;  %v10678_v39 = vld [vmem:[#allocation24 + $0x268] sm:$0xff]  ;;  %v16467_v48 = vcombine.low %v10665_v31, %v10669_v41 }
 0x9a8   :  { %13883 = vmatprep.subr.bf16.mxu1 %v16422_v44  ;;  %v16469_v44 = vcombine.low %v10666_v33, %v10670_v36  ;;  %v16478_v50 = vcombine.high %v10674_v28, %v10678_v39  ;;  %v10714_v41 = vld [vmem:[#allocation24 + $0x388] sm:$0xff] }
 0x9a9   :  { %v10718_v33 = vld [vmem:[#allocation24 + $0x3a8] sm:$0xff] }
 0x9aa   :  { %13720 = vmatpush1.bf16.msra.mxu0 %v16419_v55  ;;  %v10682_v55 = vld [vmem:[#allocation24 + $0x288] sm:$0xff] }
 0x9ab   :  { %13884 = vmatpush1.bf16.msra.mxu1 %v16421_v26  ;;  %13721 = vmatprep.subr.bf16.mxu0 %v16428_v15  ;;  %v10686_v26 = vld [vmem:[#allocation24 + $0x2a8] sm:$0xff]  ;;  %v16475_v15 = vcombine.low %v10673_v42, %v10677_v45  ;;  %v10721_v42 = vld [vmem:[#allocation24 + $0x3c0] sm:$0xff] }
 0x9ac   :  { %13885 = vmatprep.subr.bf16.mxu1 %v16430_v59  ;;  %v16477_v59 = vcombine.low %v10674_v28, %v10678_v39  ;;  %v16486_v0 = vcombine.high %v10682_v55, %v10686_v26  ;;  %v10725_v45 = vld [vmem:[#allocation24 + $0x3e0] sm:$0xff]  ;;  %v10722_v39 = vld [vmem:[#allocation24 + $0x3c8] sm:$0xff] }
 0x9ae   :  { %13722 = vmatpush1.bf16.msra.mxu0 %v16427_v5  ;;  %v10690_v5 = vld [vmem:[#allocation24 + $0x2c8] sm:$0xff] }
 0x9af   :  { %13886 = vmatpush1.bf16.msra.mxu1 %v16429_v9  ;;  %13723 = vmatprep.subr.bf16.mxu0 %v16436_v38  ;;  %v10694_v9 = vld [vmem:[#allocation24 + $0x2e8] sm:$0xff]  ;;  %v16483_v38 = vcombine.low %v10681_v19, %v10685_v32  ;;  %v16517_v19 = vcombine.low %v10714_v41, %v10718_v33  ;;  %v16524_v32 = vcombine.high %v10721_v42, %v10725_v45 }
 0x9b0   :  { %13887 = vmatprep.subr.bf16.mxu1 %v16438_v18  ;;  %v16485_v18 = vcombine.low %v10682_v55, %v10686_v26  ;;  %v16494_v10 = vcombine.high %v10690_v5, %v10694_v9  ;;  %v16493_v1 = vcombine.low %v10690_v5, %v10694_v9  ;;  %v10729_v26 = vld [vmem:[#allocation24 + $0x400] sm:$0xff] }
 0x9b2   :  { %13724 = vmatpush1.bf16.msra.mxu0 %v16435_v35  ;;  %v18896_v35 = vsub.s32 3, %v18489_v58 }
 0x9b3   :  { %13888 = vmatpush1.bf16.msra.mxu1 %v16437_v24  ;;  %13725 = vmatprep.subr.bf16.mxu0 %v16444_v53  ;;  %v10698_v24 = vld [vmem:[#allocation24 + $0x308] sm:$0xff] }
 0x9b4   :  { %13889 = vmatprep.subr.bf16.mxu1 %v16446_v61  ;;  %v10702_v53 = vld [vmem:[#allocation24 + $0x328] sm:$0xff]  ;;  %v16491_v61 = vcombine.low %v10689_v13, %v10693_v3  ;;  %v16523_v3 = vcombine.low %v10721_v42, %v10725_v45 }
 0x9b5   :  { %v16502_v54 = vcombine.high %v10698_v24, %v10702_v53  ;;  %v16501_v27 = vcombine.low %v10698_v24, %v10702_v53  ;;  %v10734_v13 = vld [vmem:[#allocation24 + $0x428] sm:$0xff] }
 0x9b6   :  { %13726 = vmatpush1.bf16.msra.mxu0 %v16443_v46  ;;  %v10705_v46 = vld [vmem:[#allocation24 + $0x340] sm:$0xff]  ;;  %v10738_v24 = vld [vmem:[#allocation24 + $0x448] sm:$0xff] }
 0x9b7   :  { %13890 = vmatpush1.bf16.msra.mxu1 %v16445_v22  ;;  %13727 = vmatprep.subr.bf16.mxu0 %v16452_v23  ;;  %v10709_v22 = vld [vmem:[#allocation24 + $0x360] sm:$0xff]  ;;  %v4026_v23 = vrot.slane %v18876_v4, %v18896_v35  ;;  %v10742_v53 = vld [vmem:[#allocation24 + $0x468] sm:$0xff] }
 0x9b8   :  { %13891 = vmatprep.subr.bf16.mxu1 %v16454_v47  ;;  %v10706_v47 = vld [vmem:[#allocation24 + $0x348] sm:$0xff]  ;;  %v16507_v36 = vcombine.low %v10705_v46, %v10709_v22 }
 0x9b9   :  { %v17226_v31 = vadd.f32 %v18858_v21, %v4026_v23  ;;  %v16509_v51 = vcombine.low %v10706_v47, %v10710_v12  ;;  %v10509_v21 = vrot.slane %v18881_v6, %v18896_v35  ;;  %v10746_v23 = vld [vmem:[#allocation24 + $0x488] sm:$0xff] }
 0x9ba   :  { %13728 = vmatpush1.bf16.msra.mxu0 %v16451_v30  ;;  %v16508_v30 = vcombine.high %v10705_v46, %v10709_v22  ;;  %v16542_v22 = vcombine.high %v10738_v24, %v10742_v53 }
 0x9bb   :  { %13892 = vmatpush1.bf16.msra.mxu1 %v16453_v17  ;;  %13729 = vmatprep.subr.bf16.mxu0 %v16460_v25  ;;  %v16510_v17 = vcombine.high %v10706_v47, %v10710_v12  ;;  %v10713_v25 = vld [vmem:[#allocation24 + $0x380] sm:$0xff]  ;;  %v10486_v28 = vmax.f32 %v17226_v31, 0.0  ;;  %v10750_v47 = vld [vmem:[#allocation24 + $0x4a8] sm:$0xff] }
 0x9bc   :  { %13893 = vmatprep.subr.bf16.mxu1 %v16462_v2  ;;  %v10717_v2 = vld [vmem:[#allocation24 + $0x3a0] sm:$0xff] }
 0x9be   :  { %13730 = vmatpush1.bf16.msra.mxu0 %v16459_v34  ;;  %v10483_v34 = vmax.f32 %v17223_v29, 0.0 }
 0x9bf   :  { %13894 = vmatpush1.bf16.msra.mxu1 %v16461_v43  ;;  %13731 = vmatprep.subr.bf16.mxu0 %v16468_v11  ;;  %v10497_v43 = vrot.slane %v18881_v6, %v18492_v60  ;;  %v16516_v11 = vcombine.high %v10713_v25, %v10717_v2 }
 0x9c0   :  { %13895 = vmatprep.subr.bf16.mxu1 %v16470_v37  ;;  %v16518_v37 = vcombine.high %v10714_v41, %v10718_v33  ;;  %v16549_v41 = vcombine.low %v10746_v23, %v10750_v47 }
 0x9c2   :  { %13732 = vmatpush1.bf16.msra.mxu0 %v16467_v48  ;;  %v10726_v48 = vld [vmem:[#allocation24 + $0x3e8] sm:$0xff] }
 0x9c3   :  { %13896 = vmatpush1.bf16.msra.mxu1 %v16469_v44  ;;  %13733 = vmatprep.subr.bf16.mxu0 %v16476_v49  ;;  %v10548_v44 = vrot.slane %v18885_v57, %v18492_v60  ;;  %v16515_v49 = vcombine.low %v10713_v25, %v10717_v2  ;;  %v16526_v55 = vcombine.high %v10722_v39, %v10726_v48  ;;  %v10754_v25 = vld [vmem:[#allocation24 + $0x4c8] sm:$0xff] }
 0x9c4   :  { %13897 = vmatprep.subr.bf16.mxu1 %v16478_v50  ;;  %v10534_v50 = vmul.f32 %v10497_v43, %v10483_v34  ;;  %v16525_v9 = vcombine.low %v10722_v39, %v10726_v48  ;;  %v10758_v2 = vld [vmem:[#allocation24 + $0x4e8] sm:$0xff]  ;;  %v10761_v34 = vld [vmem:[#allocation24 + $0x500] sm:$0xff] }
 0x9c5   :  { %v10765_v43 = vld [vmem:[#allocation24 + $0x520] sm:$0xff]  ;;  %v16557_v42 = vcombine.low %v10754_v25, %v10758_v2  ;;  %v10770_v48 = vld [vmem:[#allocation24 + $0x548] sm:$0xff] }
 0x9c6   :  { %13734 = vmatpush1.bf16.msra.mxu0 %v16475_v15  ;;  %v10733_v15 = vld [vmem:[#allocation24 + $0x420] sm:$0xff]  ;;  %v10585_v5 = vadd.f32 %v10548_v44, %v10534_v50  ;;  %v16564_v45 = vcombine.high %v10761_v34, %v10765_v43  ;;  %v10774_v44 = vld [vmem:[#allocation24 + $0x568] sm:$0xff] }
 0x9c7   :  { %13898 = vmatpush1.bf16.msra.mxu1 %v16477_v59  ;;  %13735 = vmatprep.subr.bf16.mxu0 %v16484_v40  ;;  %v10537_v59 = vmul.f32 %v10509_v21, %v10486_v28  ;;  %v10560_v40 = vrot.slane %v18885_v57, %v18896_v35  ;;  %v16531_v8 = vcombine.low %v10729_v26, %v10733_v15  ;;  %v10769_v21 = vld [vmem:[#allocation24 + $0x540] sm:$0xff] }
 0x9c8   :  { %13899 = vmatprep.subr.bf16.mxu1 %v16486_v0  ;;  %v10730_v0 = vld [vmem:[#allocation24 + $0x408] sm:$0xff]  ;;  %v10773_v39 = vld [vmem:[#allocation24 + $0x560] sm:$0xff] }
 0x9c9   :  { %v16533_v14 = vcombine.low %v10730_v0, %v10734_v13 }
 0x9ca   :  { %13736 = vmatpush1.bf16.msra.mxu0 %v16483_v38  ;;  %v16532_v38 = vcombine.high %v10729_v26, %v10733_v15  ;;  %v10781_v26 = vld [vmem:[#allocation24 + $0x5a0] sm:$0xff]  ;;  %v10778_v15 = vld [vmem:[#allocation24 + $0x588] sm:$0xff] }
 0x9cb   :  { %13900 = vmatpush1.bf16.msra.mxu1 %v16485_v18  ;;  %13737 = vmatprep.subr.bf16.mxu0 %v16492_v52  ;;  %v16534_v18 = vcombine.high %v10730_v0, %v10734_v13  ;;  %v10588_v52 = vadd.f32 %v10560_v40, %v10537_v59  ;;  %v10782_v59 = vld [vmem:[#allocation24 + $0x5a8] sm:$0xff]  ;;  %v16571_v40 = vcombine.low %v10769_v21, %v10773_v39 }
 0x9cc   :  { %13901 = vmatprep.subr.bf16.mxu1 %v16494_v10  ;;  %v10737_v10 = vld [vmem:[#allocation24 + $0x440] sm:$0xff]  ;;  %v16573_v0 = vcombine.low %v10770_v48, %v10774_v44 }
 0x9cd   :  { %v18914_v46 = vpack.c.bf16 %v10588_v52, %v10588_v52  ;;  %v16539_v12 = vcombine.low %v10737_v10, %v10741_v63 }
 0x9ce   :  { %13738 = vmatpush1.bf16.msra.mxu0 %v16491_v61  ;;  %v18912_v61 = vpack.c.bf16 %v10585_v5, %v10585_v5  ;;  %v10785_v5 = vld [vmem:[#allocation24 + $0x5c0] sm:$0xff] }
 0x9cf   :  { %13902 = vmatpush1.bf16.msra.mxu1 %v16493_v1  ;;  %13739 = vmatprep.subr.bf16.mxu0 %v16500_v16  ;;  %v16540_v1 = vcombine.high %v10737_v10, %v10741_v63  ;;  %v10745_v16 = vld [vmem:[#allocation24 + $0x480] sm:$0xff]  ;;  %v16581_v10 = vcombine.low %v10778_v15, %v10782_v59 }
 0x9d0   :  { %13903 = vmatprep.subr.bf16.mxu1 %v16502_v54  ;;  %v10749_v54 = vld [vmem:[#allocation24 + $0x4a0] sm:$0xff] }
 0x9d1   :  { %v16548_v29 = vcombine.high %v10745_v16, %v10749_v54  ;;  %v16547_v31 = vcombine.low %v10745_v16, %v10749_v54 }
 0x9d2   :  { %13740 = vmatpush1.bf16.msra.mxu0 %v16499_v7  ;;  %v16541_v7 = vcombine.low %v10738_v24, %v10742_v53  ;;  %v10793_v24 = vld [vmem:[#allocation24 + $0x600] sm:$0xff] }
 0x9d3   :  { %13904 = vmatpush1.bf16.msra.mxu1 %v16501_v27  ;;  %13741 = vmatprep.subr.bf16.mxu0 %v16508_v30  ;;  %v16550_v27 = vcombine.high %v10746_v23, %v10750_v47  ;;  %v10753_v30 = vld [vmem:[#allocation24 + $0x4c0] sm:$0xff] }
 0x9d4   :  { %13905 = vmatprep.subr.bf16.mxu1 %v16510_v17  ;;  %v10757_v17 = vld [vmem:[#allocation24 + $0x4e0] sm:$0xff] }
 0x9d5   :  { %v16556_v33 = vcombine.high %v10753_v30, %v10757_v17  ;;  %v10797_v53 = vld [vmem:[#allocation24 + $0x620] sm:$0xff] }
 0x9d6   :  { %13742 = vmatpush1.bf16.msra.mxu0 %v16507_v36  ;;  %v16558_v36 = vcombine.high %v10754_v25, %v10758_v2  ;;  %v10801_v47 = vld [vmem:[#allocation24 + $0x640] sm:$0xff] }
 0x9d7   :  { %13906 = vmatpush1.bf16.msra.mxu1 %v16509_v51  ;;  %13743 = vmatprep.subr.bf16.mxu0 %v16516_v11  ;;  %v10762_v51 = vld [vmem:[#allocation24 + $0x508] sm:$0xff]  ;;  %v10809_v2 = vld [vmem:[#allocation24 + $0x680] sm:$0xff] }
 0x9d8   :  { %13907 = vmatprep.subr.bf16.mxu1 %v16518_v37  ;;  %v10766_v11 = vld [vmem:[#allocation24 + $0x528] sm:$0xff]  ;;  %v16555_v37 = vcombine.low %v10753_v30, %v10757_v17 }
 0x9d9   :  { %v16566_v28 = vcombine.high %v10762_v51, %v10766_v11  ;;  %v16565_v50 = vcombine.low %v10762_v51, %v10766_v11  ;;  %v10817_v11 = vld [vmem:[#allocation24 + $0x6c0] sm:$0xff] }
 0x9da   :  { %13744 = vmatpush1.bf16.msra.mxu0 %v16515_v49  ;;  %v16563_v49 = vcombine.low %v10761_v34, %v10765_v43 }
 0x9db   :  { %13908 = vmatpush1.bf16.msra.mxu1 %v16517_v19  ;;  %13745 = vmatprep.subr.bf16.mxu0 %v16524_v32  ;;  %v16572_v19 = vcombine.high %v10769_v21, %v10773_v39  ;;  %v16574_v32 = vcombine.high %v10770_v48, %v10774_v44  ;;  %v18921_v21 = vsub.s32 2, %v18489_v58 }
 0x9dc   :  { %13909 = vmatprep.subr.bf16.mxu1 %v16526_v55  ;;  %v10777_v55 = vld [vmem:[#allocation24 + $0x580] sm:$0xff] }
 0x9dd   :  { %v16580_v13 = vcombine.high %v10777_v55, %v10781_v26  ;;  %v16579_v52 = vcombine.low %v10777_v55, %v10781_v26  ;;  %v4022_v26 = vrot.slane %v18876_v4, %v18921_v21 }
 0x9de   :  { %13746 = vmatpush1.bf16.msra.mxu0 %v16523_v3  ;;  %v16582_v3 = vcombine.high %v10778_v15, %v10782_v59 }
 0x9df   :  { %13910 = vmatpush1.bf16.msra.mxu1 %v16525_v9  ;;  %13756 = vmatprep.subr.bf16.mxu0 %v16532_v38  ;;  %v10789_v9 = vld [vmem:[#allocation24 + $0x5e0] sm:$0xff]  ;;  %v10786_v38 = vld [vmem:[#allocation24 + $0x5c8] sm:$0xff] }
 0x9e0   :  { %13920 = vmatprep.subr.bf16.mxu1 %v16534_v18  ;;  %v10790_v18 = vld [vmem:[#allocation24 + $0x5e8] sm:$0xff]  ;;  %v16588_v63 = vcombine.high %v10785_v5, %v10789_v9  ;;  %v16587_v16 = vcombine.low %v10785_v5, %v10789_v9 }
 0x9e1   :  { %13748 = vmatmul.mubr.bf16.vlgmr.msra.gmra.mrb[56].mxu0 %v18912_v61  ;;  %v16589_v54 = vcombine.low %v10786_v38, %v10790_v18  ;;  %v10838_v5 = vld [vmem:[#allocation24 + $0x768] sm:$0xff] }
 0x9e2   :  { %13912 = vmatmul.mubr.bf16.vlgmr.msra.gmra.mrb[64].mxu1 %v18912_v61  ;;  %13757 = vmatpush1.bf16.msra.mxu0 %v16531_v8  ;;  %v16590_v8 = vcombine.high %v10786_v38, %v10790_v18  ;;  %v17225_v38 = vadd.f32 %v18854_v56, %v4022_v26 }
 0x9e3   :  { %13788 = vmatprep.mubr.bf16.mxu0 %v18914_v46  ;;  %13921 = vmatpush1.bf16.msra.mxu1 %v16533_v14  ;;  %v10794_v14 = vld [vmem:[#allocation24 + $0x608] sm:$0xff] }
 0x9e4   :  { %13952 = vmatprep.mubr.bf16.mxu1 %v18914_v46  ;;  %13758 = vmatprep.subr.bf16.mxu0 %v16540_v1  ;;  %v10798_v1 = vld [vmem:[#allocation24 + $0x628] sm:$0xff] }
 0x9e5   :  { %13922 = vmatprep.subr.bf16.mxu1 %v16542_v22  ;;  %v16596_v22 = vcombine.high %v10793_v24, %v10797_v53  ;;  %v16598_v23 = vcombine.high %v10794_v14, %v10798_v1  ;;  %v16597_v30 = vcombine.low %v10794_v14, %v10798_v1  ;;  %v10485_v14 = vmax.f32 %v17225_v38, 0.0 }
 0x9e6   :  { %13759 = vmatpush1.bf16.msra.mxu0 %v16539_v12  ;;  %v10805_v12 = vld [vmem:[#allocation24 + $0x660] sm:$0xff]  ;;  %v10505_v1 = vrot.slane %v18881_v6, %v18921_v21 }
 0x9e7   :  { %13923 = vmatpush1.bf16.msra.mxu1 %v16541_v7  ;;  %13760 = vmatprep.subr.bf16.mxu0 %v16548_v29  ;;  %v10802_v7 = vld [vmem:[#allocation24 + $0x648] sm:$0xff]  ;;  %v16604_v17 = vcombine.high %v10801_v47, %v10805_v12 }
 0x9e8   :  { %13924 = vmatprep.subr.bf16.mxu1 %v16550_v27  ;;  %v10806_v29 = vld [vmem:[#allocation24 + $0x668] sm:$0xff]  ;;  %v16595_v27 = vcombine.low %v10793_v24, %v10797_v53 }
 0x9e9   :  { %v16606_v25 = vcombine.high %v10802_v7, %v10806_v29  ;;  %v16605_v34 = vcombine.low %v10802_v7, %v10806_v29  ;;  %v10846_v24 = vld [vmem:[#allocation24 + $0x7a8] sm:$0xff]  ;;  %v10556_v7 = vrot.slane %v18885_v57, %v18921_v21 }
 0x9ea   :  { %13761 = vmatpush1.bf16.msra.mxu0 %v16547_v31  ;;  %v10813_v31 = vld [vmem:[#allocation24 + $0x6a0] sm:$0xff] }
 0x9eb   :  { %13925 = vmatpush1.bf16.msra.mxu1 %v16549_v41  ;;  %13762 = vmatprep.subr.bf16.mxu0 %v16556_v33  ;;  %v10810_v41 = vld [vmem:[#allocation24 + $0x688] sm:$0xff]  ;;  %v16612_v43 = vcombine.high %v10809_v2, %v10813_v31 }
 0x9ec   :  { %13926 = vmatprep.subr.bf16.mxu1 %v16558_v36  ;;  %v10814_v33 = vld [vmem:[#allocation24 + $0x6a8] sm:$0xff]  ;;  %v16603_v36 = vcombine.low %v10801_v47, %v10805_v12 }
 0x9ed   :  { %v16614_v51 = vcombine.high %v10810_v41, %v10814_v33  ;;  %v16613_v39 = vcombine.low %v10810_v41, %v10814_v33  ;;  %v10850_v47 = vld [vmem:[#allocation24 + $0x7c8] sm:$0xff] }
 0x9ee   :  { %13763 = vmatpush1.bf16.msra.mxu0 %v16555_v37  ;;  %v10821_v37 = vld [vmem:[#allocation24 + $0x6e0] sm:$0xff]  ;;  %v10854_v12 = vld [vmem:[#allocation24 + $0x7e8] sm:$0xff] }
 0x9ef   :  { %13927 = vmatpush1.bf16.msra.mxu1 %v16557_v42  ;;  %13764 = vmatprep.subr.bf16.mxu0 %v16564_v45  ;;  %v10818_v42 = vld [vmem:[#allocation24 + $0x6c8] sm:$0xff]  ;;  %v16620_v48 = vcombine.high %v10817_v11, %v10821_v37  ;;  %v16619_v55 = vcombine.low %v10817_v11, %v10821_v37  ;;  %v10869_v11 = vld [vmem:[#allocation24 + $0x860] sm:$0xff] }
 0x9f0   :  { %13928 = vmatprep.subr.bf16.mxu1 %v16566_v28  ;;  %v10822_v45 = vld [vmem:[#allocation24 + $0x6e8] sm:$0xff]  ;;  %v16611_v28 = vcombine.low %v10809_v2, %v10813_v31  ;;  %v10861_v2 = vld [vmem:[#allocation24 + $0x820] sm:$0xff] }
 0x9f1   :  { %v16622_v44 = vcombine.high %v10818_v42, %v10822_v45  ;;  %v16621_v15 = vcombine.low %v10818_v42, %v10822_v45  ;;  %v10858_v31 = vld [vmem:[#allocation24 + $0x808] sm:$0xff] }
 0x9f2   :  { %13765 = vmatpush1.bf16.msra.mxu0 %v16563_v49  ;;  %v10825_v49 = vld [vmem:[#allocation24 + $0x700] sm:$0xff]  ;;  %v10862_v41 = vld [vmem:[#allocation24 + $0x828] sm:$0xff] }
 0x9f3   :  { %13929 = vmatpush1.bf16.msra.mxu1 %v16565_v50  ;;  %13766 = vmatprep.subr.bf16.mxu0 %v16572_v19  ;;  %v10829_v50 = vld [vmem:[#allocation24 + $0x720] sm:$0xff]  ;;  %v10826_v19 = vld [vmem:[#allocation24 + $0x708] sm:$0xff] }
 0x9f4   :  { %13930 = vmatprep.subr.bf16.mxu1 %v16574_v32  ;;  %v10830_v32 = vld [vmem:[#allocation24 + $0x728] sm:$0xff]  ;;  %v16628_v59 = vcombine.high %v10825_v49, %v10829_v50  ;;  %v16627_v9 = vcombine.low %v10825_v49, %v10829_v50  ;;  %v10873_v49 = vld [vmem:[#allocation24 + $0x880] sm:$0xff] }
 0x9f5   :  { %v16629_v18 = vcombine.low %v10826_v19, %v10830_v32  ;;  %v10866_v37 = vld [vmem:[#allocation24 + $0x848] sm:$0xff]  ;;  %v10877_v50 = vld [vmem:[#allocation24 + $0x8a0] sm:$0xff] }
 0x9f6   :  { %13767 = vmatpush1.bf16.msra.mxu0 %v16571_v40  ;;  %v16630_v40 = vcombine.high %v10826_v19, %v10830_v32  ;;  %v10870_v42 = vld [vmem:[#allocation24 + $0x868] sm:$0xff] }
 0x9f7   :  { %13931 = vmatpush1.bf16.msra.mxu1 %v16573_v0  ;;  %13768 = vmatprep.subr.bf16.mxu0 %v16580_v13  ;;  %v10833_v0 = vld [vmem:[#allocation24 + $0x740] sm:$0xff]  ;;  %v10874_v19 = vld [vmem:[#allocation24 + $0x888] sm:$0xff]  ;;  %v16669_v26 = vcombine.low %v10866_v37, %v10870_v42 }
 0x9f8   :  { %13932 = vmatprep.subr.bf16.mxu1 %v16582_v3  ;;  %v10837_v13 = vld [vmem:[#allocation24 + $0x760] sm:$0xff]  ;;  %v10834_v3 = vld [vmem:[#allocation24 + $0x748] sm:$0xff] }
 0x9f9   :  { %v16638_v4 = vcombine.high %v10834_v3, %v10838_v5  ;;  %v16635_v53 = vcombine.low %v10833_v0, %v10837_v13  ;;  %v10878_v32 = vld [vmem:[#allocation24 + $0x8a8] sm:$0xff] }
 0x9fa   :  { %13769 = vmatpush1.bf16.msra.mxu0 %v16579_v52  ;;  %v16636_v52 = vcombine.high %v10833_v0, %v10837_v13  ;;  %v10885_v0 = vld [vmem:[#allocation24 + $0x8e0] sm:$0xff]  ;;  %v10882_v13 = vld [vmem:[#allocation24 + $0x8c8] sm:$0xff] }
 0x9fb   :  { %13933 = vmatpush1.bf16.msra.mxu1 %v16581_v10  ;;  %13770 = vmatprep.subr.bf16.mxu0 %v16588_v63  ;;  %v10841_v10 = vld [vmem:[#allocation24 + $0x780] sm:$0xff] }
 0x9fc   :  { %13934 = vmatprep.subr.bf16.mxu1 %v16590_v8  ;;  %v10845_v63 = vld [vmem:[#allocation24 + $0x7a0] sm:$0xff]  ;;  %v10842_v8 = vld [vmem:[#allocation24 + $0x788] sm:$0xff] }
 0x9fd   :  { %v16644_v56 = vcombine.high %v10841_v10, %v10845_v63  ;;  %v16643_v29 = vcombine.low %v10841_v10, %v10845_v63  ;;  %v10890_v10 = vld [vmem:[#allocation24 + $0x908] sm:$0xff] }
 0x9fe   :  { %13771 = vmatpush1.bf16.msra.mxu0 %v16587_v16  ;;  %v16637_v16 = vcombine.low %v10834_v3, %v10838_v5  ;;  %v10886_v3 = vld [vmem:[#allocation24 + $0x8e8] sm:$0xff]  ;;  %v16675_v5 = vcombine.low %v10873_v49, %v10877_v50 }
 0x9ff   :  { %13935 = vmatpush1.bf16.msra.mxu1 %v16589_v54  ;;  %13772 = vmatprep.subr.bf16.mxu0 %v16596_v22  ;;  %v16646_v54 = vcombine.high %v10842_v8, %v10846_v24  ;;  %v10849_v22 = vld [vmem:[#allocation24 + $0x7c0] sm:$0xff]  ;;  %v10894_v63 = vld [vmem:[#allocation24 + $0x928] sm:$0xff] }
 0xa00   :  { %13936 = vmatprep.subr.bf16.mxu1 %v16598_v23  ;;  %v10853_v23 = vld [vmem:[#allocation24 + $0x7e0] sm:$0xff] }
 0xa01   :  { %v16652_v6 = vcombine.high %v10849_v22, %v10853_v23  ;;  %v16651_v33 = vcombine.low %v10849_v22, %v10853_v23  ;;  %v16693_v23 = vcombine.low %v10890_v10, %v10894_v63 }
 0xa02   :  { %13773 = vmatpush1.bf16.msra.mxu0 %v16595_v27  ;;  %v10536_v27 = vmul.f32 %v10505_v1, %v10485_v14  ;;  %v16694_v14 = vcombine.high %v10890_v10, %v10894_v63  ;;  %v10897_v1 = vld [vmem:[#allocation24 + $0x940] sm:$0xff]  ;;  %v10946_v63 = vld [vmem:[#allocation24 + $0xac8] sm:$0xff] }
 0xa03   :  { %13937 = vmatpush1.bf16.msra.mxu1 %v16597_v30  ;;  %13774 = vmatprep.subr.bf16.mxu0 %v16604_v17  ;;  %v16645_v30 = vcombine.low %v10842_v8, %v10846_v24  ;;  %v16654_v17 = vcombine.high %v10850_v47, %v10854_v12  ;;  %v16685_v24 = vcombine.low %v10882_v13, %v10886_v3  ;;  %v10949_v10 = vld [vmem:[#allocation24 + $0xae0] sm:$0xff] }
 0xa04   :  { %13938 = vmatprep.subr.bf16.mxu1 %v16606_v25  ;;  %v10857_v25 = vld [vmem:[#allocation24 + $0x800] sm:$0xff] }
 0xa05   :  { %v16660_v57 = vcombine.high %v10857_v25, %v10861_v2  ;;  %v16659_v45 = vcombine.low %v10857_v25, %v10861_v2 }
 0xa06   :  { %13775 = vmatpush1.bf16.msra.mxu0 %v16603_v36  ;;  %v10587_v36 = vadd.f32 %v10556_v7, %v10536_v27  ;;  %v10905_v7 = vld [vmem:[#allocation24 + $0x980] sm:$0xff]  ;;  %v10906_v27 = vld [vmem:[#allocation24 + $0x988] sm:$0xff] }
 0xa07   :  { %13939 = vmatpush1.bf16.msra.mxu1 %v16605_v34  ;;  %13776 = vmatprep.subr.bf16.mxu0 %v16612_v43  ;;  %v16653_v34 = vcombine.low %v10850_v47, %v10854_v12  ;;  %v16662_v43 = vcombine.high %v10858_v31, %v10862_v41 }
 0xa08   :  { %13940 = vmatprep.subr.bf16.mxu1 %v16614_v51  ;;  %v10865_v51 = vld [vmem:[#allocation24 + $0x840] sm:$0xff] }
 0xa0a   :  { %13777 = vmatpush1.bf16.msra.mxu0 %v16611_v28  ;;  %v18930_v28 = vpack.c.bf16 %v10587_v36, %v10587_v36  ;;  %v10918_v36 = vld [vmem:[#allocation24 + $0x9e8] sm:$0xff] }
 0xa0b   :  { %13941 = vmatpush1.bf16.msra.mxu1 %v16613_v39  ;;  %13778 = vmatprep.subr.bf16.mxu0 %v16620_v48  ;;  %v16661_v39 = vcombine.low %v10858_v31, %v10862_v41  ;;  %v16668_v48 = vcombine.high %v10865_v51, %v10869_v11  ;;  %v10913_v31 = vld [vmem:[#allocation24 + $0x9c0] sm:$0xff] }
 0xa0c   :  { %13942 = vmatprep.subr.bf16.mxu1 %v16622_v44  ;;  %v16670_v44 = vcombine.high %v10866_v37, %v10870_v42  ;;  %v10917_v41 = vld [vmem:[#allocation24 + $0x9e0] sm:$0xff]  ;;  %v10922_v42 = vld [vmem:[#allocation24 + $0xa08] sm:$0xff] }
 0xa0d   :  { %v10925_v37 = vld [vmem:[#allocation24 + $0xa20] sm:$0xff] }
 0xa0e   :  { %13779 = vmatpush1.bf16.msra.mxu0 %v16619_v55  ;;  %v16667_v55 = vcombine.low %v10865_v51, %v10869_v11  ;;  %v10921_v11 = vld [vmem:[#allocation24 + $0xa00] sm:$0xff] }
 0xa0f   :  { %13943 = vmatpush1.bf16.msra.mxu1 %v16621_v15  ;;  %13780 = vmatprep.subr.bf16.mxu0 %v16628_v59  ;;  %v16676_v15 = vcombine.high %v10873_v49, %v10877_v50  ;;  %v16678_v59 = vcombine.high %v10874_v19, %v10878_v32  ;;  %v10929_v50 = vld [vmem:[#allocation24 + $0xa40] sm:$0xff] }
 0xa10   :  { %13944 = vmatprep.subr.bf16.mxu1 %v16630_v40  ;;  %v10881_v40 = vld [vmem:[#allocation24 + $0x8c0] sm:$0xff] }
 0xa11   :  { %v16684_v38 = vcombine.high %v10881_v40, %v10885_v0  ;;  %v16683_v8 = vcombine.low %v10881_v40, %v10885_v0  ;;  %v10937_v0 = vld [vmem:[#allocation24 + $0xa80] sm:$0xff] }
 0xa12   :  { %13781 = vmatpush1.bf16.msra.mxu0 %v16627_v9  ;;  %v16677_v9 = vcombine.low %v10874_v19, %v10878_v32  ;;  %v10933_v19 = vld [vmem:[#allocation24 + $0xa60] sm:$0xff]  ;;  %v10930_v32 = vld [vmem:[#allocation24 + $0xa48] sm:$0xff] }
 0xa13   :  { %13945 = vmatpush1.bf16.msra.mxu1 %v16629_v18  ;;  %13782 = vmatprep.subr.bf16.mxu0 %v16636_v52  ;;  %v16686_v18 = vcombine.high %v10882_v13, %v10886_v3  ;;  %v10889_v52 = vld [vmem:[#allocation24 + $0x900] sm:$0xff]  ;;  %v10938_v3 = vld [vmem:[#allocation24 + $0xa88] sm:$0xff] }
 0xa14   :  { %13946 = vmatprep.subr.bf16.mxu1 %v16638_v4  ;;  %v10893_v4 = vld [vmem:[#allocation24 + $0x920] sm:$0xff] }
 0xa15   :  { %v16691_v22 = vcombine.low %v10889_v52, %v10893_v4  ;;  %v10941_v13 = vld [vmem:[#allocation24 + $0xaa0] sm:$0xff] }
 0xa16   :  { %13783 = vmatpush1.bf16.msra.mxu0 %v16635_v53  ;;  %v16692_v53 = vcombine.high %v10889_v52, %v10893_v4  ;;  %v10945_v4 = vld [vmem:[#allocation24 + $0xac0] sm:$0xff] }
 0xa17   :  { %13947 = vmatpush1.bf16.msra.mxu1 %v16637_v16  ;;  %13784 = vmatprep.subr.bf16.mxu0 %v16644_v56  ;;  %v10901_v16 = vld [vmem:[#allocation24 + $0x960] sm:$0xff]  ;;  %v10898_v56 = vld [vmem:[#allocation24 + $0x948] sm:$0xff] }
 0xa18   :  { %13948 = vmatprep.subr.bf16.mxu1 %v16646_v54  ;;  %v10902_v54 = vld [vmem:[#allocation24 + $0x968] sm:$0xff]  ;;  %v16700_v47 = vcombine.high %v10897_v1, %v10901_v16 }
 0xa19   :  { %v16702_v12 = vcombine.high %v10898_v56, %v10902_v54 }
 0xa1a   :  { %13785 = vmatpush1.bf16.msra.mxu0 %v16643_v29  ;;  %v10909_v29 = vld [vmem:[#allocation24 + $0x9a0] sm:$0xff] }
 0xa1b   :  { %13949 = vmatpush1.bf16.msra.mxu1 %v16645_v30  ;;  %13786 = vmatprep.subr.bf16.mxu0 %v16652_v6  ;;  %v10910_v30 = vld [vmem:[#allocation24 + $0x9a8] sm:$0xff]  ;;  %v16699_v6 = vcombine.low %v10897_v1, %v10901_v16  ;;  %v16708_v25 = vcombine.high %v10905_v7, %v10909_v29  ;;  %v10953_v16 = vld [vmem:[#allocation24 + $0xb00] sm:$0xff] }
 0xa1c   :  { %13950 = vmatprep.subr.bf16.mxu1 %v16654_v17  ;;  %v16701_v17 = vcombine.low %v10898_v56, %v10902_v54  ;;  %v16710_v2 = vcombine.high %v10906_v27, %v10910_v30  ;;  %v10957_v56 = vld [vmem:[#allocation24 + $0xb20] sm:$0xff]  ;;  %v10954_v54 = vld [vmem:[#allocation24 + $0xb08] sm:$0xff] }
 0xa1e   :  { %13787 = vmatpush1.bf16.msra.mxu0 %v16651_v33  ;;  %v10914_v33 = vld [vmem:[#allocation24 + $0x9c8] sm:$0xff] }
 0xa1f   :  { %13951 = vmatpush1.bf16.msra.mxu1 %v16653_v34  ;;  %13797 = vmatprep.subr.bf16.mxu0 %v16660_v57  ;;  %v16707_v34 = vcombine.low %v10905_v7, %v10909_v29  ;;  %v16709_v57 = vcombine.low %v10906_v27, %v10910_v30  ;;  %v16718_v51 = vcombine.high %v10914_v33, %v10918_v36  ;;  %v10961_v29 = vld [vmem:[#allocation24 + $0xb40] sm:$0xff]  ;;  %v10962_v30 = vld [vmem:[#allocation24 + $0xb48] sm:$0xff] }
 0xa20   :  { %13961 = vmatprep.subr.bf16.mxu1 %v16662_v43  ;;  %v16716_v43 = vcombine.high %v10913_v31, %v10917_v41  ;;  %v10965_v27 = vld [vmem:[#allocation24 + $0xb60] sm:$0xff] }
 0xa21   :  { %13789 = vmatmul.mubr.bf16.vlgmr.msra.gmra.mrb[56].mxu0 %v18930_v28 }
 0xa22   :  { %13953 = vmatmul.mubr.bf16.vlgmr.msra.gmra.mrb[64].mxu1 %v18930_v28  ;;  %13798 = vmatpush1.bf16.msra.mxu0 %v16659_v45  ;;  %v10926_v45 = vld [vmem:[#allocation24 + $0xa28] sm:$0xff] }
 0xa23   :  { %13962 = vmatpush1.bf16.msra.mxu1 %v16661_v39  ;;  %13799 = vmatprep.subr.bf16.mxu0 %v16668_v48  ;;  %v16715_v39 = vcombine.low %v10913_v31, %v10917_v41  ;;  %v16717_v48 = vcombine.low %v10914_v33, %v10918_v36  ;;  %v16726_v49 = vcombine.high %v10922_v42, %v10926_v45  ;;  %v10969_v41 = vld [vmem:[#allocation24 + $0xb80] sm:$0xff]  ;;  %v10970_v36 = vld [vmem:[#allocation24 + $0xb88] sm:$0xff] }
 0xa24   :  { %13963 = vmatprep.subr.bf16.mxu1 %v16670_v44  ;;  %v16724_v44 = vcombine.high %v10921_v11, %v10925_v37  ;;  %v10973_v33 = vld [vmem:[#allocation24 + $0xba0] sm:$0xff] }
 0xa26   :  { %13800 = vmatpush1.bf16.msra.mxu0 %v16667_v55  ;;  %v10934_v55 = vld [vmem:[#allocation24 + $0xa68] sm:$0xff] }
 0xa27   :  { %13964 = vmatpush1.bf16.msra.mxu1 %v16669_v26  ;;  %13801 = vmatprep.subr.bf16.mxu0 %v16676_v15  ;;  %v16723_v26 = vcombine.low %v10921_v11, %v10925_v37  ;;  %v16725_v15 = vcombine.low %v10922_v42, %v10926_v45  ;;  %v16734_v40 = vcombine.high %v10930_v32, %v10934_v55  ;;  %v10977_v37 = vld [vmem:[#allocation24 + $0xbc0] sm:$0xff]  ;;  %v10978_v45 = vld [vmem:[#allocation24 + $0xbc8] sm:$0xff] }
 0xa28   :  { %13965 = vmatprep.subr.bf16.mxu1 %v16678_v59  ;;  %v16732_v59 = vcombine.high %v10929_v50, %v10933_v19  ;;  %v10981_v42 = vld [vmem:[#allocation24 + $0xbe0] sm:$0xff] }
 0xa2a   :  { %13802 = vmatpush1.bf16.msra.mxu0 %v16675_v5  ;;  %v10942_v5 = vld [vmem:[#allocation24 + $0xaa8] sm:$0xff] }
 0xa2b   :  { %13966 = vmatpush1.bf16.msra.mxu1 %v16677_v9  ;;  %13803 = vmatprep.subr.bf16.mxu0 %v16684_v38  ;;  %v16731_v9 = vcombine.low %v10929_v50, %v10933_v19  ;;  %v16733_v38 = vcombine.low %v10930_v32, %v10934_v55  ;;  %v16742_v52 = vcombine.high %v10938_v3, %v10942_v5  ;;  %v18934_v19 = vld [vmem:[#allocation24 + $0xc00] sm:$0xff]  ;;  %v18938_v55 = vld [vmem:[#allocation24 + $0xc08] sm:$0xff] }
 0xa2c   :  { %13967 = vmatprep.subr.bf16.mxu1 %v16686_v18  ;;  %v16740_v18 = vcombine.high %v10937_v0, %v10941_v13  ;;  %v18936_v32 = vld [vmem:[#allocation24 + $0xc20] sm:$0xff] }
 0xa2e   :  { %13804 = vmatpush1.bf16.msra.mxu0 %v16683_v8  ;;  %v10950_v8 = vld [vmem:[#allocation24 + $0xae8] sm:$0xff] }
 0xa2f   :  { %13968 = vmatpush1.bf16.msra.mxu1 %v16685_v24  ;;  %13805 = vmatprep.subr.bf16.mxu0 %v16692_v53  ;;  %v16739_v24 = vcombine.low %v10937_v0, %v10941_v13  ;;  %v16741_v53 = vcombine.low %v10938_v3, %v10942_v5  ;;  %v16750_v1 = vcombine.high %v10946_v63, %v10950_v8  ;;  %v18947_v13 = vsub.s32 4, %v18489_v58 }
 0xa30   :  { %13969 = vmatprep.subr.bf16.mxu1 %v16694_v14  ;;  %v16748_v14 = vcombine.high %v10945_v4, %v10949_v10  ;;  %v18950_v3 = vsub.s32 5, %v18489_v58  ;;  %v18953_v5 = vsub.s32 7, %v18489_v58 }
 0xa32   :  { %13806 = vmatpush1.bf16.msra.mxu0 %v16691_v22  ;;  %v10958_v22 = vld [vmem:[#allocation24 + $0xb28] sm:$0xff] }
 0xa33   :  { %13970 = vmatpush1.bf16.msra.mxu1 %v16693_v23  ;;  %13807 = vmatprep.subr.bf16.mxu0 %v16700_v47  ;;  %v16747_v23 = vcombine.low %v10945_v4, %v10949_v10  ;;  %v16749_v47 = vcombine.low %v10946_v63, %v10950_v8  ;;  %v16758_v7 = vcombine.high %v10954_v54, %v10958_v22  ;;  %v18963_v63 = vld [vmem:[#allocation22 + $0x1] ss:$4 sm:$0xff] }
 0xa34   :  { %13971 = vmatprep.subr.bf16.mxu1 %v16702_v12  ;;  %v16756_v12 = vcombine.high %v10953_v16, %v10957_v56  ;;  %v10513_v8 = vrot.slane %v18963_v63, %v18947_v13 }
 0xa36   :  { %13808 = vmatpush1.bf16.msra.mxu0 %v16699_v6  ;;  %v10966_v6 = vld [vmem:[#allocation24 + $0xb68] sm:$0xff] }
 0xa37   :  { %13972 = vmatpush1.bf16.msra.mxu1 %v16701_v17  ;;  %13809 = vmatprep.subr.bf16.mxu0 %v16708_v25  ;;  %v16755_v17 = vcombine.low %v10953_v16, %v10957_v56  ;;  %v16757_v25 = vcombine.low %v10954_v54, %v10958_v22  ;;  %v16766_v31 = vcombine.high %v10962_v30, %v10966_v6  ;;  %v18971_v22 = vld [vmem:[#allocation22 + $0x2] ss:$4 sm:$0xff] }
 0xa38   :  { %13973 = vmatprep.subr.bf16.mxu1 %v16710_v2  ;;  %v16764_v2 = vcombine.high %v10961_v29, %v10965_v27 }
 0xa3a   :  { %13810 = vmatpush1.bf16.msra.mxu0 %v16707_v34  ;;  %v10974_v34 = vld [vmem:[#allocation24 + $0xba8] sm:$0xff] }
 0xa3b   :  { %13974 = vmatpush1.bf16.msra.mxu1 %v16709_v57  ;;  %13811 = vmatprep.subr.bf16.mxu0 %v16716_v43  ;;  %v16763_v57 = vcombine.low %v10961_v29, %v10965_v27  ;;  %v16765_v43 = vcombine.low %v10962_v30, %v10966_v6  ;;  %v16774_v11 = vcombine.high %v10970_v36, %v10974_v34 }
 0xa3c   :  { %13975 = vmatprep.subr.bf16.mxu1 %v16718_v51  ;;  %v16772_v51 = vcombine.high %v10969_v41, %v10973_v33  ;;  %v10568_v30 = vrot.slane %v18971_v22, %v18950_v3 }
 0xa3e   :  { %13812 = vmatpush1.bf16.msra.mxu0 %v16715_v39  ;;  %v10982_v39 = vld [vmem:[#allocation24 + $0xbe8] sm:$0xff] }
 0xa3f   :  { %13976 = vmatpush1.bf16.msra.mxu1 %v16717_v48  ;;  %13813 = vmatprep.subr.bf16.mxu0 %v16724_v44  ;;  %v16771_v48 = vcombine.low %v10969_v41, %v10973_v33  ;;  %v16773_v44 = vcombine.low %v10970_v36, %v10974_v34  ;;  %v16782_v50 = vcombine.high %v10978_v45, %v10982_v39  ;;  %v10993_v34 = vld [vmem:[#allocation24 + $0xc40] sm:$0xff] }
 0xa40   :  { %13977 = vmatprep.subr.bf16.mxu1 %v16726_v49  ;;  %v16780_v49 = vcombine.high %v10977_v37, %v10981_v42 }
 0xa42   :  { %13814 = vmatpush1.bf16.msra.mxu0 %v16723_v26  ;;  %v18940_v26 = vld [vmem:[#allocation24 + $0xc28] sm:$0xff] }
 0xa43   :  { %13978 = vmatpush1.bf16.msra.mxu1 %v16725_v15  ;;  %13815 = vmatprep.subr.bf16.mxu0 %v16732_v59  ;;  %v16779_v15 = vcombine.low %v10977_v37, %v10981_v42  ;;  %v16781_v59 = vcombine.low %v10978_v45, %v10982_v39  ;;  %v16790_v0 = vcombine.high %v18938_v55, %v18940_v26 }
 0xa44   :  { %13979 = vmatprep.subr.bf16.mxu1 %v16734_v40  ;;  %v16788_v40 = vcombine.high %v18934_v19, %v18936_v32  ;;  %v16787_v42 = vcombine.low %v18934_v19, %v18936_v32  ;;  %v16789_v45 = vcombine.low %v18938_v55, %v18940_v26 }
 0xa46   :  { %13816 = vmatpush1.bf16.msra.mxu0 %v16731_v9  ;;  %v18955_v9 = vld [vmem:[#allocation22] ss:$4 sm:$0xff] }
 0xa47   :  { %13980 = vmatpush1.bf16.msra.mxu1 %v16733_v38  ;;  %13817 = vmatprep.subr.bf16.mxu0 %v16740_v18  ;;  %v4030_v38 = vrot.slane %v18955_v9, %v18947_v13  ;;  %v4034_v18 = vrot.slane %v18955_v9, %v18950_v3 }
 0xa48   :  { %13981 = vmatprep.subr.bf16.mxu1 %v16742_v52  ;;  %v4042_v52 = vrot.slane %v18955_v9, %v18953_v5 }
 0xa4a   :  { %13818 = vmatpush1.bf16.msra.mxu0 %v16739_v24 }
 0xa4b   :  { %13982 = vmatpush1.bf16.msra.mxu1 %v16741_v53  ;;  %13819 = vmatprep.subr.bf16.mxu0 %v16748_v14 }
 0xa4c   :  { %13983 = vmatprep.subr.bf16.mxu1 %v16750_v1  ;;  %v10517_v1 = vrot.slane %v18963_v63, %v18950_v3 }
 0xa4e   :  { %13820 = vmatpush1.bf16.msra.mxu0 %v16747_v23  ;;  %v10564_v23 = vrot.slane %v18971_v22, %v18947_v13 }
 0xa4f   :  { %13984 = vmatpush1.bf16.msra.mxu1 %v16749_v47  ;;  %13821 = vmatprep.subr.bf16.mxu0 %v16756_v12  ;;  %v10525_v12 = vrot.slane %v18963_v63, %v18953_v5 }
 0xa50   :  { %13985 = vmatprep.subr.bf16.mxu1 %v16758_v7 }
 0xa52   :  { %13822 = vmatpush1.bf16.msra.mxu0 %v16755_v17 }
 0xa53   :  { %13986 = vmatpush1.bf16.msra.mxu1 %v16757_v25  ;;  %13823 = vmatprep.subr.bf16.mxu0 %v16764_v2  ;;  %v10576_v2 = vrot.slane %v18971_v22, %v18953_v5 }
 0xa54   :  { %13987 = vmatprep.subr.bf16.mxu1 %v16766_v31 }
 0xa56   :  { %13824 = vmatpush1.bf16.msra.mxu0 %v16763_v57 }
 0xa57   :  { %13988 = vmatpush1.bf16.msra.mxu1 %v16765_v43  ;;  %13825 = vmatprep.subr.bf16.mxu0 %v16772_v51  ;;  %v10997_v43 = vld [vmem:[#allocation24 + $0xc60] sm:$0xff]  ;;  %v10994_v51 = vld [vmem:[#allocation24 + $0xc48] sm:$0xff] }
 0xa58   :  { %13989 = vmatprep.subr.bf16.mxu1 %v16774_v11  ;;  %v10998_v11 = vld [vmem:[#allocation24 + $0xc68] sm:$0xff]  ;;  %v16795_v19 = vcombine.low %v10993_v34, %v10997_v43 }
 0xa59   :  { %v16797_v32 = vcombine.low %v10994_v51, %v10998_v11 }
 0xa5a   :  { %13826 = vmatpush1.bf16.msra.mxu0 %v16771_v48  ;;  %v11001_v48 = vld [vmem:[#allocation24 + $0xc80] sm:$0xff] }
 0xa5b   :  { %13990 = vmatpush1.bf16.msra.mxu1 %v16773_v44  ;;  %13827 = vmatprep.subr.bf16.mxu0 %v16780_v49  ;;  %v16796_v44 = vcombine.high %v10993_v34, %v10997_v43  ;;  %v16798_v49 = vcombine.high %v10994_v51, %v10998_v11  ;;  %v11041_v11 = vld [vmem:[#allocation24 + $0xdc0] sm:$0xff] }
 0xa5c   :  { %13991 = vmatprep.subr.bf16.mxu1 %v16782_v50  ;;  %v11005_v50 = vld [vmem:[#allocation24 + $0xca0] sm:$0xff] }
 0xa5d   :  { %v16804_v55 = vcombine.high %v11001_v48, %v11005_v50 }
 0xa5e   :  { %13828 = vmatpush1.bf16.msra.mxu0 %v16779_v15  ;;  %v11002_v15 = vld [vmem:[#allocation24 + $0xc88] sm:$0xff] }
 0xa5f   :  { %13992 = vmatpush1.bf16.msra.mxu1 %v16781_v59  ;;  %13838 = vmatprep.subr.bf16.mxu0 %v16788_v40  ;;  %v11006_v59 = vld [vmem:[#allocation24 + $0xca8] sm:$0xff] }
 0xa60   :  { %14002 = vmatprep.subr.bf16.mxu1 %v16790_v0  ;;  %v16806_v26 = vcombine.high %v11002_v15, %v11006_v59  ;;  %v11009_v0 = vld [vmem:[#allocation24 + $0xcc0] sm:$0xff] }
 0xa74   :  { %v10148_v4 = vpop.f32.mrb[52].mxu0 }
 0xa75   :  { %v17227_v10 = vadd.f32 %v10148_v4, %v4030_v38  ;;  %v18967_v24 = vpop.f32.mrb[60].mxu1  ;;  %v10150_v53 = vpop.f32.mrb[53].mxu0  ;;  %v11013_v38 = vld [vmem:[#allocation24 + $0xce0] sm:$0xff]  ;;  %v16803_v4 = vcombine.low %v11001_v48, %v11005_v50  ;;  %v11046_v48 = vld [vmem:[#allocation24 + $0xde8] sm:$0xff] }
 0xa76   :  { %v17228_v14 = vadd.f32 %v10150_v53, %v4034_v18  ;;  %v10478_v16 = vpop.f32.mrb[61].mxu1  ;;  %v10152_v56 = vpop.f32.mrb[54].mxu0  ;;  %v11010_v18 = vld [vmem:[#allocation24 + $0xcc8] sm:$0xff] }
 0xa77   :  { %v10487_v54 = vmax.f32 %v17227_v10, 0.0  ;;  %v17230_v47 = vadd.f32 %v10478_v16, %v4042_v52  ;;  %v10480_v7 = vpop.f32.mrb[62].mxu1  ;;  %v10153_v29 = vpop.f32.mrb[55].mxu0  ;;  %v11014_v52 = vld [vmem:[#allocation24 + $0xce8] sm:$0xff]  ;;  %v16805_v10 = vcombine.low %v11002_v15, %v11006_v59  ;;  %v11049_v59 = vld [vmem:[#allocation24 + $0xe00] sm:$0xff] }
 0xa78   :  { %v10488_v27 = vmax.f32 %v17228_v14, 0.0  ;;  %v10481_v6 = vpop.f32.mrb[63].mxu1  ;;  %v16814_v53 = vcombine.high %v11010_v18, %v11014_v52  ;;  %v11017_v14 = vld [vmem:[#allocation24 + $0xd00] sm:$0xff]  ;;  %v11018_v16 = vld [vmem:[#allocation24 + $0xd08] sm:$0xff] }
 0xa79   :  { %v10538_v17 = vmul.f32 %v10513_v8, %v10487_v54  ;;  %v10490_v25 = vmax.f32 %v17230_v47, 0.0  ;;  %v16812_v8 = vcombine.high %v11009_v0, %v11013_v38  ;;  %v11022_v56 = vld [vmem:[#allocation24 + $0xd28] sm:$0xff]  ;;  %v16811_v54 = vcombine.low %v11009_v0, %v11013_v38  ;;  %v11025_v7 = vld [vmem:[#allocation24 + $0xd40] sm:$0xff] }
 0xa7a   :  { %v10539_v31 = vmul.f32 %v10517_v1, %v10488_v27  ;;  %v11021_v1 = vld [vmem:[#allocation24 + $0xd20] sm:$0xff]  ;;  %v11026_v27 = vld [vmem:[#allocation24 + $0xd48] sm:$0xff] }
 0xa7b   :  { %v10589_v41 = vadd.f32 %v10564_v23, %v10538_v17  ;;  %v10541_v33 = vmul.f32 %v10525_v12, %v10490_v25  ;;  %v16813_v23 = vcombine.low %v11010_v18, %v11014_v52  ;;  %v16820_v47 = vcombine.high %v11017_v14, %v11021_v1  ;;  %v11029_v29 = vld [vmem:[#allocation24 + $0xd60] sm:$0xff] }
 0xa7c   :  { %v10590_v36 = vadd.f32 %v10568_v30, %v10539_v31  ;;  %v16822_v12 = vcombine.high %v11018_v16, %v11022_v56  ;;  %v11030_v30 = vld [vmem:[#allocation24 + $0xd68] sm:$0xff]  ;;  %v16819_v6 = vcombine.low %v11017_v14, %v11021_v1  ;;  %v16821_v17 = vcombine.low %v11018_v16, %v11022_v56  ;;  %v11033_v31 = vld [vmem:[#allocation24 + $0xd80] sm:$0xff] }
 0xa7d   :  { %v10592_v57 = vadd.f32 %v10576_v2, %v10541_v33  ;;  %v18987_v39 = vpack.c.bf16 %v10589_v41, %v10589_v41  ;;  %v16828_v25 = vcombine.high %v11025_v7, %v11029_v29  ;;  %v16830_v2 = vcombine.high %v11026_v27, %v11030_v30  ;;  %v11037_v41 = vld [vmem:[#allocation24 + $0xda0] sm:$0xff]  ;;  %v11034_v33 = vld [vmem:[#allocation24 + $0xd88] sm:$0xff] }
 0xa7e   :  { %v18981_v37 = vpack.c.bf16 %v10590_v36, %v10590_v36  ;;  %v11038_v36 = vld [vmem:[#allocation24 + $0xda8] sm:$0xff]  ;;  %v16827_v34 = vcombine.low %v11025_v7, %v11029_v29  ;;  %v16836_v43 = vcombine.high %v11033_v31, %v11037_v41  ;;  %v11057_v52 = vld [vmem:[#allocation24 + $0xe40] sm:$0xff] }
 0xa7f   :  { %v18991_v40 = vpack.c.bf16 %v10592_v57, %v10592_v57  ;;  %v16829_v57 = vcombine.low %v11026_v27, %v11030_v30  ;;  %v16838_v51 = vcombine.high %v11034_v33, %v11038_v36  ;;  %v11065_v56 = vld [vmem:[#allocation24 + $0xe80] sm:$0xff] }
 0xa80   :  { %13829 = vmatprep.mubr.bf16.mxu0 %v18981_v37  ;;  %13993 = vmatprep.mubr.bf16.mxu1 %v18981_v37  ;;  %v11073_v30 = vld [vmem:[#allocation24 + $0xec0] sm:$0xff] }
 0xa81   :  { %13830 = vmatmul.mubr.bf16.vlgmr.msra.gmra.mrb[56].mxu0 %v18987_v39  ;;  %13994 = vmatmul.mubr.bf16.vlgmr.msra.gmra.mrb[64].mxu1 %v18987_v39 }
 0xa82   :  { %13839 = vmatpush1.bf16.msra.mxu0 %v16787_v42  ;;  %14003 = vmatpush1.bf16.msra.mxu1 %v16789_v45  ;;  %v11045_v42 = vld [vmem:[#allocation24 + $0xde0] sm:$0xff]  ;;  %v11042_v45 = vld [vmem:[#allocation24 + $0xdc8] sm:$0xff] }
 0xa83   :  { %13870 = vmatprep.mubr.bf16.mxu0 %v18991_v40  ;;  %14034 = vmatprep.mubr.bf16.mxu1 %v18991_v40  ;;  %v16844_v50 = vcombine.high %v11041_v11, %v11045_v42  ;;  %v16846_v15 = vcombine.high %v11042_v45, %v11046_v48  ;;  %v16845_v0 = vcombine.low %v11042_v45, %v11046_v48 }
 0xa84   :  { %13840 = vmatprep.subr.bf16.mxu0 %v16796_v44  ;;  %14004 = vmatprep.subr.bf16.mxu1 %v16798_v49  ;;  %v16835_v44 = vcombine.low %v11033_v31, %v11037_v41  ;;  %v16837_v49 = vcombine.low %v11034_v33, %v11038_v36  ;;  %v18998_v41 = vsub.s32 6, %v18489_v58 }
 0xa86   :  { %13841 = vmatpush1.bf16.msra.mxu0 %v16795_v19  ;;  %14005 = vmatpush1.bf16.msra.mxu1 %v16797_v32  ;;  %v11053_v19 = vld [vmem:[#allocation24 + $0xe20] sm:$0xff]  ;;  %v11050_v32 = vld [vmem:[#allocation24 + $0xe08] sm:$0xff]  ;;  %v4038_v45 = vrot.slane %v18955_v9, %v18998_v41 }
 0xa87   :  { %13842 = vmatprep.subr.bf16.mxu0 %v16804_v55  ;;  %14006 = vmatprep.subr.bf16.mxu1 %v16806_v26  ;;  %v11054_v55 = vld [vmem:[#allocation24 + $0xe28] sm:$0xff]  ;;  %v16843_v26 = vcombine.low %v11041_v11, %v11045_v42  ;;  %v16852_v38 = vcombine.high %v11049_v59, %v11053_v19  ;;  %v11101_v9 = vld [vmem:[#allocation24 + $0xfa0] sm:$0xff] }
 0xa88   :  { %v16854_v18 = vcombine.high %v11050_v32, %v11054_v55  ;;  %v16853_v14 = vcombine.low %v11050_v32, %v11054_v55  ;;  %v17229_v32 = vadd.f32 %v18967_v24, %v4038_v45 }
 0xa8a   :  { %13843 = vmatpush1.bf16.msra.mxu0 %v16803_v4  ;;  %14007 = vmatpush1.bf16.msra.mxu1 %v16805_v10  ;;  %v11061_v4 = vld [vmem:[#allocation24 + $0xe60] sm:$0xff]  ;;  %v11058_v10 = vld [vmem:[#allocation24 + $0xe48] sm:$0xff] }
 0xa8b   :  { %13844 = vmatprep.subr.bf16.mxu0 %v16812_v8  ;;  %14008 = vmatprep.subr.bf16.mxu1 %v16814_v53  ;;  %v11062_v8 = vld [vmem:[#allocation24 + $0xe68] sm:$0xff]  ;;  %v16851_v53 = vcombine.low %v11049_v59, %v11053_v19  ;;  %v16860_v1 = vcombine.high %v11057_v52, %v11061_v4 }
 0xa8c   :  { %v16862_v16 = vcombine.high %v11058_v10, %v11062_v8  ;;  %v16861_v7 = vcombine.low %v11058_v10, %v11062_v8  ;;  %v10489_v10 = vmax.f32 %v17229_v32, 0.0  ;;  %v10521_v8 = vrot.slane %v18963_v63, %v18998_v41  ;;  %v10627_v32 = vld [vmem:[#allocation24 + $0xd0] sm:$0xff] }
 0xa8e   :  { %13845 = vmatpush1.bf16.msra.mxu0 %v16811_v54  ;;  %14009 = vmatpush1.bf16.msra.mxu1 %v16813_v23  ;;  %v11069_v54 = vld [vmem:[#allocation24 + $0xea0] sm:$0xff]  ;;  %v11066_v23 = vld [vmem:[#allocation24 + $0xe88] sm:$0xff] }
 0xa8f   :  { %13846 = vmatprep.subr.bf16.mxu0 %v16820_v47  ;;  %14010 = vmatprep.subr.bf16.mxu1 %v16822_v12  ;;  %v11070_v47 = vld [vmem:[#allocation24 + $0xea8] sm:$0xff]  ;;  %v16859_v12 = vcombine.low %v11057_v52, %v11061_v4  ;;  %v16868_v29 = vcombine.high %v11065_v56, %v11069_v54 }
 0xa90   :  { %v16870_v27 = vcombine.high %v11066_v23, %v11070_v47  ;;  %v16869_v31 = vcombine.low %v11066_v23, %v11070_v47 }
 0xa92   :  { %13847 = vmatpush1.bf16.msra.mxu0 %v16819_v6  ;;  %14011 = vmatpush1.bf16.msra.mxu1 %v16821_v17  ;;  %v11077_v6 = vld [vmem:[#allocation24 + $0xee0] sm:$0xff]  ;;  %v11074_v17 = vld [vmem:[#allocation24 + $0xec8] sm:$0xff] }
 0xa93   :  { %13848 = vmatprep.subr.bf16.mxu0 %v16828_v25  ;;  %14012 = vmatprep.subr.bf16.mxu1 %v16830_v2  ;;  %v11078_v25 = vld [vmem:[#allocation24 + $0xee8] sm:$0xff]  ;;  %v16867_v2 = vcombine.low %v11065_v56, %v11069_v54  ;;  %v16876_v33 = vcombine.high %v11073_v30, %v11077_v6  ;;  %v16875_v11 = vcombine.low %v11073_v30, %v11077_v6  ;;  %v10604_v30 = vld [vmem:[#allocation24 + $0x18] sm:$0xff] }
 0xa94   :  { %v16878_v36 = vcombine.high %v11074_v17, %v11078_v25  ;;  %v16877_v42 = vcombine.low %v11074_v17, %v11078_v25  ;;  %v11110_v56 = vld [vmem:[#allocation24 + $0xfe8] sm:$0xff]  ;;  %v10572_v54 = vrot.slane %v18971_v22, %v18998_v41  ;;  %v10608_v6 = vld [vmem:[#allocation24 + $0x38] sm:$0xff] }
 0xa96   :  { %13849 = vmatpush1.bf16.msra.mxu0 %v16827_v34  ;;  %14013 = vmatpush1.bf16.msra.mxu1 %v16829_v57  ;;  %v11081_v34 = vld [vmem:[#allocation24 + $0xf00] sm:$0xff] }
 0xa97   :  { %13850 = vmatprep.subr.bf16.mxu0 %v16836_v43  ;;  %14014 = vmatprep.subr.bf16.mxu1 %v16838_v51  ;;  %v11085_v57 = vld [vmem:[#allocation24 + $0xf20] sm:$0xff]  ;;  %v11082_v43 = vld [vmem:[#allocation24 + $0xf08] sm:$0xff] }
 0xa98   :  { %v11086_v51 = vld [vmem:[#allocation24 + $0xf28] sm:$0xff]  ;;  %v16884_v48 = vcombine.high %v11081_v34, %v11085_v57  ;;  %v16883_v59 = vcombine.low %v11081_v34, %v11085_v57  ;;  %v10612_v34 = vld [vmem:[#allocation24 + $0x58] sm:$0xff] }
 0xa99   :  { %v16886_v58 = vcombine.high %v11082_v43, %v11086_v51  ;;  %v16885_v19 = vcombine.low %v11082_v43, %v11086_v51  ;;  %v10616_v57 = vld [vmem:[#allocation24 + $0x78] sm:$0xff] }
 0xa9a   :  { %13851 = vmatpush1.bf16.msra.mxu0 %v16835_v44  ;;  %14015 = vmatpush1.bf16.msra.mxu1 %v16837_v49  ;;  %v11089_v44 = vld [vmem:[#allocation24 + $0xf40] sm:$0xff]  ;;  %v16418_v45 = vcombine.high %v10612_v34, %v10616_v57 }
 0xa9b   :  { %13852 = vmatprep.subr.bf16.mxu0 %v16844_v50  ;;  %14016 = vmatprep.subr.bf16.mxu1 %v16846_v15  ;;  %v11093_v49 = vld [vmem:[#allocation24 + $0xf60] sm:$0xff]  ;;  %v11090_v50 = vld [vmem:[#allocation24 + $0xf48] sm:$0xff] }
 0xa9c   :  { %v11094_v15 = vld [vmem:[#allocation24 + $0xf68] sm:$0xff]  ;;  %v16892_v55 = vcombine.high %v11089_v44, %v11093_v49  ;;  %v16891_v52 = vcombine.low %v11089_v44, %v11093_v49  ;;  %v10620_v44 = vld [vmem:[#allocation24 + $0x98] sm:$0xff] }
 0xa9d   :  { %v16893_v4 = vcombine.low %v11090_v50, %v11094_v15  ;;  %v10624_v49 = vld [vmem:[#allocation24 + $0xb8] sm:$0xff] }
 0xa9e   :  { %13853 = vmatpush1.bf16.msra.mxu0 %v16843_v26  ;;  %14017 = vmatpush1.bf16.msra.mxu1 %v16845_v0  ;;  %v16894_v26 = vcombine.high %v11090_v50, %v11094_v15  ;;  %v11097_v0 = vld [vmem:[#allocation24 + $0xf80] sm:$0xff]  ;;  %v16417_v15 = vcombine.low %v10612_v34, %v10616_v57  ;;  %v10664_v34 = vld [vmem:[#allocation24 + $0x1f8] sm:$0xff] }
 0xa9f   :  { %13854 = vmatprep.subr.bf16.mxu0 %v16852_v38  ;;  %14018 = vmatprep.subr.bf16.mxu1 %v16854_v18  ;;  %v11098_v38 = vld [vmem:[#allocation24 + $0xf88] sm:$0xff]  ;;  %v16899_v23 = vcombine.low %v11097_v0, %v11101_v9 }
 0xaa0   :  { %v11102_v18 = vld [vmem:[#allocation24 + $0xfa8] sm:$0xff] }
 0xaa1   :  { %v16902_v24 = vcombine.high %v11098_v38, %v11102_v18  ;;  %v16901_v47 = vcombine.low %v11098_v38, %v11102_v18  ;;  %v16425_v38 = vcombine.low %v10620_v44, %v10624_v49 }
 0xaa2   :  { %13855 = vmatpush1.bf16.msra.mxu0 %v16851_v53  ;;  %14019 = vmatpush1.bf16.msra.mxu1 %v16853_v14  ;;  %v16900_v53 = vcombine.high %v11097_v0, %v11101_v9  ;;  %v11105_v14 = vld [vmem:[#allocation24 + $0xfc0] sm:$0xff]  ;;  %v10632_v0 = vld [vmem:[#allocation24 + $0xf8] sm:$0xff] }
 0xaa3   :  { %13856 = vmatprep.subr.bf16.mxu0 %v16860_v1  ;;  %14020 = vmatprep.subr.bf16.mxu1 %v16862_v16  ;;  %v11109_v1 = vld [vmem:[#allocation24 + $0xfe0] sm:$0xff]  ;;  %v11106_v16 = vld [vmem:[#allocation24 + $0xfc8] sm:$0xff] }
 0xaa4   :  { %v16910_v63 = vcombine.high %v11106_v16, %v11110_v56  ;;  %v16907_v17 = vcombine.low %v11105_v14, %v11109_v1  ;;  %v16909_v25 = vcombine.low %v11106_v16, %v11110_v56  ;;  %v10643_v16 = vld [vmem:[#allocation24 + $0x150] sm:$0xff] }
 0xaa5   :  { %v10647_v56 = vld [vmem:[#allocation24 + $0x170] sm:$0xff] }
 0xaa6   :  { %13857 = vmatpush1.bf16.msra.mxu0 %v16859_v12  ;;  %14021 = vmatpush1.bf16.msra.mxu1 %v16861_v7  ;;  %v10540_v12 = vmul.f32 %v10521_v8, %v10489_v10  ;;  %v16908_v7 = vcombine.high %v11105_v14, %v11109_v1  ;;  %v10639_v10 = vld [vmem:[#allocation24 + $0x130] sm:$0xff]  ;;  %v10640_v8 = vld [vmem:[#allocation24 + $0x138] sm:$0xff] }
 0xaa7   :  { %13858 = vmatprep.subr.bf16.mxu0 %v16868_v29  ;;  %14022 = vmatprep.subr.bf16.mxu1 %v16870_v27  ;;  %v10603_v29 = vld [vmem:[#allocation24 + $0x10] sm:$0xff] }
 0xaa8   :  { %v10607_v27 = vld [vmem:[#allocation24 + $0x30] sm:$0xff] }
 0xaa9   :  { %v16408_v22 = vcombine.high %v10603_v29, %v10607_v27  ;;  %v16407_v43 = vcombine.low %v10603_v29, %v10607_v27  ;;  %v10651_v29 = vld [vmem:[#allocation24 + $0x190] sm:$0xff] }
 0xaaa   :  { %13859 = vmatpush1.bf16.msra.mxu0 %v16867_v2  ;;  %14023 = vmatpush1.bf16.msra.mxu1 %v16869_v31  ;;  %v10591_v2 = vadd.f32 %v10572_v54, %v10540_v12  ;;  %v16410_v31 = vcombine.high %v10604_v30, %v10608_v6  ;;  %v10644_v54 = vld [vmem:[#allocation24 + $0x158] sm:$0xff]  ;;  %v10655_v27 = vld [vmem:[#allocation24 + $0x1b0] sm:$0xff] }
 0xaab   :  { %13860 = vmatprep.subr.bf16.mxu0 %v16876_v33  ;;  %14024 = vmatprep.subr.bf16.mxu1 %v16878_v36  ;;  %v10611_v33 = vld [vmem:[#allocation24 + $0x50] sm:$0xff]  ;;  %v16455_v57 = vcombine.low %v10651_v29, %v10655_v27 }
 0xaac   :  { %v10615_v36 = vld [vmem:[#allocation24 + $0x70] sm:$0xff]  ;;  %v19007_v51 = vpack.c.bf16 %v10591_v2, %v10591_v2  ;;  %v16456_v2 = vcombine.high %v10651_v29, %v10655_v27  ;;  %v10700_v27 = vld [vmem:[#allocation24 + $0x318] sm:$0xff] }
 0xaad   :  { %v16415_v50 = vcombine.low %v10611_v33, %v10615_v36  ;;  %v10703_v29 = vld [vmem:[#allocation24 + $0x330] sm:$0xff] }
 0xaae   :  { %13861 = vmatpush1.bf16.msra.mxu0 %v16875_v11  ;;  %14025 = vmatpush1.bf16.msra.mxu1 %v16877_v42  ;;  %v16409_v11 = vcombine.low %v10604_v30, %v10608_v6  ;;  %v16416_v42 = vcombine.high %v10611_v33, %v10615_v36  ;;  %v10652_v30 = vld [vmem:[#allocation24 + $0x198] sm:$0xff]  ;;  %v10663_v33 = vld [vmem:[#allocation24 + $0x1f0] sm:$0xff] }
 0xaaf   :  { %13862 = vmatprep.subr.bf16.mxu0 %v16884_v48  ;;  %14026 = vmatprep.subr.bf16.mxu1 %v16886_v58  ;;  %v10619_v48 = vld [vmem:[#allocation24 + $0x90] sm:$0xff]  ;;  %v10656_v6 = vld [vmem:[#allocation24 + $0x1b8] sm:$0xff] }
 0xab0   :  { %v10623_v58 = vld [vmem:[#allocation24 + $0xb0] sm:$0xff]  ;;  %v10660_v36 = vld [vmem:[#allocation24 + $0x1d8] sm:$0xff] }
 0xab1   :  { %v16423_v9 = vcombine.low %v10619_v48, %v10623_v58 }
 0xab2   :  { %13863 = vmatpush1.bf16.msra.mxu0 %v16883_v59  ;;  %14027 = vmatpush1.bf16.msra.mxu1 %v16885_v19  ;;  %v16424_v59 = vcombine.high %v10619_v48, %v10623_v58  ;;  %v16426_v19 = vcombine.high %v10620_v44, %v10624_v49  ;;  %v10671_v48 = vld [vmem:[#allocation24 + $0x230] sm:$0xff]  ;;  %v10668_v58 = vld [vmem:[#allocation24 + $0x218] sm:$0xff] }
 0xab3   :  { %13864 = vmatprep.subr.bf16.mxu0 %v16892_v55  ;;  %14028 = vmatprep.subr.bf16.mxu1 %v16894_v26  ;;  %v10631_v55 = vld [vmem:[#allocation24 + $0xf0] sm:$0xff]  ;;  %v10628_v26 = vld [vmem:[#allocation24 + $0xd8] sm:$0xff] }
 0xab4   :  { %v16432_v18 = vcombine.high %v10627_v32, %v10631_v55  ;;  %v10672_v44 = vld [vmem:[#allocation24 + $0x238] sm:$0xff] }
 0xab6   :  { %13865 = vmatpush1.bf16.msra.mxu0 %v16891_v52  ;;  %14029 = vmatpush1.bf16.msra.mxu1 %v16893_v4  ;;  %v16434_v52 = vcombine.high %v10628_v26, %v10632_v0  ;;  %v10635_v4 = vld [vmem:[#allocation24 + $0x110] sm:$0xff] }
 0xab7   :  { %13866 = vmatprep.subr.bf16.mxu0 %v16900_v53  ;;  %14030 = vmatprep.subr.bf16.mxu1 %v16902_v24  ;;  %v16431_v53 = vcombine.low %v10627_v32, %v10631_v55  ;;  %v16433_v24 = vcombine.low %v10628_v26, %v10632_v0  ;;  %v16440_v14 = vcombine.high %v10635_v4, %v10639_v10  ;;  %v10679_v32 = vld [vmem:[#allocation24 + $0x270] sm:$0xff]  ;;  %v10676_v55 = vld [vmem:[#allocation24 + $0x258] sm:$0xff] }
 0xab8   :  { %v10680_v26 = vld [vmem:[#allocation24 + $0x278] sm:$0xff] }
 0xaba   :  { %13867 = vmatpush1.bf16.msra.mxu0 %v16899_v23  ;;  %14031 = vmatpush1.bf16.msra.mxu1 %v16901_v47  ;;  %v10648_v23 = vld [vmem:[#allocation24 + $0x178] sm:$0xff]  ;;  %v16439_v47 = vcombine.low %v10635_v4, %v10639_v10  ;;  %v10687_v4 = vld [vmem:[#allocation24 + $0x2b0] sm:$0xff] }
 0xabb   :  { %13868 = vmatprep.subr.bf16.mxu0 %v16908_v7  ;;  %14032 = vmatprep.subr.bf16.mxu1 %v16910_v63  ;;  %v16448_v7 = vcombine.high %v10643_v16, %v10647_v56  ;;  %v16450_v63 = vcombine.high %v10644_v54, %v10648_v23  ;;  %v10684_v10 = vld [vmem:[#allocation24 + $0x298] sm:$0xff] }
 0xabe   :  { %13869 = vmatpush1.bf16.msra.mxu0 %v16907_v17  ;;  %14033 = vmatpush1.bf16.msra.mxu1 %v16909_v25  ;;  %v16447_v17 = vcombine.low %v10643_v16, %v10647_v56  ;;  %v16449_v25 = vcombine.low %v10644_v54, %v10648_v23  ;;  %v10695_v16 = vld [vmem:[#allocation24 + $0x2f0] sm:$0xff]  ;;  %v10692_v56 = vld [vmem:[#allocation24 + $0x2d8] sm:$0xff] }
 0xabf   :  { %14043 = vmatprep.subr.bf16.mxu0 %v16408_v22  ;;  %14207 = vmatprep.subr.bf16.mxu1 %v16410_v31  ;;  %v16458_v22 = vcombine.high %v10652_v30, %v10656_v6  ;;  %v10659_v31 = vld [vmem:[#allocation24 + $0x1d0] sm:$0xff]  ;;  %v10696_v54 = vld [vmem:[#allocation24 + $0x2f8] sm:$0xff] }
 0xac0   :  { %v16463_v49 = vcombine.low %v10659_v31, %v10663_v33 }
 0xac1   :  { %13871 = vmatmul.mubr.bf16.vlgmr.msra.gmra.mrb[56].mxu0 %v19007_v51  ;;  %14035 = vmatmul.mubr.bf16.vlgmr.msra.gmra.mrb[64].mxu1 %v19007_v51 }
 0xac2   :  { %14044 = vmatpush1.bf16.msra.mxu0 %v16407_v43  ;;  %14075 = vmatprep.mubr.bf16.mxu0 %v18889_v20  ;;  %v16457_v43 = vcombine.low %v10652_v30, %v10656_v6  ;;  %v10704_v30 = vld [vmem:[#allocation24 + $0x338] sm:$0xff] }
 0xac3   :  { %14208 = vmatpush1.bf16.msra.mxu1 %v16409_v11  ;;  %14239 = vmatprep.mubr.bf16.mxu1 %v18889_v20  ;;  %v10636_v20 = vld [vmem:[#allocation24 + $0x118] sm:$0xff]  ;;  %v16464_v11 = vcombine.high %v10659_v31, %v10663_v33  ;;  %v10711_v31 = vld [vmem:[#allocation24 + $0x370] sm:$0xff] }
 0xac4   :  { %14045 = vmatprep.subr.bf16.mxu0 %v16416_v42  ;;  %14209 = vmatprep.subr.bf16.mxu1 %v16418_v45  ;;  %v16442_v1 = vcombine.high %v10636_v20, %v10640_v8  ;;  %v16441_v12 = vcombine.low %v10636_v20, %v10640_v8  ;;  %v16466_v42 = vcombine.high %v10660_v36, %v10664_v34  ;;  %v10667_v45 = vld [vmem:[#allocation24 + $0x210] sm:$0xff]  ;;  %v10688_v20 = vld [vmem:[#allocation24 + $0x2b8] sm:$0xff] }
 0xac5   :  { %v16471_v0 = vcombine.low %v10667_v45, %v10671_v48  ;;  %v10708_v33 = vld [vmem:[#allocation24 + $0x358] sm:$0xff] }
 0xac6   :  { %14046 = vmatpush1.bf16.msra.mxu0 %v16415_v50  ;;  %v16465_v50 = vcombine.low %v10660_v36, %v10664_v34  ;;  %v10712_v36 = vld [vmem:[#allocation24 + $0x378] sm:$0xff] }
 0xac7   :  { %14210 = vmatpush1.bf16.msra.mxu1 %v16417_v15  ;;  %14047 = vmatprep.subr.bf16.mxu0 %v16424_v59  ;;  %v16472_v15 = vcombine.high %v10667_v45, %v10671_v48  ;;  %v16474_v59 = vcombine.high %v10668_v58, %v10672_v44  ;;  %v10719_v45 = vld [vmem:[#allocation24 + $0x3b0] sm:$0xff]  ;;  %v10716_v48 = vld [vmem:[#allocation24 + $0x398] sm:$0xff] }
 0xac8   :  { %14211 = vmatprep.subr.bf16.mxu1 %v16426_v19  ;;  %v10675_v19 = vld [vmem:[#allocation24 + $0x250] sm:$0xff] }
 0xac9   :  { %v16479_v8 = vcombine.low %v10675_v19, %v10679_v32 }
 0xaca   :  { %14048 = vmatpush1.bf16.msra.mxu0 %v16423_v9  ;;  %v16473_v9 = vcombine.low %v10668_v58, %v10672_v44  ;;  %v10720_v58 = vld [vmem:[#allocation24 + $0x3b8] sm:$0xff] }
 0xacb   :  { %14212 = vmatpush1.bf16.msra.mxu1 %v16425_v38  ;;  %14049 = vmatprep.subr.bf16.mxu0 %v16432_v18  ;;  %v16480_v38 = vcombine.high %v10675_v19, %v10679_v32  ;;  %v16482_v18 = vcombine.high %v10676_v55, %v10680_v26  ;;  %v10727_v19 = vld [vmem:[#allocation24 + $0x3f0] sm:$0xff]  ;;  %v10724_v32 = vld [vmem:[#allocation24 + $0x3d8] sm:$0xff] }
 0xacc   :  { %14213 = vmatprep.subr.bf16.mxu1 %v16434_v52  ;;  %v10683_v52 = vld [vmem:[#allocation24 + $0x290] sm:$0xff] }
 0xacd   :  { %v16487_v23 = vcombine.low %v10683_v52, %v10687_v4 }
 0xace   :  { %14050 = vmatpush1.bf16.msra.mxu0 %v16431_v53  ;;  %v16481_v53 = vcombine.low %v10676_v55, %v10680_v26  ;;  %v10728_v55 = vld [vmem:[#allocation24 + $0x3f8] sm:$0xff] }
 0xacf   :  { %14214 = vmatpush1.bf16.msra.mxu1 %v16433_v24  ;;  %14051 = vmatprep.subr.bf16.mxu0 %v16440_v14  ;;  %v16488_v24 = vcombine.high %v10683_v52, %v10687_v4  ;;  %v16490_v14 = vcombine.high %v10684_v10, %v10688_v20  ;;  %v10735_v52 = vld [vmem:[#allocation24 + $0x430] sm:$0xff]  ;;  %v10732_v4 = vld [vmem:[#allocation24 + $0x418] sm:$0xff] }
 0xad0   :  { %14215 = vmatprep.subr.bf16.mxu1 %v16442_v1  ;;  %v10691_v1 = vld [vmem:[#allocation24 + $0x2d0] sm:$0xff] }
 0xad1   :  { %v16495_v6 = vcombine.low %v10691_v1, %v10695_v16 }
 0xad2   :  { %14052 = vmatpush1.bf16.msra.mxu0 %v16439_v47  ;;  %v16489_v47 = vcombine.low %v10684_v10, %v10688_v20  ;;  %v10736_v10 = vld [vmem:[#allocation24 + $0x438] sm:$0xff] }
 0xad3   :  { %14216 = vmatpush1.bf16.msra.mxu1 %v16441_v12  ;;  %14053 = vmatprep.subr.bf16.mxu0 %v16448_v7  ;;  %v16496_v12 = vcombine.high %v10691_v1, %v10695_v16  ;;  %v16498_v7 = vcombine.high %v10692_v56, %v10696_v54  ;;  %v10743_v1 = vld [vmem:[#allocation24 + $0x470] sm:$0xff] }
 0xad4   :  { %14217 = vmatprep.subr.bf16.mxu1 %v16450_v63  ;;  %v10699_v63 = vld [vmem:[#allocation24 + $0x310] sm:$0xff] }
 0xad5   :  { %v16503_v34 = vcombine.low %v10699_v63, %v10703_v29 }
 0xad6   :  { %14054 = vmatpush1.bf16.msra.mxu0 %v16447_v17  ;;  %v16497_v17 = vcombine.low %v10692_v56, %v10696_v54  ;;  %v10740_v56 = vld [vmem:[#allocation24 + $0x458] sm:$0xff] }
 0xad7   :  { %14218 = vmatpush1.bf16.msra.mxu1 %v16449_v25  ;;  %14055 = vmatprep.subr.bf16.mxu0 %v16456_v2  ;;  %v16504_v25 = vcombine.high %v10699_v63, %v10703_v29  ;;  %v16506_v2 = vcombine.high %v10700_v27, %v10704_v30  ;;  %v10744_v54 = vld [vmem:[#allocation24 + $0x478] sm:$0xff] }
 0xad8   :  { %14219 = vmatprep.subr.bf16.mxu1 %v16458_v22  ;;  %v10707_v22 = vld [vmem:[#allocation24 + $0x350] sm:$0xff]  ;;  %v16546_v63 = vcombine.high %v10740_v56, %v10744_v54  ;;  %v10748_v29 = vld [vmem:[#allocation24 + $0x498] sm:$0xff] }
 0xad9   :  { %v16511_v44 = vcombine.low %v10707_v22, %v10711_v31 }
 0xada   :  { %14056 = vmatpush1.bf16.msra.mxu0 %v16455_v57  ;;  %v16505_v57 = vcombine.low %v10700_v27, %v10704_v30  ;;  %v10752_v27 = vld [vmem:[#allocation24 + $0x4b8] sm:$0xff] }
 0xadb   :  { %14220 = vmatpush1.bf16.msra.mxu1 %v16457_v43  ;;  %14057 = vmatprep.subr.bf16.mxu0 %v16464_v11  ;;  %v16512_v43 = vcombine.high %v10707_v22, %v10711_v31  ;;  %v16514_v11 = vcombine.high %v10708_v33, %v10712_v36  ;;  %v10759_v22 = vld [vmem:[#allocation24 + $0x4f0] sm:$0xff]  ;;  %v10756_v31 = vld [vmem:[#allocation24 + $0x4d8] sm:$0xff] }
 0xadc   :  { %14221 = vmatprep.subr.bf16.mxu1 %v16466_v42  ;;  %v10715_v42 = vld [vmem:[#allocation24 + $0x390] sm:$0xff] }
 0xadd   :  { %v16519_v26 = vcombine.low %v10715_v42, %v10719_v45 }
 0xade   :  { %14058 = vmatpush1.bf16.msra.mxu0 %v16463_v49  ;;  %v16513_v49 = vcombine.low %v10708_v33, %v10712_v36  ;;  %v10760_v33 = vld [vmem:[#allocation24 + $0x4f8] sm:$0xff] }
 0xadf   :  { %14222 = vmatpush1.bf16.msra.mxu1 %v16465_v50  ;;  %14059 = vmatprep.subr.bf16.mxu0 %v16472_v15  ;;  %v16520_v50 = vcombine.high %v10715_v42, %v10719_v45  ;;  %v16522_v15 = vcombine.high %v10716_v48, %v10720_v58  ;;  %v10764_v42 = vld [vmem:[#allocation24 + $0x518] sm:$0xff] }
 0xae0   :  { %14223 = vmatprep.subr.bf16.mxu1 %v16474_v59  ;;  %v10723_v59 = vld [vmem:[#allocation24 + $0x3d0] sm:$0xff]  ;;  %v10768_v45 = vld [vmem:[#allocation24 + $0x538] sm:$0xff] }
 0xae1   :  { %v16527_v20 = vcombine.low %v10723_v59, %v10727_v19 }
 0xae2   :  { %14060 = vmatpush1.bf16.msra.mxu0 %v16471_v0  ;;  %v16521_v0 = vcombine.low %v10716_v48, %v10720_v58  ;;  %v16561_v48 = vcombine.low %v10756_v31, %v10760_v33 }
 0xae3   :  { %14224 = vmatpush1.bf16.msra.mxu1 %v16473_v9  ;;  %14061 = vmatprep.subr.bf16.mxu0 %v16480_v38  ;;  %v16528_v9 = vcombine.high %v10723_v59, %v10727_v19  ;;  %v16530_v38 = vcombine.high %v10724_v32, %v10728_v55  ;;  %v10776_v59 = vld [vmem:[#allocation24 + $0x578] sm:$0xff] }
 0xae4   :  { %14225 = vmatprep.subr.bf16.mxu1 %v16482_v18  ;;  %v10731_v18 = vld [vmem:[#allocation24 + $0x410] sm:$0xff] }
 0xae5   :  { %v16535_v16 = vcombine.low %v10731_v18, %v10735_v52 }
 0xae6   :  { %14062 = vmatpush1.bf16.msra.mxu0 %v16479_v8  ;;  %v16529_v8 = vcombine.low %v10724_v32, %v10728_v55  ;;  %v16569_v32 = vcombine.low %v10764_v42, %v10768_v45 }
 0xae7   :  { %14226 = vmatpush1.bf16.msra.mxu1 %v16481_v53  ;;  %14063 = vmatprep.subr.bf16.mxu0 %v16488_v24  ;;  %v16536_v53 = vcombine.high %v10731_v18, %v10735_v52  ;;  %v16538_v24 = vcombine.high %v10732_v4, %v10736_v10  ;;  %v10784_v18 = vld [vmem:[#allocation24 + $0x5b8] sm:$0xff] }
 0xae8   :  { %14227 = vmatprep.subr.bf16.mxu1 %v16490_v14  ;;  %v10739_v14 = vld [vmem:[#allocation24 + $0x450] sm:$0xff] }
 0xae9   :  { %v16543_v30 = vcombine.low %v10739_v14, %v10743_v1 }
 0xaea   :  { %14064 = vmatpush1.bf16.msra.mxu0 %v16487_v23  ;;  %v16537_v23 = vcombine.low %v10732_v4, %v10736_v10 }
 0xaeb   :  { %14228 = vmatpush1.bf16.msra.mxu1 %v16489_v47  ;;  %14065 = vmatprep.subr.bf16.mxu0 %v16496_v12  ;;  %v16544_v47 = vcombine.high %v10739_v14, %v10743_v1  ;;  %v10747_v12 = vld [vmem:[#allocation24 + $0x490] sm:$0xff]  ;;  %v10792_v14 = vld [vmem:[#allocation24 + $0x5f8] sm:$0xff] }
 0xaec   :  { %14229 = vmatprep.subr.bf16.mxu1 %v16498_v7  ;;  %v10751_v7 = vld [vmem:[#allocation24 + $0x4b0] sm:$0xff] }
 0xaed   :  { %v16551_v36 = vcombine.low %v10747_v12, %v10751_v7 }
 0xaee   :  { %14066 = vmatpush1.bf16.msra.mxu0 %v16495_v6  ;;  %v16545_v6 = vcombine.low %v10740_v56, %v10744_v54 }
 0xaef   :  { %14230 = vmatpush1.bf16.msra.mxu1 %v16497_v17  ;;  %14067 = vmatprep.subr.bf16.mxu0 %v16504_v25  ;;  %v16552_v17 = vcombine.high %v10747_v12, %v10751_v7  ;;  %v16554_v25 = vcombine.high %v10748_v29, %v10752_v27  ;;  %v10796_v12 = vld [vmem:[#allocation24 + $0x618] sm:$0xff] }
 0xaf0   :  { %14231 = vmatprep.subr.bf16.mxu1 %v16506_v2  ;;  %v10755_v2 = vld [vmem:[#allocation24 + $0x4d0] sm:$0xff]  ;;  %v10800_v7 = vld [vmem:[#allocation24 + $0x638] sm:$0xff] }
 0xaf2   :  { %14068 = vmatpush1.bf16.msra.mxu0 %v16503_v34  ;;  %v16560_v34 = vcombine.high %v10755_v2, %v10759_v22 }
 0xaf3   :  { %14232 = vmatpush1.bf16.msra.mxu1 %v16505_v57  ;;  %14069 = vmatprep.subr.bf16.mxu0 %v16512_v43  ;;  %v16562_v57 = vcombine.high %v10756_v31, %v10760_v33  ;;  %v10763_v43 = vld [vmem:[#allocation24 + $0x510] sm:$0xff]  ;;  %v16601_v31 = vcombine.low %v10796_v12, %v10800_v7 }
 0xaf4   :  { %14233 = vmatprep.subr.bf16.mxu1 %v16514_v11  ;;  %v10767_v11 = vld [vmem:[#allocation24 + $0x530] sm:$0xff] }
 0xaf5   :  { %v16568_v58 = vcombine.high %v10763_v43, %v10767_v11  ;;  %v16567_v19 = vcombine.low %v10763_v43, %v10767_v11  ;;  %v10816_v43 = vld [vmem:[#allocation24 + $0x6b8] sm:$0xff] }
 0xaf6   :  { %14070 = vmatpush1.bf16.msra.mxu0 %v16511_v44  ;;  %v16570_v44 = vcombine.high %v10764_v42, %v10768_v45 }
 0xaf7   :  { %14234 = vmatpush1.bf16.msra.mxu1 %v16513_v49  ;;  %14071 = vmatprep.subr.bf16.mxu0 %v16520_v50  ;;  %v10771_v49 = vld [vmem:[#allocation24 + $0x550] sm:$0xff] }
 0xaf8   :  { %14235 = vmatprep.subr.bf16.mxu1 %v16522_v15  ;;  %v10775_v50 = vld [vmem:[#allocation24 + $0x570] sm:$0xff]  ;;  %v10772_v15 = vld [vmem:[#allocation24 + $0x558] sm:$0xff] }
 0xaf9   :  { %v16576_v55 = vcombine.high %v10771_v49, %v10775_v50  ;;  %v16575_v52 = vcombine.low %v10771_v49, %v10775_v50  ;;  %v16577_v4 = vcombine.low %v10772_v15, %v10776_v59  ;;  %v10824_v49 = vld [vmem:[#allocation24 + $0x6f8] sm:$0xff] }
 0xafa   :  { %14072 = vmatpush1.bf16.msra.mxu0 %v16519_v26  ;;  %v16578_v26 = vcombine.high %v10772_v15, %v10776_v59 }
 0xafb   :  { %14236 = vmatpush1.bf16.msra.mxu1 %v16521_v0  ;;  %14073 = vmatprep.subr.bf16.mxu0 %v16528_v9  ;;  %v10779_v0 = vld [vmem:[#allocation24 + $0x590] sm:$0xff] }
 0xafc   :  { %14237 = vmatprep.subr.bf16.mxu1 %v16530_v38  ;;  %v10783_v9 = vld [vmem:[#allocation24 + $0x5b0] sm:$0xff]  ;;  %v10780_v38 = vld [vmem:[#allocation24 + $0x598] sm:$0xff] }
 0xafd   :  { %v16584_v10 = vcombine.high %v10779_v0, %v10783_v9  ;;  %v16583_v1 = vcombine.low %v10779_v0, %v10783_v9  ;;  %v10832_v0 = vld [vmem:[#allocation24 + $0x738] sm:$0xff] }
 0xafe   :  { %14074 = vmatpush1.bf16.msra.mxu0 %v16527_v20  ;;  %v16586_v20 = vcombine.high %v10780_v38, %v10784_v18 }
 0xaff   :  { %14238 = vmatpush1.bf16.msra.mxu1 %v16529_v8  ;;  %14084 = vmatprep.subr.bf16.mxu0 %v16536_v53  ;;  %v10787_v8 = vld [vmem:[#allocation24 + $0x5d0] sm:$0xff] }
 0xb00   :  { %14248 = vmatprep.subr.bf16.mxu1 %v16538_v24  ;;  %v10791_v53 = vld [vmem:[#allocation24 + $0x5f0] sm:$0xff]  ;;  %v10788_v24 = vld [vmem:[#allocation24 + $0x5d8] sm:$0xff] }
 0xb01   :  { %14076 = vmatmul.mubr.bf16.vlgmr.msra.gmra.mrb[60].mxu0 %v18912_v61  ;;  %v16592_v56 = vcombine.high %v10787_v8, %v10791_v53  ;;  %v16594_v54 = vcombine.high %v10788_v24, %v10792_v14 }
 0xb02   :  { %14240 = vmatmul.mubr.bf16.vlgmr.msra.gmra.mrb[68].mxu1 %v18912_v61  ;;  %14085 = vmatpush1.bf16.msra.mxu0 %v16535_v16  ;;  %v16553_v61 = vcombine.low %v10748_v29, %v10752_v27  ;;  %v16585_v16 = vcombine.low %v10780_v38, %v10784_v18  ;;  %v16593_v29 = vcombine.low %v10788_v24, %v10792_v14 }
 0xb03   :  { %14116 = vmatprep.mubr.bf16.mxu0 %v18914_v46  ;;  %14249 = vmatpush1.bf16.msra.mxu1 %v16537_v23  ;;  %v10795_v23 = vld [vmem:[#allocation24 + $0x610] sm:$0xff] }
 0xb04   :  { %14280 = vmatprep.mubr.bf16.mxu1 %v18914_v46  ;;  %14086 = vmatprep.subr.bf16.mxu0 %v16544_v47  ;;  %v16559_v46 = vcombine.low %v10755_v2, %v10759_v22  ;;  %v10799_v47 = vld [vmem:[#allocation24 + $0x630] sm:$0xff]  ;;  %v10808_v2 = vld [vmem:[#allocation24 + $0x678] sm:$0xff] }
 0xb05   :  { %14250 = vmatprep.subr.bf16.mxu1 %v16546_v63  ;;  %v16591_v63 = vcombine.low %v10787_v8, %v10791_v53  ;;  %v16600_v27 = vcombine.high %v10795_v23, %v10799_v47  ;;  %v16599_v22 = vcombine.low %v10795_v23, %v10799_v47  ;;  %v10840_v8 = vld [vmem:[#allocation24 + $0x778] sm:$0xff] }
 0xb06   :  { %14087 = vmatpush1.bf16.msra.mxu0 %v16543_v30  ;;  %v16602_v30 = vcombine.high %v10796_v12, %v10800_v7  ;;  %v10848_v23 = vld [vmem:[#allocation24 + $0x7b8] sm:$0xff] }
 0xb07   :  { %14251 = vmatpush1.bf16.msra.mxu1 %v16545_v6  ;;  %14088 = vmatprep.subr.bf16.mxu0 %v16552_v17  ;;  %v10803_v6 = vld [vmem:[#allocation24 + $0x650] sm:$0xff] }
 0xb08   :  { %14252 = vmatprep.subr.bf16.mxu1 %v16554_v25  ;;  %v10807_v17 = vld [vmem:[#allocation24 + $0x670] sm:$0xff]  ;;  %v10804_v25 = vld [vmem:[#allocation24 + $0x658] sm:$0xff] }
 0xb09   :  { %v16608_v33 = vcombine.high %v10803_v6, %v10807_v17  ;;  %v16607_v11 = vcombine.low %v10803_v6, %v10807_v17  ;;  %v16609_v42 = vcombine.low %v10804_v25, %v10808_v2  ;;  %v10856_v6 = vld [vmem:[#allocation24 + $0x7f8] sm:$0xff] }
 0xb0a   :  { %14089 = vmatpush1.bf16.msra.mxu0 %v16551_v36  ;;  %v16610_v36 = vcombine.high %v10804_v25, %v10808_v2 }
 0xb0b   :  { %14253 = vmatpush1.bf16.msra.mxu1 %v16553_v61  ;;  %14090 = vmatprep.subr.bf16.mxu0 %v16560_v34  ;;  %v10811_v61 = vld [vmem:[#allocation24 + $0x690] sm:$0xff] }
 0xb0c   :  { %14254 = vmatprep.subr.bf16.mxu1 %v16562_v57  ;;  %v10815_v34 = vld [vmem:[#allocation24 + $0x6b0] sm:$0xff]  ;;  %v10812_v57 = vld [vmem:[#allocation24 + $0x698] sm:$0xff] }
 0xb0d   :  { %v16616_v45 = vcombine.high %v10811_v61, %v10815_v34  ;;  %v16615_v50 = vcombine.low %v10811_v61, %v10815_v34  ;;  %v16617_v15 = vcombine.low %v10812_v57, %v10816_v43  ;;  %v10864_v61 = vld [vmem:[#allocation24 + $0x838] sm:$0xff] }
 0xb0e   :  { %14091 = vmatpush1.bf16.msra.mxu0 %v16559_v46  ;;  %v16618_v46 = vcombine.high %v10812_v57, %v10816_v43 }
 0xb0f   :  { %14255 = vmatpush1.bf16.msra.mxu1 %v16561_v48  ;;  %14092 = vmatprep.subr.bf16.mxu0 %v16568_v58  ;;  %v10819_v48 = vld [vmem:[#allocation24 + $0x6d0] sm:$0xff] }
 0xb10   :  { %14256 = vmatprep.subr.bf16.mxu1 %v16570_v44  ;;  %v10823_v58 = vld [vmem:[#allocation24 + $0x6f0] sm:$0xff]  ;;  %v10820_v44 = vld [vmem:[#allocation24 + $0x6d8] sm:$0xff] }
 0xb11   :  { %v16624_v59 = vcombine.high %v10819_v48, %v10823_v58  ;;  %v16623_v9 = vcombine.low %v10819_v48, %v10823_v58  ;;  %v16625_v38 = vcombine.low %v10820_v44, %v10824_v49  ;;  %v10868_v48 = vld [vmem:[#allocation24 + $0x858] sm:$0xff] }
 0xb12   :  { %14093 = vmatpush1.bf16.msra.mxu0 %v16567_v19  ;;  %v16626_v19 = vcombine.high %v10820_v44, %v10824_v49  ;;  %v10872_v58 = vld [vmem:[#allocation24 + $0x878] sm:$0xff] }
 0xb13   :  { %14257 = vmatpush1.bf16.msra.mxu1 %v16569_v32  ;;  %14094 = vmatprep.subr.bf16.mxu0 %v16576_v55  ;;  %v10827_v32 = vld [vmem:[#allocation24 + $0x710] sm:$0xff] }
 0xb14   :  { %14258 = vmatprep.subr.bf16.mxu1 %v16578_v26  ;;  %v10831_v55 = vld [vmem:[#allocation24 + $0x730] sm:$0xff]  ;;  %v10828_v26 = vld [vmem:[#allocation24 + $0x718] sm:$0xff] }
 0xb15   :  { %v16632_v18 = vcombine.high %v10827_v32, %v10831_v55  ;;  %v16631_v53 = vcombine.low %v10827_v32, %v10831_v55  ;;  %v16633_v24 = vcombine.low %v10828_v26, %v10832_v0  ;;  %v10880_v32 = vld [vmem:[#allocation24 + $0x8b8] sm:$0xff] }
 0xb16   :  { %14095 = vmatpush1.bf16.msra.mxu0 %v16575_v52  ;;  %v16634_v52 = vcombine.high %v10828_v26, %v10832_v0  ;;  %v16673_v26 = vcombine.low %v10868_v48, %v10872_v58 }
 0xb17   :  { %14259 = vmatpush1.bf16.msra.mxu1 %v16577_v4  ;;  %14096 = vmatprep.subr.bf16.mxu0 %v16584_v10  ;;  %v10835_v4 = vld [vmem:[#allocation24 + $0x750] sm:$0xff] }
 0xb18   :  { %14260 = vmatprep.subr.bf16.mxu1 %v16586_v20  ;;  %v10839_v10 = vld [vmem:[#allocation24 + $0x770] sm:$0xff]  ;;  %v10836_v20 = vld [vmem:[#allocation24 + $0x758] sm:$0xff] }
 0xb19   :  { %v16640_v14 = vcombine.high %v10835_v4, %v10839_v10  ;;  %v16639_v47 = vcombine.low %v10835_v4, %v10839_v10  ;;  %v16641_v12 = vcombine.low %v10836_v20, %v10840_v8  ;;  %v10888_v4 = vld [vmem:[#allocation24 + $0x8f8] sm:$0xff] }
 0xb1a   :  { %14097 = vmatpush1.bf16.msra.mxu0 %v16583_v1  ;;  %v16642_v1 = vcombine.high %v10836_v20, %v10840_v8 }
 0xb1b   :  { %14261 = vmatpush1.bf16.msra.mxu1 %v16585_v16  ;;  %14098 = vmatprep.subr.bf16.mxu0 %v16592_v56  ;;  %v10843_v16 = vld [vmem:[#allocation24 + $0x790] sm:$0xff] }
 0xb1c   :  { %14262 = vmatprep.subr.bf16.mxu1 %v16594_v54  ;;  %v10847_v56 = vld [vmem:[#allocation24 + $0x7b0] sm:$0xff]  ;;  %v10844_v54 = vld [vmem:[#allocation24 + $0x798] sm:$0xff] }
 0xb1d   :  { %v16648_v7 = vcombine.high %v10843_v16, %v10847_v56  ;;  %v16647_v17 = vcombine.low %v10843_v16, %v10847_v56  ;;  %v16649_v25 = vcombine.low %v10844_v54, %v10848_v23 }
 0xb1e   :  { %14099 = vmatpush1.bf16.msra.mxu0 %v16591_v63  ;;  %v16650_v63 = vcombine.high %v10844_v54, %v10848_v23  ;;  %v10899_v23 = vld [vmem:[#allocation24 + $0x950] sm:$0xff] }
 0xb1f   :  { %14263 = vmatpush1.bf16.msra.mxu1 %v16593_v29  ;;  %14100 = vmatprep.subr.bf16.mxu0 %v16600_v27  ;;  %v10851_v29 = vld [vmem:[#allocation24 + $0x7d0] sm:$0xff] }
 0xb20   :  { %14264 = vmatprep.subr.bf16.mxu1 %v16602_v30  ;;  %v10855_v27 = vld [vmem:[#allocation24 + $0x7f0] sm:$0xff]  ;;  %v10852_v30 = vld [vmem:[#allocation24 + $0x7d8] sm:$0xff] }
 0xb21   :  { %v16656_v2 = vcombine.high %v10851_v29, %v10855_v27  ;;  %v16655_v34 = vcombine.low %v10851_v29, %v10855_v27  ;;  %v16657_v57 = vcombine.low %v10852_v30, %v10856_v6 }
 0xb22   :  { %14101 = vmatpush1.bf16.msra.mxu0 %v16599_v22  ;;  %v16658_v22 = vcombine.high %v10852_v30, %v10856_v6  ;;  %v10907_v6 = vld [vmem:[#allocation24 + $0x990] sm:$0xff] }
 0xb23   :  { %14265 = vmatpush1.bf16.msra.mxu1 %v16601_v31  ;;  %14102 = vmatprep.subr.bf16.mxu0 %v16608_v33  ;;  %v10859_v31 = vld [vmem:[#allocation24 + $0x810] sm:$0xff] }
 0xb24   :  { %14266 = vmatprep.subr.bf16.mxu1 %v16610_v36  ;;  %v10863_v33 = vld [vmem:[#allocation24 + $0x830] sm:$0xff]  ;;  %v10860_v36 = vld [vmem:[#allocation24 + $0x818] sm:$0xff] }
 0xb25   :  { %v16664_v43 = vcombine.high %v10859_v31, %v10863_v33  ;;  %v16665_v44 = vcombine.low %v10860_v36, %v10864_v61 }
 0xb26   :  { %14103 = vmatpush1.bf16.msra.mxu0 %v16607_v11  ;;  %v16666_v11 = vcombine.high %v10860_v36, %v10864_v61  ;;  %v10915_v61 = vld [vmem:[#allocation24 + $0x9d0] sm:$0xff] }
 0xb27   :  { %14267 = vmatpush1.bf16.msra.mxu1 %v16609_v42  ;;  %14104 = vmatprep.subr.bf16.mxu0 %v16616_v45  ;;  %v10867_v42 = vld [vmem:[#allocation24 + $0x850] sm:$0xff] }
 0xb28   :  { %14268 = vmatprep.subr.bf16.mxu1 %v16618_v46  ;;  %v10871_v45 = vld [vmem:[#allocation24 + $0x870] sm:$0xff]  ;;  %v16663_v46 = vcombine.low %v10859_v31, %v10863_v33 }
 0xb29   :  { %v16672_v49 = vcombine.high %v10867_v42, %v10871_v45  ;;  %v16671_v55 = vcombine.low %v10867_v42, %v10871_v45 }
 0xb2a   :  { %14105 = vmatpush1.bf16.msra.mxu0 %v16615_v50  ;;  %v10875_v50 = vld [vmem:[#allocation24 + $0x890] sm:$0xff] }
 0xb2b   :  { %14269 = vmatpush1.bf16.msra.mxu1 %v16617_v15  ;;  %14106 = vmatprep.subr.bf16.mxu0 %v16624_v59  ;;  %v10879_v15 = vld [vmem:[#allocation24 + $0x8b0] sm:$0xff]  ;;  %v16674_v59 = vcombine.high %v10868_v48, %v10872_v58 }
 0xb2c   :  { %14270 = vmatprep.subr.bf16.mxu1 %v16626_v19  ;;  %v10876_v19 = vld [vmem:[#allocation24 + $0x898] sm:$0xff]  ;;  %v16680_v0 = vcombine.high %v10875_v50, %v10879_v15  ;;  %v16679_v10 = vcombine.low %v10875_v50, %v10879_v15  ;;  %v10923_v48 = vld [vmem:[#allocation24 + $0xa10] sm:$0xff] }
 0xb2d   :  { %v10927_v58 = vld [vmem:[#allocation24 + $0xa30] sm:$0xff] }
 0xb2e   :  { %14107 = vmatpush1.bf16.msra.mxu0 %v16623_v9  ;;  %v16682_v9 = vcombine.high %v10876_v19, %v10880_v32 }
 0xb2f   :  { %14271 = vmatpush1.bf16.msra.mxu1 %v16625_v38  ;;  %14108 = vmatprep.subr.bf16.mxu0 %v16632_v18  ;;  %v10883_v38 = vld [vmem:[#allocation24 + $0x8d0] sm:$0xff] }
 0xb30   :  { %14272 = vmatprep.subr.bf16.mxu1 %v16634_v52  ;;  %v10887_v18 = vld [vmem:[#allocation24 + $0x8f0] sm:$0xff]  ;;  %v10884_v52 = vld [vmem:[#allocation24 + $0x8d8] sm:$0xff] }
 0xb31   :  { %v16688_v20 = vcombine.high %v10883_v38, %v10887_v18  ;;  %v16690_v8 = vcombine.high %v10884_v52, %v10888_v4  ;;  %v16689_v16 = vcombine.low %v10884_v52, %v10888_v4  ;;  %v10939_v4 = vld [vmem:[#allocation24 + $0xa90] sm:$0xff] }
 0xb32   :  { %14109 = vmatpush1.bf16.msra.mxu0 %v16631_v53  ;;  %v10891_v53 = vld [vmem:[#allocation24 + $0x910] sm:$0xff] }
 0xb33   :  { %14273 = vmatpush1.bf16.msra.mxu1 %v16633_v24  ;;  %14110 = vmatprep.subr.bf16.mxu0 %v16640_v14  ;;  %v10895_v24 = vld [vmem:[#allocation24 + $0x930] sm:$0xff]  ;;  %v10892_v14 = vld [vmem:[#allocation24 + $0x918] sm:$0xff] }
 0xb34   :  { %14274 = vmatprep.subr.bf16.mxu1 %v16642_v1  ;;  %v10896_v1 = vld [vmem:[#allocation24 + $0x938] sm:$0xff]  ;;  %v16696_v56 = vcombine.high %v10891_v53, %v10895_v24 }
 0xb35   :  { %v16698_v54 = vcombine.high %v10892_v14, %v10896_v1  ;;  %v16697_v29 = vcombine.low %v10892_v14, %v10896_v1  ;;  %v10947_v1 = vld [vmem:[#allocation24 + $0xad0] sm:$0xff] }
 0xb36   :  { %14111 = vmatpush1.bf16.msra.mxu0 %v16639_v47  ;;  %v10903_v47 = vld [vmem:[#allocation24 + $0x970] sm:$0xff] }
 0xb37   :  { %14275 = vmatpush1.bf16.msra.mxu1 %v16641_v12  ;;  %14112 = vmatprep.subr.bf16.mxu0 %v16648_v7  ;;  %v10900_v12 = vld [vmem:[#allocation24 + $0x958] sm:$0xff]  ;;  %v16704_v27 = vcombine.high %v10899_v23, %v10903_v47 }
 0xb38   :  { %14276 = vmatprep.subr.bf16.mxu1 %v16650_v63  ;;  %v10904_v7 = vld [vmem:[#allocation24 + $0x978] sm:$0xff]  ;;  %v16695_v63 = vcombine.low %v10891_v53, %v10895_v24 }
 0xb39   :  { %v16706_v30 = vcombine.high %v10900_v12, %v10904_v7  ;;  %v16705_v31 = vcombine.low %v10900_v12, %v10904_v7  ;;  %v10955_v7 = vld [vmem:[#allocation24 + $0xb10] sm:$0xff] }
 0xb3a   :  { %14113 = vmatpush1.bf16.msra.mxu0 %v16647_v17  ;;  %v10911_v17 = vld [vmem:[#allocation24 + $0x9b0] sm:$0xff] }
 0xb3b   :  { %14277 = vmatpush1.bf16.msra.mxu1 %v16649_v25  ;;  %14114 = vmatprep.subr.bf16.mxu0 %v16656_v2  ;;  %v10908_v25 = vld [vmem:[#allocation24 + $0x998] sm:$0xff]  ;;  %v16712_v33 = vcombine.high %v10907_v6, %v10911_v17 }
 0xb3c   :  { %14278 = vmatprep.subr.bf16.mxu1 %v16658_v22  ;;  %v10912_v2 = vld [vmem:[#allocation24 + $0x9b8] sm:$0xff]  ;;  %v16703_v22 = vcombine.low %v10899_v23, %v10903_v47 }
 0xb3d   :  { %v16714_v36 = vcombine.high %v10908_v25, %v10912_v2  ;;  %v16713_v42 = vcombine.low %v10908_v25, %v10912_v2  ;;  %v10963_v2 = vld [vmem:[#allocation24 + $0xb50] sm:$0xff] }
 0xb3e   :  { %14115 = vmatpush1.bf16.msra.mxu0 %v16655_v34  ;;  %v10919_v34 = vld [vmem:[#allocation24 + $0x9f0] sm:$0xff] }
 0xb3f   :  { %14279 = vmatpush1.bf16.msra.mxu1 %v16657_v57  ;;  %14125 = vmatprep.subr.bf16.mxu0 %v16664_v43  ;;  %v10916_v57 = vld [vmem:[#allocation24 + $0x9d8] sm:$0xff]  ;;  %v16720_v45 = vcombine.high %v10915_v61, %v10919_v34  ;;  %v16719_v50 = vcombine.low %v10915_v61, %v10919_v34 }
 0xb40   :  { %14289 = vmatprep.subr.bf16.mxu1 %v16666_v11  ;;  %v10920_v43 = vld [vmem:[#allocation24 + $0x9f8] sm:$0xff]  ;;  %v16711_v11 = vcombine.low %v10907_v6, %v10911_v17 }
 0xb41   :  { %14117 = vmatmul.mubr.bf16.vlgmr.msra.gmra.mrb[60].mxu0 %v18930_v28  ;;  %v16721_v15 = vcombine.low %v10916_v57, %v10920_v43 }
 0xb42   :  { %14281 = vmatmul.mubr.bf16.vlgmr.msra.gmra.mrb[68].mxu1 %v18930_v28  ;;  %14126 = vmatpush1.bf16.msra.mxu0 %v16663_v46  ;;  %v16681_v28 = vcombine.low %v10876_v19, %v10880_v32  ;;  %v16722_v46 = vcombine.high %v10916_v57, %v10920_v43  ;;  %v10931_v32 = vld [vmem:[#allocation24 + $0xa50] sm:$0xff] }
 0xb43   :  { %14157 = vmatprep.mubr.bf16.mxu0 %v18981_v37  ;;  %14290 = vmatpush1.bf16.msra.mxu1 %v16665_v44  ;;  %v10924_v44 = vld [vmem:[#allocation24 + $0xa18] sm:$0xff]  ;;  %v10971_v43 = vld [vmem:[#allocation24 + $0xb90] sm:$0xff] }
 0xb44   :  { %14321 = vmatprep.mubr.bf16.mxu1 %v18981_v37  ;;  %14127 = vmatprep.subr.bf16.mxu0 %v16672_v49  ;;  %v16687_v37 = vcombine.low %v10883_v38, %v10887_v18  ;;  %v10928_v49 = vld [vmem:[#allocation24 + $0xa38] sm:$0xff] }
 0xb45   :  { %14291 = vmatprep.subr.bf16.mxu1 %v16674_v59  ;;  %v16728_v59 = vcombine.high %v10923_v48, %v10927_v58  ;;  %v16730_v19 = vcombine.high %v10924_v44, %v10928_v49  ;;  %v16729_v38 = vcombine.low %v10924_v44, %v10928_v49  ;;  %v10979_v49 = vld [vmem:[#allocation24 + $0xbd0] sm:$0xff] }
 0xb46   :  { %14128 = vmatpush1.bf16.msra.mxu0 %v16671_v55  ;;  %v10935_v55 = vld [vmem:[#allocation24 + $0xa70] sm:$0xff] }
 0xb47   :  { %14292 = vmatpush1.bf16.msra.mxu1 %v16673_v26  ;;  %14129 = vmatprep.subr.bf16.mxu0 %v16680_v0  ;;  %v10932_v26 = vld [vmem:[#allocation24 + $0xa58] sm:$0xff]  ;;  %v16736_v18 = vcombine.high %v10931_v32, %v10935_v55 }
 0xb48   :  { %14293 = vmatprep.subr.bf16.mxu1 %v16682_v9  ;;  %v10936_v0 = vld [vmem:[#allocation24 + $0xa78] sm:$0xff]  ;;  %v16727_v9 = vcombine.low %v10923_v48, %v10927_v58 }
 0xb49   :  { %v16738_v52 = vcombine.high %v10932_v26, %v10936_v0  ;;  %v16737_v53 = vcombine.low %v10932_v26, %v10936_v0  ;;  %v10987_v0 = vld [vmem:[#allocation24 + $0xc10] sm:$0xff] }
 0xb4a   :  { %14130 = vmatpush1.bf16.msra.mxu0 %v16679_v10  ;;  %v10943_v10 = vld [vmem:[#allocation24 + $0xab0] sm:$0xff] }
 0xb4b   :  { %14294 = vmatpush1.bf16.msra.mxu1 %v16681_v28  ;;  %14131 = vmatprep.subr.bf16.mxu0 %v16688_v20  ;;  %v10940_v28 = vld [vmem:[#allocation24 + $0xa98] sm:$0xff]  ;;  %v16744_v24 = vcombine.high %v10939_v4, %v10943_v10 }
 0xb4c   :  { %14295 = vmatprep.subr.bf16.mxu1 %v16690_v8  ;;  %v10944_v20 = vld [vmem:[#allocation24 + $0xab8] sm:$0xff]  ;;  %v16735_v8 = vcombine.low %v10931_v32, %v10935_v55 }
 0xb4d   :  { %v16746_v14 = vcombine.high %v10940_v28, %v10944_v20  ;;  %v16745_v23 = vcombine.low %v10940_v28, %v10944_v20  ;;  %v10995_v20 = vld [vmem:[#allocation24 + $0xc50] sm:$0xff] }
 0xb4e   :  { %14132 = vmatpush1.bf16.msra.mxu0 %v16687_v37  ;;  %v10951_v37 = vld [vmem:[#allocation24 + $0xaf0] sm:$0xff] }
 0xb4f   :  { %14296 = vmatpush1.bf16.msra.mxu1 %v16689_v16  ;;  %14133 = vmatprep.subr.bf16.mxu0 %v16696_v56  ;;  %v10948_v16 = vld [vmem:[#allocation24 + $0xad8] sm:$0xff]  ;;  %v16752_v47 = vcombine.high %v10947_v1, %v10951_v37 }
 0xb50   :  { %14297 = vmatprep.subr.bf16.mxu1 %v16698_v54  ;;  %v10952_v56 = vld [vmem:[#allocation24 + $0xaf8] sm:$0xff]  ;;  %v16743_v54 = vcombine.low %v10939_v4, %v10943_v10 }
 0xb51   :  { %v16754_v12 = vcombine.high %v10948_v16, %v10952_v56  ;;  %v16753_v6 = vcombine.low %v10948_v16, %v10952_v56  ;;  %v11003_v16 = vld [vmem:[#allocation24 + $0xc90] sm:$0xff] }
 0xb52   :  { %14134 = vmatpush1.bf16.msra.mxu0 %v16695_v63  ;;  %v10959_v63 = vld [vmem:[#allocation24 + $0xb30] sm:$0xff] }
 0xb53   :  { %14298 = vmatpush1.bf16.msra.mxu1 %v16697_v29  ;;  %14135 = vmatprep.subr.bf16.mxu0 %v16704_v27  ;;  %v10956_v29 = vld [vmem:[#allocation24 + $0xb18] sm:$0xff]  ;;  %v16760_v17 = vcombine.high %v10955_v7, %v10959_v63  ;;  %v11007_v56 = vld [vmem:[#allocation24 + $0xcb0] sm:$0xff] }
 0xb54   :  { %14299 = vmatprep.subr.bf16.mxu1 %v16706_v30  ;;  %v10960_v27 = vld [vmem:[#allocation24 + $0xb38] sm:$0xff]  ;;  %v16751_v30 = vcombine.low %v10947_v1, %v10951_v37 }
 0xb55   :  { %v16762_v25 = vcombine.high %v10956_v29, %v10960_v27  ;;  %v16761_v61 = vcombine.low %v10956_v29, %v10960_v27  ;;  %v11011_v27 = vld [vmem:[#allocation24 + $0xcd0] sm:$0xff] }
 0xb56   :  { %14136 = vmatpush1.bf16.msra.mxu0 %v16703_v22  ;;  %v10967_v22 = vld [vmem:[#allocation24 + $0xb70] sm:$0xff] }
 0xb57   :  { %14300 = vmatpush1.bf16.msra.mxu1 %v16705_v31  ;;  %14137 = vmatprep.subr.bf16.mxu0 %v16712_v33  ;;  %v10964_v31 = vld [vmem:[#allocation24 + $0xb58] sm:$0xff]  ;;  %v16768_v34 = vcombine.high %v10963_v2, %v10967_v22 }
 0xb58   :  { %14301 = vmatprep.subr.bf16.mxu1 %v16714_v36  ;;  %v10968_v33 = vld [vmem:[#allocation24 + $0xb78] sm:$0xff]  ;;  %v16759_v36 = vcombine.low %v10955_v7, %v10959_v63  ;;  %v16808_v63 = vcombine.high %v11003_v16, %v11007_v56 }
 0xb59   :  { %v16770_v57 = vcombine.high %v10964_v31, %v10968_v33  ;;  %v16769_v48 = vcombine.low %v10964_v31, %v10968_v33  ;;  %v11019_v31 = vld [vmem:[#allocation24 + $0xd10] sm:$0xff] }
 0xb5a   :  { %14138 = vmatpush1.bf16.msra.mxu0 %v16711_v11  ;;  %v10975_v11 = vld [vmem:[#allocation24 + $0xbb0] sm:$0xff] }
 0xb5b   :  { %14302 = vmatpush1.bf16.msra.mxu1 %v16713_v42  ;;  %14139 = vmatprep.subr.bf16.mxu0 %v16720_v45  ;;  %v10972_v42 = vld [vmem:[#allocation24 + $0xb98] sm:$0xff]  ;;  %v16776_v58 = vcombine.high %v10971_v43, %v10975_v11  ;;  %v11023_v33 = vld [vmem:[#allocation24 + $0xd30] sm:$0xff] }
 0xb5c   :  { %14303 = vmatprep.subr.bf16.mxu1 %v16722_v46  ;;  %v10976_v45 = vld [vmem:[#allocation24 + $0xbb8] sm:$0xff]  ;;  %v16767_v46 = vcombine.low %v10963_v2, %v10967_v22 }
 0xb5d   :  { %v16778_v44 = vcombine.high %v10972_v42, %v10976_v45  ;;  %v16777_v32 = vcombine.low %v10972_v42, %v10976_v45  ;;  %v11031_v42 = vld [vmem:[#allocation24 + $0xd70] sm:$0xff]  ;;  %v11028_v45 = vld [vmem:[#allocation24 + $0xd58] sm:$0xff] }
 0xb5e   :  { %14140 = vmatpush1.bf16.msra.mxu0 %v16719_v50  ;;  %v10983_v50 = vld [vmem:[#allocation24 + $0xbf0] sm:$0xff] }
 0xb5f   :  { %14304 = vmatpush1.bf16.msra.mxu1 %v16721_v15  ;;  %14141 = vmatprep.subr.bf16.mxu0 %v16728_v59  ;;  %v10980_v15 = vld [vmem:[#allocation24 + $0xbd8] sm:$0xff]  ;;  %v16784_v55 = vcombine.high %v10979_v49, %v10983_v50 }
 0xb60   :  { %14305 = vmatprep.subr.bf16.mxu1 %v16730_v19  ;;  %v10984_v59 = vld [vmem:[#allocation24 + $0xbf8] sm:$0xff]  ;;  %v16775_v19 = vcombine.low %v10971_v43, %v10975_v11  ;;  %v11027_v11 = vld [vmem:[#allocation24 + $0xd50] sm:$0xff] }
 0xb61   :  { %v16786_v26 = vcombine.high %v10980_v15, %v10984_v59  ;;  %v16785_v4 = vcombine.low %v10980_v15, %v10984_v59  ;;  %v11039_v15 = vld [vmem:[#allocation24 + $0xdb0] sm:$0xff]  ;;  %v11036_v59 = vld [vmem:[#allocation24 + $0xd98] sm:$0xff] }
 0xb62   :  { %14142 = vmatpush1.bf16.msra.mxu0 %v16727_v9  ;;  %v10991_v9 = vld [vmem:[#allocation24 + $0xc30] sm:$0xff] }
 0xb63   :  { %14306 = vmatpush1.bf16.msra.mxu1 %v16729_v38  ;;  %14143 = vmatprep.subr.bf16.mxu0 %v16736_v18  ;;  %v10988_v38 = vld [vmem:[#allocation24 + $0xc18] sm:$0xff]  ;;  %v16792_v10 = vcombine.high %v10987_v0, %v10991_v9 }
 0xb64   :  { %14307 = vmatprep.subr.bf16.mxu1 %v16738_v52  ;;  %v10992_v18 = vld [vmem:[#allocation24 + $0xc38] sm:$0xff]  ;;  %v16783_v52 = vcombine.low %v10979_v49, %v10983_v50  ;;  %v11035_v50 = vld [vmem:[#allocation24 + $0xd90] sm:$0xff] }
 0xb65   :  { %v16794_v28 = vcombine.high %v10988_v38, %v10992_v18  ;;  %v16793_v1 = vcombine.low %v10988_v38, %v10992_v18  ;;  %v11043_v18 = vld [vmem:[#allocation24 + $0xdd0] sm:$0xff] }
 0xb66   :  { %14144 = vmatpush1.bf16.msra.mxu0 %v16735_v8  ;;  %v10999_v8 = vld [vmem:[#allocation24 + $0xc70] sm:$0xff] }
 0xb67   :  { %14308 = vmatpush1.bf16.msra.mxu1 %v16737_v53  ;;  %14145 = vmatprep.subr.bf16.mxu0 %v16744_v24  ;;  %v16791_v53 = vcombine.low %v10987_v0, %v10991_v9  ;;  %v10996_v24 = vld [vmem:[#allocation24 + $0xc58] sm:$0xff]  ;;  %v16800_v37 = vcombine.high %v10995_v20, %v10999_v8 }
 0xb68   :  { %14309 = vmatprep.subr.bf16.mxu1 %v16746_v14  ;;  %v11000_v14 = vld [vmem:[#allocation24 + $0xc78] sm:$0xff] }
 0xb69   :  { %v16801_v7 = vcombine.low %v10996_v24, %v11000_v14 }
 0xb6a   :  { %14146 = vmatpush1.bf16.msra.mxu0 %v16743_v54  ;;  %v16802_v54 = vcombine.high %v10996_v24, %v11000_v14  ;;  %v16839_v24 = vcombine.low %v11035_v50, %v11039_v15 }
 0xb6b   :  { %14310 = vmatpush1.bf16.msra.mxu1 %v16745_v23  ;;  %14147 = vmatprep.subr.bf16.mxu0 %v16752_v47  ;;  %v11004_v23 = vld [vmem:[#allocation24 + $0xc98] sm:$0xff] }
 0xb6c   :  { %14311 = vmatprep.subr.bf16.mxu1 %v16754_v12  ;;  %v11008_v47 = vld [vmem:[#allocation24 + $0xcb8] sm:$0xff]  ;;  %v16799_v12 = vcombine.low %v10995_v20, %v10999_v8 }
 0xb6d   :  { %v16810_v29 = vcombine.high %v11004_v23, %v11008_v47  ;;  %v11048_v20 = vld [vmem:[#allocation24 + $0xdf8] sm:$0xff] }
 0xb6e   :  { %14148 = vmatpush1.bf16.msra.mxu0 %v16751_v30  ;;  %v11015_v30 = vld [vmem:[#allocation24 + $0xcf0] sm:$0xff] }
 0xb6f   :  { %14312 = vmatpush1.bf16.msra.mxu1 %v16753_v6  ;;  %14149 = vmatprep.subr.bf16.mxu0 %v16760_v17  ;;  %v11012_v6 = vld [vmem:[#allocation24 + $0xcd8] sm:$0xff]  ;;  %v16816_v2 = vcombine.high %v11011_v27, %v11015_v30 }
 0xb70   :  { %14313 = vmatprep.subr.bf16.mxu1 %v16762_v25  ;;  %v11016_v17 = vld [vmem:[#allocation24 + $0xcf8] sm:$0xff]  ;;  %v16807_v25 = vcombine.low %v11003_v16, %v11007_v56 }
 0xb71   :  { %v16818_v22 = vcombine.high %v11012_v6, %v11016_v17 }
 0xb72   :  { %14150 = vmatpush1.bf16.msra.mxu0 %v16759_v36  ;;  %v11020_v36 = vld [vmem:[#allocation24 + $0xd18] sm:$0xff] }
 0xb73   :  { %14314 = vmatpush1.bf16.msra.mxu1 %v16761_v61  ;;  %14151 = vmatprep.subr.bf16.mxu0 %v16768_v34  ;;  %v11024_v61 = vld [vmem:[#allocation24 + $0xd38] sm:$0xff]  ;;  %v16817_v34 = vcombine.low %v11012_v6, %v11016_v17  ;;  %v11063_v6 = vld [vmem:[#allocation24 + $0xe70] sm:$0xff] }
 0xb74   :  { %14315 = vmatprep.subr.bf16.mxu1 %v16770_v57  ;;  %v16824_v57 = vcombine.high %v11019_v31, %v11023_v33  ;;  %v16826_v43 = vcombine.high %v11020_v36, %v11024_v61  ;;  %v11060_v17 = vld [vmem:[#allocation24 + $0xe58] sm:$0xff] }
 0xb76   :  { %14152 = vmatpush1.bf16.msra.mxu0 %v16767_v46  ;;  %v11032_v46 = vld [vmem:[#allocation24 + $0xd78] sm:$0xff] }
 0xb77   :  { %14316 = vmatpush1.bf16.msra.mxu1 %v16769_v48  ;;  %14153 = vmatprep.subr.bf16.mxu0 %v16776_v58  ;;  %v16823_v48 = vcombine.low %v11019_v31, %v11023_v33  ;;  %v16825_v58 = vcombine.low %v11020_v36, %v11024_v61  ;;  %v16834_v49 = vcombine.high %v11028_v45, %v11032_v46  ;;  %v11067_v33 = vld [vmem:[#allocation24 + $0xe90] sm:$0xff]  ;;  %v11068_v61 = vld [vmem:[#allocation24 + $0xe98] sm:$0xff] }
 0xb78   :  { %14317 = vmatprep.subr.bf16.mxu1 %v16778_v44  ;;  %v16832_v44 = vcombine.high %v11027_v11, %v11031_v42  ;;  %v11071_v36 = vld [vmem:[#allocation24 + $0xeb0] sm:$0xff] }
 0xb7a   :  { %14154 = vmatpush1.bf16.msra.mxu0 %v16775_v19  ;;  %v11040_v19 = vld [vmem:[#allocation24 + $0xdb8] sm:$0xff] }
 0xb7b   :  { %14318 = vmatpush1.bf16.msra.mxu1 %v16777_v32  ;;  %14155 = vmatprep.subr.bf16.mxu0 %v16784_v55  ;;  %v16831_v32 = vcombine.low %v11027_v11, %v11031_v42  ;;  %v16833_v55 = vcombine.low %v11028_v45, %v11032_v46  ;;  %v16842_v38 = vcombine.high %v11036_v59, %v11040_v19  ;;  %v11075_v42 = vld [vmem:[#allocation24 + $0xed0] sm:$0xff]  ;;  %v11076_v46 = vld [vmem:[#allocation24 + $0xed8] sm:$0xff] }
 0xb7c   :  { %14319 = vmatprep.subr.bf16.mxu1 %v16786_v26  ;;  %v16840_v26 = vcombine.high %v11035_v50, %v11039_v15  ;;  %v11079_v45 = vld [vmem:[#allocation24 + $0xef0] sm:$0xff] }
 0xb7d   :  { %v11083_v15 = vld [vmem:[#allocation24 + $0xf10] sm:$0xff] }
 0xb7e   :  { %14156 = vmatpush1.bf16.msra.mxu0 %v16783_v52  ;;  %v11047_v52 = vld [vmem:[#allocation24 + $0xdf0] sm:$0xff] }
 0xb7f   :  { %14320 = vmatpush1.bf16.msra.mxu1 %v16785_v4  ;;  %14166 = vmatprep.subr.bf16.mxu0 %v16792_v10  ;;  %v16848_v16 = vcombine.high %v11043_v18, %v11047_v52 }
 0xb80   :  { %14330 = vmatprep.subr.bf16.mxu1 %v16794_v28  ;;  %v11044_v28 = vld [vmem:[#allocation24 + $0xdd8] sm:$0xff] }
 0xb81   :  { %14158 = vmatmul.mubr.bf16.vlgmr.msra.gmra.mrb[60].mxu0 %v18987_v39  ;;  %v16850_v56 = vcombine.high %v11044_v28, %v11048_v20 }
 0xb82   :  { %14322 = vmatmul.mubr.bf16.vlgmr.msra.gmra.mrb[68].mxu1 %v18987_v39  ;;  %14167 = vmatpush1.bf16.msra.mxu0 %v16791_v53  ;;  %v16809_v39 = vcombine.low %v11004_v23, %v11008_v47  ;;  %v11055_v23 = vld [vmem:[#allocation24 + $0xe30] sm:$0xff]  ;;  %v11052_v47 = vld [vmem:[#allocation24 + $0xe18] sm:$0xff] }
 0xb83   :  { %14198 = vmatprep.mubr.bf16.mxu0 %v18991_v40  ;;  %14331 = vmatpush1.bf16.msra.mxu1 %v16793_v1 }
 0xb84   :  { %14362 = vmatprep.mubr.bf16.mxu1 %v18991_v40  ;;  %14168 = vmatprep.subr.bf16.mxu0 %v16800_v37  ;;  %v16815_v40 = vcombine.low %v11011_v27, %v11015_v30  ;;  %v16841_v37 = vcombine.low %v11036_v59, %v11040_v19  ;;  %v11059_v30 = vld [vmem:[#allocation24 + $0xe50] sm:$0xff]  ;;  %v11084_v19 = vld [vmem:[#allocation24 + $0xf18] sm:$0xff] }
 0xb85   :  { %14332 = vmatprep.subr.bf16.mxu1 %v16802_v54  ;;  %v11051_v54 = vld [vmem:[#allocation24 + $0xe10] sm:$0xff] }
 0xb86   :  { %14169 = vmatpush1.bf16.msra.mxu0 %v16799_v12  ;;  %v11056_v12 = vld [vmem:[#allocation24 + $0xe38] sm:$0xff]  ;;  %v11087_v59 = vld [vmem:[#allocation24 + $0xf30] sm:$0xff] }
 0xb87   :  { %14333 = vmatpush1.bf16.msra.mxu1 %v16801_v7  ;;  %14170 = vmatprep.subr.bf16.mxu0 %v16808_v63  ;;  %v16847_v7 = vcombine.low %v11043_v18, %v11047_v52  ;;  %v16849_v63 = vcombine.low %v11044_v28, %v11048_v20  ;;  %v16858_v27 = vcombine.high %v11052_v47, %v11056_v12  ;;  %v11091_v28 = vld [vmem:[#allocation24 + $0xf50] sm:$0xff] }
 0xb88   :  { %14334 = vmatprep.subr.bf16.mxu1 %v16810_v29  ;;  %v16856_v29 = vcombine.high %v11051_v54, %v11055_v23  ;;  %v16888_v18 = vcombine.high %v11083_v15, %v11087_v59  ;;  %v11095_v20 = vld [vmem:[#allocation24 + $0xf70] sm:$0xff] }
 0xb8a   :  { %14171 = vmatpush1.bf16.msra.mxu0 %v16807_v25  ;;  %v11064_v25 = vld [vmem:[#allocation24 + $0xe78] sm:$0xff] }
 0xb8b   :  { %14335 = vmatpush1.bf16.msra.mxu1 %v16809_v39  ;;  %14172 = vmatprep.subr.bf16.mxu0 %v16816_v2  ;;  %v16855_v39 = vcombine.low %v11051_v54, %v11055_v23  ;;  %v16857_v2 = vcombine.low %v11052_v47, %v11056_v12  ;;  %v16866_v31 = vcombine.high %v11060_v17, %v11064_v25  ;;  %v11103_v54 = vld [vmem:[#allocation24 + $0xfb0] sm:$0xff]  ;;  %v11100_v47 = vld [vmem:[#allocation24 + $0xf98] sm:$0xff] }
 0xb8c   :  { %14336 = vmatprep.subr.bf16.mxu1 %v16818_v22  ;;  %v16864_v22 = vcombine.high %v11059_v30, %v11063_v6  ;;  %v11104_v12 = vld [vmem:[#allocation24 + $0xfb8] sm:$0xff] }
 0xb8e   :  { %14173 = vmatpush1.bf16.msra.mxu0 %v16815_v40  ;;  %v11072_v40 = vld [vmem:[#allocation24 + $0xeb8] sm:$0xff] }
 0xb8f   :  { %14337 = vmatpush1.bf16.msra.mxu1 %v16817_v34  ;;  %14174 = vmatprep.subr.bf16.mxu0 %v16824_v57  ;;  %v16863_v34 = vcombine.low %v11059_v30, %v11063_v6  ;;  %v16865_v57 = vcombine.low %v11060_v17, %v11064_v25  ;;  %v16874_v11 = vcombine.high %v11068_v61, %v11072_v40  ;;  %v11107_v6 = vld [vmem:[#allocation24 + $0xfd0] sm:$0xff] }
 0xb90   :  { %14338 = vmatprep.subr.bf16.mxu1 %v16826_v43  ;;  %v16872_v43 = vcombine.high %v11067_v33, %v11071_v36  ;;  %v16906_v30 = vcombine.high %v11100_v47, %v11104_v12  ;;  %v11111_v17 = vld [vmem:[#allocation24 + $0xff0] sm:$0xff] }
 0xb92   :  { %14175 = vmatpush1.bf16.msra.mxu0 %v16823_v48  ;;  %v11080_v48 = vld [vmem:[#allocation24 + $0xef8] sm:$0xff] }
 0xb93   :  { %14339 = vmatpush1.bf16.msra.mxu1 %v16825_v58  ;;  %14176 = vmatprep.subr.bf16.mxu0 %v16832_v44  ;;  %v16871_v58 = vcombine.low %v11067_v33, %v11071_v36  ;;  %v16873_v44 = vcombine.low %v11068_v61, %v11072_v40  ;;  %v16882_v50 = vcombine.high %v11076_v46, %v11080_v48 }
 0xb94   :  { %v19025_v0 = vpop.f32.mrb[56].mxu0  ;;  %v19027_v9 = vpop.f32.mrb[64].mxu1  ;;  %14340 = vmatprep.subr.bf16.mxu1 %v16834_v49  ;;  %v16880_v49 = vcombine.high %v11075_v42, %v11079_v45  ;;  %v16905_v33 = vcombine.low %v11100_v47, %v11104_v12  ;;  %v16912_v36 = vcombine.high %v11107_v6, %v11111_v17  ;;  %v17706_v47 = vld [vmem:[#allocation27 + $0x80] sm:$0xff]  }
 0xb95   :  { %v19029_v4 = vpop.f32.mrb[57].mxu0  ;;  %v19031_v10 = vpop.f32.mrb[65].mxu1 }
 0xb96   :  { %v13876_v8 = vpop.f32.mrb[58].mxu0  ;;  %v14040_v53 = vpop.f32.mrb[66].mxu1  ;;  %14177 = vmatpush1.bf16.msra.mxu0 %v16831_v32  ;;  %v11088_v32 = vld [vmem:[#allocation24 + $0xf38] sm:$0xff] }
 0xb97   :  { %14341 = vmatpush1.bf16.msra.mxu1 %v16833_v55  ;;  %v13877_v14 = vpop.f32.mrb[59].mxu0  ;;  %v14041_v1 = vpop.f32.mrb[67].mxu1  ;;  %14178 = vmatprep.subr.bf16.mxu0 %v16840_v26  ;;  %v19033_v55 = vld [vmem:[#allocation25] ss:$4 sm:$0xff]  ;;  %v16879_v26 = vcombine.low %v11075_v42, %v11079_v45  ;;  %v16890_v52 = vcombine.high %v11084_v19, %v11088_v32 }
 0xb98   :  { %14342 = vmatprep.subr.bf16.mxu1 %v16842_v38  ;;  %v16881_v38 = vcombine.low %v11076_v46, %v11080_v48  ;;  %v11122_v8 = vrot.slane %v19033_v55, %v18495_v62  ;;  %v11092_v53 = vld [vmem:[#allocation24 + $0xf58] sm:$0xff]  ;;  %v16887_v14 = vcombine.low %v11083_v15, %v11087_v59  ;;  %v16889_v1 = vcombine.low %v11084_v19, %v11088_v32  ;;  %v17690_v45 = vld [vmem:[#allocation27] sm:$0xff]   ;;  %v17691_v46 = vld [vmem:[#allocation27 + $0x48] sm:$0xff]  }
 0xb99   :  { %v11118_v15 = vrot.slane %v19033_v55, %v18492_v60  ;;  %v17697_v59 = vld [vmem:[#allocation27 + $0x60] sm:$0xff]   ;;  %v11130_v19 = vrot.slane %v19033_v55, %v18896_v35 }
 0xb9a   :  { %14179 = vmatpush1.bf16.msra.mxu0 %v16839_v24  ;;  %v11096_v24 = vld [vmem:[#allocation24 + $0xf78] sm:$0xff]  ;;  %v17232_v23 = vadd.f32 %v19029_v4, %v11122_v8 }
 0xb9b   :  { %14343 = vmatpush1.bf16.msra.mxu1 %v16841_v37  ;;  %14180 = vmatprep.subr.bf16.mxu0 %v16848_v16  ;;  %v16896_v37 = vcombine.high %v11091_v28, %v11095_v20  ;;  %v16898_v16 = vcombine.high %v11092_v53, %v11096_v24  ;;  %v11112_v4 = vld [vmem:[#allocation24 + $0xff8] sm:$0xff]  ;;  %v17231_v32 = vadd.f32 %v19025_v0, %v11118_v15  ;;  %v17730_v15 = vld [vmem:[#allocation27 + $0x120] sm:$0xff]  }
 0xb9c   :  { %14344 = vmatprep.subr.bf16.mxu1 %v16850_v56  ;;  %v11099_v56 = vld [vmem:[#allocation24 + $0xf90] sm:$0xff]  ;;  %v14372_v25 = vmax.f32 %v17232_v23, 0.0 }
 0xb9e   :  { %14181 = vmatpush1.bf16.msra.mxu0 %v16847_v7  ;;  %v19038_v7 = vld [vmem:[#allocation25 + $0x1] ss:$4 sm:$0xff] }
 0xb9f   :  { %14345 = vmatpush1.bf16.msra.mxu1 %v16849_v63  ;;  %14182 = vmatprep.subr.bf16.mxu0 %v16856_v29  ;;  %v16895_v63 = vcombine.low %v11091_v28, %v11095_v20  ;;  %v16897_v29 = vcombine.low %v11092_v53, %v11096_v24  ;;  %v14385_v28 = vrot.slane %v19038_v7, %v18492_v60  ;;  %v17701_v20 = vld [vmem:[#allocation27 + $0x70] sm:$0xff]  }
 0xba0   :  { %14346 = vmatprep.subr.bf16.mxu1 %v16858_v27  ;;  %v16904_v27 = vcombine.high %v11099_v56, %v11103_v54  ;;  %v14397_v53 = vrot.slane %v19038_v7, %v18896_v35  ;;  %v17702_v24 = vld [vmem:[#allocation27 + $0x30] sm:$0xff]  }
 0xba2   :  { %14183 = vmatpush1.bf16.msra.mxu0 %v16855_v39  ;;  %v14389_v39 = vrot.slane %v19038_v7, %v18495_v62 }
 0xba3   :  { %14347 = vmatpush1.bf16.msra.mxu1 %v16857_v2  ;;  %14184 = vmatprep.subr.bf16.mxu0 %v16864_v22  ;;  %v11108_v2 = vld [vmem:[#allocation24 + $0xfd8] sm:$0xff] }
 0xba4   :  { %14348 = vmatprep.subr.bf16.mxu1 %v16866_v31  ;;  %v19042_v22 = vld [vmem:[#allocation25 + $0x2] ss:$4 sm:$0xff]  ;;  %v16903_v31 = vcombine.low %v11099_v56, %v11103_v54  ;;  %v16914_v61 = vcombine.high %v11108_v2, %v11112_v4  ;;  %v14423_v40 = vmul.f32 %v14389_v39, %v14372_v25 }
 0xba5   :  { %v14436_v0 = vrot.slane %v19042_v22, %v18492_v60  ;;  %v17705_v54 = vld [vmem:[#allocation27 + $0xc0] sm:$0xff]   ;;  %v17708_v60 = vld [vmem:[#allocation27 + $0x88] sm:$0xff]  }
 0xba6   :  { %14185 = vmatpush1.bf16.msra.mxu0 %v16863_v34  ;;  %v14440_v34 = vrot.slane %v19042_v22, %v18495_v62  ;;  %v17692_v62 = vld [vmem:[#allocation27 + $0x8] sm:$0xff]   ;;  %v17713_v25 = vld [vmem:[#allocation27 + $0xe0] sm:$0xff]  }
 0xba7   :  { %14349 = vmatpush1.bf16.msra.mxu1 %v16865_v57  ;;  %14186 = vmatprep.subr.bf16.mxu0 %v16872_v43  ;;  %v16911_v57 = vcombine.low %v11107_v6, %v11111_v17  ;;  %v16913_v43 = vcombine.low %v11108_v2, %v11112_v4  ;;  %v17712_v6 = vld [vmem:[#allocation27 + $0x98] sm:$0xff]   ;;  %v11126_v17 = vrot.slane %v19033_v55, %v18921_v21  ;;  %v17714_v39 = vld [vmem:[#allocation27 + $0xa0] sm:$0xff]   ;;  %v17715_v4 = vld [vmem:[#allocation27 + $0xe8] sm:$0xff]  }
 0xba8   :  { %14350 = vmatprep.subr.bf16.mxu1 %v16874_v11  ;;  %v17689_v11 = vld [vmem:[#allocation27 + $0x40] sm:$0xff]   ;;  %v14474_v42 = vadd.f32 %v14440_v34, %v14423_v40  ;;  %v17718_v40 = vld [vmem:[#allocation27 + $0xb0] sm:$0xff]  }
 0xba9   :  { %v17233_v2 = vadd.f32 %v19027_v9, %v11126_v17  ;;  %v17720_v9 = vld [vmem:[#allocation27 + $0xb8] sm:$0xff]  }
 0xbaa   :  { %14187 = vmatpush1.bf16.msra.mxu0 %v16871_v58  ;;  %v14482_v48 = vpack.c.bf16 %v14474_v42, %v14474_v42  ;;  %v17693_v58 = vld [vmem:[#allocation27 + $0x50] sm:$0xff]   ;;  %v17721_v42 = vld [vmem:[#allocation27 + $0x140] sm:$0xff]  }
 0xbab   :  { %14351 = vmatpush1.bf16.msra.mxu1 %v16873_v44  ;;  %14188 = vmatprep.subr.bf16.mxu0 %v16880_v49  ;;  %v17694_v44 = vld [vmem:[#allocation27 + $0x10] sm:$0xff]   ;;  %v17695_v49 = vld [vmem:[#allocation27 + $0x58] sm:$0xff]  }
 0xbac   :  { %14352 = vmatprep.subr.bf16.mxu1 %v16882_v50  ;;  %v17696_v50 = vld [vmem:[#allocation27 + $0x18] sm:$0xff]  }
 0xbae   :  { %14189 = vmatpush1.bf16.msra.mxu0 %v16879_v26  ;;  %v17699_v26 = vld [vmem:[#allocation27 + $0x68] sm:$0xff]  }
 0xbaf   :  { %14353 = vmatpush1.bf16.msra.mxu1 %v16881_v38  ;;  %14190 = vmatprep.subr.bf16.mxu0 %v16888_v18  ;;  %v17234_v38 = vadd.f32 %v19031_v10, %v11130_v19  ;;  %v17700_v18 = vld [vmem:[#allocation27 + $0x28] sm:$0xff]   ;;  %v17703_v10 = vld [vmem:[#allocation27 + $0x78] sm:$0xff]  }
 0xbb0   :  { %14354 = vmatprep.subr.bf16.mxu1 %v16890_v52  ;;  %v14371_v52 = vmax.f32 %v17231_v32, 0.0  ;;  %v17732_v19 = vld [vmem:[#allocation27 + $0x128] sm:$0xff]   ;;  %v17734_v32 = vld [vmem:[#allocation27 + $0x130] sm:$0xff]  }
 0xbb1   :  { %v14374_v8 = vmax.f32 %v17234_v38, 0.0  ;;  %v17736_v38 = vld [vmem:[#allocation27 + $0x138] sm:$0xff]  }
 0xbb2   :  { %14191 = vmatpush1.bf16.msra.mxu0 %v16887_v14  ;;  %v14422_v14 = vmul.f32 %v14385_v28, %v14371_v52  ;;  %v11134_v52 = vrot.slane %v19033_v55, %v18947_v13  ;;  %v11138_v28 = vrot.slane %v19033_v55, %v18950_v3 }
 0xbb3   :  { %14355 = vmatpush1.bf16.msra.mxu1 %v16889_v1  ;;  %14192 = vmatprep.subr.bf16.mxu0 %v16896_v37  ;;  %v14425_v1 = vmul.f32 %v14397_v53, %v14374_v8  ;;  %v14448_v37 = vrot.slane %v19042_v22, %v18896_v35  ;;  %v17710_v35 = vld [vmem:[#allocation27 + $0x90] sm:$0xff]  }
 0xbb4   :  { %14356 = vmatprep.subr.bf16.mxu1 %v16898_v16  ;;  %v17704_v16 = vld [vmem:[#allocation27 + $0x38] sm:$0xff]   ;;  %v14473_v56 = vadd.f32 %v14436_v0, %v14422_v14 }
 0xbb5   :  { %v14476_v23 = vadd.f32 %v14448_v37, %v14425_v1  ;;  %v14405_v1 = vrot.slane %v19038_v7, %v18950_v3 }
 0xbb6   :  { %14193 = vmatpush1.bf16.msra.mxu0 %v16895_v63  ;;  %v14481_v12 = vpack.c.bf16 %v14473_v56, %v14473_v56  ;;  %v17707_v63 = vld [vmem:[#allocation27 + $0xc8] sm:$0xff]  }
 0xbb7   :  { %14357 = vmatpush1.bf16.msra.mxu1 %v16897_v29  ;;  %14194 = vmatprep.subr.bf16.mxu0 %v16904_v27  ;;  %v14484_v29 = vpack.c.bf16 %v14476_v23, %v14476_v23  ;;  %v17709_v27 = vld [vmem:[#allocation27 + $0xd0] sm:$0xff]  }
 0xbb8   :  { %14358 = vmatprep.subr.bf16.mxu1 %v16906_v30  ;;  %v17711_v30 = vld [vmem:[#allocation27 + $0xd8] sm:$0xff]  }
 0xbba   :  { %14195 = vmatpush1.bf16.msra.mxu0 %v16903_v31  ;;  %v17716_v31 = vld [vmem:[#allocation27 + $0xa8] sm:$0xff]  }
 0xbbb   :  { %14359 = vmatpush1.bf16.msra.mxu1 %v16905_v33  ;;  %14196 = vmatprep.subr.bf16.mxu0 %v16912_v36  ;;  %v14373_v33 = vmax.f32 %v17233_v2, 0.0  ;;  %v14393_v36 = vrot.slane %v19038_v7, %v18921_v21 }
 0xbbc   :  { %14360 = vmatprep.subr.bf16.mxu1 %v16914_v61  ;;  %v17717_v61 = vld [vmem:[#allocation27 + $0xf0] sm:$0xff]  }
 0xbbd   :  { %v14424_v34 = vmul.f32 %v14393_v36, %v14373_v33  ;;  %v17739_v36 = vld [vmem:[#allocation27 + $0x1c8] sm:$0xff]  }
 0xbbe   :  { %14197 = vmatpush1.bf16.msra.mxu0 %v16911_v57  ;;  %v14444_v57 = vrot.slane %v19042_v22, %v18921_v21  ;;  %v17727_v21 = vld [vmem:[#allocation27 + $0x158] sm:$0xff]  }
 0xbbf   :  { %14361 = vmatpush1.bf16.msra.mxu1 %v16913_v43  ;;  %17031 = vmatprep.subr.bf16.mxu0 %v17689_v11  ;;  %v17719_v43 = vld [vmem:[#allocation27 + $0xf8] sm:$0xff]  }
 0xbc0   :  { %v14475_v11 = vadd.f32 %v14444_v57, %v14424_v34  ;;  %v17742_v34 = vld [vmem:[#allocation27 + $0x190] sm:$0xff]   ;;  %v17744_v57 = vld [vmem:[#allocation27 + $0x198] sm:$0xff]  }
 0xbc1   :  { %14199 = vmatmul.mubr.bf16.vlgmr.msra.gmra.mrb[60].mxu0 %v19007_v51 }
 0xbc2   :  { %14363 = vmatmul.mubr.bf16.vlgmr.msra.gmra.mrb[68].mxu1 %v19007_v51  ;;  %17032 = vmatpush3.bf16.msra.mxu0 %v17690_v45  ;;  %v17698_v51 = vld [vmem:[#allocation27 + $0x20] sm:$0xff]  }
 0xbc3   :  { %15040 = vmatprep.mubr.bf16.mxu0 %v14482_v48  ;;  %17033 = vmatprep.subr.bf16.mxu0 %v17691_v46  ;;  %v17722_v45 = vld [vmem:[#allocation27 + $0x100] sm:$0xff]   ;;  %v14483_v46 = vpack.c.bf16 %v14475_v11, %v14475_v11  ;;  %v17723_v48 = vld [vmem:[#allocation27 + $0x148] sm:$0xff]  }
 0xbc4   :  { %v17746_v11 = vld [vmem:[#allocation27 + $0x1a0] sm:$0xff]  }
 0xbc6   :  { %17034 = vmatpush3.bf16.msra.mxu0 %v17692_v62  ;;  %v17724_v62 = vld [vmem:[#allocation27 + $0x108] sm:$0xff]  }
 0xbc7   :  { %17035 = vmatprep.subr.bf16.mxu0 %v17693_v58  ;;  %v17725_v58 = vld [vmem:[#allocation27 + $0x150] sm:$0xff]  }
 0xbca   :  { %17036 = vmatpush3.bf16.msra.mxu0 %v17694_v44  ;;  %v17726_v44 = vld [vmem:[#allocation27 + $0x110] sm:$0xff]  }
 0xbcb   :  { %17037 = vmatprep.subr.bf16.mxu0 %v17695_v49  ;;  %v17728_v49 = vld [vmem:[#allocation27 + $0x118] sm:$0xff]  }
 0xbce   :  { %17038 = vmatpush3.bf16.msra.mxu0 %v17696_v50  ;;  %v17729_v50 = vld [vmem:[#allocation27 + $0x160] sm:$0xff]  }
 0xbcf   :  { %17039 = vmatprep.subr.bf16.mxu0 %v17697_v59  ;;  %v17731_v59 = vld [vmem:[#allocation27 + $0x168] sm:$0xff]  }
 0xbd2   :  { %17040 = vmatpush3.bf16.msra.mxu0 %v17698_v51  ;;  %v17733_v51 = vld [vmem:[#allocation27 + $0x170] sm:$0xff]  }
 0xbd3   :  { %17041 = vmatprep.subr.bf16.mxu0 %v17699_v26  ;;  %v17735_v26 = vld [vmem:[#allocation27 + $0x178] sm:$0xff]  }
 0xbd6   :  { %17042 = vmatpush3.bf16.msra.mxu0 %v17700_v18  ;;  %v17737_v18 = vld [vmem:[#allocation27 + $0x1c0] sm:$0xff]  }
 0xbd7   :  { %17043 = vmatprep.subr.bf16.mxu0 %v17701_v20  ;;  %v11146_v20 = vrot.slane %v19033_v55, %v18953_v5 }
 0xbda   :  { %17044 = vmatpush3.bf16.msra.mxu0 %v17702_v24  ;;  %v14401_v24 = vrot.slane %v19038_v7, %v18947_v13 }
 0xbdb   :  { %17045 = vmatprep.subr.bf16.mxu0 %v17703_v10 }
 0xbde   :  { %17046 = vmatpush3.bf16.msra.mxu0 %v17704_v16 }
 0xbdf   :  { %17053 = vmatprep.subr.bf16.mxu0 %v17705_v54  ;;  %v14452_v54 = vrot.slane %v19042_v22, %v18947_v13 }
 0xbe1   :  { %15041 = vmatmul.mubr.bf16.vlgmr.msra.gmra.mrb[64].mxu0 %v14481_v12 }
 0xbe2   :  { %17054 = vmatpush3.bf16.msra.mxu0 %v17706_v47  ;;  %15080 = vmatprep.mubr.bf16.mxu0 %v14484_v29  ;;  %v14413_v47 = vrot.slane %v19038_v7, %v18953_v5 }
 0xbe3   :  { %17055 = vmatprep.subr.bf16.mxu0 %v17707_v63 }
 0xbe6   :  { %17056 = vmatpush3.bf16.msra.mxu0 %v17708_v60 }
 0xbe7   :  { %17057 = vmatprep.subr.bf16.mxu0 %v17709_v27  ;;  %v14456_v27 = vrot.slane %v19042_v22, %v18950_v3  ;;  %v17740_v3 = vld [vmem:[#allocation27 + $0x188] sm:$0xff]  }
 0xbea   :  { %17058 = vmatpush3.bf16.msra.mxu0 %v17710_v35 }
 0xbeb   :  { %17059 = vmatprep.subr.bf16.mxu0 %v17711_v30 }
 0xbee   :  { %17060 = vmatpush3.bf16.msra.mxu0 %v17712_v6  ;;  %v14464_v6 = vrot.slane %v19042_v22, %v18953_v5  ;;  %v17743_v5 = vld [vmem:[#allocation27 + $0x1d8] sm:$0xff]  }
 0xbef   :  { %17061 = vmatprep.subr.bf16.mxu0 %v17713_v25 }
 0xbf2   :  { %17062 = vmatpush3.bf16.msra.mxu0 %v17714_v39 }
 0xbf3   :  { %17063 = vmatprep.subr.bf16.mxu0 %v17715_v4 }
 0xbf6   :  { %17064 = vmatpush3.bf16.msra.mxu0 %v17716_v31  ;;  %v17738_v31 = vld [vmem:[#allocation27 + $0x180] sm:$0xff]  }
 0xbf7   :  { %17065 = vmatprep.subr.bf16.mxu0 %v17717_v61 }
 0xbfa   :  { %17066 = vmatpush3.bf16.msra.mxu0 %v17718_v40  ;;  %v17741_v40 = vld [vmem:[#allocation27 + $0x1d0] sm:$0xff]  }
 0xbfb   :  { %17067 = vmatprep.subr.bf16.mxu0 %v17719_v43  ;;  %v11142_v43 = vrot.slane %v19033_v55, %v18998_v41 }
 0xbfe   :  { %17068 = vmatpush3.bf16.msra.mxu0 %v17720_v9  ;;  %v17745_v9 = vld [vmem:[#allocation27 + $0x1e0] sm:$0xff]  }
 0xbff   :  { %17075 = vmatprep.subr.bf16.mxu0 %v17721_v42 }
 0xc01   :  { %15081 = vmatmul.mubr.bf16.vlgmr.msra.gmra.mrb[68].mxu0 %v14483_v46  ;;  %v17748_v46 = vld [vmem:[#allocation27 + $0x1a8] sm:$0xff]  }
 0xc02   :  { %17076 = vmatpush3.bf16.msra.mxu0 %v17722_v45  ;;  %v17747_v45 = vld [vmem:[#allocation27 + $0x1e8] sm:$0xff]  }
 0xc03   :  { %17077 = vmatprep.subr.bf16.mxu0 %v17723_v48 }
 0xc06   :  { %17078 = vmatpush3.bf16.msra.mxu0 %v17724_v62  ;;  %v14409_v62 = vrot.slane %v19038_v7, %v18998_v41 }
 0xc07   :  { %17079 = vmatprep.subr.bf16.mxu0 %v17725_v58  ;;  %v17749_v58 = vld [vmem:[#allocation27 + $0x1f0] sm:$0xff]  }
 0xc0a   :  { %17080 = vmatpush3.bf16.msra.mxu0 %v17726_v44 }
 0xc0b   :  { %17081 = vmatprep.subr.bf16.mxu0 %v17727_v21 }
 0xc0e   :  { %17082 = vmatpush3.bf16.msra.mxu0 %v17728_v49 }
 0xc0f   :  { %17083 = vmatprep.subr.bf16.mxu0 %v17729_v50  ;;  %v17750_v50 = vld [vmem:[#allocation27 + $0x1b0] sm:$0xff]  }
 0xc12   :  { %17084 = vmatpush3.bf16.msra.mxu0 %v17730_v15 }
 0xc13   :  { %17085 = vmatprep.subr.bf16.mxu0 %v17731_v59  ;;  %v14460_v59 = vrot.slane %v19042_v22, %v18998_v41 }
 0xc16   :  { %17086 = vmatpush3.bf16.msra.mxu0 %v17732_v19 }
 0xc17   :  { %17087 = vmatprep.subr.bf16.mxu0 %v17733_v51  ;;  %v17751_v51 = vld [vmem:[#allocation27 + $0x1f8] sm:$0xff]  }
 0xc1a   :  { %17088 = vmatpush3.bf16.msra.mxu0 %v17734_v32  ;;  %v17752_v32 = vld [vmem:[#allocation27 + $0x1b8] sm:$0xff]  }
 0xc1b   :  { %17089 = vmatprep.subr.bf16.mxu0 %v17735_v26 }
 0xc1e   :  { %17090 = vmatpush3.bf16.msra.mxu0 %v17736_v38  ;;  %v16915_v38 = vld [vmem:[#allocation28] ss:$0 sm:$0xff] }
 0xc1f   :  { %17097 = vmatprep.subr.bf16.mxu0 %v17737_v18 }
 0xc94   :  { %v14200_v8 = vpop.f32.mrb[60].mxu0 }
 0xc95   :  { %v17235_v53 = vadd.f32 %v14200_v8, %v11134_v52  ;;  %v14364_v14 = vpop.f32.mrb[68].mxu1  ;;  %v14202_v0 = vpop.f32.mrb[61].mxu0 }
 0xc96   :  { %v17236_v10 = vadd.f32 %v14202_v0, %v11138_v28  ;;  %v14366_v37 = vpop.f32.mrb[69].mxu1  ;;  %v14204_v16 = vpop.f32.mrb[62].mxu0  ;;  %v17237_v42 = vadd.f32 %v14364_v14, %v11142_v43 }
 0xc97   :  { %v14375_v56 = vmax.f32 %v17235_v53, 0.0  ;;  %v17238_v23 = vadd.f32 %v14366_v37, %v11146_v20  ;;  %v14368_v12 = vpop.f32.mrb[70].mxu1  ;;  %v14205_v63 = vpop.f32.mrb[63].mxu0 }
 0xc98   :  { %v14376_v29 = vmax.f32 %v17236_v10, 0.0  ;;  %v14369_v60 = vpop.f32.mrb[71].mxu1  ;;  %v14377_v48 = vmax.f32 %v17237_v42, 0.0 }
 0xc99   :  { %v14426_v35 = vmul.f32 %v14401_v24, %v14375_v56  ;;  %v14378_v30 = vmax.f32 %v17238_v23, 0.0 }
 0xc9a   :  { %v14427_v17 = vmul.f32 %v14405_v1, %v14376_v29  ;;  %v14428_v15 = vmul.f32 %v14409_v62, %v14377_v48 }
 0xc9b   :  { %v14477_v25 = vadd.f32 %v14452_v54, %v14426_v35  ;;  %v14429_v39 = vmul.f32 %v14413_v47, %v14378_v30 }
 0xc9c   :  { %v14478_v13 = vadd.f32 %v14456_v27, %v14427_v17  ;;  %v14479_v26 = vadd.f32 %v14460_v59, %v14428_v15 }
 0xc9d   :  { %v14480_v2 = vadd.f32 %v14464_v6, %v14429_v39  ;;  %v14485_v33 = vpack.c.bf16 %v14477_v25, %v14477_v25 }
 0xc9e   :  { %v14486_v4 = vpack.c.bf16 %v14478_v13, %v14478_v13  ;;  %v14487_v7 = vpack.c.bf16 %v14479_v26, %v14479_v26 }
 0xc9f   :  { %v14488_v61 = vpack.c.bf16 %v14480_v2, %v14480_v2 }
 0xca0   :  { %15120 = vmatprep.mubr.bf16.mxu0 %v14486_v4 }
 0xca1   :  { %15121 = vmatmul.mubr.bf16.vlgmr.msra.gmra.mrb[72].mxu0 %v14485_v33 }
 0xca2   :  { %17098 = vmatpush3.bf16.msra.mxu0 %v17738_v31  ;;  %15160 = vmatprep.mubr.bf16.mxu0 %v14488_v61 }
 0xca3   :  { %17099 = vmatprep.subr.bf16.mxu0 %v17739_v36 }
 0xca6   :  { %17100 = vmatpush3.bf16.msra.mxu0 %v17740_v3 }
 0xca7   :  { %17101 = vmatprep.subr.bf16.mxu0 %v17741_v40 }
 0xcaa   :  { %17102 = vmatpush3.bf16.msra.mxu0 %v17742_v34 }
 0xcab   :  { %17103 = vmatprep.subr.bf16.mxu0 %v17743_v5 }
 0xcae   :  { %17104 = vmatpush3.bf16.msra.mxu0 %v17744_v57 }
 0xcaf   :  { %17105 = vmatprep.subr.bf16.mxu0 %v17745_v9 }
 0xcb2   :  { %17106 = vmatpush3.bf16.msra.mxu0 %v17746_v11 }
 0xcb3   :  { %17107 = vmatprep.subr.bf16.mxu0 %v17747_v45 }
 0xcb4   :  { %v17047_v44 = vpop.f32.mrb[64].mxu0 }
 0xcb5   :  { %v17048_v21 = vpop.f32.mrb[65].mxu0 }
 0xcb6   :  { %v17049_v49 = vadd.f32 %v17048_v21, %v17047_v44  ;;  %17108 = vmatpush3.bf16.msra.mxu0 %v17748_v46  ;;  %v17050_v55 = vpop.f32.mrb[66].mxu0 }
 0xcb7   :  { %v17051_v19 = vpop.f32.mrb[67].mxu0  ;;  %17109 = vmatprep.subr.bf16.mxu0 %v17749_v58 }
 0xcb8   :  { %v15043_v28 = vadd.f32 %v17049_v49, %v16915_v38 }
 0xcba   :  { %17110 = vmatpush3.bf16.msra.mxu0 %v17750_v50 }
 0xcbb   :  { %17111 = vmatprep.subr.bf16.mxu0 %v17751_v51 }
 0xcbe   :  { %17112 = vmatpush3.bf16.msra.mxu0 %v17752_v32 }
 0xcc1   :  { %15161 = vmatmul.mubr.bf16.vlgmr.msra.gmra.mrb[76].mxu0 %v14487_v7 }
 0xcd4   :  { %v17069_v18 = vpop.f32.mrb[68].mxu0 }
 0xcd5   :  { %v17070_v52 = vpop.f32.mrb[69].mxu0 }
 0xcd6   :  { %v17071_v20 = vadd.f32 %v17070_v52, %v17069_v18  ;;  %v17072_v8 = vpop.f32.mrb[70].mxu0 }
 0xcd7   :  { %v17073_v53 = vpop.f32.mrb[71].mxu0 }
 0xcd8   :  { %v15083_v24 = vadd.f32 %v17071_v20, %v15043_v28 }
 0xd74   :  { %v17091_v14 = vpop.f32.mrb[72].mxu0 }
 0xd75   :  { %v17092_v41 = vpop.f32.mrb[73].mxu0 }
 0xd76   :  { %v17093_v22 = vadd.f32 %v17092_v41, %v17091_v14  ;;  %v17094_v0 = vpop.f32.mrb[74].mxu0 }
 0xd77   :  { %v17095_v10 = vpop.f32.mrb[75].mxu0 }
 0xd78   :  { %v15123_v1 = vadd.f32 %v17093_v22, %v15083_v24 }
 0xd94   :  { %v17113_v37 = vpop.f32.mrb[76].mxu0 }
 0xd95   :  { %v17114_v16 = vpop.f32.mrb[77].mxu0 }
 0xd96   :  { %v17115_v56 = vadd.f32 %v17114_v16, %v17113_v37  ;;  %v17116_v54 = vpop.f32.mrb[78].mxu0 }
 0xd97   :  { %v17117_v23 = vpop.f32.mrb[79].mxu0 }
 0xd98   :  { %v15163_v47 = vadd.f32 %v17115_v56, %v15123_v1 }
 0xd9a   :  { %15168 = vst [vmem:[#allocation30] sm:$0x3] %v15163_v47 }
 0xd9b   :  { %18076 = shalt.err (!%p18073_p4)
}
 0xd9c   :  { %s18077_s28 = scalar_lea.hbm %s19120_s15, 32 }
 0xd9d   :  { %p18078_p5 = scmp.ne.s32.totalorder %s19120_s15, %s18077_s28  ;;  %p18081_p6 = scmp.lt.u32.totalorder %s18077_s28, %s19120_s15 }
 0xd9f   :  { %p18083_p7 = pnand %p18081_p6, %p18078_p5 }
 0xda1   :  { %18086 = shalt.err (!%p18083_p7)
}
 0xda2   :  { %15178 = dma.vmem_to_hbm [thread:$0]  %s15176_s4, 32, %s19120_s15, [#allocation9]  }
 0xda3   :  { %18103 = dma.done.wait [#allocation9], 32  }
 0xda4   :  { %18104 = vsyncadd [#allocation9], 4294967264 }
 0xda5   :  { %15182 = vsyncpa [#allocation8], 1 }
 0xda6   :  { %15183 = vsyncpa [#allocation11], 1 }
 0xda7   :  { %15184 = vsyncpa [#allocation14], 1 }
 0xda8   :  { %15185 = vsyncpa [#allocation17], 1 }
 0xda9   :  { %15186 = vsyncpa [#allocation20], 1 }
 0xdaa   :  { %15187 = vsyncpa [#allocation23], 1 }
 0xdab   :  { %15188 = vsyncpa [#allocation26], 1 }
 0xdac   :  { %15189 = vsyncpa [#allocation29], 1 }
 0xdad   :  { %15190 = vsyncpa [#allocation9], 1 }

</bundles_post_ra>
